<compile_context>
chip_gen: v7x
topology: tpu7x:2x2x1
jax: 0.10.0
libtpu: 0.0.40
codegen_flags: <defaults>
</compile_context>

<pallas_src>
import math

import jax
import jax.numpy as jnp
from jax.experimental import pallas as pl
from jax.experimental.pallas import tpu as pltpu


def _round_up(x, m):
    return ((x + m - 1) // m) * m


def _pick_row_tile(n, cap):
    """Row tile for the second-to-last block dim.

    Returns (tile, padded_n).  Prefers the full dim (always legal) or a
    multiple-of-8 divisor of n so jnp.pad on the big operand is a no-op.
    """
    cap = max(8, cap)
    if n <= cap:
        return n, n
    best = 0
    d = 8
    while d <= cap:
        if n % d == 0:
            best = d
        d += 8
    if best >= 8:
        return best, n
    t = max(8, (cap // 8) * 8)
    return t, _round_up(n, t)


# ---------------------------------------------------------------------------
# Pallas kernels
# ---------------------------------------------------------------------------
def _make_conv_plane_kernel(apply_relu, has_residual, kd):
    """Per-depth-plane matmul with f32 accumulator and fused BN/residual/ReLU."""

    def kernel(*refs):
        if has_residual:
            p_ref, w_ref, c_ref, r_ref, o_ref, acc_ref = refs
        else:
            p_ref, w_ref, c_ref, o_ref, acc_ref = refs
            r_ref = None
        a = pl.program_id(4)

        @pl.when(a == 0)
        def _():
            acc_ref[...] = jnp.zeros_like(acc_ref)

        acc_ref[...] += jnp.dot(p_ref[0, 0], w_ref[0],
                                preferred_element_type=jnp.float32)

        @pl.when(a == kd - 1)
        def _():
            out = acc_ref[...] + c_ref[...]
            if has_residual:
                out = out + r_ref[0, 0].astype(jnp.float32)
            if apply_relu:
                out = jnp.maximum(out, 0.0)
            o_ref[0, 0] = out.astype(o_ref.dtype)

    return kernel


def _make_matmul_kernel(apply_relu, has_residual):
    """Single-K-step fused matmul (used for the 1x1x1 downsample convs)."""

    def kernel(*refs):
        if has_residual:
            a_ref, b_ref, c_ref, r_ref, o_ref = refs
        else:
            a_ref, b_ref, c_ref, o_ref = refs
            r_ref = None
        out = jnp.dot(a_ref[...], b_ref[...], preferred_element_type=jnp.float32)
        out = out + c_ref[...]
        if has_residual:
            out = out + r_ref[...].astype(jnp.float32)
        if apply_relu:
            out = jnp.maximum(out, 0.0)
        o_ref[...] = out.astype(o_ref.dtype)

    return kernel


def _max3_kernel(a_ref, b_ref, c_ref, o_ref):
    o_ref[...] = jnp.maximum(jnp.maximum(a_ref[...], b_ref[...]), c_ref[...])


def _make_gap_kernel(inv_s):
    def kernel(x_ref, o_ref, acc_ref):
        @pl.when(pl.program_id(1) == 0)
        def _():
            acc_ref[...] = jnp.zeros_like(acc_ref)

        acc_ref[...] += jnp.sum(x_ref[...].astype(jnp.float32), axis=1)

        @pl.when(pl.program_id(1) == pl.num_programs(1) - 1)
        def _():
            o_ref[...] = acc_ref[...] * inv_s

    return kernel


# ---------------------------------------------------------------------------
# Conv3d + BN (+ residual) (+ ReLU), plane-decomposed
# ---------------------------------------------------------------------------
def conv3d_bn(x, w, scale, bias, *, stride, padding, relu, residual=None,
              out_dtype=jnp.bfloat16):
    """Conv3d (no bias) + folded BN [+ residual] [+ ReLU].

    x: (N, D, H, W, Cin) channels-last.  w: (Cout, Cin, kD, kH, kW).
    Only the in-plane (kH*kW) taps are materialized; the kD taps are a grid
    reduction axis whose BlockSpec selects the shifted D-plane of P.
    """
    N, D, H, W, Cin = x.shape
    Cout, _, kd, kh, kw = w.shape
    s, p = stride, padding
    xp = jnp.pad(x, ((0, 0), (p, p), (p, p), (p, p), (0, 0)))
    Dp = D + 2 * p
    Do = (D + 2 * p - kd) // s + 1
    Ho = (H + 2 * p - kh) // s + 1
    Wo = (W + 2 * p - kw) // s + 1
    HW = Ho * Wo
    K9 = Cin * kh * kw

    # In-plane patches.  (Cin == 1 -> squeeze first so every slice is lane-dense.)
    if Cin == 1:
        xc = xp[..., 0]
        views = [xc[:, :, b:b + s * (Ho - 1) + 1:s, c:c + s * (Wo - 1) + 1:s]
                 for b in range(kh) for c in range(kw)]
        P = jnp.stack(views, axis=-1)                      # (N, Dp, Ho, Wo, kh*kw)
    else:
        views = [xp[:, :, b:b + s * (Ho - 1) + 1:s, c:c + s * (Wo - 1) + 1:s, :]
                 for b in range(kh) for c in range(kw)]
        P = jnp.stack(views, axis=-1)                      # (N, Dp, Ho, Wo, Cin, kh*kw)
    P = P.reshape(N, Dp, HW, K9).astype(jnp.bfloat16)

    # Per-plane weights, BN scale folded into the output columns: (kd, Cin*kh*kw, Cout)
    Wk = jnp.transpose(w, (2, 1, 3, 4, 0)).reshape(kd, K9, Cout)
    Wk = (Wk.astype(jnp.float32) * scale.reshape(1, 1, Cout)).astype(jnp.bfloat16)
    bvec = bias.reshape(1, Cout).astype(jnp.float32)

    # Row tile over Ho*Wo: full plane when the block stays ~<=2 MiB, else a divisor.
    tm_cap = max(8, min(2048, (2 * 1024 * 1024) // (K9 * 2)))
    tm, HWp = _pick_row_tile(HW, tm_cap)
    if HWp != HW:
        P = jnp.pad(P, ((0, 0), (0, 0), (0, HWp - HW), (0, 0)))

    # Cout tile; keep >=2 parallel blocks when the rest of the grid is tiny (v7x).
    tn = Cout if Cout <= 256 else 256
    if tn > 128 and N * Do * (HWp // tm) * (Cout // tn) < 2:
        tn = 128

    has_res = residual is not None
    inputs = [P, Wk, bvec]
    in_specs = [
        pl.BlockSpec((1, 1, tm, K9), lambda n, d, i, j, a: (n, d * s + a, i, 0)),
        pl.BlockSpec((1, K9, tn), lambda n, d, i, j, a: (a, 0, j)),
        pl.BlockSpec((1, tn), lambda n, d, i, j, a: (0, j)),
    ]
    if has_res:
        R = residual.reshape(N, Do, HW, Cout).astype(jnp.bfloat16)
        if HWp != HW:
            R = jnp.pad(R, ((0, 0), (0, 0), (0, HWp - HW), (0, 0)))
        inputs.append(R)
        in_specs.append(
            pl.BlockSpec((1, 1, tm, tn), lambda n, d, i, j, a: (n, d, i, j)))

    out = pl.pallas_call(
        _make_conv_plane_kernel(relu, has_res, kd),
        out_shape=jax.ShapeDtypeStruct((N, Do, HWp, Cout), out_dtype),
        grid_spec=pltpu.PrefetchScalarGridSpec(
            num_scalar_prefetch=0,
            grid=(N, Do, HWp // tm, Cout // tn, kd),
            in_specs=in_specs,
            out_specs=pl.BlockSpec((1, 1, tm, tn),
                                   lambda n, d, i, j, a: (n, d, i, j)),
            scratch_shapes=[pltpu.VMEM((tm, tn), jnp.float32)],
        ),
        compiler_params=pltpu.CompilerParams(
            dimension_semantics=("parallel", "parallel", "parallel", "parallel",
                                 "arbitrary")),
    )(*inputs)
    return out[:, :, :HW, :].reshape(N, Do, Ho, Wo, Cout)


# ---------------------------------------------------------------------------
# 1x1x1 conv (downsample) as a single-K-step fused matmul
# ---------------------------------------------------------------------------
def matmul_bias_act(a, b_scaled, bias, *, relu, residual=None,
                    out_dtype=jnp.bfloat16):
    """out = [relu]( (a @ b_scaled) + bias [+ residual] ).  K <= 512 here."""
    M, K = a.shape
    _, Nc = b_scaled.shape

    tm_cap = max(8, min(1024, (2 * 1024 * 1024) // (max(K, 128) * 2)))
    tm, Mp = _pick_row_tile(M, tm_cap)
    tn = Nc if Nc <= 256 else 256
    if tn > 128 and (Mp // tm) * (Nc // tn) < 2:
        tn = 128

    a_p = a.astype(jnp.bfloat16)
    if Mp != M:
        a_p = jnp.pad(a_p, ((0, Mp - M), (0, 0)))
    b_p = b_scaled.astype(jnp.bfloat16)
    c_p = bias.reshape(1, Nc).astype(jnp.float32)

    has_res = residual is not None
    inputs = [a_p, b_p, c_p]
    in_specs = [
        pl.BlockSpec((tm, K), lambda i, j: (i, 0)),
        pl.BlockSpec((K, tn), lambda i, j: (0, j)),
        pl.BlockSpec((1, tn), lambda i, j: (0, j)),
    ]
    if has_res:
        r_p = residual.astype(jnp.bfloat16)
        if Mp != M:
            r_p = jnp.pad(r_p, ((0, Mp - M), (0, 0)))
        inputs.append(r_p)
        in_specs.append(pl.BlockSpec((tm, tn), lambda i, j: (i, j)))

    out = pl.pallas_call(
        _make_matmul_kernel(relu, has_res),
        out_shape=jax.ShapeDtypeStruct((Mp, Nc), out_dtype),
        grid_spec=pltpu.PrefetchScalarGridSpec(
            num_scalar_prefetch=0,
            grid=(Mp // tm, Nc // tn),
            in_specs=in_specs,
            out_specs=pl.BlockSpec((tm, tn), lambda i, j: (i, j)),
        ),
        compiler_params=pltpu.CompilerParams(
            dimension_semantics=("parallel", "parallel")),
    )(*inputs)
    return out[:M]


# ---------------------------------------------------------------------------
# MaxPool3d (separable) and global average pool
# ---------------------------------------------------------------------------
def _pool_axis(x, axis, *, s, p):
    """1-D max pool (k=3) along `axis` of an NDHWC tensor: 3 shifted strided
    views fed as separate operands to an elementwise-max Pallas kernel."""
    dim = x.shape[axis]
    out_dim = (dim + 2 * p - 3) // s + 1
    pad_cfg = [(0, 0)] * x.ndim
    pad_cfg[axis] = (p, p)
    xp = jnp.pad(x, pad_cfg, constant_values=-jnp.inf)
    views = []
    for t in range(3):
        idx = [slice(None)] * x.ndim
        idx[axis] = slice(t, t + s * (out_dim - 1) + 1, s)
        views.append(xp[tuple(idx)])
    out_shape = views[0].shape
    L = out_shape[-1] * out_shape[-2]            # lane-dense (W', C) merged
    R = math.prod(out_shape[:-2])
    v2d = [v.reshape(R, L) for v in views]

    tr_cap = max(8, min(512, (1024 * 1024) // max(L * x.dtype.itemsize, 1)))
    tr, Rp = _pick_row_tile(R, tr_cap)
    if Rp != R:
        v2d = [jnp.pad(v, ((0, Rp - R), (0, 0))) for v in v2d]

    out = pl.pallas_call(
        _max3_kernel,
        out_shape=jax.ShapeDtypeStruct((Rp, L), x.dtype),
        grid_spec=pltpu.PrefetchScalarGridSpec(
            num_scalar_prefetch=0,
            grid=(Rp // tr,),
            in_specs=[pl.BlockSpec((tr, L), lambda i: (i, 0))] * 3,
            out_specs=pl.BlockSpec((tr, L), lambda i: (i, 0)),
        ),
        compiler_params=pltpu.CompilerParams(dimension_semantics=("parallel",)),
    )(*v2d)
    return out[:R].reshape(out_shape)


def maxpool3d(x, *, k, stride, padding):
    """MaxPool3d(k=3, s=2, p=1) as three exact separable 1-D passes (9 taps)."""
    assert k == 3
    x = _pool_axis(x, 3, s=stride, p=padding)    # W
    x = _pool_axis(x, 2, s=stride, p=padding)    # H
    x = _pool_axis(x, 1, s=stride, p=padding)    # D
    return x


def global_avg_pool(x):
    """Adaptive avg-pool to 1x1x1: lane-dense (C-last) spatial-sum accumulation."""
    N, D, H, W, C = x.shape
    S = D * H * W
    rows = x.reshape(N, S, C)
    nt = min(64, _round_up(N, 8))
    # Cap the block at ~2 MiB so double-buffering stays cheap on all gens (v7x 64 MiB).
    st_cap = max(8, ((2 * 1024 * 1024) // (nt * C * x.dtype.itemsize)) // 8 * 8)
    st = min(st_cap, _round_up(S, 8))
    Np_, Sp = _round_up(N, nt), _round_up(S, st)
    rows = jnp.pad(rows, ((0, Np_ - N), (0, Sp - S), (0, 0)))
    out = pl.pallas_call(
        _make_gap_kernel(1.0 / float(S)),
        out_shape=jax.ShapeDtypeStruct((Np_, C), jnp.float32),
        grid_spec=pltpu.PrefetchScalarGridSpec(
            num_scalar_prefetch=0,
            grid=(Np_ // nt, Sp // st),
            in_specs=[pl.BlockSpec((nt, st, C), lambda i, j: (i, j, 0))],
            out_specs=pl.BlockSpec((nt, C), lambda i, j: (i, 0)),
            scratch_shapes=[pltpu.VMEM((nt, C), jnp.float32)],
        ),
        compiler_params=pltpu.CompilerParams(
            dimension_semantics=("parallel", "arbitrary")),
    )(rows)
    return out[:N]


# ---------------------------------------------------------------------------
# ResNet-10 3D encoder
# ---------------------------------------------------------------------------
LAYER_STRIDES = (1, 2, 2, 2)   # static (not traced) block strides


def basic_block(x, blk, stride):
    """3D ResNet BasicBlock, shortcut type 'B' (1x1x1 conv + BN when needed)."""
    if "wd" in blk:
        xs = x[:, ::stride, ::stride, ::stride, :]
        N, Do, Ho, Wo, Cin = xs.shape
        Cout = blk["wd"].shape[0]
        Bm = (blk["wd"].reshape(Cout, Cin).T.astype(jnp.float32)
              * blk["sd"].reshape(1, -1))
        res = matmul_bias_act(xs.reshape(-1, Cin), Bm, blk["bd"], relu=False)
        res = res.reshape(N, Do, Ho, Wo, Cout)
    else:
        res = x
    out = conv3d_bn(x, blk["w1"], blk["s1"], blk["b1"],
                    stride=stride, padding=1, relu=True)
    out = conv3d_bn(out, blk["w2"], blk["s2"], blk["b2"],
                    stride=1, padding=1, relu=True, residual=res)
    return out


@jax.jit
def medicalnet_encoder_forward(x_ncdhw, params):
    # NCDHW -> NDHWC once; channels-last, bf16 activations below.
    x = jnp.transpose(x_ncdhw, (0, 2, 3, 4, 1)).astype(jnp.bfloat16)
    # conv1: Conv3d(1, 64, k=7, stride=2, pad=3) + BN + ReLU
    x = conv3d_bn(x, params["conv1_w"], params["bn1_scale"], params["bn1_bias"],
                  stride=2, padding=3, relu=True)
    # maxpool: k=3, stride=2, pad=1
    x = maxpool3d(x, k=3, stride=2, padding=1)
    # layer1..layer4 (ResNet-10: one BasicBlock each, channels 64/128/256/512)
    for blk, stride in zip(params["layers"], LAYER_STRIDES):
        x = basic_block(x, blk, stride)
    # adaptive global average pool -> (N, 512); model.fc = Identity
    return global_avg_pool(x)


# ---------------------------------------------------------------------------
# Deterministic synthetic parameter init (shapes from ResNet-10 3D / MedicalNet)
# ---------------------------------------------------------------------------
def init_conv(key, cout, cin, k):
    fan_in = cin * k * k * k
    w = jax.random.normal(key, (cout, cin, k, k, k), dtype=jnp.float32)
    return w * (1.0 / math.sqrt(fan_in))


def init_bn(key, c, eps=1e-5):
    k1, k2, k3, k4 = jax.random.split(key, 4)
    gamma = 1.0 + 0.1 * jax.random.normal(k1, (c,), dtype=jnp.float32)
    beta = 0.1 * jax.random.normal(k2, (c,), dtype=jnp.float32)
    rmean = 0.1 * jax.random.normal(k3, (c,), dtype=jnp.float32)
    rvar = 1.0 + 0.1 * jnp.abs(jax.random.normal(k4, (c,), dtype=jnp.float32))
    scale = gamma / jnp.sqrt(rvar + eps)
    bias = beta - rmean * scale
    return scale, bias


def init_params(key):
    ki = iter(jax.random.split(key, 32))
    params = {}
    params["conv1_w"] = init_conv(next(ki), 64, 1, 7)
    params["bn1_scale"], params["bn1_bias"] = init_bn(next(ki), 64)
    layer_cfg = [(64, 1), (128, 2), (256, 2), (512, 2)]
    in_c = 64
    layers = []
    for out_c, stride in layer_cfg:
        blk = {}
        blk["w1"] = init_conv(next(ki), out_c, in_c, 3)
        blk["s1"], blk["b1"] = init_bn(next(ki), out_c)
        blk["w2"] = init_conv(next(ki), out_c, out_c, 3)
        blk["s2"], blk["b2"] = init_bn(next(ki), out_c)
        if stride != 1 or in_c != out_c:
            blk["wd"] = init_conv(next(ki), out_c, in_c, 1)
            blk["sd"], blk["bd"] = init_bn(next(ki), out_c)
        layers.append(blk)
        in_c = out_c
    params["layers"] = layers
    return params


if __name__ == "__main__":
    key = jax.random.PRNGKey(0)
    pkey, xkey = jax.random.split(key)
    params = init_params(pkey)
    # MedicalNet takes single-channel 3D volumes, NCDHW. Small test shape.
    x = jax.random.normal(xkey, (2, 1, 8, 16, 16), dtype=jnp.float32)
    feats = medicalnet_encoder_forward(x, params)
    feats = jax.block_until_ready(feats)
    assert feats.shape == (2, 512), feats.shape
    assert bool(jnp.all(jnp.isfinite(feats)))
    print("KERNEL_OK")
</pallas_src>

<mosaic_0001>
module attributes {stable_mosaic.version = 11 : i64} {
  func.func @kernel(%arg0: i32, %arg1: i32, %arg2: i32, %arg3: i32, %arg4: i32, %arg5: memref<1x1x64x49xbf16, #tpu.memory_space<vmem>>, %arg6: memref<1x49x64xbf16, #tpu.memory_space<vmem>>, %arg7: memref<1x64xf32, #tpu.memory_space<vmem>>, %arg8: memref<1x1x64x64xbf16, #tpu.memory_space<vmem>>, %arg9: memref<64x64xf32, #tpu.memory_space<vmem>>) attributes {dimension_semantics = [#tpu.dimension_semantics<parallel>, #tpu.dimension_semantics<parallel>, #tpu.dimension_semantics<parallel>, #tpu.dimension_semantics<parallel>, #tpu.dimension_semantics<arbitrary>], iteration_bounds = array<i64: 2, 4, 1, 1, 7>, scalar_prefetch = 0 : i64, scratch_operands = 1 : i64, tpu.core_type = #tpu.core_type<tc>, window_params = [{transform_indices = @transform_0, window_bounds = array<i64: 1, 1, 64, 49>}, {transform_indices = @transform_1, window_bounds = array<i64: 1, 49, 64>}, {transform_indices = @transform_2, window_bounds = array<i64: 1, 64>}, {transform_indices = @transform_3, window_bounds = array<i64: 1, 1, 64, 64>}]} {
    %c0_i32 = arith.constant 0 : i32
    %0 = arith.cmpi eq, %arg4, %c0_i32 : i32
    %1 = arith.extui %0 : i1 to i32
    %c0_i32_0 = arith.constant 0 : i32
    %2 = arith.cmpi ne, %1, %c0_i32_0 : i32
    scf.if %2 {
      %cst_12 = arith.constant 0.000000e+00 : f32
      %14 = vector.broadcast %cst_12 : f32 to vector<64x64xf32>
      %c0_13 = arith.constant 0 : index
      %c0_14 = arith.constant 0 : index
      %15 = vector.load %arg9[%c0_13, %c0_14] : memref<64x64xf32, #tpu.memory_space<vmem>>, vector<64x64xf32>
      tpu.vector_store %arg9[%c0_13, %c0_14], %14 {strides = array<i32>} : memref<64x64xf32, #tpu.memory_space<vmem>>, vector<64x64xf32>,
    } else {
    }
    %c0 = arith.constant 0 : index
    %c0_1 = arith.constant 0 : index
    %3 = vector.load %arg9[%c0, %c0_1] : memref<64x64xf32, #tpu.memory_space<vmem>>, vector<64x64xf32>
    %c0_2 = arith.constant 0 : index
    %c0_3 = arith.constant 0 : index
    %c0_4 = arith.constant 0 : index
    %c0_5 = arith.constant 0 : index
    %4 = vector.load %arg5[%c0_2, %c0_3, %c0_4, %c0_5] : memref<1x1x64x49xbf16, #tpu.memory_space<vmem>>, vector<1x1x64x49xbf16>
    %5 = vector.shape_cast %4 : vector<1x1x64x49xbf16> to vector<64x49xbf16>
    %c0_6 = arith.constant 0 : index
    %c0_7 = arith.constant 0 : index
    %c0_8 = arith.constant 0 : index
    %6 = vector.load %arg6[%c0_6, %c0_7, %c0_8] : memref<1x49x64xbf16, #tpu.memory_space<vmem>>, vector<1x49x64xbf16>
    %7 = vector.shape_cast %6 : vector<1x49x64xbf16> to vector<49x64xbf16>
    %cst = arith.constant dense<0.000000e+00> : vector<64x64xf32>
    %8 = tpu.matmul %5, %7, %cst {dimension_numbers = #tpu.dot_dimension_numbers<[1], [0], [0], [1], [0, 0, 1, 1], [], []>} : vector<64x49xbf16>, vector<49x64xbf16>, vector<64x64xf32> -> vector<64x64xf32>
    %9 = arith.addf %3, %8 : vector<64x64xf32>
    %c0_9 = arith.constant 0 : index
    %c0_10 = arith.constant 0 : index
    %10 = vector.load %arg9[%c0_9, %c0_10] : memref<64x64xf32, #tpu.memory_space<vmem>>, vector<64x64xf32>
    tpu.vector_store %arg9[%c0_9, %c0_10], %9 {strides = array<i32>} : memref<64x64xf32, #tpu.memory_space<vmem>>, vector<64x64xf32>,
    %c6_i32 = arith.constant 6 : i32
    %11 = arith.cmpi eq, %arg4, %c6_i32 : i32
    %12 = arith.extui %11 : i1 to i32
    %c0_i32_11 = arith.constant 0 : i32
    %13 = arith.cmpi ne, %12, %c0_i32_11 : i32
    scf.if %13 {
      %c0_12 = arith.constant 0 : index
      %c0_13 = arith.constant 0 : index
      %14 = vector.load %arg9[%c0_12, %c0_13] : memref<64x64xf32, #tpu.memory_space<vmem>>, vector<64x64xf32>
      %c0_14 = arith.constant 0 : index
      %c0_15 = arith.constant 0 : index
      %15 = vector.load %arg7[%c0_14, %c0_15] : memref<1x64xf32, #tpu.memory_space<vmem>>, vector<1x64xf32>
      %16 = vector.broadcast %15 : vector<1x64xf32> to vector<64x64xf32>
      %17 = arith.addf %14, %16 : vector<64x64xf32>
      %cst_16 = arith.constant 0.000000e+00 : f32
      %18 = vector.broadcast %cst_16 : f32 to vector<64x64xf32>
      %19 = arith.maximumf %17, %18 : vector<64x64xf32>
      %20 = arith.truncf %19 : vector<64x64xf32> to vector<64x64xbf16>
      %c0_17 = arith.constant 0 : index
      %c0_18 = arith.constant 0 : index
      %c0_19 = arith.constant 0 : index
      %c0_20 = arith.constant 0 : index
      %21 = vector.load %arg8[%c0_17, %c0_18, %c0_19, %c0_20] : memref<1x1x64x64xbf16, #tpu.memory_space<vmem>>, vector<1x1x64x64xbf16>
      %22 = vector.shape_cast %21 : vector<1x1x64x64xbf16> to vector<64x64xbf16>
      %23 = vector.shape_cast %20 : vector<64x64xbf16> to vector<1x1x64x64xbf16>
      tpu.vector_store %arg8[%c0_17, %c0_18, %c0_19, %c0_20], %23 {strides = array<i32>} : memref<1x1x64x64xbf16, #tpu.memory_space<vmem>>, vector<1x1x64x64xbf16>,
    } else {
    }
    return
  }
  func.func @transform_0(%arg0: i32, %arg1: i32, %arg2: i32, %arg3: i32, %arg4: i32) -> (i32, i32, i32, i32) {
    %c2_i32 = arith.constant 2 : i32
    %0 = arith.muli %arg1, %c2_i32 : i32
    %1 = arith.addi %0, %arg4 : i32
    %c0_i32 = arith.constant 0 : i32
    %c0_i32_0 = arith.constant 0 : i32
    return %arg0, %1, %arg2, %c0_i32 : i32, i32, i32, i32
  }
  func.func @transform_1(%arg0: i32, %arg1: i32, %arg2: i32, %arg3: i32, %arg4: i32) -> (i32, i32, i32) {
    %c0_i32 = arith.constant 0 : i32
    %c0_i32_0 = arith.constant 0 : i32
    return %arg4, %c0_i32, %arg3 : i32, i32, i32
  }
  func.func @transform_2(%arg0: i32, %arg1: i32, %arg2: i32, %arg3: i32, %arg4: i32) -> (i32, i32) {
    %c0_i32 = arith.constant 0 : i32
    %c0_i32_0 = arith.constant 0 : i32
    return %c0_i32, %arg3 : i32, i32
  }
  func.func @transform_3(%arg0: i32, %arg1: i32, %arg2: i32, %arg3: i32, %arg4: i32) -> (i32, i32, i32, i32) {
    %c0_i32 = arith.constant 0 : i32
    return %arg0, %arg1, %arg2, %arg3 : i32, i32, i32, i32
  }
}

module attributes {stable_mosaic.version = 11 : i64} {
  func.func @_max3_kernel(%arg0: i32, %arg1: memref<64x256xbf16, #tpu.memory_space<vmem>>, %arg2: memref<64x256xbf16, #tpu.memory_space<vmem>>, %arg3: memref<64x256xbf16, #tpu.memory_space<vmem>>, %arg4: memref<64x256xbf16, #tpu.memory_space<vmem>>) attributes {dimension_semantics = [#tpu.dimension_semantics<parallel>], iteration_bounds = array<i64: 1>, scalar_prefetch = 0 : i64, scratch_operands = 0 : i64, tpu.core_type = #tpu.core_type<tc>, window_params = [{transform_indices = @transform_0, window_bounds = array<i64: 64, 256>}, {transform_indices = @transform_1, window_bounds = array<i64: 64, 256>}, {transform_indices = @transform_2, window_bounds = array<i64: 64, 256>}, {transform_indices = @transform_3, window_bounds = array<i64: 64, 256>}]} {
    %c0 = arith.constant 0 : index
    %c0_0 = arith.constant 0 : index
    %0 = vector.load %arg1[%c0, %c0_0] : memref<64x256xbf16, #tpu.memory_space<vmem>>, vector<64x256xbf16>
    %c0_1 = arith.constant 0 : index
    %c0_2 = arith.constant 0 : index
    %1 = vector.load %arg2[%c0_1, %c0_2] : memref<64x256xbf16, #tpu.memory_space<vmem>>, vector<64x256xbf16>
    %2 = arith.maximumf %0, %1 : vector<64x256xbf16>
    %c0_3 = arith.constant 0 : index
    %c0_4 = arith.constant 0 : index
    %3 = vector.load %arg3[%c0_3, %c0_4] : memref<64x256xbf16, #tpu.memory_space<vmem>>, vector<64x256xbf16>
    %4 = arith.maximumf %2, %3 : vector<64x256xbf16>
    %c0_5 = arith.constant 0 : index
    %c0_6 = arith.constant 0 : index
    %5 = vector.load %arg4[%c0_5, %c0_6] : memref<64x256xbf16, #tpu.memory_space<vmem>>, vector<64x256xbf16>
    tpu.vector_store %arg4[%c0_5, %c0_6], %4 {strides = array<i32>} : memref<64x256xbf16, #tpu.memory_space<vmem>>, vector<64x256xbf16>,
    return
  }
  func.func @transform_0(%arg0: i32) -> (i32, i32) {
    %c0_i32 = arith.constant 0 : i32
    %c0_i32_0 = arith.constant 0 : i32
    return %arg0, %c0_i32 : i32, i32
  }
  func.func @transform_1(%arg0: i32) -> (i32, i32) {
    %c0_i32 = arith.constant 0 : i32
    %c0_i32_0 = arith.constant 0 : i32
    return %arg0, %c0_i32 : i32, i32
  }
  func.func @transform_2(%arg0: i32) -> (i32, i32) {
    %c0_i32 = arith.constant 0 : i32
    %c0_i32_0 = arith.constant 0 : i32
    return %arg0, %c0_i32 : i32, i32
  }
  func.func @transform_3(%arg0: i32) -> (i32, i32) {
    %c0_i32 = arith.constant 0 : i32
    %c0_i32_0 = arith.constant 0 : i32
    return %arg0, %c0_i32 : i32, i32
  }
}

module attributes {stable_mosaic.version = 11 : i64} {
  func.func @_max3_kernel(%arg0: i32, %arg1: memref<32x256xbf16, #tpu.memory_space<vmem>>, %arg2: memref<32x256xbf16, #tpu.memory_space<vmem>>, %arg3: memref<32x256xbf16, #tpu.memory_space<vmem>>, %arg4: memref<32x256xbf16, #tpu.memory_space<vmem>>) attributes {dimension_semantics = [#tpu.dimension_semantics<parallel>], iteration_bounds = array<i64: 1>, scalar_prefetch = 0 : i64, scratch_operands = 0 : i64, tpu.core_type = #tpu.core_type<tc>, window_params = [{transform_indices = @transform_0, window_bounds = array<i64: 32, 256>}, {transform_indices = @transform_1, window_bounds = array<i64: 32, 256>}, {transform_indices = @transform_2, window_bounds = array<i64: 32, 256>}, {transform_indices = @transform_3, window_bounds = array<i64: 32, 256>}]} {
    %c0 = arith.constant 0 : index
    %c0_0 = arith.constant 0 : index
    %0 = vector.load %arg1[%c0, %c0_0] : memref<32x256xbf16, #tpu.memory_space<vmem>>, vector<32x256xbf16>
    %c0_1 = arith.constant 0 : index
    %c0_2 = arith.constant 0 : index
    %1 = vector.load %arg2[%c0_1, %c0_2] : memref<32x256xbf16, #tpu.memory_space<vmem>>, vector<32x256xbf16>
    %2 = arith.maximumf %0, %1 : vector<32x256xbf16>
    %c0_3 = arith.constant 0 : index
    %c0_4 = arith.constant 0 : index
    %3 = vector.load %arg3[%c0_3, %c0_4] : memref<32x256xbf16, #tpu.memory_space<vmem>>, vector<32x256xbf16>
    %4 = arith.maximumf %2, %3 : vector<32x256xbf16>
    %c0_5 = arith.constant 0 : index
    %c0_6 = arith.constant 0 : index
    %5 = vector.load %arg4[%c0_5, %c0_6] : memref<32x256xbf16, #tpu.memory_space<vmem>>, vector<32x256xbf16>
    tpu.vector_store %arg4[%c0_5, %c0_6], %4 {strides = array<i32>} : memref<32x256xbf16, #tpu.memory_space<vmem>>, vector<32x256xbf16>,
    return
  }
  func.func @transform_0(%arg0: i32) -> (i32, i32) {
    %c0_i32 = arith.constant 0 : i32
    %c0_i32_0 = arith.constant 0 : i32
    return %arg0, %c0_i32 : i32, i32
  }
  func.func @transform_1(%arg0: i32) -> (i32, i32) {
    %c0_i32 = arith.constant 0 : i32
    %c0_i32_0 = arith.constant 0 : i32
    return %arg0, %c0_i32 : i32, i32
  }
  func.func @transform_2(%arg0: i32) -> (i32, i32) {
    %c0_i32 = arith.constant 0 : i32
    %c0_i32_0 = arith.constant 0 : i32
    return %arg0, %c0_i32 : i32, i32
  }
  func.func @transform_3(%arg0: i32) -> (i32, i32) {
    %c0_i32 = arith.constant 0 : i32
    %c0_i32_0 = arith.constant 0 : i32
    return %arg0, %c0_i32 : i32, i32
  }
}

module attributes {stable_mosaic.version = 11 : i64} {
  func.func @_max3_kernel(%arg0: i32, %arg1: memref<16x256xbf16, #tpu.memory_space<vmem>>, %arg2: memref<16x256xbf16, #tpu.memory_space<vmem>>, %arg3: memref<16x256xbf16, #tpu.memory_space<vmem>>, %arg4: memref<16x256xbf16, #tpu.memory_space<vmem>>) attributes {dimension_semantics = [#tpu.dimension_semantics<parallel>], iteration_bounds = array<i64: 1>, scalar_prefetch = 0 : i64, scratch_operands = 0 : i64, tpu.core_type = #tpu.core_type<tc>, window_params = [{transform_indices = @transform_0, window_bounds = array<i64: 16, 256>}, {transform_indices = @transform_1, window_bounds = array<i64: 16, 256>}, {transform_indices = @transform_2, window_bounds = array<i64: 16, 256>}, {transform_indices = @transform_3, window_bounds = array<i64: 16, 256>}]} {
    %c0 = arith.constant 0 : index
    %c0_0 = arith.constant 0 : index
    %0 = vector.load %arg1[%c0, %c0_0] : memref<16x256xbf16, #tpu.memory_space<vmem>>, vector<16x256xbf16>
    %c0_1 = arith.constant 0 : index
    %c0_2 = arith.constant 0 : index
    %1 = vector.load %arg2[%c0_1, %c0_2] : memref<16x256xbf16, #tpu.memory_space<vmem>>, vector<16x256xbf16>
    %2 = arith.maximumf %0, %1 : vector<16x256xbf16>
    %c0_3 = arith.constant 0 : index
    %c0_4 = arith.constant 0 : index
    %3 = vector.load %arg3[%c0_3, %c0_4] : memref<16x256xbf16, #tpu.memory_space<vmem>>, vector<16x256xbf16>
    %4 = arith.maximumf %2, %3 : vector<16x256xbf16>
    %c0_5 = arith.constant 0 : index
    %c0_6 = arith.constant 0 : index
    %5 = vector.load %arg4[%c0_5, %c0_6] : memref<16x256xbf16, #tpu.memory_space<vmem>>, vector<16x256xbf16>
    tpu.vector_store %arg4[%c0_5, %c0_6], %4 {strides = array<i32>} : memref<16x256xbf16, #tpu.memory_space<vmem>>, vector<16x256xbf16>,
    return
  }
  func.func @transform_0(%arg0: i32) -> (i32, i32) {
    %c0_i32 = arith.constant 0 : i32
    %c0_i32_0 = arith.constant 0 : i32
    return %arg0, %c0_i32 : i32, i32
  }
  func.func @transform_1(%arg0: i32) -> (i32, i32) {
    %c0_i32 = arith.constant 0 : i32
    %c0_i32_0 = arith.constant 0 : i32
    return %arg0, %c0_i32 : i32, i32
  }
  func.func @transform_2(%arg0: i32) -> (i32, i32) {
    %c0_i32 = arith.constant 0 : i32
    %c0_i32_0 = arith.constant 0 : i32
    return %arg0, %c0_i32 : i32, i32
  }
  func.func @transform_3(%arg0: i32) -> (i32, i32) {
    %c0_i32 = arith.constant 0 : i32
    %c0_i32_0 = arith.constant 0 : i32
    return %arg0, %c0_i32 : i32, i32
  }
}

module attributes {stable_mosaic.version = 11 : i64} {
  func.func @kernel(%arg0: i32, %arg1: i32, %arg2: i32, %arg3: i32, %arg4: i32, %arg5: memref<1x1x16x576xbf16, #tpu.memory_space<vmem>>, %arg6: memref<1x576x64xbf16, #tpu.memory_space<vmem>>, %arg7: memref<1x64xf32, #tpu.memory_space<vmem>>, %arg8: memref<1x1x16x64xbf16, #tpu.memory_space<vmem>>, %arg9: memref<16x64xf32, #tpu.memory_space<vmem>>) attributes {dimension_semantics = [#tpu.dimension_semantics<parallel>, #tpu.dimension_semantics<parallel>, #tpu.dimension_semantics<parallel>, #tpu.dimension_semantics<parallel>, #tpu.dimension_semantics<arbitrary>], iteration_bounds = array<i64: 2, 2, 1, 1, 3>, scalar_prefetch = 0 : i64, scratch_operands = 1 : i64, tpu.core_type = #tpu.core_type<tc>, window_params = [{transform_indices = @transform_0, window_bounds = array<i64: 1, 1, 16, 576>}, {transform_indices = @transform_1, window_bounds = array<i64: 1, 576, 64>}, {transform_indices = @transform_2, window_bounds = array<i64: 1, 64>}, {transform_indices = @transform_3, window_bounds = array<i64: 1, 1, 16, 64>}]} {
    %c0_i32 = arith.constant 0 : i32
    %0 = arith.cmpi eq, %arg4, %c0_i32 : i32
    %1 = arith.extui %0 : i1 to i32
    %c0_i32_0 = arith.constant 0 : i32
    %2 = arith.cmpi ne, %1, %c0_i32_0 : i32
    scf.if %2 {
      %cst_12 = arith.constant 0.000000e+00 : f32
      %14 = vector.broadcast %cst_12 : f32 to vector<16x64xf32>
      %c0_13 = arith.constant 0 : index
      %c0_14 = arith.constant 0 : index
      %15 = vector.load %arg9[%c0_13, %c0_14] : memref<16x64xf32, #tpu.memory_space<vmem>>, vector<16x64xf32>
      tpu.vector_store %arg9[%c0_13, %c0_14], %14 {strides = array<i32>} : memref<16x64xf32, #tpu.memory_space<vmem>>, vector<16x64xf32>,
    } else {
    }
    %c0 = arith.constant 0 : index
    %c0_1 = arith.constant 0 : index
    %3 = vector.load %arg9[%c0, %c0_1] : memref<16x64xf32, #tpu.memory_space<vmem>>, vector<16x64xf32>
    %c0_2 = arith.constant 0 : index
    %c0_3 = arith.constant 0 : index
    %c0_4 = arith.constant 0 : index
    %c0_5 = arith.constant 0 : index
    %4 = vector.load %arg5[%c0_2, %c0_3, %c0_4, %c0_5] : memref<1x1x16x576xbf16, #tpu.memory_space<vmem>>, vector<1x1x16x576xbf16>
    %5 = vector.shape_cast %4 : vector<1x1x16x576xbf16> to vector<16x576xbf16>
    %c0_6 = arith.constant 0 : index
    %c0_7 = arith.constant 0 : index
    %c0_8 = arith.constant 0 : index
    %6 = vector.load %arg6[%c0_6, %c0_7, %c0_8] : memref<1x576x64xbf16, #tpu.memory_space<vmem>>, vector<1x576x64xbf16>
    %7 = vector.shape_cast %6 : vector<1x576x64xbf16> to vector<576x64xbf16>
    %cst = arith.constant dense<0.000000e+00> : vector<16x64xf32>
    %8 = tpu.matmul %5, %7, %cst {dimension_numbers = #tpu.dot_dimension_numbers<[1], [0], [0], [1], [0, 0, 1, 1], [], []>} : vector<16x576xbf16>, vector<576x64xbf16>, vector<16x64xf32> -> vector<16x64xf32>
    %9 = arith.addf %3, %8 : vector<16x64xf32>
    %c0_9 = arith.constant 0 : index
    %c0_10 = arith.constant 0 : index
    %10 = vector.load %arg9[%c0_9, %c0_10] : memref<16x64xf32, #tpu.memory_space<vmem>>, vector<16x64xf32>
    tpu.vector_store %arg9[%c0_9, %c0_10], %9 {strides = array<i32>} : memref<16x64xf32, #tpu.memory_space<vmem>>, vector<16x64xf32>,
    %c2_i32 = arith.constant 2 : i32
    %11 = arith.cmpi eq, %arg4, %c2_i32 : i32
    %12 = arith.extui %11 : i1 to i32
    %c0_i32_11 = arith.constant 0 : i32
    %13 = arith.cmpi ne, %12, %c0_i32_11 : i32
    scf.if %13 {
      %c0_12 = arith.constant 0 : index
      %c0_13 = arith.constant 0 : index
      %14 = vector.load %arg9[%c0_12, %c0_13] : memref<16x64xf32, #tpu.memory_space<vmem>>, vector<16x64xf32>
      %c0_14 = arith.constant 0 : index
      %c0_15 = arith.constant 0 : index
      %15 = vector.load %arg7[%c0_14, %c0_15] : memref<1x64xf32, #tpu.memory_space<vmem>>, vector<1x64xf32>
      %16 = vector.broadcast %15 : vector<1x64xf32> to vector<16x64xf32>
      %17 = arith.addf %14, %16 : vector<16x64xf32>
      %cst_16 = arith.constant 0.000000e+00 : f32
      %18 = vector.broadcast %cst_16 : f32 to vector<16x64xf32>
      %19 = arith.maximumf %17, %18 : vector<16x64xf32>
      %20 = arith.truncf %19 : vector<16x64xf32> to vector<16x64xbf16>
      %c0_17 = arith.constant 0 : index
      %c0_18 = arith.constant 0 : index
      %c0_19 = arith.constant 0 : index
      %c0_20 = arith.constant 0 : index
      %21 = vector.load %arg8[%c0_17, %c0_18, %c0_19, %c0_20] : memref<1x1x16x64xbf16, #tpu.memory_space<vmem>>, vector<1x1x16x64xbf16>
      %22 = vector.shape_cast %21 : vector<1x1x16x64xbf16> to vector<16x64xbf16>
      %23 = vector.shape_cast %20 : vector<16x64xbf16> to vector<1x1x16x64xbf16>
      tpu.vector_store %arg8[%c0_17, %c0_18, %c0_19, %c0_20], %23 {strides = array<i32>} : memref<1x1x16x64xbf16, #tpu.memory_space<vmem>>, vector<1x1x16x64xbf16>,
    } else {
    }
    return
  }
  func.func @transform_0(%arg0: i32, %arg1: i32, %arg2: i32, %arg3: i32, %arg4: i32) -> (i32, i32, i32, i32) {
    %c1_i32 = arith.constant 1 : i32
    %0 = arith.muli %arg1, %c1_i32 : i32
    %1 = arith.addi %0, %arg4 : i32
    %c0_i32 = arith.constant 0 : i32
    %c0_i32_0 = arith.constant 0 : i32
    return %arg0, %1, %arg2, %c0_i32 : i32, i32, i32, i32
  }
  func.func @transform_1(%arg0: i32, %arg1: i32, %arg2: i32, %arg3: i32, %arg4: i32) -> (i32, i32, i32) {
    %c0_i32 = arith.constant 0 : i32
    %c0_i32_0 = arith.constant 0 : i32
    return %arg4, %c0_i32, %arg3 : i32, i32, i32
  }
  func.func @transform_2(%arg0: i32, %arg1: i32, %arg2: i32, %arg3: i32, %arg4: i32) -> (i32, i32) {
    %c0_i32 = arith.constant 0 : i32
    %c0_i32_0 = arith.constant 0 : i32
    return %c0_i32, %arg3 : i32, i32
  }
  func.func @transform_3(%arg0: i32, %arg1: i32, %arg2: i32, %arg3: i32, %arg4: i32) -> (i32, i32, i32, i32) {
    %c0_i32 = arith.constant 0 : i32
    return %arg0, %arg1, %arg2, %arg3 : i32, i32, i32, i32
  }
}

module attributes {stable_mosaic.version = 11 : i64} {
  func.func @kernel(%arg0: i32, %arg1: i32, %arg2: i32, %arg3: i32, %arg4: i32, %arg5: memref<1x1x16x576xbf16, #tpu.memory_space<vmem>>, %arg6: memref<1x576x64xbf16, #tpu.memory_space<vmem>>, %arg7: memref<1x64xf32, #tpu.memory_space<vmem>>, %arg8: memref<1x1x16x64xbf16, #tpu.memory_space<vmem>>, %arg9: memref<1x1x16x64xbf16, #tpu.memory_space<vmem>>, %arg10: memref<16x64xf32, #tpu.memory_space<vmem>>) attributes {dimension_semantics = [#tpu.dimension_semantics<parallel>, #tpu.dimension_semantics<parallel>, #tpu.dimension_semantics<parallel>, #tpu.dimension_semantics<parallel>, #tpu.dimension_semantics<arbitrary>], iteration_bounds = array<i64: 2, 2, 1, 1, 3>, scalar_prefetch = 0 : i64, scratch_operands = 1 : i64, tpu.core_type = #tpu.core_type<tc>, window_params = [{transform_indices = @transform_0, window_bounds = array<i64: 1, 1, 16, 576>}, {transform_indices = @transform_1, window_bounds = array<i64: 1, 576, 64>}, {transform_indices = @transform_2, window_bounds = array<i64: 1, 64>}, {transform_indices = @transform_3, window_bounds = array<i64: 1, 1, 16, 64>}, {transform_indices = @transform_4, window_bounds = array<i64: 1, 1, 16, 64>}]} {
    %c0_i32 = arith.constant 0 : i32
    %0 = arith.cmpi eq, %arg4, %c0_i32 : i32
    %1 = arith.extui %0 : i1 to i32
    %c0_i32_0 = arith.constant 0 : i32
    %2 = arith.cmpi ne, %1, %c0_i32_0 : i32
    scf.if %2 {
      %cst_12 = arith.constant 0.000000e+00 : f32
      %14 = vector.broadcast %cst_12 : f32 to vector<16x64xf32>
      %c0_13 = arith.constant 0 : index
      %c0_14 = arith.constant 0 : index
      %15 = vector.load %arg10[%c0_13, %c0_14] : memref<16x64xf32, #tpu.memory_space<vmem>>, vector<16x64xf32>
      tpu.vector_store %arg10[%c0_13, %c0_14], %14 {strides = array<i32>} : memref<16x64xf32, #tpu.memory_space<vmem>>, vector<16x64xf32>,
    } else {
    }
    %c0 = arith.constant 0 : index
    %c0_1 = arith.constant 0 : index
    %3 = vector.load %arg10[%c0, %c0_1] : memref<16x64xf32, #tpu.memory_space<vmem>>, vector<16x64xf32>
    %c0_2 = arith.constant 0 : index
    %c0_3 = arith.constant 0 : index
    %c0_4 = arith.constant 0 : index
    %c0_5 = arith.constant 0 : index
    %4 = vector.load %arg5[%c0_2, %c0_3, %c0_4, %c0_5] : memref<1x1x16x576xbf16, #tpu.memory_space<vmem>>, vector<1x1x16x576xbf16>
    %5 = vector.shape_cast %4 : vector<1x1x16x576xbf16> to vector<16x576xbf16>
    %c0_6 = arith.constant 0 : index
    %c0_7 = arith.constant 0 : index
    %c0_8 = arith.constant 0 : index
    %6 = vector.load %arg6[%c0_6, %c0_7, %c0_8] : memref<1x576x64xbf16, #tpu.memory_space<vmem>>, vector<1x576x64xbf16>
    %7 = vector.shape_cast %6 : vector<1x576x64xbf16> to vector<576x64xbf16>
    %cst = arith.constant dense<0.000000e+00> : vector<16x64xf32>
    %8 = tpu.matmul %5, %7, %cst {dimension_numbers = #tpu.dot_dimension_numbers<[1], [0], [0], [1], [0, 0, 1, 1], [], []>} : vector<16x576xbf16>, vector<576x64xbf16>, vector<16x64xf32> -> vector<16x64xf32>
    %9 = arith.addf %3, %8 : vector<16x64xf32>
    %c0_9 = arith.constant 0 : index
    %c0_10 = arith.constant 0 : index
    %10 = vector.load %arg10[%c0_9, %c0_10] : memref<16x64xf32, #tpu.memory_space<vmem>>, vector<16x64xf32>
    tpu.vector_store %arg10[%c0_9, %c0_10], %9 {strides = array<i32>} : memref<16x64xf32, #tpu.memory_space<vmem>>, vector<16x64xf32>,
    %c2_i32 = arith.constant 2 : i32
    %11 = arith.cmpi eq, %arg4, %c2_i32 : i32
    %12 = arith.extui %11 : i1 to i32
    %c0_i32_11 = arith.constant 0 : i32
    %13 = arith.cmpi ne, %12, %c0_i32_11 : i32
    scf.if %13 {
      %c0_12 = arith.constant 0 : index
      %c0_13 = arith.constant 0 : index
      %14 = vector.load %arg10[%c0_12, %c0_13] : memref<16x64xf32, #tpu.memory_space<vmem>>, vector<16x64xf32>
      %c0_14 = arith.constant 0 : index
      %c0_15 = arith.constant 0 : index
      %15 = vector.load %arg7[%c0_14, %c0_15] : memref<1x64xf32, #tpu.memory_space<vmem>>, vector<1x64xf32>
      %16 = vector.broadcast %15 : vector<1x64xf32> to vector<16x64xf32>
      %17 = arith.addf %14, %16 : vector<16x64xf32>
      %c0_16 = arith.constant 0 : index
      %c0_17 = arith.constant 0 : index
      %c0_18 = arith.constant 0 : index
      %c0_19 = arith.constant 0 : index
      %18 = vector.load %arg8[%c0_16, %c0_17, %c0_18, %c0_19] : memref<1x1x16x64xbf16, #tpu.memory_space<vmem>>, vector<1x1x16x64xbf16>
      %19 = vector.shape_cast %18 : vector<1x1x16x64xbf16> to vector<16x64xbf16>
      %20 = arith.extf %19 : vector<16x64xbf16> to vector<16x64xf32>
      %21 = arith.addf %17, %20 : vector<16x64xf32>
      %cst_20 = arith.constant 0.000000e+00 : f32
      %22 = vector.broadcast %cst_20 : f32 to vector<16x64xf32>
      %23 = arith.maximumf %21, %22 : vector<16x64xf32>
      %24 = arith.truncf %23 : vector<16x64xf32> to vector<16x64xbf16>
      %c0_21 = arith.constant 0 : index
      %c0_22 = arith.constant 0 : index
      %c0_23 = arith.constant 0 : index
      %c0_24 = arith.constant 0 : index
      %25 = vector.load %arg9[%c0_21, %c0_22, %c0_23, %c0_24] : memref<1x1x16x64xbf16, #tpu.memory_space<vmem>>, vector<1x1x16x64xbf16>
      %26 = vector.shape_cast %25 : vector<1x1x16x64xbf16> to vector<16x64xbf16>
      %27 = vector.shape_cast %24 : vector<16x64xbf16> to vector<1x1x16x64xbf16>
      tpu.vector_store %arg9[%c0_21, %c0_22, %c0_23, %c0_24], %27 {strides = array<i32>} : memref<1x1x16x64xbf16, #tpu.memory_space<vmem>>, vector<1x1x16x64xbf16>,
    } else {
    }
    return
  }
  func.func @transform_0(%arg0: i32, %arg1: i32, %arg2: i32, %arg3: i32, %arg4: i32) -> (i32, i32, i32, i32) {
    %c1_i32 = arith.constant 1 : i32
    %0 = arith.muli %arg1, %c1_i32 : i32
    %1 = arith.addi %0, %arg4 : i32
    %c0_i32 = arith.constant 0 : i32
    %c0_i32_0 = arith.constant 0 : i32
    return %arg0, %1, %arg2, %c0_i32 : i32, i32, i32, i32
  }
  func.func @transform_1(%arg0: i32, %arg1: i32, %arg2: i32, %arg3: i32, %arg4: i32) -> (i32, i32, i32) {
    %c0_i32 = arith.constant 0 : i32
    %c0_i32_0 = arith.constant 0 : i32
    return %arg4, %c0_i32, %arg3 : i32, i32, i32
  }
  func.func @transform_2(%arg0: i32, %arg1: i32, %arg2: i32, %arg3: i32, %arg4: i32) -> (i32, i32) {
    %c0_i32 = arith.constant 0 : i32
    %c0_i32_0 = arith.constant 0 : i32
    return %c0_i32, %arg3 : i32, i32
  }
  func.func @transform_3(%arg0: i32, %arg1: i32, %arg2: i32, %arg3: i32, %arg4: i32) -> (i32, i32, i32, i32) {
    %c0_i32 = arith.constant 0 : i32
    return %arg0, %arg1, %arg2, %arg3 : i32, i32, i32, i32
  }
  func.func @transform_4(%arg0: i32, %arg1: i32, %arg2: i32, %arg3: i32, %arg4: i32) -> (i32, i32, i32, i32) {
    %c0_i32 = arith.constant 0 : i32
    return %arg0, %arg1, %arg2, %arg3 : i32, i32, i32, i32
  }
}

module attributes {stable_mosaic.version = 11 : i64} {
  func.func @kernel(%arg0: i32, %arg1: i32, %arg2: i32, %arg3: i32, %arg4: i32, %arg5: memref<1x1x4x576xbf16, #tpu.memory_space<vmem>>, %arg6: memref<1x576x128xbf16, #tpu.memory_space<vmem>>, %arg7: memref<1x128xf32, #tpu.memory_space<vmem>>, %arg8: memref<1x1x4x128xbf16, #tpu.memory_space<vmem>>, %arg9: memref<4x128xf32, #tpu.memory_space<vmem>>) attributes {dimension_semantics = [#tpu.dimension_semantics<parallel>, #tpu.dimension_semantics<parallel>, #tpu.dimension_semantics<parallel>, #tpu.dimension_semantics<parallel>, #tpu.dimension_semantics<arbitrary>], iteration_bounds = array<i64: 2, 1, 1, 1, 3>, scalar_prefetch = 0 : i64, scratch_operands = 1 : i64, tpu.core_type = #tpu.core_type<tc>, window_params = [{transform_indices = @transform_0, window_bounds = array<i64: 1, 1, 4, 576>}, {transform_indices = @transform_1, window_bounds = array<i64: 1, 576, 128>}, {transform_indices = @transform_2, window_bounds = array<i64: 1, 128>}, {transform_indices = @transform_3, window_bounds = array<i64: 1, 1, 4, 128>}]} {
    %c0_i32 = arith.constant 0 : i32
    %0 = arith.cmpi eq, %arg4, %c0_i32 : i32
    %1 = arith.extui %0 : i1 to i32
    %c0_i32_0 = arith.constant 0 : i32
    %2 = arith.cmpi ne, %1, %c0_i32_0 : i32
    scf.if %2 {
      %cst_12 = arith.constant 0.000000e+00 : f32
      %14 = vector.broadcast %cst_12 : f32 to vector<4x128xf32>
      %c0_13 = arith.constant 0 : index
      %c0_14 = arith.constant 0 : index
      %15 = vector.load %arg9[%c0_13, %c0_14] : memref<4x128xf32, #tpu.memory_space<vmem>>, vector<4x128xf32>
      tpu.vector_store %arg9[%c0_13, %c0_14], %14 {strides = array<i32>} : memref<4x128xf32, #tpu.memory_space<vmem>>, vector<4x128xf32>,
    } else {
    }
    %c0 = arith.constant 0 : index
    %c0_1 = arith.constant 0 : index
    %3 = vector.load %arg9[%c0, %c0_1] : memref<4x128xf32, #tpu.memory_space<vmem>>, vector<4x128xf32>
    %c0_2 = arith.constant 0 : index
    %c0_3 = arith.constant 0 : index
    %c0_4 = arith.constant 0 : index
    %c0_5 = arith.constant 0 : index
    %4 = vector.load %arg5[%c0_2, %c0_3, %c0_4, %c0_5] : memref<1x1x4x576xbf16, #tpu.memory_space<vmem>>, vector<1x1x4x576xbf16>
    %5 = vector.shape_cast %4 : vector<1x1x4x576xbf16> to vector<4x576xbf16>
    %c0_6 = arith.constant 0 : index
    %c0_7 = arith.constant 0 : index
    %c0_8 = arith.constant 0 : index
    %6 = vector.load %arg6[%c0_6, %c0_7, %c0_8] : memref<1x576x128xbf16, #tpu.memory_space<vmem>>, vector<1x576x128xbf16>
    %7 = vector.shape_cast %6 : vector<1x576x128xbf16> to vector<576x128xbf16>
    %cst = arith.constant dense<0.000000e+00> : vector<4x128xf32>
    %8 = tpu.matmul %5, %7, %cst {dimension_numbers = #tpu.dot_dimension_numbers<[1], [0], [0], [1], [0, 0, 1, 1], [], []>} : vector<4x576xbf16>, vector<576x128xbf16>, vector<4x128xf32> -> vector<4x128xf32>
    %9 = arith.addf %3, %8 : vector<4x128xf32>
    %c0_9 = arith.constant 0 : index
    %c0_10 = arith.constant 0 : index
    %10 = vector.load %arg9[%c0_9, %c0_10] : memref<4x128xf32, #tpu.memory_space<vmem>>, vector<4x128xf32>
    tpu.vector_store %arg9[%c0_9, %c0_10], %9 {strides = array<i32>} : memref<4x128xf32, #tpu.memory_space<vmem>>, vector<4x128xf32>,
    %c2_i32 = arith.constant 2 : i32
    %11 = arith.cmpi eq, %arg4, %c2_i32 : i32
    %12 = arith.extui %11 : i1 to i32
    %c0_i32_11 = arith.constant 0 : i32
    %13 = arith.cmpi ne, %12, %c0_i32_11 : i32
    scf.if %13 {
      %c0_12 = arith.constant 0 : index
      %c0_13 = arith.constant 0 : index
      %14 = vector.load %arg9[%c0_12, %c0_13] : memref<4x128xf32, #tpu.memory_space<vmem>>, vector<4x128xf32>
      %c0_14 = arith.constant 0 : index
      %c0_15 = arith.constant 0 : index
      %15 = vector.load %arg7[%c0_14, %c0_15] : memref<1x128xf32, #tpu.memory_space<vmem>>, vector<1x128xf32>
      %16 = vector.broadcast %15 : vector<1x128xf32> to vector<4x128xf32>
      %17 = arith.addf %14, %16 : vector<4x128xf32>
      %cst_16 = arith.constant 0.000000e+00 : f32
      %18 = vector.broadcast %cst_16 : f32 to vector<4x128xf32>
      %19 = arith.maximumf %17, %18 : vector<4x128xf32>
      %20 = arith.truncf %19 : vector<4x128xf32> to vector<4x128xbf16>
      %c0_17 = arith.constant 0 : index
      %c0_18 = arith.constant 0 : index
      %c0_19 = arith.constant 0 : index
      %c0_20 = arith.constant 0 : index
      %21 = vector.load %arg8[%c0_17, %c0_18, %c0_19, %c0_20] : memref<1x1x4x128xbf16, #tpu.memory_space<vmem>>, vector<1x1x4x128xbf16>
      %22 = vector.shape_cast %21 : vector<1x1x4x128xbf16> to vector<4x128xbf16>
      %23 = vector.shape_cast %20 : vector<4x128xbf16> to vector<1x1x4x128xbf16>
      tpu.vector_store %arg8[%c0_17, %c0_18, %c0_19, %c0_20], %23 {strides = array<i32>} : memref<1x1x4x128xbf16, #tpu.memory_space<vmem>>, vector<1x1x4x128xbf16>,
    } else {
    }
    return
  }
  func.func @transform_0(%arg0: i32, %arg1: i32, %arg2: i32, %arg3: i32, %arg4: i32) -> (i32, i32, i32, i32) {
    %c2_i32 = arith.constant 2 : i32
    %0 = arith.muli %arg1, %c2_i32 : i32
    %1 = arith.addi %0, %arg4 : i32
    %c0_i32 = arith.constant 0 : i32
    %c0_i32_0 = arith.constant 0 : i32
    return %arg0, %1, %arg2, %c0_i32 : i32, i32, i32, i32
  }
  func.func @transform_1(%arg0: i32, %arg1: i32, %arg2: i32, %arg3: i32, %arg4: i32) -> (i32, i32, i32) {
    %c0_i32 = arith.constant 0 : i32
    %c0_i32_0 = arith.constant 0 : i32
    return %arg4, %c0_i32, %arg3 : i32, i32, i32
  }
  func.func @transform_2(%arg0: i32, %arg1: i32, %arg2: i32, %arg3: i32, %arg4: i32) -> (i32, i32) {
    %c0_i32 = arith.constant 0 : i32
    %c0_i32_0 = arith.constant 0 : i32
    return %c0_i32, %arg3 : i32, i32
  }
  func.func @transform_3(%arg0: i32, %arg1: i32, %arg2: i32, %arg3: i32, %arg4: i32) -> (i32, i32, i32, i32) {
    %c0_i32 = arith.constant 0 : i32
    return %arg0, %arg1, %arg2, %arg3 : i32, i32, i32, i32
  }
}

module attributes {stable_mosaic.version = 11 : i64} {
  func.func @kernel(%arg0: i32, %arg1: i32, %arg2: memref<8x64xbf16, #tpu.memory_space<vmem>>, %arg3: memref<64x128xbf16, #tpu.memory_space<vmem>>, %arg4: memref<1x128xf32, #tpu.memory_space<vmem>>, %arg5: memref<8x128xbf16, #tpu.memory_space<vmem>>) attributes {dimension_semantics = [#tpu.dimension_semantics<parallel>, #tpu.dimension_semantics<parallel>], iteration_bounds = array<i64: 1, 1>, scalar_prefetch = 0 : i64, scratch_operands = 0 : i64, tpu.core_type = #tpu.core_type<tc>, window_params = [{transform_indices = @transform_0, window_bounds = array<i64: 8, 64>}, {transform_indices = @transform_1, window_bounds = array<i64: 64, 128>}, {transform_indices = @transform_2, window_bounds = array<i64: 1, 128>}, {transform_indices = @transform_3, window_bounds = array<i64: 8, 128>}]} {
    %c0 = arith.constant 0 : index
    %c0_0 = arith.constant 0 : index
    %0 = vector.load %arg2[%c0, %c0_0] : memref<8x64xbf16, #tpu.memory_space<vmem>>, vector<8x64xbf16>
    %c0_1 = arith.constant 0 : index
    %c0_2 = arith.constant 0 : index
    %1 = vector.load %arg3[%c0_1, %c0_2] : memref<64x128xbf16, #tpu.memory_space<vmem>>, vector<64x128xbf16>
    %cst = arith.constant dense<0.000000e+00> : vector<8x128xf32>
    %2 = tpu.matmul %0, %1, %cst {dimension_numbers = #tpu.dot_dimension_numbers<[1], [0], [0], [1], [0, 0, 1, 1], [], []>} : vector<8x64xbf16>, vector<64x128xbf16>, vector<8x128xf32> -> vector<8x128xf32>
    %c0_3 = arith.constant 0 : index
    %c0_4 = arith.constant 0 : index
    %3 = vector.load %arg4[%c0_3, %c0_4] : memref<1x128xf32, #tpu.memory_space<vmem>>, vector<1x128xf32>
    %4 = vector.broadcast %3 : vector<1x128xf32> to vector<8x128xf32>
    %5 = arith.addf %2, %4 : vector<8x128xf32>
    %6 = arith.truncf %5 : vector<8x128xf32> to vector<8x128xbf16>
    %c0_5 = arith.constant 0 : index
    %c0_6 = arith.constant 0 : index
    %7 = vector.load %arg5[%c0_5, %c0_6] : memref<8x128xbf16, #tpu.memory_space<vmem>>, vector<8x128xbf16>
    tpu.vector_store %arg5[%c0_5, %c0_6], %6 {strides = array<i32>} : memref<8x128xbf16, #tpu.memory_space<vmem>>, vector<8x128xbf16>,
    return
  }
  func.func @transform_0(%arg0: i32, %arg1: i32) -> (i32, i32) {
    %c0_i32 = arith.constant 0 : i32
    %c0_i32_0 = arith.constant 0 : i32
    return %arg0, %c0_i32 : i32, i32
  }
  func.func @transform_1(%arg0: i32, %arg1: i32) -> (i32, i32) {
    %c0_i32 = arith.constant 0 : i32
    %c0_i32_0 = arith.constant 0 : i32
    return %c0_i32, %arg1 : i32, i32
  }
  func.func @transform_2(%arg0: i32, %arg1: i32) -> (i32, i32) {
    %c0_i32 = arith.constant 0 : i32
    %c0_i32_0 = arith.constant 0 : i32
    return %c0_i32, %arg1 : i32, i32
  }
  func.func @transform_3(%arg0: i32, %arg1: i32) -> (i32, i32) {
    %c0_i32 = arith.constant 0 : i32
    return %arg0, %arg1 : i32, i32
  }
}

module attributes {stable_mosaic.version = 11 : i64} {
  func.func @kernel(%arg0: i32, %arg1: i32, %arg2: i32, %arg3: i32, %arg4: i32, %arg5: memref<1x1x4x1152xbf16, #tpu.memory_space<vmem>>, %arg6: memref<1x1152x128xbf16, #tpu.memory_space<vmem>>, %arg7: memref<1x128xf32, #tpu.memory_space<vmem>>, %arg8: memref<1x1x4x128xbf16, #tpu.memory_space<vmem>>, %arg9: memref<1x1x4x128xbf16, #tpu.memory_space<vmem>>, %arg10: memref<4x128xf32, #tpu.memory_space<vmem>>) attributes {dimension_semantics = [#tpu.dimension_semantics<parallel>, #tpu.dimension_semantics<parallel>, #tpu.dimension_semantics<parallel>, #tpu.dimension_semantics<parallel>, #tpu.dimension_semantics<arbitrary>], iteration_bounds = array<i64: 2, 1, 1, 1, 3>, scalar_prefetch = 0 : i64, scratch_operands = 1 : i64, tpu.core_type = #tpu.core_type<tc>, window_params = [{transform_indices = @transform_0, window_bounds = array<i64: 1, 1, 4, 1152>}, {transform_indices = @transform_1, window_bounds = array<i64: 1, 1152, 128>}, {transform_indices = @transform_2, window_bounds = array<i64: 1, 128>}, {transform_indices = @transform_3, window_bounds = array<i64: 1, 1, 4, 128>}, {transform_indices = @transform_4, window_bounds = array<i64: 1, 1, 4, 128>}]} {
    %c0_i32 = arith.constant 0 : i32
    %0 = arith.cmpi eq, %arg4, %c0_i32 : i32
    %1 = arith.extui %0 : i1 to i32
    %c0_i32_0 = arith.constant 0 : i32
    %2 = arith.cmpi ne, %1, %c0_i32_0 : i32
    scf.if %2 {
      %cst_12 = arith.constant 0.000000e+00 : f32
      %14 = vector.broadcast %cst_12 : f32 to vector<4x128xf32>
      %c0_13 = arith.constant 0 : index
      %c0_14 = arith.constant 0 : index
      %15 = vector.load %arg10[%c0_13, %c0_14] : memref<4x128xf32, #tpu.memory_space<vmem>>, vector<4x128xf32>
      tpu.vector_store %arg10[%c0_13, %c0_14], %14 {strides = array<i32>} : memref<4x128xf32, #tpu.memory_space<vmem>>, vector<4x128xf32>,
    } else {
    }
    %c0 = arith.constant 0 : index
    %c0_1 = arith.constant 0 : index
    %3 = vector.load %arg10[%c0, %c0_1] : memref<4x128xf32, #tpu.memory_space<vmem>>, vector<4x128xf32>
    %c0_2 = arith.constant 0 : index
    %c0_3 = arith.constant 0 : index
    %c0_4 = arith.constant 0 : index
    %c0_5 = arith.constant 0 : index
    %4 = vector.load %arg5[%c0_2, %c0_3, %c0_4, %c0_5] : memref<1x1x4x1152xbf16, #tpu.memory_space<vmem>>, vector<1x1x4x1152xbf16>
    %5 = vector.shape_cast %4 : vector<1x1x4x1152xbf16> to vector<4x1152xbf16>
    %c0_6 = arith.constant 0 : index
    %c0_7 = arith.constant 0 : index
    %c0_8 = arith.constant 0 : index
    %6 = vector.load %arg6[%c0_6, %c0_7, %c0_8] : memref<1x1152x128xbf16, #tpu.memory_space<vmem>>, vector<1x1152x128xbf16>
    %7 = vector.shape_cast %6 : vector<1x1152x128xbf16> to vector<1152x128xbf16>
    %cst = arith.constant dense<0.000000e+00> : vector<4x128xf32>
    %8 = tpu.matmul %5, %7, %cst {dimension_numbers = #tpu.dot_dimension_numbers<[1], [0], [0], [1], [0, 0, 1, 1], [], []>} : vector<4x1152xbf16>, vector<1152x128xbf16>, vector<4x128xf32> -> vector<4x128xf32>
    %9 = arith.addf %3, %8 : vector<4x128xf32>
    %c0_9 = arith.constant 0 : index
    %c0_10 = arith.constant 0 : index
    %10 = vector.load %arg10[%c0_9, %c0_10] : memref<4x128xf32, #tpu.memory_space<vmem>>, vector<4x128xf32>
    tpu.vector_store %arg10[%c0_9, %c0_10], %9 {strides = array<i32>} : memref<4x128xf32, #tpu.memory_space<vmem>>, vector<4x128xf32>,
    %c2_i32 = arith.constant 2 : i32
    %11 = arith.cmpi eq, %arg4, %c2_i32 : i32
    %12 = arith.extui %11 : i1 to i32
    %c0_i32_11 = arith.constant 0 : i32
    %13 = arith.cmpi ne, %12, %c0_i32_11 : i32
    scf.if %13 {
      %c0_12 = arith.constant 0 : index
      %c0_13 = arith.constant 0 : index
      %14 = vector.load %arg10[%c0_12, %c0_13] : memref<4x128xf32, #tpu.memory_space<vmem>>, vector<4x128xf32>
      %c0_14 = arith.constant 0 : index
      %c0_15 = arith.constant 0 : index
      %15 = vector.load %arg7[%c0_14, %c0_15] : memref<1x128xf32, #tpu.memory_space<vmem>>, vector<1x128xf32>
      %16 = vector.broadcast %15 : vector<1x128xf32> to vector<4x128xf32>
      %17 = arith.addf %14, %16 : vector<4x128xf32>
      %c0_16 = arith.constant 0 : index
      %c0_17 = arith.constant 0 : index
      %c0_18 = arith.constant 0 : index
      %c0_19 = arith.constant 0 : index
      %18 = vector.load %arg8[%c0_16, %c0_17, %c0_18, %c0_19] : memref<1x1x4x128xbf16, #tpu.memory_space<vmem>>, vector<1x1x4x128xbf16>
      %19 = vector.shape_cast %18 : vector<1x1x4x128xbf16> to vector<4x128xbf16>
      %20 = arith.extf %19 : vector<4x128xbf16> to vector<4x128xf32>
      %21 = arith.addf %17, %20 : vector<4x128xf32>
      %cst_20 = arith.constant 0.000000e+00 : f32
      %22 = vector.broadcast %cst_20 : f32 to vector<4x128xf32>
      %23 = arith.maximumf %21, %22 : vector<4x128xf32>
      %24 = arith.truncf %23 : vector<4x128xf32> to vector<4x128xbf16>
      %c0_21 = arith.constant 0 : index
      %c0_22 = arith.constant 0 : index
      %c0_23 = arith.constant 0 : index
      %c0_24 = arith.constant 0 : index
      %25 = vector.load %arg9[%c0_21, %c0_22, %c0_23, %c0_24] : memref<1x1x4x128xbf16, #tpu.memory_space<vmem>>, vector<1x1x4x128xbf16>
      %26 = vector.shape_cast %25 : vector<1x1x4x128xbf16> to vector<4x128xbf16>
      %27 = vector.shape_cast %24 : vector<4x128xbf16> to vector<1x1x4x128xbf16>
      tpu.vector_store %arg9[%c0_21, %c0_22, %c0_23, %c0_24], %27 {strides = array<i32>} : memref<1x1x4x128xbf16, #tpu.memory_space<vmem>>, vector<1x1x4x128xbf16>,
    } else {
    }
    return
  }
  func.func @transform_0(%arg0: i32, %arg1: i32, %arg2: i32, %arg3: i32, %arg4: i32) -> (i32, i32, i32, i32) {
    %c1_i32 = arith.constant 1 : i32
    %0 = arith.muli %arg1, %c1_i32 : i32
    %1 = arith.addi %0, %arg4 : i32
    %c0_i32 = arith.constant 0 : i32
    %c0_i32_0 = arith.constant 0 : i32
    return %arg0, %1, %arg2, %c0_i32 : i32, i32, i32, i32
  }
  func.func @transform_1(%arg0: i32, %arg1: i32, %arg2: i32, %arg3: i32, %arg4: i32) -> (i32, i32, i32) {
    %c0_i32 = arith.constant 0 : i32
    %c0_i32_0 = arith.constant 0 : i32
    return %arg4, %c0_i32, %arg3 : i32, i32, i32
  }
  func.func @transform_2(%arg0: i32, %arg1: i32, %arg2: i32, %arg3: i32, %arg4: i32) -> (i32, i32) {
    %c0_i32 = arith.constant 0 : i32
    %c0_i32_0 = arith.constant 0 : i32
    return %c0_i32, %arg3 : i32, i32
  }
  func.func @transform_3(%arg0: i32, %arg1: i32, %arg2: i32, %arg3: i32, %arg4: i32) -> (i32, i32, i32, i32) {
    %c0_i32 = arith.constant 0 : i32
    return %arg0, %arg1, %arg2, %arg3 : i32, i32, i32, i32
  }
  func.func @transform_4(%arg0: i32, %arg1: i32, %arg2: i32, %arg3: i32, %arg4: i32) -> (i32, i32, i32, i32) {
    %c0_i32 = arith.constant 0 : i32
    return %arg0, %arg1, %arg2, %arg3 : i32, i32, i32, i32
  }
}

module attributes {stable_mosaic.version = 11 : i64} {
  func.func @kernel(%arg0: i32, %arg1: i32, %arg2: i32, %arg3: i32, %arg4: i32, %arg5: memref<1x1x1x1152xbf16, #tpu.memory_space<vmem>>, %arg6: memref<1x1152x256xbf16, #tpu.memory_space<vmem>>, %arg7: memref<1x256xf32, #tpu.memory_space<vmem>>, %arg8: memref<1x1x1x256xbf16, #tpu.memory_space<vmem>>, %arg9: memref<1x256xf32, #tpu.memory_space<vmem>>) attributes {dimension_semantics = [#tpu.dimension_semantics<parallel>, #tpu.dimension_semantics<parallel>, #tpu.dimension_semantics<parallel>, #tpu.dimension_semantics<parallel>, #tpu.dimension_semantics<arbitrary>], iteration_bounds = array<i64: 2, 1, 1, 1, 3>, scalar_prefetch = 0 : i64, scratch_operands = 1 : i64, tpu.core_type = #tpu.core_type<tc>, window_params = [{transform_indices = @transform_0, window_bounds = array<i64: 1, 1, 1, 1152>}, {transform_indices = @transform_1, window_bounds = array<i64: 1, 1152, 256>}, {transform_indices = @transform_2, window_bounds = array<i64: 1, 256>}, {transform_indices = @transform_3, window_bounds = array<i64: 1, 1, 1, 256>}]} {
    %c0_i32 = arith.constant 0 : i32
    %0 = arith.cmpi eq, %arg4, %c0_i32 : i32
    %1 = arith.extui %0 : i1 to i32
    %c0_i32_0 = arith.constant 0 : i32
    %2 = arith.cmpi ne, %1, %c0_i32_0 : i32
    scf.if %2 {
      %cst_12 = arith.constant 0.000000e+00 : f32
      %14 = vector.broadcast %cst_12 : f32 to vector<1x256xf32>
      %c0_13 = arith.constant 0 : index
      %c0_14 = arith.constant 0 : index
      %15 = vector.load %arg9[%c0_13, %c0_14] : memref<1x256xf32, #tpu.memory_space<vmem>>, vector<1x256xf32>
      tpu.vector_store %arg9[%c0_13, %c0_14], %14 {strides = array<i32>} : memref<1x256xf32, #tpu.memory_space<vmem>>, vector<1x256xf32>,
    } else {
    }
    %c0 = arith.constant 0 : index
    %c0_1 = arith.constant 0 : index
    %3 = vector.load %arg9[%c0, %c0_1] : memref<1x256xf32, #tpu.memory_space<vmem>>, vector<1x256xf32>
    %c0_2 = arith.constant 0 : index
    %c0_3 = arith.constant 0 : index
    %c0_4 = arith.constant 0 : index
    %c0_5 = arith.constant 0 : index
    %4 = vector.load %arg5[%c0_2, %c0_3, %c0_4, %c0_5] : memref<1x1x1x1152xbf16, #tpu.memory_space<vmem>>, vector<1x1x1x1152xbf16>
    %5 = vector.shape_cast %4 : vector<1x1x1x1152xbf16> to vector<1x1152xbf16>
    %c0_6 = arith.constant 0 : index
    %c0_7 = arith.constant 0 : index
    %c0_8 = arith.constant 0 : index
    %6 = vector.load %arg6[%c0_6, %c0_7, %c0_8] : memref<1x1152x256xbf16, #tpu.memory_space<vmem>>, vector<1x1152x256xbf16>
    %7 = vector.shape_cast %6 : vector<1x1152x256xbf16> to vector<1152x256xbf16>
    %cst = arith.constant dense<0.000000e+00> : vector<1x256xf32>
    %8 = tpu.matmul %5, %7, %cst {dimension_numbers = #tpu.dot_dimension_numbers<[1], [0], [0], [1], [0, 0, 1, 1], [], []>} : vector<1x1152xbf16>, vector<1152x256xbf16>, vector<1x256xf32> -> vector<1x256xf32>
    %9 = arith.addf %3, %8 : vector<1x256xf32>
    %c0_9 = arith.constant 0 : index
    %c0_10 = arith.constant 0 : index
    %10 = vector.load %arg9[%c0_9, %c0_10] : memref<1x256xf32, #tpu.memory_space<vmem>>, vector<1x256xf32>
    tpu.vector_store %arg9[%c0_9, %c0_10], %9 {strides = array<i32>} : memref<1x256xf32, #tpu.memory_space<vmem>>, vector<1x256xf32>,
    %c2_i32 = arith.constant 2 : i32
    %11 = arith.cmpi eq, %arg4, %c2_i32 : i32
    %12 = arith.extui %11 : i1 to i32
    %c0_i32_11 = arith.constant 0 : i32
    %13 = arith.cmpi ne, %12, %c0_i32_11 : i32
    scf.if %13 {
      %c0_12 = arith.constant 0 : index
      %c0_13 = arith.constant 0 : index
      %14 = vector.load %arg9[%c0_12, %c0_13] : memref<1x256xf32, #tpu.memory_space<vmem>>, vector<1x256xf32>
      %c0_14 = arith.constant 0 : index
      %c0_15 = arith.constant 0 : index
      %15 = vector.load %arg7[%c0_14, %c0_15] : memref<1x256xf32, #tpu.memory_space<vmem>>, vector<1x256xf32>
      %16 = arith.addf %14, %15 : vector<1x256xf32>
      %cst_16 = arith.constant 0.000000e+00 : f32
      %17 = vector.broadcast %cst_16 : f32 to vector<1x256xf32>
      %18 = arith.maximumf %16, %17 : vector<1x256xf32>
      %19 = arith.truncf %18 : vector<1x256xf32> to vector<1x256xbf16>
      %c0_17 = arith.constant 0 : index
      %c0_18 = arith.constant 0 : index
      %c0_19 = arith.constant 0 : index
      %c0_20 = arith.constant 0 : index
      %20 = vector.load %arg8[%c0_17, %c0_18, %c0_19, %c0_20] : memref<1x1x1x256xbf16, #tpu.memory_space<vmem>>, vector<1x1x1x256xbf16>
      %21 = vector.shape_cast %20 : vector<1x1x1x256xbf16> to vector<1x256xbf16>
      %22 = vector.shape_cast %19 : vector<1x256xbf16> to vector<1x1x1x256xbf16>
      tpu.vector_store %arg8[%c0_17, %c0_18, %c0_19, %c0_20], %22 {strides = array<i32>} : memref<1x1x1x256xbf16, #tpu.memory_space<vmem>>, vector<1x1x1x256xbf16>,
    } else {
    }
    return
  }
  func.func @transform_0(%arg0: i32, %arg1: i32, %arg2: i32, %arg3: i32, %arg4: i32) -> (i32, i32, i32, i32) {
    %c2_i32 = arith.constant 2 : i32
    %0 = arith.muli %arg1, %c2_i32 : i32
    %1 = arith.addi %0, %arg4 : i32
    %c0_i32 = arith.constant 0 : i32
    %c0_i32_0 = arith.constant 0 : i32
    return %arg0, %1, %arg2, %c0_i32 : i32, i32, i32, i32
  }
  func.func @transform_1(%arg0: i32, %arg1: i32, %arg2: i32, %arg3: i32, %arg4: i32) -> (i32, i32, i32) {
    %c0_i32 = arith.constant 0 : i32
    %c0_i32_0 = arith.constant 0 : i32
    return %arg4, %c0_i32, %arg3 : i32, i32, i32
  }
  func.func @transform_2(%arg0: i32, %arg1: i32, %arg2: i32, %arg3: i32, %arg4: i32) -> (i32, i32) {
    %c0_i32 = arith.constant 0 : i32
    %c0_i32_0 = arith.constant 0 : i32
    return %c0_i32, %arg3 : i32, i32
  }
  func.func @transform_3(%arg0: i32, %arg1: i32, %arg2: i32, %arg3: i32, %arg4: i32) -> (i32, i32, i32, i32) {
    %c0_i32 = arith.constant 0 : i32
    return %arg0, %arg1, %arg2, %arg3 : i32, i32, i32, i32
  }
}

module attributes {stable_mosaic.version = 11 : i64} {
  func.func @kernel(%arg0: i32, %arg1: i32, %arg2: memref<2x128xbf16, #tpu.memory_space<vmem>>, %arg3: memref<128x128xbf16, #tpu.memory_space<vmem>>, %arg4: memref<1x128xf32, #tpu.memory_space<vmem>>, %arg5: memref<2x128xbf16, #tpu.memory_space<vmem>>) attributes {dimension_semantics = [#tpu.dimension_semantics<parallel>, #tpu.dimension_semantics<parallel>], iteration_bounds = array<i64: 1, 2>, scalar_prefetch = 0 : i64, scratch_operands = 0 : i64, tpu.core_type = #tpu.core_type<tc>, window_params = [{transform_indices = @transform_0, window_bounds = array<i64: 2, 128>}, {transform_indices = @transform_1, window_bounds = array<i64: 128, 128>}, {transform_indices = @transform_2, window_bounds = array<i64: 1, 128>}, {transform_indices = @transform_3, window_bounds = array<i64: 2, 128>}]} {
    %c0 = arith.constant 0 : index
    %c0_0 = arith.constant 0 : index
    %0 = vector.load %arg2[%c0, %c0_0] : memref<2x128xbf16, #tpu.memory_space<vmem>>, vector<2x128xbf16>
    %c0_1 = arith.constant 0 : index
    %c0_2 = arith.constant 0 : index
    %1 = vector.load %arg3[%c0_1, %c0_2] : memref<128x128xbf16, #tpu.memory_space<vmem>>, vector<128x128xbf16>
    %cst = arith.constant dense<0.000000e+00> : vector<2x128xf32>
    %2 = tpu.matmul %0, %1, %cst {dimension_numbers = #tpu.dot_dimension_numbers<[1], [0], [0], [1], [0, 0, 1, 1], [], []>} : vector<2x128xbf16>, vector<128x128xbf16>, vector<2x128xf32> -> vector<2x128xf32>
    %c0_3 = arith.constant 0 : index
    %c0_4 = arith.constant 0 : index
    %3 = vector.load %arg4[%c0_3, %c0_4] : memref<1x128xf32, #tpu.memory_space<vmem>>, vector<1x128xf32>
    %4 = vector.broadcast %3 : vector<1x128xf32> to vector<2x128xf32>
    %5 = arith.addf %2, %4 : vector<2x128xf32>
    %6 = arith.truncf %5 : vector<2x128xf32> to vector<2x128xbf16>
    %c0_5 = arith.constant 0 : index
    %c0_6 = arith.constant 0 : index
    %7 = vector.load %arg5[%c0_5, %c0_6] : memref<2x128xbf16, #tpu.memory_space<vmem>>, vector<2x128xbf16>
    tpu.vector_store %arg5[%c0_5, %c0_6], %6 {strides = array<i32>} : memref<2x128xbf16, #tpu.memory_space<vmem>>, vector<2x128xbf16>,
    return
  }
  func.func @transform_0(%arg0: i32, %arg1: i32) -> (i32, i32) {
    %c0_i32 = arith.constant 0 : i32
    %c0_i32_0 = arith.constant 0 : i32
    return %arg0, %c0_i32 : i32, i32
  }
  func.func @transform_1(%arg0: i32, %arg1: i32) -> (i32, i32) {
    %c0_i32 = arith.constant 0 : i32
    %c0_i32_0 = arith.constant 0 : i32
    return %c0_i32, %arg1 : i32, i32
  }
  func.func @transform_2(%arg0: i32, %arg1: i32) -> (i32, i32) {
    %c0_i32 = arith.constant 0 : i32
    %c0_i32_0 = arith.constant 0 : i32
    return %c0_i32, %arg1 : i32, i32
  }
  func.func @transform_3(%arg0: i32, %arg1: i32) -> (i32, i32) {
    %c0_i32 = arith.constant 0 : i32
    return %arg0, %arg1 : i32, i32
  }
}

module attributes {stable_mosaic.version = 11 : i64} {
  func.func @kernel(%arg0: i32, %arg1: i32, %arg2: i32, %arg3: i32, %arg4: i32, %arg5: memref<1x1x1x2304xbf16, #tpu.memory_space<vmem>>, %arg6: memref<1x2304x256xbf16, #tpu.memory_space<vmem>>, %arg7: memref<1x256xf32, #tpu.memory_space<vmem>>, %arg8: memref<1x1x1x256xbf16, #tpu.memory_space<vmem>>, %arg9: memref<1x1x1x256xbf16, #tpu.memory_space<vmem>>, %arg10: memref<1x256xf32, #tpu.memory_space<vmem>>) attributes {dimension_semantics = [#tpu.dimension_semantics<parallel>, #tpu.dimension_semantics<parallel>, #tpu.dimension_semantics<parallel>, #tpu.dimension_semantics<parallel>, #tpu.dimension_semantics<arbitrary>], iteration_bounds = array<i64: 2, 1, 1, 1, 3>, scalar_prefetch = 0 : i64, scratch_operands = 1 : i64, tpu.core_type = #tpu.core_type<tc>, window_params = [{transform_indices = @transform_0, window_bounds = array<i64: 1, 1, 1, 2304>}, {transform_indices = @transform_1, window_bounds = array<i64: 1, 2304, 256>}, {transform_indices = @transform_2, window_bounds = array<i64: 1, 256>}, {transform_indices = @transform_3, window_bounds = array<i64: 1, 1, 1, 256>}, {transform_indices = @transform_4, window_bounds = array<i64: 1, 1, 1, 256>}]} {
    %c0_i32 = arith.constant 0 : i32
    %0 = arith.cmpi eq, %arg4, %c0_i32 : i32
    %1 = arith.extui %0 : i1 to i32
    %c0_i32_0 = arith.constant 0 : i32
    %2 = arith.cmpi ne, %1, %c0_i32_0 : i32
    scf.if %2 {
      %cst_12 = arith.constant 0.000000e+00 : f32
      %14 = vector.broadcast %cst_12 : f32 to vector<1x256xf32>
      %c0_13 = arith.constant 0 : index
      %c0_14 = arith.constant 0 : index
      %15 = vector.load %arg10[%c0_13, %c0_14] : memref<1x256xf32, #tpu.memory_space<vmem>>, vector<1x256xf32>
      tpu.vector_store %arg10[%c0_13, %c0_14], %14 {strides = array<i32>} : memref<1x256xf32, #tpu.memory_space<vmem>>, vector<1x256xf32>,
    } else {
    }
    %c0 = arith.constant 0 : index
    %c0_1 = arith.constant 0 : index
    %3 = vector.load %arg10[%c0, %c0_1] : memref<1x256xf32, #tpu.memory_space<vmem>>, vector<1x256xf32>
    %c0_2 = arith.constant 0 : index
    %c0_3 = arith.constant 0 : index
    %c0_4 = arith.constant 0 : index
    %c0_5 = arith.constant 0 : index
    %4 = vector.load %arg5[%c0_2, %c0_3, %c0_4, %c0_5] : memref<1x1x1x2304xbf16, #tpu.memory_space<vmem>>, vector<1x1x1x2304xbf16>
    %5 = vector.shape_cast %4 : vector<1x1x1x2304xbf16> to vector<1x2304xbf16>
    %c0_6 = arith.constant 0 : index
    %c0_7 = arith.constant 0 : index
    %c0_8 = arith.constant 0 : index
    %6 = vector.load %arg6[%c0_6, %c0_7, %c0_8] : memref<1x2304x256xbf16, #tpu.memory_space<vmem>>, vector<1x2304x256xbf16>
    %7 = vector.shape_cast %6 : vector<1x2304x256xbf16> to vector<2304x256xbf16>
    %cst = arith.constant dense<0.000000e+00> : vector<1x256xf32>
    %8 = tpu.matmul %5, %7, %cst {dimension_numbers = #tpu.dot_dimension_numbers<[1], [0], [0], [1], [0, 0, 1, 1], [], []>} : vector<1x2304xbf16>, vector<2304x256xbf16>, vector<1x256xf32> -> vector<1x256xf32>
    %9 = arith.addf %3, %8 : vector<1x256xf32>
    %c0_9 = arith.constant 0 : index
    %c0_10 = arith.constant 0 : index
    %10 = vector.load %arg10[%c0_9, %c0_10] : memref<1x256xf32, #tpu.memory_space<vmem>>, vector<1x256xf32>
    tpu.vector_store %arg10[%c0_9, %c0_10], %9 {strides = array<i32>} : memref<1x256xf32, #tpu.memory_space<vmem>>, vector<1x256xf32>,
    %c2_i32 = arith.constant 2 : i32
    %11 = arith.cmpi eq, %arg4, %c2_i32 : i32
    %12 = arith.extui %11 : i1 to i32
    %c0_i32_11 = arith.constant 0 : i32
    %13 = arith.cmpi ne, %12, %c0_i32_11 : i32
    scf.if %13 {
      %c0_12 = arith.constant 0 : index
      %c0_13 = arith.constant 0 : index
      %14 = vector.load %arg10[%c0_12, %c0_13] : memref<1x256xf32, #tpu.memory_space<vmem>>, vector<1x256xf32>
      %c0_14 = arith.constant 0 : index
      %c0_15 = arith.constant 0 : index
      %15 = vector.load %arg7[%c0_14, %c0_15] : memref<1x256xf32, #tpu.memory_space<vmem>>, vector<1x256xf32>
      %16 = arith.addf %14, %15 : vector<1x256xf32>
      %c0_16 = arith.constant 0 : index
      %c0_17 = arith.constant 0 : index
      %c0_18 = arith.constant 0 : index
      %c0_19 = arith.constant 0 : index
      %17 = vector.load %arg8[%c0_16, %c0_17, %c0_18, %c0_19] : memref<1x1x1x256xbf16, #tpu.memory_space<vmem>>, vector<1x1x1x256xbf16>
      %18 = vector.shape_cast %17 : vector<1x1x1x256xbf16> to vector<1x256xbf16>
      %19 = arith.extf %18 : vector<1x256xbf16> to vector<1x256xf32>
      %20 = arith.addf %16, %19 : vector<1x256xf32>
      %cst_20 = arith.constant 0.000000e+00 : f32
      %21 = vector.broadcast %cst_20 : f32 to vector<1x256xf32>
      %22 = arith.maximumf %20, %21 : vector<1x256xf32>
      %23 = arith.truncf %22 : vector<1x256xf32> to vector<1x256xbf16>
      %c0_21 = arith.constant 0 : index
      %c0_22 = arith.constant 0 : index
      %c0_23 = arith.constant 0 : index
      %c0_24 = arith.constant 0 : index
      %24 = vector.load %arg9[%c0_21, %c0_22, %c0_23, %c0_24] : memref<1x1x1x256xbf16, #tpu.memory_space<vmem>>, vector<1x1x1x256xbf16>
      %25 = vector.shape_cast %24 : vector<1x1x1x256xbf16> to vector<1x256xbf16>
      %26 = vector.shape_cast %23 : vector<1x256xbf16> to vector<1x1x1x256xbf16>
      tpu.vector_store %arg9[%c0_21, %c0_22, %c0_23, %c0_24], %26 {strides = array<i32>} : memref<1x1x1x256xbf16, #tpu.memory_space<vmem>>, vector<1x1x1x256xbf16>,
    } else {
    }
    return
  }
  func.func @transform_0(%arg0: i32, %arg1: i32, %arg2: i32, %arg3: i32, %arg4: i32) -> (i32, i32, i32, i32) {
    %c1_i32 = arith.constant 1 : i32
    %0 = arith.muli %arg1, %c1_i32 : i32
    %1 = arith.addi %0, %arg4 : i32
    %c0_i32 = arith.constant 0 : i32
    %c0_i32_0 = arith.constant 0 : i32
    return %arg0, %1, %arg2, %c0_i32 : i32, i32, i32, i32
  }
  func.func @transform_1(%arg0: i32, %arg1: i32, %arg2: i32, %arg3: i32, %arg4: i32) -> (i32, i32, i32) {
    %c0_i32 = arith.constant 0 : i32
    %c0_i32_0 = arith.constant 0 : i32
    return %arg4, %c0_i32, %arg3 : i32, i32, i32
  }
  func.func @transform_2(%arg0: i32, %arg1: i32, %arg2: i32, %arg3: i32, %arg4: i32) -> (i32, i32) {
    %c0_i32 = arith.constant 0 : i32
    %c0_i32_0 = arith.constant 0 : i32
    return %c0_i32, %arg3 : i32, i32
  }
  func.func @transform_3(%arg0: i32, %arg1: i32, %arg2: i32, %arg3: i32, %arg4: i32) -> (i32, i32, i32, i32) {
    %c0_i32 = arith.constant 0 : i32
    return %arg0, %arg1, %arg2, %arg3 : i32, i32, i32, i32
  }
  func.func @transform_4(%arg0: i32, %arg1: i32, %arg2: i32, %arg3: i32, %arg4: i32) -> (i32, i32, i32, i32) {
    %c0_i32 = arith.constant 0 : i32
    return %arg0, %arg1, %arg2, %arg3 : i32, i32, i32, i32
  }
}

module attributes {stable_mosaic.version = 11 : i64} {
  func.func @kernel(%arg0: i32, %arg1: i32, %arg2: i32, %arg3: i32, %arg4: i32, %arg5: memref<1x1x1x2304xbf16, #tpu.memory_space<vmem>>, %arg6: memref<1x2304x256xbf16, #tpu.memory_space<vmem>>, %arg7: memref<1x256xf32, #tpu.memory_space<vmem>>, %arg8: memref<1x1x1x256xbf16, #tpu.memory_space<vmem>>, %arg9: memref<1x256xf32, #tpu.memory_space<vmem>>) attributes {dimension_semantics = [#tpu.dimension_semantics<parallel>, #tpu.dimension_semantics<parallel>, #tpu.dimension_semantics<parallel>, #tpu.dimension_semantics<parallel>, #tpu.dimension_semantics<arbitrary>], iteration_bounds = array<i64: 2, 1, 1, 2, 3>, scalar_prefetch = 0 : i64, scratch_operands = 1 : i64, tpu.core_type = #tpu.core_type<tc>, window_params = [{transform_indices = @transform_0, window_bounds = array<i64: 1, 1, 1, 2304>}, {transform_indices = @transform_1, window_bounds = array<i64: 1, 2304, 256>}, {transform_indices = @transform_2, window_bounds = array<i64: 1, 256>}, {transform_indices = @transform_3, window_bounds = array<i64: 1, 1, 1, 256>}]} {
    %c0_i32 = arith.constant 0 : i32
    %0 = arith.cmpi eq, %arg4, %c0_i32 : i32
    %1 = arith.extui %0 : i1 to i32
    %c0_i32_0 = arith.constant 0 : i32
    %2 = arith.cmpi ne, %1, %c0_i32_0 : i32
    scf.if %2 {
      %cst_12 = arith.constant 0.000000e+00 : f32
      %14 = vector.broadcast %cst_12 : f32 to vector<1x256xf32>
      %c0_13 = arith.constant 0 : index
      %c0_14 = arith.constant 0 : index
      %15 = vector.load %arg9[%c0_13, %c0_14] : memref<1x256xf32, #tpu.memory_space<vmem>>, vector<1x256xf32>
      tpu.vector_store %arg9[%c0_13, %c0_14], %14 {strides = array<i32>} : memref<1x256xf32, #tpu.memory_space<vmem>>, vector<1x256xf32>,
    } else {
    }
    %c0 = arith.constant 0 : index
    %c0_1 = arith.constant 0 : index
    %3 = vector.load %arg9[%c0, %c0_1] : memref<1x256xf32, #tpu.memory_space<vmem>>, vector<1x256xf32>
    %c0_2 = arith.constant 0 : index
    %c0_3 = arith.constant 0 : index
    %c0_4 = arith.constant 0 : index
    %c0_5 = arith.constant 0 : index
    %4 = vector.load %arg5[%c0_2, %c0_3, %c0_4, %c0_5] : memref<1x1x1x2304xbf16, #tpu.memory_space<vmem>>, vector<1x1x1x2304xbf16>
    %5 = vector.shape_cast %4 : vector<1x1x1x2304xbf16> to vector<1x2304xbf16>
    %c0_6 = arith.constant 0 : index
    %c0_7 = arith.constant 0 : index
    %c0_8 = arith.constant 0 : index
    %6 = vector.load %arg6[%c0_6, %c0_7, %c0_8] : memref<1x2304x256xbf16, #tpu.memory_space<vmem>>, vector<1x2304x256xbf16>
    %7 = vector.shape_cast %6 : vector<1x2304x256xbf16> to vector<2304x256xbf16>
    %cst = arith.constant dense<0.000000e+00> : vector<1x256xf32>
    %8 = tpu.matmul %5, %7, %cst {dimension_numbers = #tpu.dot_dimension_numbers<[1], [0], [0], [1], [0, 0, 1, 1], [], []>} : vector<1x2304xbf16>, vector<2304x256xbf16>, vector<1x256xf32> -> vector<1x256xf32>
    %9 = arith.addf %3, %8 : vector<1x256xf32>
    %c0_9 = arith.constant 0 : index
    %c0_10 = arith.constant 0 : index
    %10 = vector.load %arg9[%c0_9, %c0_10] : memref<1x256xf32, #tpu.memory_space<vmem>>, vector<1x256xf32>
    tpu.vector_store %arg9[%c0_9, %c0_10], %9 {strides = array<i32>} : memref<1x256xf32, #tpu.memory_space<vmem>>, vector<1x256xf32>,
    %c2_i32 = arith.constant 2 : i32
    %11 = arith.cmpi eq, %arg4, %c2_i32 : i32
    %12 = arith.extui %11 : i1 to i32
    %c0_i32_11 = arith.constant 0 : i32
    %13 = arith.cmpi ne, %12, %c0_i32_11 : i32
    scf.if %13 {
      %c0_12 = arith.constant 0 : index
      %c0_13 = arith.constant 0 : index
      %14 = vector.load %arg9[%c0_12, %c0_13] : memref<1x256xf32, #tpu.memory_space<vmem>>, vector<1x256xf32>
      %c0_14 = arith.constant 0 : index
      %c0_15 = arith.constant 0 : index
      %15 = vector.load %arg7[%c0_14, %c0_15] : memref<1x256xf32, #tpu.memory_space<vmem>>, vector<1x256xf32>
      %16 = arith.addf %14, %15 : vector<1x256xf32>
      %cst_16 = arith.constant 0.000000e+00 : f32
      %17 = vector.broadcast %cst_16 : f32 to vector<1x256xf32>
      %18 = arith.maximumf %16, %17 : vector<1x256xf32>
      %19 = arith.truncf %18 : vector<1x256xf32> to vector<1x256xbf16>
      %c0_17 = arith.constant 0 : index
      %c0_18 = arith.constant 0 : index
      %c0_19 = arith.constant 0 : index
      %c0_20 = arith.constant 0 : index
      %20 = vector.load %arg8[%c0_17, %c0_18, %c0_19, %c0_20] : memref<1x1x1x256xbf16, #tpu.memory_space<vmem>>, vector<1x1x1x256xbf16>
      %21 = vector.shape_cast %20 : vector<1x1x1x256xbf16> to vector<1x256xbf16>
      %22 = vector.shape_cast %19 : vector<1x256xbf16> to vector<1x1x1x256xbf16>
      tpu.vector_store %arg8[%c0_17, %c0_18, %c0_19, %c0_20], %22 {strides = array<i32>} : memref<1x1x1x256xbf16, #tpu.memory_space<vmem>>, vector<1x1x1x256xbf16>,
    } else {
    }
    return
  }
  func.func @transform_0(%arg0: i32, %arg1: i32, %arg2: i32, %arg3: i32, %arg4: i32) -> (i32, i32, i32, i32) {
    %c2_i32 = arith.constant 2 : i32
    %0 = arith.muli %arg1, %c2_i32 : i32
    %1 = arith.addi %0, %arg4 : i32
    %c0_i32 = arith.constant 0 : i32
    %c0_i32_0 = arith.constant 0 : i32
    return %arg0, %1, %arg2, %c0_i32 : i32, i32, i32, i32
  }
  func.func @transform_1(%arg0: i32, %arg1: i32, %arg2: i32, %arg3: i32, %arg4: i32) -> (i32, i32, i32) {
    %c0_i32 = arith.constant 0 : i32
    %c0_i32_0 = arith.constant 0 : i32
    return %arg4, %c0_i32, %arg3 : i32, i32, i32
  }
  func.func @transform_2(%arg0: i32, %arg1: i32, %arg2: i32, %arg3: i32, %arg4: i32) -> (i32, i32) {
    %c0_i32 = arith.constant 0 : i32
    %c0_i32_0 = arith.constant 0 : i32
    return %c0_i32, %arg3 : i32, i32
  }
  func.func @transform_3(%arg0: i32, %arg1: i32, %arg2: i32, %arg3: i32, %arg4: i32) -> (i32, i32, i32, i32) {
    %c0_i32 = arith.constant 0 : i32
    return %arg0, %arg1, %arg2, %arg3 : i32, i32, i32, i32
  }
}

module attributes {stable_mosaic.version = 11 : i64} {
  func.func @kernel(%arg0: i32, %arg1: i32, %arg2: memref<2x256xbf16, #tpu.memory_space<vmem>>, %arg3: memref<256x256xbf16, #tpu.memory_space<vmem>>, %arg4: memref<1x256xf32, #tpu.memory_space<vmem>>, %arg5: memref<2x256xbf16, #tpu.memory_space<vmem>>) attributes {dimension_semantics = [#tpu.dimension_semantics<parallel>, #tpu.dimension_semantics<parallel>], iteration_bounds = array<i64: 1, 2>, scalar_prefetch = 0 : i64, scratch_operands = 0 : i64, tpu.core_type = #tpu.core_type<tc>, window_params = [{transform_indices = @transform_0, window_bounds = array<i64: 2, 256>}, {transform_indices = @transform_1, window_bounds = array<i64: 256, 256>}, {transform_indices = @transform_2, window_bounds = array<i64: 1, 256>}, {transform_indices = @transform_3, window_bounds = array<i64: 2, 256>}]} {
    %c0 = arith.constant 0 : index
    %c0_0 = arith.constant 0 : index
    %0 = vector.load %arg2[%c0, %c0_0] : memref<2x256xbf16, #tpu.memory_space<vmem>>, vector<2x256xbf16>
    %c0_1 = arith.constant 0 : index
    %c0_2 = arith.constant 0 : index
    %1 = vector.load %arg3[%c0_1, %c0_2] : memref<256x256xbf16, #tpu.memory_space<vmem>>, vector<256x256xbf16>
    %cst = arith.constant dense<0.000000e+00> : vector<2x256xf32>
    %2 = tpu.matmul %0, %1, %cst {dimension_numbers = #tpu.dot_dimension_numbers<[1], [0], [0], [1], [0, 0, 1, 1], [], []>} : vector<2x256xbf16>, vector<256x256xbf16>, vector<2x256xf32> -> vector<2x256xf32>
    %c0_3 = arith.constant 0 : index
    %c0_4 = arith.constant 0 : index
    %3 = vector.load %arg4[%c0_3, %c0_4] : memref<1x256xf32, #tpu.memory_space<vmem>>, vector<1x256xf32>
    %4 = vector.broadcast %3 : vector<1x256xf32> to vector<2x256xf32>
    %5 = arith.addf %2, %4 : vector<2x256xf32>
    %6 = arith.truncf %5 : vector<2x256xf32> to vector<2x256xbf16>
    %c0_5 = arith.constant 0 : index
    %c0_6 = arith.constant 0 : index
    %7 = vector.load %arg5[%c0_5, %c0_6] : memref<2x256xbf16, #tpu.memory_space<vmem>>, vector<2x256xbf16>
    tpu.vector_store %arg5[%c0_5, %c0_6], %6 {strides = array<i32>} : memref<2x256xbf16, #tpu.memory_space<vmem>>, vector<2x256xbf16>,
    return
  }
  func.func @transform_0(%arg0: i32, %arg1: i32) -> (i32, i32) {
    %c0_i32 = arith.constant 0 : i32
    %c0_i32_0 = arith.constant 0 : i32
    return %arg0, %c0_i32 : i32, i32
  }
  func.func @transform_1(%arg0: i32, %arg1: i32) -> (i32, i32) {
    %c0_i32 = arith.constant 0 : i32
    %c0_i32_0 = arith.constant 0 : i32
    return %c0_i32, %arg1 : i32, i32
  }
  func.func @transform_2(%arg0: i32, %arg1: i32) -> (i32, i32) {
    %c0_i32 = arith.constant 0 : i32
    %c0_i32_0 = arith.constant 0 : i32
    return %c0_i32, %arg1 : i32, i32
  }
  func.func @transform_3(%arg0: i32, %arg1: i32) -> (i32, i32) {
    %c0_i32 = arith.constant 0 : i32
    return %arg0, %arg1 : i32, i32
  }
}

module attributes {stable_mosaic.version = 11 : i64} {
  func.func @kernel(%arg0: i32, %arg1: i32, %arg2: i32, %arg3: i32, %arg4: i32, %arg5: memref<1x1x1x4608xbf16, #tpu.memory_space<vmem>>, %arg6: memref<1x4608x256xbf16, #tpu.memory_space<vmem>>, %arg7: memref<1x256xf32, #tpu.memory_space<vmem>>, %arg8: memref<1x1x1x256xbf16, #tpu.memory_space<vmem>>, %arg9: memref<1x1x1x256xbf16, #tpu.memory_space<vmem>>, %arg10: memref<1x256xf32, #tpu.memory_space<vmem>>) attributes {dimension_semantics = [#tpu.dimension_semantics<parallel>, #tpu.dimension_semantics<parallel>, #tpu.dimension_semantics<parallel>, #tpu.dimension_semantics<parallel>, #tpu.dimension_semantics<arbitrary>], iteration_bounds = array<i64: 2, 1, 1, 2, 3>, scalar_prefetch = 0 : i64, scratch_operands = 1 : i64, tpu.core_type = #tpu.core_type<tc>, window_params = [{transform_indices = @transform_0, window_bounds = array<i64: 1, 1, 1, 4608>}, {transform_indices = @transform_1, window_bounds = array<i64: 1, 4608, 256>}, {transform_indices = @transform_2, window_bounds = array<i64: 1, 256>}, {transform_indices = @transform_3, window_bounds = array<i64: 1, 1, 1, 256>}, {transform_indices = @transform_4, window_bounds = array<i64: 1, 1, 1, 256>}]} {
    %c0_i32 = arith.constant 0 : i32
    %0 = arith.cmpi eq, %arg4, %c0_i32 : i32
    %1 = arith.extui %0 : i1 to i32
    %c0_i32_0 = arith.constant 0 : i32
    %2 = arith.cmpi ne, %1, %c0_i32_0 : i32
    scf.if %2 {
      %cst_12 = arith.constant 0.000000e+00 : f32
      %14 = vector.broadcast %cst_12 : f32 to vector<1x256xf32>
      %c0_13 = arith.constant 0 : index
      %c0_14 = arith.constant 0 : index
      %15 = vector.load %arg10[%c0_13, %c0_14] : memref<1x256xf32, #tpu.memory_space<vmem>>, vector<1x256xf32>
      tpu.vector_store %arg10[%c0_13, %c0_14], %14 {strides = array<i32>} : memref<1x256xf32, #tpu.memory_space<vmem>>, vector<1x256xf32>,
    } else {
    }
    %c0 = arith.constant 0 : index
    %c0_1 = arith.constant 0 : index
    %3 = vector.load %arg10[%c0, %c0_1] : memref<1x256xf32, #tpu.memory_space<vmem>>, vector<1x256xf32>
    %c0_2 = arith.constant 0 : index
    %c0_3 = arith.constant 0 : index
    %c0_4 = arith.constant 0 : index
    %c0_5 = arith.constant 0 : index
    %4 = vector.load %arg5[%c0_2, %c0_3, %c0_4, %c0_5] : memref<1x1x1x4608xbf16, #tpu.memory_space<vmem>>, vector<1x1x1x4608xbf16>
    %5 = vector.shape_cast %4 : vector<1x1x1x4608xbf16> to vector<1x4608xbf16>
    %c0_6 = arith.constant 0 : index
    %c0_7 = arith.constant 0 : index
    %c0_8 = arith.constant 0 : index
    %6 = vector.load %arg6[%c0_6, %c0_7, %c0_8] : memref<1x4608x256xbf16, #tpu.memory_space<vmem>>, vector<1x4608x256xbf16>
    %7 = vector.shape_cast %6 : vector<1x4608x256xbf16> to vector<4608x256xbf16>
    %cst = arith.constant dense<0.000000e+00> : vector<1x256xf32>
    %8 = tpu.matmul %5, %7, %cst {dimension_numbers = #tpu.dot_dimension_numbers<[1], [0], [0], [1], [0, 0, 1, 1], [], []>} : vector<1x4608xbf16>, vector<4608x256xbf16>, vector<1x256xf32> -> vector<1x256xf32>
    %9 = arith.addf %3, %8 : vector<1x256xf32>
    %c0_9 = arith.constant 0 : index
    %c0_10 = arith.constant 0 : index
    %10 = vector.load %arg10[%c0_9, %c0_10] : memref<1x256xf32, #tpu.memory_space<vmem>>, vector<1x256xf32>
    tpu.vector_store %arg10[%c0_9, %c0_10], %9 {strides = array<i32>} : memref<1x256xf32, #tpu.memory_space<vmem>>, vector<1x256xf32>,
    %c2_i32 = arith.constant 2 : i32
    %11 = arith.cmpi eq, %arg4, %c2_i32 : i32
    %12 = arith.extui %11 : i1 to i32
    %c0_i32_11 = arith.constant 0 : i32
    %13 = arith.cmpi ne, %12, %c0_i32_11 : i32
    scf.if %13 {
      %c0_12 = arith.constant 0 : index
      %c0_13 = arith.constant 0 : index
      %14 = vector.load %arg10[%c0_12, %c0_13] : memref<1x256xf32, #tpu.memory_space<vmem>>, vector<1x256xf32>
      %c0_14 = arith.constant 0 : index
      %c0_15 = arith.constant 0 : index
      %15 = vector.load %arg7[%c0_14, %c0_15] : memref<1x256xf32, #tpu.memory_space<vmem>>, vector<1x256xf32>
      %16 = arith.addf %14, %15 : vector<1x256xf32>
      %c0_16 = arith.constant 0 : index
      %c0_17 = arith.constant 0 : index
      %c0_18 = arith.constant 0 : index
      %c0_19 = arith.constant 0 : index
      %17 = vector.load %arg8[%c0_16, %c0_17, %c0_18, %c0_19] : memref<1x1x1x256xbf16, #tpu.memory_space<vmem>>, vector<1x1x1x256xbf16>
      %18 = vector.shape_cast %17 : vector<1x1x1x256xbf16> to vector<1x256xbf16>
      %19 = arith.extf %18 : vector<1x256xbf16> to vector<1x256xf32>
      %20 = arith.addf %16, %19 : vector<1x256xf32>
      %cst_20 = arith.constant 0.000000e+00 : f32
      %21 = vector.broadcast %cst_20 : f32 to vector<1x256xf32>
      %22 = arith.maximumf %20, %21 : vector<1x256xf32>
      %23 = arith.truncf %22 : vector<1x256xf32> to vector<1x256xbf16>
      %c0_21 = arith.constant 0 : index
      %c0_22 = arith.constant 0 : index
      %c0_23 = arith.constant 0 : index
      %c0_24 = arith.constant 0 : index
      %24 = vector.load %arg9[%c0_21, %c0_22, %c0_23, %c0_24] : memref<1x1x1x256xbf16, #tpu.memory_space<vmem>>, vector<1x1x1x256xbf16>
      %25 = vector.shape_cast %24 : vector<1x1x1x256xbf16> to vector<1x256xbf16>
      %26 = vector.shape_cast %23 : vector<1x256xbf16> to vector<1x1x1x256xbf16>
      tpu.vector_store %arg9[%c0_21, %c0_22, %c0_23, %c0_24], %26 {strides = array<i32>} : memref<1x1x1x256xbf16, #tpu.memory_space<vmem>>, vector<1x1x1x256xbf16>,
    } else {
    }
    return
  }
  func.func @transform_0(%arg0: i32, %arg1: i32, %arg2: i32, %arg3: i32, %arg4: i32) -> (i32, i32, i32, i32) {
    %c1_i32 = arith.constant 1 : i32
    %0 = arith.muli %arg1, %c1_i32 : i32
    %1 = arith.addi %0, %arg4 : i32
    %c0_i32 = arith.constant 0 : i32
    %c0_i32_0 = arith.constant 0 : i32
    return %arg0, %1, %arg2, %c0_i32 : i32, i32, i32, i32
  }
  func.func @transform_1(%arg0: i32, %arg1: i32, %arg2: i32, %arg3: i32, %arg4: i32) -> (i32, i32, i32) {
    %c0_i32 = arith.constant 0 : i32
    %c0_i32_0 = arith.constant 0 : i32
    return %arg4, %c0_i32, %arg3 : i32, i32, i32
  }
  func.func @transform_2(%arg0: i32, %arg1: i32, %arg2: i32, %arg3: i32, %arg4: i32) -> (i32, i32) {
    %c0_i32 = arith.constant 0 : i32
    %c0_i32_0 = arith.constant 0 : i32
    return %c0_i32, %arg3 : i32, i32
  }
  func.func @transform_3(%arg0: i32, %arg1: i32, %arg2: i32, %arg3: i32, %arg4: i32) -> (i32, i32, i32, i32) {
    %c0_i32 = arith.constant 0 : i32
    return %arg0, %arg1, %arg2, %arg3 : i32, i32, i32, i32
  }
  func.func @transform_4(%arg0: i32, %arg1: i32, %arg2: i32, %arg3: i32, %arg4: i32) -> (i32, i32, i32, i32) {
    %c0_i32 = arith.constant 0 : i32
    return %arg0, %arg1, %arg2, %arg3 : i32, i32, i32, i32
  }
}

module attributes {stable_mosaic.version = 11 : i64} {
  func.func @kernel(%arg0: i32, %arg1: i32, %arg2: memref<8x8x512xbf16, #tpu.memory_space<vmem>>, %arg3: memref<8x512xf32, #tpu.memory_space<vmem>>, %arg4: memref<8x512xf32, #tpu.memory_space<vmem>>) attributes {dimension_semantics = [#tpu.dimension_semantics<parallel>, #tpu.dimension_semantics<arbitrary>], iteration_bounds = array<i64: 1, 1>, scalar_prefetch = 0 : i64, scratch_operands = 1 : i64, tpu.core_type = #tpu.core_type<tc>, window_params = [{transform_indices = @transform_0, window_bounds = array<i64: 8, 8, 512>}, {transform_indices = @transform_1, window_bounds = array<i64: 8, 512>}]} {
    %c0_i32 = arith.constant 0 : i32
    %0 = arith.cmpi eq, %arg1, %c0_i32 : i32
    %1 = arith.extui %0 : i1 to i32
    %c0_i32_0 = arith.constant 0 : i32
    %2 = arith.cmpi ne, %1, %c0_i32_0 : i32
    scf.if %2 {
      %cst_9 = arith.constant 0.000000e+00 : f32
      %12 = vector.broadcast %cst_9 : f32 to vector<8x512xf32>
      %c0_10 = arith.constant 0 : index
      %c0_11 = arith.constant 0 : index
      %13 = vector.load %arg4[%c0_10, %c0_11] : memref<8x512xf32, #tpu.memory_space<vmem>>, vector<8x512xf32>
      tpu.vector_store %arg4[%c0_10, %c0_11], %12 {strides = array<i32>} : memref<8x512xf32, #tpu.memory_space<vmem>>, vector<8x512xf32>,
    } else {
    }
    %c0 = arith.constant 0 : index
    %c0_1 = arith.constant 0 : index
    %3 = vector.load %arg4[%c0, %c0_1] : memref<8x512xf32, #tpu.memory_space<vmem>>, vector<8x512xf32>
    %c0_2 = arith.constant 0 : index
    %c0_3 = arith.constant 0 : index
    %c0_4 = arith.constant 0 : index
    %4 = vector.load %arg2[%c0_2, %c0_3, %c0_4] : memref<8x8x512xbf16, #tpu.memory_space<vmem>>, vector<8x8x512xbf16>
    %5 = arith.extf %4 : vector<8x8x512xbf16> to vector<8x8x512xf32>
    %cst = arith.constant dense<0.000000e+00> : vector<8x512xf32>
    %6 = vector.multi_reduction <add>, %5, %cst [1] : vector<8x8x512xf32> to vector<8x512xf32>
    %7 = arith.addf %3, %6 : vector<8x512xf32>
    %c0_5 = arith.constant 0 : index
    %c0_6 = arith.constant 0 : index
    %8 = vector.load %arg4[%c0_5, %c0_6] : memref<8x512xf32, #tpu.memory_space<vmem>>, vector<8x512xf32>
    tpu.vector_store %arg4[%c0_5, %c0_6], %7 {strides = array<i32>} : memref<8x512xf32, #tpu.memory_space<vmem>>, vector<8x512xf32>,
    %c0_i32_7 = arith.constant 0 : i32
    %9 = arith.cmpi eq, %arg1, %c0_i32_7 : i32
    %10 = arith.extui %9 : i1 to i32
    %c0_i32_8 = arith.constant 0 : i32
    %11 = arith.cmpi ne, %10, %c0_i32_8 : i32
    scf.if %11 {
      %c0_9 = arith.constant 0 : index
      %c0_10 = arith.constant 0 : index
      %12 = vector.load %arg4[%c0_9, %c0_10] : memref<8x512xf32, #tpu.memory_space<vmem>>, vector<8x512xf32>
      %cst_11 = arith.constant 1.000000e+00 : f32
      %13 = vector.broadcast %cst_11 : f32 to vector<8x512xf32>
      %14 = arith.mulf %12, %13 : vector<8x512xf32>
      %c0_12 = arith.constant 0 : index
      %c0_13 = arith.constant 0 : index
      %15 = vector.load %arg3[%c0_12, %c0_13] : memref<8x512xf32, #tpu.memory_space<vmem>>, vector<8x512xf32>
      tpu.vector_store %arg3[%c0_12, %c0_13], %14 {strides = array<i32>} : memref<8x512xf32, #tpu.memory_space<vmem>>, vector<8x512xf32>,
    } else {
    }
    return
  }
  func.func @transform_0(%arg0: i32, %arg1: i32) -> (i32, i32, i32) {
    %c0_i32 = arith.constant 0 : i32
    %c0_i32_0 = arith.constant 0 : i32
    return %arg0, %arg1, %c0_i32 : i32, i32, i32
  }
  func.func @transform_1(%arg0: i32, %arg1: i32) -> (i32, i32) {
    %c0_i32 = arith.constant 0 : i32
    %c0_i32_0 = arith.constant 0 : i32
    return %arg0, %c0_i32 : i32, i32
  }
}

</mosaic_0001>

<bundles_post_ra>
// kernel: medicalnet_encoder_forward.17
= control target key start
LH: loop header
LB: loop body
LE: loop exit
PB: predicated region body
PF: predicated region fallthrough
CT: control target
= control target key end

     0   :  { %s182_s0 = inlined_call_operand.vmem [shape: bf16[64,256], index: 0, kind: input, shape index: {}]   ;;  %s183_s1 = inlined_call_operand.vmem [shape: bf16[64,256], index: 1, kind: input, shape index: {}]   ;;  %s184_s2 = inlined_call_operand.vmem [shape: bf16[64,256], index: 2, kind: input, shape index: {}]   ;;  %s185_s3 = inlined_call_operand.vmem [shape: bf16[64,256], index: 3, kind: output, shape index: {}]  }
   0x1   :  { %v14_v0 = vld [vmem:[%s182_s0] sm:$0xff]  ;;  %v15_v4 = vld [vmem:[%s182_s0 + $0x8] sm:$0xff]  ;;  %v16_v8 = vld [vmem:[%s182_s0 + $0x10] sm:$0xff] }
   0x2   :  { %v22_v1 = vld [vmem:[%s183_s1] sm:$0xff]  ;;  %v23_v5 = vld [vmem:[%s183_s1 + $0x8] sm:$0xff]  ;;  %v24_v9 = vld [vmem:[%s183_s1 + $0x10] sm:$0xff] }
   0x3   :  { %v38_v2 = vld [vmem:[%s184_s2] sm:$0xff]  ;;  %v30_v3 = vmax.bf16 %v22_v1, %v14_v0  ;;  %v39_v6 = vld [vmem:[%s184_s2 + $0x8] sm:$0xff]  ;;  %v31_v7 = vmax.bf16 %v23_v5, %v15_v4  ;;  %v40_v10 = vld [vmem:[%s184_s2 + $0x10] sm:$0xff]  ;;  %v32_v12 = vmax.bf16 %v24_v9, %v16_v8 }
   0x4   :  { %v17_v13 = vld [vmem:[%s182_s0 + $0x18] sm:$0xff]  ;;  %v18_v18 = vld [vmem:[%s182_s0 + $0x20] sm:$0xff]  ;;  %v19_v23 = vld [vmem:[%s182_s0 + $0x28] sm:$0xff] }
   0x5   :  { %v46_v11 = vmax.bf16 %v38_v2, %v30_v3  ;;  %v25_v14 = vld [vmem:[%s183_s1 + $0x18] sm:$0xff]  ;;  %v47_v16 = vmax.bf16 %v39_v6, %v31_v7  ;;  %v26_v19 = vld [vmem:[%s183_s1 + $0x20] sm:$0xff]  ;;  %v48_v21 = vmax.bf16 %v40_v10, %v32_v12  ;;  %v27_v24 = vld [vmem:[%s183_s1 + $0x28] sm:$0xff] }
   0x6   :  { %v41_v15 = vld [vmem:[%s184_s2 + $0x18] sm:$0xff]  ;;  %v33_v17 = vmax.bf16 %v25_v14, %v17_v13  ;;  %v42_v20 = vld [vmem:[%s184_s2 + $0x20] sm:$0xff]  ;;  %v34_v22 = vmax.bf16 %v26_v19, %v18_v18  ;;  %v43_v25 = vld [vmem:[%s184_s2 + $0x28] sm:$0xff]  ;;  %v35_v27 = vmax.bf16 %v27_v24, %v19_v23 }
   0x7   :  { %54 = vst [vmem:[%s185_s3] sm:$0xff] %v46_v11  ;;  %55 = vst [vmem:[%s185_s3 + $0x8] sm:$0xff] %v47_v16  ;;  %v20_v28 = vld [vmem:[%s182_s0 + $0x30] sm:$0xff]  ;;  %v21_v33 = vld [vmem:[%s182_s0 + $0x38] sm:$0xff] }
   0x8   :  { %v49_v26 = vmax.bf16 %v41_v15, %v33_v17  ;;  %v28_v29 = vld [vmem:[%s183_s1 + $0x30] sm:$0xff]  ;;  %56 = vst [vmem:[%s185_s3 + $0x10] sm:$0xff] %v48_v21  ;;  %v50_v31 = vmax.bf16 %v42_v20, %v34_v22  ;;  %v29_v34 = vld [vmem:[%s183_s1 + $0x38] sm:$0xff]  ;;  %v51_v36 = vmax.bf16 %v43_v25, %v35_v27 }
   0x9   :  { %v44_v30 = vld [vmem:[%s184_s2 + $0x30] sm:$0xff]  ;;  %v36_v32 = vmax.bf16 %v28_v29, %v20_v28  ;;  %v45_v35 = vld [vmem:[%s184_s2 + $0x38] sm:$0xff]  ;;  %v37_v37 = vmax.bf16 %v29_v34, %v21_v33 }
   0xa   :  { %57 = vst [vmem:[%s185_s3 + $0x18] sm:$0xff] %v49_v26  ;;  %58 = vst [vmem:[%s185_s3 + $0x20] sm:$0xff] %v50_v31 }
   0xb   :  { %v52_v38 = vmax.bf16 %v44_v30, %v36_v32  ;;  %59 = vst [vmem:[%s185_s3 + $0x28] sm:$0xff] %v51_v36  ;;  %v53_v39 = vmax.bf16 %v45_v35, %v37_v37 }
   0xd   :  { %60 = vst [vmem:[%s185_s3 + $0x30] sm:$0xff] %v52_v38  ;;  %61 = vst [vmem:[%s185_s3 + $0x38] sm:$0xff] %v53_v39 }

// kernel: medicalnet_encoder_forward.16
= control target key start
LH: loop header
LB: loop body
LE: loop exit
PB: predicated region body
PF: predicated region fallthrough
CT: control target
= control target key end

     0   :  { %s967_s12 = smov 0   ;;  %s969_s13 = smov 0   ;;  %s1090_s0 = inlined_call_operand.vmem [shape: bf16[2,14,64,49], index: 0, kind: input, shape index: {}]   ;;  %s1091_s1 = inlined_call_operand.vmem [shape: bf16[7,49,64], index: 1, kind: input, shape index: {}]   ;;  %s1092_s2 = inlined_call_operand.vmem [shape: f32[1,64], index: 2, kind: input, shape index: {}]   ;;  %s1093_s3 = inlined_call_operand.vmem [shape: bf16[2,4,64,64], index: 3, kind: output, shape index: {}]  }
   0x1   :  { %s971_s14 = smov 0   ;;  %s973_s15 = smov 0  }
   0x2   :  { %s975_s16 = smov 0   ;;  %s977_s17 = smov 0  }
   0x3   :  { %s979_s18 = smov 0  }
   0x4 LB: > { %s31_s19 = sadd.s32 1, %s931_s15  ;;  %s42_s20 = sadd.s32 1, %s935_s16  ;;  %s943_s18 = sphi %s979_s18, %s13_s18   ;;  %s939_s17 = sphi %s977_s17, %s1101_s17   ;;  %s935_s16 = sphi %s975_s16, %s1100_s16   ;;  %s931_s15 = sphi %s973_s15, %s1099_s15   ;;  %s927_s14 = sphi %s971_s14, %s1098_s14   ;;  %s923_s13 = sphi %s969_s13, %s1097_s13   ;;  %s919_s12 = sphi %s967_s12, %s1096_s12  }
   0x5   : > { %p32_p0 = scmp.ge.s32.totalorder %s31_s19, 7  ;;  %p748_p1 = scmp.ge.s32.totalorder %s943_s18, 1 }
   0x6   : > { %p220_p2 = scmp.lt.s32.totalorder %s943_s18, 57  ;;  %s46_s21 = sadd.s32 1, %s939_s17 }
   0x7   : > { %s1103_s19 = smov (%p32_p0, %s31_s19), 0  ;;  %s1105_s20 = smov (!%p32_p0, %s42_s20), %s935_s16 }
   0x8   : > { %p221_p3 = pnand %p748_p1, %p220_p2  ;;  %p44_p4 = scmp.ge.s32.totalorder %s1105_s20, 4 }
   0x9   : > { %s749_s22 = sshll.u32 (!%p221_p3), %s923_s13, 1  ;;  %p279_p6 = scmp.lt.s32.totalorder (!%p221_p3), %s927_s14, 1 }
   0xa   : > { %s1107_s20 = smov (%p44_p4, %s1105_s20), 0  ;;  %s1109_s21 = smov (!%p44_p4, %s46_s21), %s939_s17 }
   0xb   : > { %p48_p5 = scmp.ge.s32.totalorder %s1109_s21, 2  ;;  %224 = sbr.rel (%p221_p3) target bundleno = 282 (0x11a), region = 32 }
   0xc   : > { %s277_s23 = sadd.s32 (!%p221_p3), %s919_s12, %s749_s22  ;;  %p294_p7 = scmp.lt.s32.totalorder (!%p221_p3), %s919_s12, 6 }
   0xd   : > { %s1111_s21 = smov (%p48_p5, %s1109_s21), 0  ;;  %p281_p8 = scmp.lt.s32.totalorder (!%p221_p3), %s277_s23, 13 }
   0xe   : > { %1094 = sst [smem:[#allocation3_spill]] %s1111_s21  ;;  %p308_p9 = scmp.lt.s32.totalorder (!%p221_p3), %s923_s13, 3 }
   0xf   : > { %p756_p10 = scmp.ne.s32.totalorder (!%p221_p3), %s919_s12, 0 }
  0x12   : > { %s1113_s14 = smov (!%p279_p6, %s927_s14), 1  ;;  %s1115_s23 = smov (!%p281_p8, %s277_s23), 13 }
  0x13   : > { %s821_s24 = smul.u32 112, %s1113_s14  ;;  %s750_s26 = sshll.u32 %s1115_s23, 3  ;;  %vm327_vm0 = vcmask (!%p756_p10), 523264   ;;  %v945_v0 = vmov (!%p756_p10), 0.0  }
  0x14   : > { %s295_s25 = scalar_select %p294_p7, %s919_s12, 6 }
  0x15   : > { %s288_s27 = sadd.s32 %s821_s24, %s750_s26  ;;  %s754_s30 = sshll.u32 %s1113_s14, 5  ;;  %328 = vst.msk [vmem:[#allocation2] sm:$0xff] (!%p756_p10), %vm327_vm0, %v945_v0  ;;  %329 = vst.msk [vmem:[#allocation2 + $0x8] sm:$0xff] (!%p756_p10), %vm327_vm0, %v945_v0 }
  0x16   : > { %s822_s28 = smul.u32 28, %s295_s25  ;;  %s751_s29 = sshll.u32 %s288_s27, 2  ;;  %330 = vst.msk [vmem:[#allocation2 + $0x10] sm:$0xff] (!%p756_p10), %vm327_vm0, %v945_v0  ;;  %331 = vst.msk [vmem:[#allocation2 + $0x18] sm:$0xff] (!%p756_p10), %vm327_vm0, %v945_v0 }
  0x17   : > { %s1021_s6 = scalar_lea.vmem %s1090_s0, %s751_s29  ;;  %s1117_s13 = smov (!%p308_p9, %s923_s13), 3  ;;  %332 = vst.msk [vmem:[#allocation2 + $0x20] sm:$0xff] (!%p756_p10), %vm327_vm0, %v945_v0  ;;  %333 = vst.msk [vmem:[#allocation2 + $0x28] sm:$0xff] (!%p756_p10), %vm327_vm0, %v945_v0 }
  0x18   : > { %s301_s9 = scalar_lea.vmem %s1091_s1, %s822_s28  ;;  %s753_s10 = sshll.u32 %s1117_s13, 3  ;;  %334 = vst.msk [vmem:[#allocation2 + $0x30] sm:$0xff] (!%p756_p10), %vm327_vm0, %v945_v0  ;;  %335 = vst.msk [vmem:[#allocation2 + $0x38] sm:$0xff] (!%p756_p10), %vm327_vm0, %v945_v0 }
  0x19   : > { %s318_s11 = sadd.s32 %s754_s30, %s753_s10  ;;  %326 = sbr.rel (%p756_p10) target bundleno = 32 (0x20), region = 36 }
  0x1a   : > { %s755_s22 = sshll.u32 %s318_s11, 2 }
  0x1b   : > { %s1030_s24 = scalar_lea.vmem %s1093_s3, %s755_s22 }
  0x20 PF: > { %v881_v1 = vld [vmem:[%s301_s9] sm:$0xff]   ;;  %vm413_vm1 = vcmask 1040384   ;;  %v882_v2 = vld [vmem:[%s301_s9 + $0x8] sm:$0xff]   ;;  %v883_v3 = vld [vmem:[%s301_s9 + $0x10] sm:$0xff]   ;;  %v946_v4 = vmov 0   ;;  %vm400_vm2 = vcmask 400384  }
  0x21   : > { %797 = vmatprep.subr.bf16.mxu0 %v881_v1  ;;  %813 = vmatprep.subr.bf16.mxu1 %v881_v1  ;;  %v415_v5 = vsel %vm413_vm1, 65535, %v946_v4  ;;  %v884_v6 = vld [vmem:[%s301_s9 + $0x18] ss:$0 sps:$4 sm:$0x11]   ;;  %v885_v7 = vld [vmem:[%s1021_s6] sm:$0xff]   ;;  %v886_v8 = vld [vmem:[%s1021_s6 + $0x10] sm:$0xff]  }
  0x22   : > { %798 = vmatpush3.bf16.msra.mxu0 %v881_v1  ;;  %817 = vmatpush3.bf16.msra.mxu1 %v881_v1  ;;  %v417_v9 = vand.u32 %v884_v6, %v415_v5  ;;  %v887_v10 = vld [vmem:[%s1021_s6 + $0x8] sm:$0xff]   ;;  %v888_v11 = vld [vmem:[%s1021_s6 + $0x18] sm:$0xff]   ;;  %vm492_vm3 = vcmask 523264   ;;  %v339_v18 = vld [vmem:[#allocation2 + $0x18] sm:$0xff]  ;;  %p769_p11 = scmp.ne.s32.totalorder %s919_s12, 6 }
  0x23   : > { %799 = vmatprep.subr.bf16.mxu0 %v882_v2  ;;  %814 = vmatprep.subr.bf16.mxu1 %v882_v2  ;;  %v338_v12 = vld [vmem:[#allocation2 + $0x10] sm:$0xff]  ;;  %v336_v14 = vld [vmem:[#allocation2] sm:$0xff]  ;;  %v343_v19 = vld [vmem:[#allocation2 + $0x38] sm:$0xff]  ;;  %vm568_vm4 = vcmask (!%p769_p11), 519168  }
  0x24   : > { %805 = vmatprep.mubr.msk.bf16.mxu0 %vm400_vm2, %v885_v7  ;;  %809 = vmatprep.mubr.msk.bf16.mxu1 %vm400_vm2, %v886_v8  ;;  %v342_v13 = vld [vmem:[#allocation2 + $0x30] sm:$0xff]  ;;  %v340_v15 = vld [vmem:[#allocation2 + $0x20] sm:$0xff]  ;;  %v337_v24 = vld [vmem:[#allocation2 + $0x8] sm:$0xff] }
  0x25   : > { %v341_v25 = vld [vmem:[#allocation2 + $0x28] sm:$0xff] }
  0x26   : > { %800 = vmatpush3.bf16.msra.mxu0 %v882_v2  ;;  %818 = vmatpush3.bf16.msra.mxu1 %v882_v2  ;;  %v770_v37 = vld [vmem:[%s1092_s2] ss:$0 sm:$0xff] (!%p769_p11) }
  0x27   : > { %801 = vmatprep.subr.bf16.mxu0 %v883_v3  ;;  %815 = vmatprep.subr.bf16.mxu1 %v883_v3 }
  0x2a   : > { %802 = vmatpush3.bf16.msra.mxu0 %v883_v3  ;;  %819 = vmatpush3.bf16.msra.mxu1 %v883_v3 }
  0x2b   : > { %803 = vmatprep.subr.bf16.mxu0 %v417_v9  ;;  %816 = vmatprep.subr.bf16.mxu1 %v417_v9 }
  0x2e   : > { %804 = vmatpush3.bf16.msra.mxu0 %v417_v9  ;;  %820 = vmatpush3.bf16.msra.mxu1 %v417_v9 }
  0x31   : > { %806 = vmatmul.mubr.msk.bf16.vlgmr.msra.gmra.mrb[0].mxu0 %vm400_vm2, %v887_v10  ;;  %810 = vmatmul.mubr.msk.bf16.vlgmr.msra.gmra.mrb[0].mxu1 %vm400_vm2, %v888_v11 }
 0x104   : > { %v807_v16 = vpop.f32.mrb[0].mxu0  ;;  %v811_v17 = vpop.f32.mrb[0].mxu1  ;;  %504 = sbr.rel (%p769_p11) target bundleno = 282 (0x11a), region = 40 }
 0x105   : > { %v486_v20 = vadd.f32 %v807_v16, %v338_v12  ;;  %v490_v21 = vadd.f32 %v811_v17, %v342_v13  ;;  %v453_v22 = vpop.f32.mrb[1].mxu0  ;;  %v469_v23 = vpop.f32.mrb[1].mxu1 }
 0x106   : > { %v484_v26 = vadd.f32 %v453_v22, %v336_v14  ;;  %v488_v27 = vadd.f32 %v469_v23, %v340_v15  ;;  %v808_v28 = vpop.f32.mrb[2].mxu0  ;;  %v812_v29 = vpop.f32.mrb[2].mxu1 }
 0x107   : > { %495 = vst.msk [vmem:[#allocation2 + $0x10] sm:$0xff] %vm492_vm3, %v486_v20  ;;  %499 = vst.msk [vmem:[#allocation2 + $0x30] sm:$0xff] %vm492_vm3, %v490_v21  ;;  %v487_v30 = vadd.f32 %v808_v28, %v339_v18  ;;  %v491_v31 = vadd.f32 %v812_v29, %v343_v19  ;;  %v456_v32 = vpop.f32.mrb[3].mxu0  ;;  %v472_v33 = vpop.f32.mrb[3].mxu1 }
 0x108   : > { %493 = vst.msk [vmem:[#allocation2] sm:$0xff] %vm492_vm3, %v484_v26  ;;  %497 = vst.msk [vmem:[#allocation2 + $0x20] sm:$0xff] %vm492_vm3, %v488_v27  ;;  %v485_v34 = vadd.f32 %v456_v32, %v337_v24  ;;  %v489_v35 = vadd.f32 %v472_v33, %v341_v25 }
 0x109   : > { %496 = vst.msk [vmem:[#allocation2 + $0x18] sm:$0xff] %vm492_vm3, %v487_v30  ;;  %500 = vst.msk [vmem:[#allocation2 + $0x38] sm:$0xff] %vm492_vm3, %v491_v31 }
 0x10a   : > { %494 = vst.msk [vmem:[#allocation2 + $0x8] sm:$0xff] %vm492_vm3, %v485_v34  ;;  %498 = vst.msk [vmem:[#allocation2 + $0x28] sm:$0xff] %vm492_vm3, %v489_v35 }
 0x10e   : > { %v507_v41 = vld [vmem:[#allocation2 + $0x10] sm:$0xff] }
 0x10f   : > { %v505_v36 = vld [vmem:[#allocation2] sm:$0xff]  ;;  %v522_v44 = vadd.f32 %v770_v37, %v507_v41  ;;  %v511_v48 = vld [vmem:[#allocation2 + $0x30] sm:$0xff] }
 0x110   : > { %v520_v39 = vadd.f32 %v770_v37, %v505_v36  ;;  %v508_v42 = vld [vmem:[#allocation2 + $0x18] sm:$0xff]  ;;  %v509_v43 = vld [vmem:[#allocation2 + $0x20] sm:$0xff]  ;;  %v526_v53 = vadd.f32 %v770_v37, %v511_v48 }
 0x111   : > { %v506_v38 = vld [vmem:[#allocation2 + $0x8] sm:$0xff]  ;;  %v523_v45 = vadd.f32 %v770_v37, %v508_v42  ;;  %v524_v46 = vadd.f32 %v770_v37, %v509_v43  ;;  %v512_v49 = vld [vmem:[#allocation2 + $0x38] sm:$0xff]  ;;  %v530_v54 = vmax.f32 %v522_v44, 0.0 }
 0x112   : > { %v521_v40 = vadd.f32 %v770_v37, %v506_v38  ;;  %v510_v47 = vld [vmem:[#allocation2 + $0x28] sm:$0xff]  ;;  %v528_v50 = vmax.f32 %v520_v39, 0.0  ;;  %v527_v57 = vadd.f32 %v770_v37, %v512_v49  ;;  %v534_v61 = vmax.f32 %v526_v53, 0.0 }
 0x113   : > { %v525_v52 = vadd.f32 %v770_v37, %v510_v47  ;;  %v531_v55 = vmax.f32 %v523_v45, 0.0  ;;  %v532_v56 = vmax.f32 %v524_v46, 0.0  ;;  %v783_v62 = vpack.c.bf16 %v530_v54, %v530_v54 }
 0x114   : > { %v529_v51 = vmax.f32 %v521_v40, 0.0  ;;  %v781_v58 = vpack.c.bf16 %v528_v50, %v528_v50  ;;  %v535_v1 = vmax.f32 %v527_v57, 0.0  ;;  %v787_v3 = vpack.c.bf16 %v534_v61, %v534_v61 }
 0x115   : > { %v533_v60 = vmax.f32 %v525_v52, 0.0  ;;  %v784_v63 = vpack.c.bf16 %v531_v55, %v531_v55  ;;  %v785_v0 = vpack.c.bf16 %v532_v56, %v532_v56  ;;  %571 = vst.msk [vmem:[%s1030_s24 + $0x8] sm:$0xf] %vm568_vm4, %v783_v62 }
 0x116   : > { %v782_v59 = vpack.c.bf16 %v529_v51, %v529_v51  ;;  %569 = vst.msk [vmem:[%s1030_s24] sm:$0xf] %vm568_vm4, %v781_v58  ;;  %v788_v4 = vpack.c.bf16 %v535_v1, %v535_v1  ;;  %575 = vst.msk [vmem:[%s1030_s24 + $0x18] sm:$0xf] %vm568_vm4, %v787_v3 }
 0x117   : > { %v786_v2 = vpack.c.bf16 %v533_v60, %v533_v60  ;;  %572 = vst.msk [vmem:[%s1030_s24 + $0xc] sm:$0xf] %vm568_vm4, %v784_v63  ;;  %573 = vst.msk [vmem:[%s1030_s24 + $0x10] sm:$0xf] %vm568_vm4, %v785_v0 }
 0x118   : > { %570 = vst.msk [vmem:[%s1030_s24 + $0x4] sm:$0xf] %vm568_vm4, %v782_v59  ;;  %576 = vst.msk [vmem:[%s1030_s24 + $0x1c] sm:$0xf] %vm568_vm4, %v788_v4 }
 0x119   : > { %574 = vst.msk [vmem:[%s1030_s24 + $0x14] sm:$0xf] %vm568_vm4, %v786_v2 }
 0x11a PF: > { %s13_s18 = sadd.s32 1, %s943_s18   ;;  %s1095_s21 = sld [smem:[#allocation3_spill]] }
 0x11b   : > { %p10_p12 = scmp.ge.s32.totalorder %s13_s18, 58   ;;  %s1096_s12 = smov %s931_s15 }
 0x11c   : > { %s1097_s13 = smov %s935_s16  ;;  %s1098_s14 = smov %s939_s17 }
 0x11d   : > { %s1099_s15 = smov %s1103_s19  ;;  %s1100_s16 = smov %s1107_s20 }
 0x11e   :  { %12 = sbr.rel (!%p10_p12) target bundleno = 4 (0x4), region = 76 }
 0x120   : > { %s1101_s17 = smov %s1095_s21 }

// kernel: medicalnet_encoder_forward.18
= control target key start
LH: loop header
LB: loop body
LE: loop exit
PB: predicated region body
PF: predicated region fallthrough
CT: control target
= control target key end

     0   :  { %s110_s0 = inlined_call_operand.vmem [shape: bf16[32,256], index: 0, kind: input, shape index: {}]   ;;  %s111_s1 = inlined_call_operand.vmem [shape: bf16[32,256], index: 1, kind: input, shape index: {}]   ;;  %s112_s2 = inlined_call_operand.vmem [shape: bf16[32,256], index: 2, kind: input, shape index: {}]   ;;  %s113_s3 = inlined_call_operand.vmem [shape: bf16[32,256], index: 3, kind: output, shape index: {}]  }
   0x1   :  { %v14_v0 = vld [vmem:[%s110_s0] sm:$0xff]  ;;  %v15_v4 = vld [vmem:[%s110_s0 + $0x8] sm:$0xff]  ;;  %v16_v8 = vld [vmem:[%s110_s0 + $0x10] sm:$0xff] }
   0x2   :  { %v18_v1 = vld [vmem:[%s111_s1] sm:$0xff]  ;;  %v19_v5 = vld [vmem:[%s111_s1 + $0x8] sm:$0xff]  ;;  %v20_v9 = vld [vmem:[%s111_s1 + $0x10] sm:$0xff] }
   0x3   :  { %v26_v2 = vld [vmem:[%s112_s2] sm:$0xff]  ;;  %v22_v3 = vmax.bf16 %v18_v1, %v14_v0  ;;  %v27_v6 = vld [vmem:[%s112_s2 + $0x8] sm:$0xff]  ;;  %v23_v7 = vmax.bf16 %v19_v5, %v15_v4  ;;  %v28_v10 = vld [vmem:[%s112_s2 + $0x10] sm:$0xff]  ;;  %v24_v12 = vmax.bf16 %v20_v9, %v16_v8 }
   0x4   :  { %v17_v13 = vld [vmem:[%s110_s0 + $0x18] sm:$0xff] }
   0x5   :  { %v30_v11 = vmax.bf16 %v26_v2, %v22_v3  ;;  %v21_v14 = vld [vmem:[%s111_s1 + $0x18] sm:$0xff]  ;;  %v31_v16 = vmax.bf16 %v27_v6, %v23_v7  ;;  %v32_v18 = vmax.bf16 %v28_v10, %v24_v12 }
   0x6   :  { %v29_v15 = vld [vmem:[%s112_s2 + $0x18] sm:$0xff]  ;;  %v25_v17 = vmax.bf16 %v21_v14, %v17_v13 }
   0x7   :  { %34 = vst [vmem:[%s113_s3] sm:$0xff] %v30_v11  ;;  %35 = vst [vmem:[%s113_s3 + $0x8] sm:$0xff] %v31_v16 }
   0x8   :  { %v33_v19 = vmax.bf16 %v29_v15, %v25_v17  ;;  %36 = vst [vmem:[%s113_s3 + $0x10] sm:$0xff] %v32_v18 }
   0xa   :  { %37 = vst [vmem:[%s113_s3 + $0x18] sm:$0xff] %v33_v19 }

// kernel: medicalnet_encoder_forward.19
= control target key start
LH: loop header
LB: loop body
LE: loop exit
PB: predicated region body
PF: predicated region fallthrough
CT: control target
= control target key end

     0   :  { %s74_s0 = inlined_call_operand.vmem [shape: bf16[16,256], index: 0, kind: input, shape index: {}]   ;;  %s75_s1 = inlined_call_operand.vmem [shape: bf16[16,256], index: 1, kind: input, shape index: {}]   ;;  %s76_s2 = inlined_call_operand.vmem [shape: bf16[16,256], index: 2, kind: input, shape index: {}]   ;;  %s77_s3 = inlined_call_operand.vmem [shape: bf16[16,256], index: 3, kind: output, shape index: {}]  }
   0x1   :  { %v14_v0 = vld [vmem:[%s74_s0] sm:$0xff]  ;;  %v15_v4 = vld [vmem:[%s74_s0 + $0x8] sm:$0xff] }
   0x2   :  { %v16_v1 = vld [vmem:[%s75_s1] sm:$0xff]  ;;  %v17_v5 = vld [vmem:[%s75_s1 + $0x8] sm:$0xff] }
   0x3   :  { %v20_v2 = vld [vmem:[%s76_s2] sm:$0xff]  ;;  %v18_v3 = vmax.bf16 %v16_v1, %v14_v0  ;;  %v21_v6 = vld [vmem:[%s76_s2 + $0x8] sm:$0xff]  ;;  %v19_v7 = vmax.bf16 %v17_v5, %v15_v4 }
   0x5   :  { %v22_v8 = vmax.bf16 %v20_v2, %v18_v3  ;;  %v23_v9 = vmax.bf16 %v21_v6, %v19_v7 }
   0x7   :  { %24 = vst [vmem:[%s77_s3] sm:$0xff] %v22_v8  ;;  %25 = vst [vmem:[%s77_s3 + $0x8] sm:$0xff] %v23_v9 }

// kernel: medicalnet_encoder_forward.20
= control target key start
LH: loop header
LB: loop body
LE: loop exit
PB: predicated region body
PF: predicated region fallthrough
CT: control target
= control target key end

     0   :  { %s1280_s12 = smov 0   ;;  %s1282_s13 = smov 0   ;;  %s1419_s0 = inlined_call_operand.vmem [shape: bf16[2,4,16,576], index: 0, kind: input, shape index: {}]   ;;  %s1420_s1 = inlined_call_operand.vmem [shape: bf16[3,576,64], index: 1, kind: input, shape index: {}]   ;;  %s1421_s2 = inlined_call_operand.vmem [shape: f32[1,64], index: 2, kind: input, shape index: {}]   ;;  %s1422_s3 = inlined_call_operand.vmem [shape: bf16[2,2,16,64], index: 3, kind: output, shape index: {}]  }
   0x1   :  { %s1284_s14 = smov 0   ;;  %s1286_s15 = smov 0  }
   0x2   :  { %s1288_s16 = smov 0   ;;  %s1290_s17 = smov 0  }
   0x3   :  { %s1292_s18 = smov 0  }
   0x4 LB: > { %s31_s19 = sadd.s32 1, %s1243_s15  ;;  %s42_s20 = sadd.s32 1, %s1247_s16  ;;  %s1255_s18 = sphi %s1292_s18, %s13_s18   ;;  %s1251_s17 = sphi %s1290_s17, %s1428_s17   ;;  %s1247_s16 = sphi %s1288_s16, %s1427_s16   ;;  %s1243_s15 = sphi %s1286_s15, %s1426_s15   ;;  %s1239_s14 = sphi %s1284_s14, %s1425_s14   ;;  %s1235_s13 = sphi %s1282_s13, %s1424_s13   ;;  %s1231_s12 = sphi %s1280_s12, %s1423_s12  }
   0x5   : > { %p32_p0 = scmp.ge.s32.totalorder %s31_s19, 3  ;;  %p978_p1 = scmp.ge.s32.totalorder %s1255_s18, 1 }
   0x6   : > { %p217_p2 = scmp.lt.s32.totalorder %s1255_s18, 13  ;;  %s46_s21 = sadd.s32 1, %s1251_s17 }
   0x7   : > { %s1430_s19 = smov (%p32_p0, %s31_s19), 0  ;;  %s1432_s20 = smov (!%p32_p0, %s42_s20), %s1247_s16 }
   0x8   : > { %p218_p3 = pnand %p978_p1, %p217_p2  ;;  %p44_p4 = scmp.ge.s32.totalorder %s1432_s20, 2 }
   0x9   : > { %s273_s22 = sadd.s32 (!%p218_p3), %s1231_s12, %s1235_s13  ;;  %p275_p6 = scmp.lt.s32.totalorder (!%p218_p3), %s1239_s14, 1 }
   0xa   : > { %s1434_s20 = smov (%p44_p4, %s1432_s20), 0  ;;  %s1436_s21 = smov (!%p44_p4, %s46_s21), %s1251_s17 }
   0xb   : > { %p48_p5 = scmp.ge.s32.totalorder %s1436_s21, 2  ;;  %221 = sbr.rel (%p218_p3) target bundleno = 316 (0x13c), region = 32 }
   0xc   : > { %p277_p7 = scmp.lt.s32.totalorder (!%p218_p3), %s273_s22, 3  ;;  %p290_p8 = scmp.lt.s32.totalorder (!%p218_p3), %s1231_s12, 2 }
   0xd   : > { %s1438_s21 = smov (%p48_p5, %s1436_s21), 0  ;;  %p304_p9 = scmp.lt.s32.totalorder (!%p218_p3), %s1235_s13, 1 }
   0xe   : > { %p984_p10 = scmp.ne.s32.totalorder (!%p218_p3), %s1231_s12, 0 }
  0x12   : > { %s1440_s14 = smov (!%p275_p6, %s1239_s14), 1  ;;  %s1442_s22 = smov (!%p277_p7, %s273_s22), 3 }
  0x13   : > { %s1097_s23 = smul.u32 40, %s1440_s14  ;;  %s982_s8 = sshll.u32 %s1440_s14, 2  ;;  %vm323_vm0 = vcmask (!%p984_p10), 523264   ;;  %v1257_v0 = vmov (!%p984_p10), 0.0  }
  0x14   : > { %s1096_s24 = smul.u32 10, %s1442_s22  ;;  %s1444_s13 = smov (!%p304_p9, %s1235_s13), 1  ;;  %324 = vst.msk [vmem:[#allocation2] sm:$0xff] (!%p984_p10), %vm323_vm0, %v1257_v0  ;;  %325 = vst.msk [vmem:[#allocation2 + $0x8] sm:$0xff] (!%p984_p10), %vm323_vm0, %v1257_v0 }
  0x15   : > { %s291_s25 = scalar_select %p290_p8, %s1231_s12, 2 }
  0x16   : > { %s285_s26 = sadd.s32 %s1097_s23, %s1096_s24  ;;  %s981_s9 = sshll.u32 %s1444_s13, 1 }
  0x17   : > { %s979_s27 = sshll.u32 %s285_s26, 2  ;;  %s1098_s28 = smul.u32 288, %s291_s25 }
  0x18   : > { %s1334_s4 = scalar_lea.vmem %s1419_s0, %s979_s27  ;;  %s314_s10 = sadd.s32 %s982_s8, %s981_s9 }
  0x19   : > { %s1339_s7 = scalar_lea.vmem %s1420_s1, %s1098_s28  ;;  %s983_s11 = sshll.u32 %s314_s10, 2 }
  0x1a   : > { %s1345_s24 = scalar_lea.vmem %s1422_s3, %s983_s11  ;;  %322 = sbr.rel (%p984_p10) target bundleno = 33 (0x21), region = 36 }
  0x21 PF: > { %v1158_v1 = vld [vmem:[%s1339_s7 + $0x40] sm:$0xff]   ;;  %v1162_v5 = vld [vmem:[%s1339_s7 + $0x48] sm:$0xff]   ;;  %v1166_v9 = vld [vmem:[%s1339_s7 + $0x50] sm:$0xff]   ;;  %v1258_v35 = vmov 0.0   ;;  %vm1259_vm1 = vmmov 0   ;;  %vm647_vm2 = vcmask 523264  }
  0x22   : > { %v1159_v2 = vld [vmem:[%s1339_s7 + $0xc0] sm:$0xff]   ;;  %1035 = vmatprep.subr.bf16.mxu0 %v1158_v1  ;;  %v1163_v6 = vld [vmem:[%s1339_s7 + $0xc8] sm:$0xff]   ;;  %v1167_v10 = vld [vmem:[%s1339_s7 + $0xd0] sm:$0xff]   ;;  %p1027_p11 = scmp.ne.s32.totalorder %s1231_s12, 2 }
  0x23   : > { %v1160_v3 = vld [vmem:[%s1339_s7] sm:$0xff]   ;;  %1057 = vmatprep.subr.bf16.mxu1 %v1159_v2  ;;  %v1164_v7 = vld [vmem:[%s1339_s7 + $0x8] sm:$0xff]   ;;  %v1168_v11 = vld [vmem:[%s1339_s7 + $0x10] sm:$0xff]   ;;  %vm803_vm3 = vcmask (!%p1027_p11), 519168  }
  0x24   : > { %v1161_v4 = vld [vmem:[%s1339_s7 + $0x80] sm:$0xff]   ;;  %1036 = vmatpush3.bf16.msra.mxu0 %v1160_v3  ;;  %v1165_v8 = vld [vmem:[%s1339_s7 + $0x88] sm:$0xff]   ;;  %v1169_v12 = vld [vmem:[%s1339_s7 + $0x90] sm:$0xff]  }
  0x25   : > { %1058 = vmatpush3.bf16.msra.mxu1 %v1161_v4  ;;  %1037 = vmatprep.subr.bf16.mxu0 %v1162_v5  ;;  %v1170_v13 = vld [vmem:[%s1339_s7 + $0x58] sm:$0xff]   ;;  %v1174_v17 = vld [vmem:[%s1339_s7 + $0x60] sm:$0xff]   ;;  %v1178_v21 = vld [vmem:[%s1339_s7 + $0x68] sm:$0xff]  }
  0x26   : > { %1059 = vmatprep.subr.bf16.mxu1 %v1163_v6  ;;  %v1171_v14 = vld [vmem:[%s1339_s7 + $0xd8] sm:$0xff]   ;;  %v1175_v18 = vld [vmem:[%s1339_s7 + $0xe0] sm:$0xff]   ;;  %v1179_v22 = vld [vmem:[%s1339_s7 + $0xe8] sm:$0xff]  }
  0x27   : > { %v1172_v15 = vld [vmem:[%s1339_s7 + $0x18] sm:$0xff]   ;;  %v1176_v19 = vld [vmem:[%s1339_s7 + $0x20] sm:$0xff]   ;;  %v1180_v23 = vld [vmem:[%s1339_s7 + $0x28] sm:$0xff]  }
  0x28   : > { %1038 = vmatpush3.bf16.msra.mxu0 %v1164_v7  ;;  %v1173_v16 = vld [vmem:[%s1339_s7 + $0x98] sm:$0xff]   ;;  %v1177_v20 = vld [vmem:[%s1339_s7 + $0xa0] sm:$0xff]   ;;  %v1181_v24 = vld [vmem:[%s1339_s7 + $0xa8] sm:$0xff]  }
  0x29   : > { %1060 = vmatpush3.bf16.msra.mxu1 %v1165_v8  ;;  %1039 = vmatprep.subr.bf16.mxu0 %v1166_v9  ;;  %v1182_v25 = vld [vmem:[%s1339_s7 + $0x70] sm:$0xff]   ;;  %v1186_v29 = vld [vmem:[%s1339_s7 + $0x78] sm:$0xff]   ;;  %v1195_v37 = vld [vmem:[%s1334_s4 + $0xc] ss:$20 sps:$4 sm:$0xff]  }
  0x2a   : > { %1061 = vmatprep.subr.bf16.mxu1 %v1167_v10  ;;  %v1183_v26 = vld [vmem:[%s1339_s7 + $0xf0] sm:$0xff]   ;;  %v1187_v30 = vld [vmem:[%s1339_s7 + $0xf8] sm:$0xff]   ;;  %v1196_v38 = vld [vmem:[%s1339_s7 + $0x100] sm:$0xff]   ;;  %724 = vmatprep.mubr.bf16.mxu1 %v1195_v37 }
  0x2b   : > { %v1184_v27 = vld [vmem:[%s1339_s7 + $0x30] sm:$0xff]   ;;  %v1188_v31 = vld [vmem:[%s1339_s7 + $0x38] sm:$0xff]   ;;  %v1197_v39 = vld [vmem:[%s1339_s7 + $0x108] sm:$0xff]  }
  0x2c   : > { %1040 = vmatpush3.bf16.msra.mxu0 %v1168_v11  ;;  %v1185_v28 = vld [vmem:[%s1339_s7 + $0xb0] sm:$0xff]   ;;  %v1189_v32 = vld [vmem:[%s1339_s7 + $0xb8] sm:$0xff]   ;;  %v327_v61 = vld [vmem:[#allocation2 + $0x8] sm:$0xff] }
  0x2d   : > { %1062 = vmatpush3.bf16.msra.mxu1 %v1169_v12  ;;  %1041 = vmatprep.subr.bf16.mxu0 %v1170_v13  ;;  %v1190_v33 = vld [vmem:[%s1334_s4] ss:$20 sps:$4 sm:$0xff]   ;;  %v1192_v34 = vld [vmem:[%s1334_s4 + $0x4] ss:$20 sps:$4 sm:$0xff]   ;;  %v1193_v36 = vld [vmem:[%s1334_s4 + $0x8] ss:$20 sps:$4 sm:$0xff]  }
  0x2e   : > { %1063 = vmatprep.subr.bf16.mxu1 %v1171_v14  ;;  %683 = vmatprep.mubr.bf16.mxu0 %v1192_v34  ;;  %v1198_v40 = vld [vmem:[%s1339_s7 + $0x110] sm:$0xff]   ;;  %v1199_v41 = vld [vmem:[%s1339_s7 + $0x118] sm:$0xff]   ;;  %v1028_v4 = vld [vmem:[%s1421_s2] ss:$0 sm:$0xff] (!%p1027_p11) }
  0x2f   : > { %v1200_v42 = vld [vmem:[%s1334_s4 + $0x10] ss:$20 sps:$4 sm:$0xff]   ;;  %v326_v57 = vld [vmem:[#allocation2] sm:$0xff] }
  0x30   : > { %1042 = vmatpush3.bf16.msra.mxu0 %v1172_v15 }
  0x31   : > { %1064 = vmatpush3.bf16.msra.mxu1 %v1173_v16  ;;  %1043 = vmatprep.subr.bf16.mxu0 %v1174_v17 }
  0x32   : > { %1065 = vmatprep.subr.bf16.mxu1 %v1175_v18 }
  0x34   : > { %1044 = vmatpush3.bf16.msra.mxu0 %v1176_v19 }
  0x35   : > { %1066 = vmatpush3.bf16.msra.mxu1 %v1177_v20  ;;  %1045 = vmatprep.subr.bf16.mxu0 %v1178_v21 }
  0x36   : > { %1067 = vmatprep.subr.bf16.mxu1 %v1179_v22 }
  0x38   : > { %1046 = vmatpush3.bf16.msra.mxu0 %v1180_v23 }
  0x39   : > { %1068 = vmatpush3.bf16.msra.mxu1 %v1181_v24  ;;  %1047 = vmatprep.subr.bf16.mxu0 %v1182_v25 }
  0x3a   : > { %1069 = vmatprep.subr.bf16.mxu1 %v1183_v26 }
  0x3c   : > { %1048 = vmatpush3.bf16.msra.mxu0 %v1184_v27 }
  0x3d   : > { %1070 = vmatpush3.bf16.msra.mxu1 %v1185_v28  ;;  %1049 = vmatprep.subr.bf16.mxu0 %v1186_v29 }
  0x3e   : > { %1071 = vmatprep.subr.bf16.mxu1 %v1187_v30 }
  0x40   : > { %1050 = vmatpush3.bf16.msra.mxu0 %v1188_v31 }
  0x41   : > { %1072 = vmatpush3.bf16.msra.mxu1 %v1189_v32  ;;  %1084 = vmatprep.subr.bf16.mxu0 %v1258_v35 }
  0x43   : > { %684 = vmatmul.mubr.bf16.vlgmr.msra.gmra.mrb[0].mxu0 %v1190_v33 }
  0x44   : > { %725 = vmatmul.mubr.bf16.vlgmr.msra.gmra.mrb[0].mxu1 %v1193_v36  ;;  %1085 = vmatpush3.bf16.msra.mxu0 %v1196_v38 }
  0x45   : > { %1086 = vmatprep.subr.bf16.mxu0 %v1258_v35  ;;  %1092 = vmatprep.mubr.msk.bf16.mxu0 %vm1259_vm1, %v1258_v35 }
  0x48   : > { %1087 = vmatpush3.bf16.msra.mxu0 %v1197_v39 }
  0x49   : > { %1088 = vmatprep.subr.bf16.mxu0 %v1258_v35 }
  0x4c   : > { %1089 = vmatpush3.bf16.msra.mxu0 %v1198_v40 }
  0x4d   : > { %1090 = vmatprep.subr.bf16.mxu0 %v1258_v35 }
  0x50   : > { %1091 = vmatpush3.bf16.msra.mxu0 %v1199_v41 }
  0x53   : > { %1093 = vmatmul.mubr.msk.bf16.vlgmr.msra.gmra.mrb[4].mxu0 %vm647_vm2, %v1200_v42 }
 0x116   : > { %v1051_v43 = vpop.f32.mrb[0].mxu0 }
 0x117   : > { %v1073_v44 = vpop.f32.mrb[0].mxu1  ;;  %v1052_v45 = vpop.f32.mrb[1].mxu0 }
 0x118   : > { %v1053_v46 = vadd.f32 %v1052_v45, %v1051_v43  ;;  %v1074_v47 = vpop.f32.mrb[1].mxu1  ;;  %v1054_v48 = vpop.f32.mrb[2].mxu0 }
 0x119   : > { %v1075_v49 = vadd.f32 %v1074_v47, %v1073_v44  ;;  %v1076_v50 = vpop.f32.mrb[2].mxu1  ;;  %v1055_v51 = vpop.f32.mrb[3].mxu0 }
 0x11a   : > { %v1056_v52 = vadd.f32 %v1055_v51, %v1054_v48  ;;  %v1077_v53 = vpop.f32.mrb[3].mxu1 }
 0x11b   : > { %v1078_v54 = vadd.f32 %v1077_v53, %v1076_v50  ;;  %v727_v55 = vadd.f32 %v1075_v49, %v1053_v46 }
 0x11d   : > { %v730_v56 = vadd.f32 %v1078_v54, %v1056_v52 }
 0x126   : > { %v767_v58 = vpop.f32.mrb[4].mxu0 }
 0x127   : > { %v768_v59 = vadd.f32 %v767_v58, %v727_v55  ;;  %v1094_v60 = vpop.f32.mrb[5].mxu0  ;;  %781 = sbr.rel (%p1027_p11) target bundleno = 316 (0x13c), region = 40 }
 0x128   : > { %v770_v62 = vpop.f32.mrb[6].mxu0 }
 0x129   : > { %v774_v63 = vadd.f32 %v768_v59, %v326_v57  ;;  %v771_v0 = vadd.f32 %v770_v62, %v730_v56  ;;  %v1095_v1 = vpop.f32.mrb[7].mxu0 }
 0x12b   : > { %776 = vst.msk [vmem:[#allocation2] sm:$0xff] %vm647_vm2, %v774_v63  ;;  %v775_v2 = vadd.f32 %v771_v0, %v327_v61 }
 0x12d   : > { %777 = vst.msk [vmem:[#allocation2 + $0x8] sm:$0xff] %vm647_vm2, %v775_v2 }
 0x132   : > { %v782_v3 = vld [vmem:[#allocation2] sm:$0xff] }
 0x133   : > { %v791_v6 = vadd.f32 %v1028_v4, %v782_v3 }
 0x134   : > { %v783_v5 = vld [vmem:[#allocation2 + $0x8] sm:$0xff] }
 0x135   : > { %v792_v7 = vadd.f32 %v1028_v4, %v783_v5  ;;  %v793_v8 = vmax.f32 %v791_v6, 0.0 }
 0x137   : > { %v794_v9 = vmax.f32 %v792_v7, 0.0  ;;  %v1033_v10 = vpack.c.bf16 %v793_v8, %v793_v8 }
 0x139   : > { %v1034_v11 = vpack.c.bf16 %v794_v9, %v794_v9  ;;  %804 = vst.msk [vmem:[%s1345_s24] sm:$0xf] %vm803_vm3, %v1033_v10 }
 0x13b   : > { %805 = vst.msk [vmem:[%s1345_s24 + $0x4] sm:$0xf] %vm803_vm3, %v1034_v11 }
 0x13c PF: > { %s13_s18 = sadd.s32 1, %s1255_s18   ;;  %s1423_s12 = smov %s1243_s15 }
 0x13d   : > { %p10_p12 = scmp.ge.s32.totalorder %s13_s18, 14   ;;  %s1424_s13 = smov %s1247_s16 }
 0x13e   : > { %s1425_s14 = smov %s1251_s17  ;;  %s1426_s15 = smov %s1430_s19 }
 0x13f   : > { %s1427_s16 = smov %s1434_s20  ;;  %s1428_s17 = smov %s1438_s21 }
 0x140   :  { %12 = sbr.rel (!%p10_p12) target bundleno = 4 (0x4), region = 76 }

// kernel: medicalnet_encoder_forward.21
= control target key start
LH: loop header
LB: loop body
LE: loop exit
PB: predicated region body
PF: predicated region fallthrough
CT: control target
= control target key end

     0   :  { %s1413_s15 = smov 0   ;;  %s1415_s16 = smov 0   ;;  %s1558_s0 = inlined_call_operand.vmem [shape: bf16[2,4,16,576], index: 0, kind: input, shape index: {}]   ;;  %s1559_s1 = inlined_call_operand.vmem [shape: bf16[3,576,64], index: 1, kind: input, shape index: {}]   ;;  %s1560_s2 = inlined_call_operand.vmem [shape: f32[1,64], index: 2, kind: input, shape index: {}]   ;;  %s1561_s3 = inlined_call_operand.vmem [shape: bf16[2,2,16,64], index: 3, kind: input, shape index: {}]   ;;  %s1562_s4 = inlined_call_operand.vmem [shape: bf16[2,2,16,64], index: 4, kind: output, shape index: {}]  }
   0x1   :  { %s1417_s17 = smov 0   ;;  %s1419_s18 = smov 0  }
   0x2   :  { %s1421_s19 = smov 0   ;;  %s1423_s20 = smov 0  }
   0x3   :  { %s1425_s21 = smov 0  }
   0x4 LB: > { %s32_s22 = sadd.s32 1, %s1371_s18  ;;  %s43_s23 = sadd.s32 1, %s1375_s19  ;;  %s1383_s21 = sphi %s1425_s21, %s14_s21   ;;  %s1379_s20 = sphi %s1423_s20, %s1570_s20   ;;  %s1375_s19 = sphi %s1421_s19, %s1569_s19   ;;  %s1371_s18 = sphi %s1419_s18, %s1568_s18   ;;  %s1367_s17 = sphi %s1417_s17, %s1567_s17   ;;  %s1363_s16 = sphi %s1415_s16, %s1566_s16   ;;  %s1359_s15 = sphi %s1413_s15, %s1565_s15  }
   0x5   : > { %p33_p0 = scmp.ge.s32.totalorder %s32_s22, 3  ;;  %p1099_p1 = scmp.ge.s32.totalorder %s1383_s21, 1 }
   0x6   : > { %p270_p2 = scmp.lt.s32.totalorder %s1383_s21, 13  ;;  %s47_s24 = sadd.s32 1, %s1379_s20 }
   0x7   : > { %s1572_s22 = smov (%p33_p0, %s32_s22), 0  ;;  %s1574_s23 = smov (!%p33_p0, %s43_s23), %s1375_s19 }
   0x8   : > { %p271_p3 = pnand %p1099_p1, %p270_p2  ;;  %p45_p4 = scmp.ge.s32.totalorder %s1574_s23, 2 }
   0x9   : > { %s344_s25 = sadd.s32 (!%p271_p3), %s1359_s15, %s1363_s16  ;;  %p346_p6 = scmp.lt.s32.totalorder (!%p271_p3), %s1367_s17, 1 }
   0xa   : > { %s1576_s23 = smov (%p45_p4, %s1574_s23), 0  ;;  %s1578_s24 = smov (!%p45_p4, %s47_s24), %s1379_s20 }
   0xb   : > { %p49_p5 = scmp.ge.s32.totalorder %s1578_s24, 2  ;;  %274 = sbr.rel (%p271_p3) target bundleno = 319 (0x13f), region = 36 }
   0xc   : > { %p348_p7 = scmp.lt.s32.totalorder (!%p271_p3), %s344_s25, 3  ;;  %p361_p8 = scmp.lt.s32.totalorder (!%p271_p3), %s1359_s15, 2 }
   0xd   : > { %s1580_s24 = smov (%p49_p5, %s1578_s24), 0  ;;  %p375_p9 = scmp.lt.s32.totalorder (!%p271_p3), %s1363_s16, 1 }
   0xe   : > { %1563 = sst [smem:[#allocation3_spill]] %s1580_s24  ;;  %p1108_p10 = scmp.ne.s32.totalorder (!%p271_p3), %s1359_s15, 0 }
  0x12   : > { %s1582_s17 = smov (!%p346_p6, %s1367_s17), 1  ;;  %s1584_s25 = smov (!%p348_p7, %s344_s25), 3 }
  0x13   : > { %s1225_s26 = smul.u32 40, %s1582_s17  ;;  %s1103_s12 = sshll.u32 %s1582_s17, 2  ;;  %vm411_vm0 = vcmask (!%p1108_p10), 523264   ;;  %v1385_v0 = vmov (!%p1108_p10), 0.0  }
  0x14   : > { %s1224_s27 = smul.u32 10, %s1584_s25  ;;  %s1586_s16 = smov (!%p375_p9, %s1363_s16), 1  ;;  %412 = vst.msk [vmem:[#allocation2] sm:$0xff] (!%p1108_p10), %vm411_vm0, %v1385_v0  ;;  %413 = vst.msk [vmem:[#allocation2 + $0x8] sm:$0xff] (!%p1108_p10), %vm411_vm0, %v1385_v0 }
  0x15   : > { %s362_s28 = scalar_select %p361_p8, %s1359_s15, 2 }
  0x16   : > { %s356_s29 = sadd.s32 %s1225_s26, %s1224_s27  ;;  %s1102_s13 = sshll.u32 %s1586_s16, 1 }
  0x17   : > { %s1100_s30 = sshll.u32 %s356_s29, 2  ;;  %s1226_s5 = smul.u32 288, %s362_s28 }
  0x18   : > { %s1467_s8 = scalar_lea.vmem %s1558_s0, %s1100_s30  ;;  %s385_s14 = sadd.s32 %s1103_s12, %s1102_s13 }
  0x19   : > { %s1472_s11 = scalar_lea.vmem %s1559_s1, %s1226_s5  ;;  %s1104_s25 = sshll.u32 %s385_s14, 2 }
  0x1a   : > { %s1478_s27 = scalar_lea.vmem %s1561_s3, %s1104_s25  ;;  %s1483_s30 = scalar_lea.vmem %s1562_s4, %s1104_s25 }
  0x1b   : > { %410 = sbr.rel (%p1108_p10) target bundleno = 34 (0x22), region = 40 }
  0x22 PF: > { %v1286_v1 = vld [vmem:[%s1472_s11 + $0x40] sm:$0xff]   ;;  %v1290_v5 = vld [vmem:[%s1472_s11 + $0x48] sm:$0xff]   ;;  %v1294_v9 = vld [vmem:[%s1472_s11 + $0x50] sm:$0xff]   ;;  %v1386_v35 = vmov 0.0   ;;  %vm1387_vm1 = vmmov 0   ;;  %vm735_vm2 = vcmask 523264  }
  0x23   : > { %v1287_v2 = vld [vmem:[%s1472_s11 + $0xc0] sm:$0xff]   ;;  %1163 = vmatprep.subr.bf16.mxu0 %v1286_v1  ;;  %v1291_v6 = vld [vmem:[%s1472_s11 + $0xc8] sm:$0xff]   ;;  %v1295_v10 = vld [vmem:[%s1472_s11 + $0xd0] sm:$0xff]   ;;  %p1151_p11 = scmp.ne.s32.totalorder %s1359_s15, 2 }
  0x24   : > { %v1288_v3 = vld [vmem:[%s1472_s11] sm:$0xff]   ;;  %1185 = vmatprep.subr.bf16.mxu1 %v1287_v2  ;;  %v1292_v7 = vld [vmem:[%s1472_s11 + $0x8] sm:$0xff]   ;;  %v1296_v11 = vld [vmem:[%s1472_s11 + $0x10] sm:$0xff]   ;;  %vm897_vm3 = vcmask (!%p1151_p11), 519168  }
  0x25   : > { %v1289_v4 = vld [vmem:[%s1472_s11 + $0x80] sm:$0xff]   ;;  %1164 = vmatpush3.bf16.msra.mxu0 %v1288_v3  ;;  %v1293_v8 = vld [vmem:[%s1472_s11 + $0x88] sm:$0xff]   ;;  %v1297_v12 = vld [vmem:[%s1472_s11 + $0x90] sm:$0xff]  }
  0x26   : > { %1186 = vmatpush3.bf16.msra.mxu1 %v1289_v4  ;;  %1165 = vmatprep.subr.bf16.mxu0 %v1290_v5  ;;  %v1298_v13 = vld [vmem:[%s1472_s11 + $0x58] sm:$0xff]   ;;  %v1302_v17 = vld [vmem:[%s1472_s11 + $0x60] sm:$0xff]   ;;  %v1306_v21 = vld [vmem:[%s1472_s11 + $0x68] sm:$0xff]  }
  0x27   : > { %1187 = vmatprep.subr.bf16.mxu1 %v1291_v6  ;;  %v1299_v14 = vld [vmem:[%s1472_s11 + $0xd8] sm:$0xff]   ;;  %v1303_v18 = vld [vmem:[%s1472_s11 + $0xe0] sm:$0xff]   ;;  %v1307_v22 = vld [vmem:[%s1472_s11 + $0xe8] sm:$0xff]  }
  0x28   : > { %v1300_v15 = vld [vmem:[%s1472_s11 + $0x18] sm:$0xff]   ;;  %v1304_v19 = vld [vmem:[%s1472_s11 + $0x20] sm:$0xff]   ;;  %v1308_v23 = vld [vmem:[%s1472_s11 + $0x28] sm:$0xff]  }
  0x29   : > { %1166 = vmatpush3.bf16.msra.mxu0 %v1292_v7  ;;  %v1301_v16 = vld [vmem:[%s1472_s11 + $0x98] sm:$0xff]   ;;  %v1305_v20 = vld [vmem:[%s1472_s11 + $0xa0] sm:$0xff]   ;;  %v1309_v24 = vld [vmem:[%s1472_s11 + $0xa8] sm:$0xff]  }
  0x2a   : > { %1188 = vmatpush3.bf16.msra.mxu1 %v1293_v8  ;;  %1167 = vmatprep.subr.bf16.mxu0 %v1294_v9  ;;  %v1310_v25 = vld [vmem:[%s1472_s11 + $0x70] sm:$0xff]   ;;  %v1314_v29 = vld [vmem:[%s1472_s11 + $0x78] sm:$0xff]   ;;  %v1323_v37 = vld [vmem:[%s1467_s8 + $0xc] ss:$20 sps:$4 sm:$0xff]  }
  0x2b   : > { %1189 = vmatprep.subr.bf16.mxu1 %v1295_v10  ;;  %v1311_v26 = vld [vmem:[%s1472_s11 + $0xf0] sm:$0xff]   ;;  %v1315_v30 = vld [vmem:[%s1472_s11 + $0xf8] sm:$0xff]   ;;  %v1324_v38 = vld [vmem:[%s1472_s11 + $0x100] sm:$0xff]   ;;  %812 = vmatprep.mubr.bf16.mxu1 %v1323_v37 }
  0x2c   : > { %v1312_v27 = vld [vmem:[%s1472_s11 + $0x30] sm:$0xff]   ;;  %v1316_v31 = vld [vmem:[%s1472_s11 + $0x38] sm:$0xff]   ;;  %v1325_v39 = vld [vmem:[%s1472_s11 + $0x108] sm:$0xff]  }
  0x2d   : > { %1168 = vmatpush3.bf16.msra.mxu0 %v1296_v11  ;;  %v1313_v28 = vld [vmem:[%s1472_s11 + $0xb0] sm:$0xff]   ;;  %v1317_v32 = vld [vmem:[%s1472_s11 + $0xb8] sm:$0xff]   ;;  %v415_v61 = vld [vmem:[#allocation2 + $0x8] sm:$0xff] }
  0x2e   : > { %1190 = vmatpush3.bf16.msra.mxu1 %v1297_v12  ;;  %1169 = vmatprep.subr.bf16.mxu0 %v1298_v13  ;;  %v1318_v33 = vld [vmem:[%s1467_s8] ss:$20 sps:$4 sm:$0xff]   ;;  %v1320_v34 = vld [vmem:[%s1467_s8 + $0x4] ss:$20 sps:$4 sm:$0xff]   ;;  %v1321_v36 = vld [vmem:[%s1467_s8 + $0x8] ss:$20 sps:$4 sm:$0xff]  }
  0x2f   : > { %1191 = vmatprep.subr.bf16.mxu1 %v1299_v14  ;;  %771 = vmatprep.mubr.bf16.mxu0 %v1320_v34  ;;  %v1326_v40 = vld [vmem:[%s1472_s11 + $0x110] sm:$0xff]   ;;  %v1327_v41 = vld [vmem:[%s1472_s11 + $0x118] sm:$0xff]   ;;  %v1152_v4 = vld [vmem:[%s1560_s2] ss:$0 sm:$0xff] (!%p1151_p11) }
  0x30   : > { %v1328_v42 = vld [vmem:[%s1467_s8 + $0x10] ss:$20 sps:$4 sm:$0xff]   ;;  %v414_v57 = vld [vmem:[#allocation2] sm:$0xff] }
  0x31   : > { %1170 = vmatpush3.bf16.msra.mxu0 %v1300_v15  ;;  %v1160_v5 = vld [vmem:[%s1478_s27] sm:$0xff] (!%p1151_p11)  }
  0x32   : > { %1192 = vmatpush3.bf16.msra.mxu1 %v1301_v16  ;;  %1171 = vmatprep.subr.bf16.mxu0 %v1302_v17  ;;  %v1161_v7 = vunpack.c.l.bf16 (!%p1151_p11), %v1160_v5  ;;  %v1162_v9 = vunpack.c.h.bf16 (!%p1151_p11), %v1160_v5 }
  0x33   : > { %1193 = vmatprep.subr.bf16.mxu1 %v1303_v18 }
  0x35   : > { %1172 = vmatpush3.bf16.msra.mxu0 %v1304_v19 }
  0x36   : > { %1194 = vmatpush3.bf16.msra.mxu1 %v1305_v20  ;;  %1173 = vmatprep.subr.bf16.mxu0 %v1306_v21 }
  0x37   : > { %1195 = vmatprep.subr.bf16.mxu1 %v1307_v22 }
  0x39   : > { %1174 = vmatpush3.bf16.msra.mxu0 %v1308_v23 }
  0x3a   : > { %1196 = vmatpush3.bf16.msra.mxu1 %v1309_v24  ;;  %1175 = vmatprep.subr.bf16.mxu0 %v1310_v25 }
  0x3b   : > { %1197 = vmatprep.subr.bf16.mxu1 %v1311_v26 }
  0x3d   : > { %1176 = vmatpush3.bf16.msra.mxu0 %v1312_v27 }
  0x3e   : > { %1198 = vmatpush3.bf16.msra.mxu1 %v1313_v28  ;;  %1177 = vmatprep.subr.bf16.mxu0 %v1314_v29 }
  0x3f   : > { %1199 = vmatprep.subr.bf16.mxu1 %v1315_v30 }
  0x41   : > { %1178 = vmatpush3.bf16.msra.mxu0 %v1316_v31 }
  0x42   : > { %1200 = vmatpush3.bf16.msra.mxu1 %v1317_v32  ;;  %1212 = vmatprep.subr.bf16.mxu0 %v1386_v35 }
  0x44   : > { %772 = vmatmul.mubr.bf16.vlgmr.msra.gmra.mrb[0].mxu0 %v1318_v33 }
  0x45   : > { %813 = vmatmul.mubr.bf16.vlgmr.msra.gmra.mrb[0].mxu1 %v1321_v36  ;;  %1213 = vmatpush3.bf16.msra.mxu0 %v1324_v38 }
  0x46   : > { %1214 = vmatprep.subr.bf16.mxu0 %v1386_v35  ;;  %1220 = vmatprep.mubr.msk.bf16.mxu0 %vm1387_vm1, %v1386_v35 }
  0x49   : > { %1215 = vmatpush3.bf16.msra.mxu0 %v1325_v39 }
  0x4a   : > { %1216 = vmatprep.subr.bf16.mxu0 %v1386_v35 }
  0x4d   : > { %1217 = vmatpush3.bf16.msra.mxu0 %v1326_v40 }
  0x4e   : > { %1218 = vmatprep.subr.bf16.mxu0 %v1386_v35 }
  0x51   : > { %1219 = vmatpush3.bf16.msra.mxu0 %v1327_v41 }
  0x54   : > { %1221 = vmatmul.mubr.msk.bf16.vlgmr.msra.gmra.mrb[4].mxu0 %vm735_vm2, %v1328_v42 }
 0x117   : > { %v1179_v43 = vpop.f32.mrb[0].mxu0 }
 0x118   : > { %v1201_v44 = vpop.f32.mrb[0].mxu1  ;;  %v1180_v45 = vpop.f32.mrb[1].mxu0 }
 0x119   : > { %v1181_v46 = vadd.f32 %v1180_v45, %v1179_v43  ;;  %v1202_v47 = vpop.f32.mrb[1].mxu1  ;;  %v1182_v48 = vpop.f32.mrb[2].mxu0 }
 0x11a   : > { %v1203_v49 = vadd.f32 %v1202_v47, %v1201_v44  ;;  %v1204_v50 = vpop.f32.mrb[2].mxu1  ;;  %v1183_v51 = vpop.f32.mrb[3].mxu0 }
 0x11b   : > { %v1184_v52 = vadd.f32 %v1183_v51, %v1182_v48  ;;  %v1205_v53 = vpop.f32.mrb[3].mxu1 }
 0x11c   : > { %v1206_v54 = vadd.f32 %v1205_v53, %v1204_v50  ;;  %v815_v55 = vadd.f32 %v1203_v49, %v1181_v46 }
 0x11e   : > { %v818_v56 = vadd.f32 %v1206_v54, %v1184_v52 }
 0x127   : > { %v855_v58 = vpop.f32.mrb[4].mxu0 }
 0x128   : > { %v856_v59 = vadd.f32 %v855_v58, %v815_v55  ;;  %v1222_v60 = vpop.f32.mrb[5].mxu0  ;;  %869 = sbr.rel (%p1151_p11) target bundleno = 319 (0x13f), region = 44 }
 0x129   : > { %v858_v62 = vpop.f32.mrb[6].mxu0 }
 0x12a   : > { %v862_v63 = vadd.f32 %v856_v59, %v414_v57  ;;  %v859_v0 = vadd.f32 %v858_v62, %v818_v56  ;;  %v1223_v1 = vpop.f32.mrb[7].mxu0 }
 0x12c   : > { %864 = vst.msk [vmem:[#allocation2] sm:$0xff] %vm735_vm2, %v862_v63  ;;  %v863_v2 = vadd.f32 %v859_v0, %v415_v61 }
 0x12e   : > { %865 = vst.msk [vmem:[#allocation2 + $0x8] sm:$0xff] %vm735_vm2, %v863_v2 }
 0x133   : > { %v870_v3 = vld [vmem:[#allocation2] sm:$0xff] }
 0x134   : > { %v879_v6 = vadd.f32 %v1152_v4, %v870_v3 }
 0x135   : > { %v871_v8 = vld [vmem:[#allocation2 + $0x8] sm:$0xff] }
 0x136   : > { %v880_v10 = vadd.f32 %v1152_v4, %v871_v8  ;;  %v885_v11 = vadd.f32 %v1161_v7, %v879_v6 }
 0x138   : > { %v886_v12 = vadd.f32 %v1162_v9, %v880_v10  ;;  %v887_v13 = vmax.f32 %v885_v11, 0.0 }
 0x13a   : > { %v888_v14 = vmax.f32 %v886_v12, 0.0  ;;  %v1157_v15 = vpack.c.bf16 %v887_v13, %v887_v13 }
 0x13c   : > { %v1158_v16 = vpack.c.bf16 %v888_v14, %v888_v14  ;;  %898 = vst.msk [vmem:[%s1483_s30] sm:$0xf] %vm897_vm3, %v1157_v15 }
 0x13e   : > { %899 = vst.msk [vmem:[%s1483_s30 + $0x4] sm:$0xf] %vm897_vm3, %v1158_v16 }
 0x13f PF: > { %s14_s21 = sadd.s32 1, %s1383_s21   ;;  %s1564_s24 = sld [smem:[#allocation3_spill]] }
 0x140   : > { %p11_p12 = scmp.ge.s32.totalorder %s14_s21, 14   ;;  %s1565_s15 = smov %s1371_s18 }
 0x141   : > { %s1566_s16 = smov %s1375_s19  ;;  %s1567_s17 = smov %s1379_s20 }
 0x142   : > { %s1568_s18 = smov %s1572_s22  ;;  %s1569_s19 = smov %s1576_s23 }
 0x143   :  { %13 = sbr.rel (!%p11_p12) target bundleno = 4 (0x4), region = 83 }
 0x145   : > { %s1570_s20 = smov %s1564_s24 }

// kernel: medicalnet_encoder_forward.23
= control target key start
LH: loop header
LB: loop body
LE: loop exit
PB: predicated region body
PF: predicated region fallthrough
CT: control target
= control target key end

     0   :  { %s1192_s12 = smov 0   ;;  %s1194_s13 = smov 0   ;;  %s1302_s0 = inlined_call_operand.vmem [shape: bf16[2,4,4,576], index: 0, kind: input, shape index: {}]   ;;  %s1303_s1 = inlined_call_operand.vmem [shape: bf16[3,576,128], index: 1, kind: input, shape index: {}]   ;;  %s1304_s2 = inlined_call_operand.vmem [shape: f32[1,128], index: 2, kind: input, shape index: {}]   ;;  %s1305_s3 = inlined_call_operand.vmem [shape: bf16[2,1,4,128], index: 3, kind: output, shape index: {}]  }
   0x1   :  { %s1196_s14 = smov 0   ;;  %s1198_s15 = smov 0  }
   0x2   :  { %s1200_s16 = smov 0  }
   0x3 LB: > { %s31_s17 = sadd.s32 1, %s1158_s14  ;;  %s46_s18 = sadd.s32 1, %s1162_s15  ;;  %s1166_s16 = sphi %s1200_s16, %s13_s16   ;;  %s1162_s15 = sphi %s1198_s15, %s1309_s15   ;;  %s1158_s14 = sphi %s1196_s14, %s1308_s14   ;;  %s1154_s13 = sphi %s1194_s13, %s1307_s13   ;;  %s1150_s12 = sphi %s1192_s12, %s1306_s12  }
   0x4   : > { %p32_p0 = scmp.ge.s32.totalorder %s31_s17, 3  ;;  %p936_p1 = scmp.ge.s32.totalorder %s1166_s16, 1 }
   0x5   : > { %p219_p2 = scmp.lt.s32.totalorder %s1166_s16, 7 }
   0x6   : > { %s1311_s17 = smov (%p32_p0, %s31_s17), 0  ;;  %s1313_s18 = smov (!%p32_p0, %s46_s18), %s1162_s15 }
   0x7   : > { %p220_p3 = pnand %p936_p1, %p219_p2  ;;  %p48_p4 = scmp.ge.s32.totalorder %s1313_s18, 2 }
   0x8   : > { %p274_p5 = scmp.lt.s32.totalorder (!%p220_p3), %s1154_s13, 1  ;;  %p276_p6 = scmp.lt.s32.totalorder (!%p220_p3), %s1150_s12, 3 }
   0x9   : > { %s1315_s18 = smov (%p48_p4, %s1313_s18), 0  ;;  %223 = sbr.rel (%p220_p3) target bundleno = 309 (0x135), region = 32 }
   0xa   : > { %p289_p7 = scmp.lt.s32.totalorder (!%p220_p3), %s1150_s12, 2  ;;  %p940_p8 = scmp.ne.s32.totalorder (!%p220_p3), %s1150_s12, 0 }
  0x10   : > { %s1317_s13 = smov (!%p274_p5, %s1154_s13), 1  ;;  %v1168_v0 = vmov (!%p940_p8), 0.0  }
  0x11   : > { %s277_s19 = scalar_select %p276_p6, %s1150_s12, 3 }
  0x12   : > { %s1045_s20 = smul.u32 20, %s1317_s13  ;;  %s939_s21 = sshll.u32 %s1317_s13, 1  ;;  %318 = vst [vmem:[#allocation2] sm:$0xf] (!%p940_p8), %v1168_v0 }
  0x13   : > { %s1044_s22 = smul.u32 5, %s277_s19  ;;  %s1230_s25 = scalar_lea.vmem %s1305_s3, %s939_s21 }
  0x14   : > { %s290_s26 = scalar_select %p289_p7, %s1150_s12, 2 }
  0x15   : > { %s284_s27 = sadd.s32 %s1045_s20, %s1044_s22  ;;  %317 = sbr.rel (%p940_p8) target bundleno = 28 (0x1c), region = 36 }
  0x16   : > { %s937_s28 = sshll.u32 %s284_s27, 1  ;;  %s1046_s29 = smul.u32 288, %s290_s26 }
  0x17   : > { %s1236_s5 = scalar_lea.vmem %s1302_s0, %s937_s28 }
  0x18   : > { %s1241_s8 = scalar_lea.vmem %s1303_s1, %s1046_s29 }
  0x1c PF: > { %v1091_v1 = vld [vmem:[%s1241_s8 + $0x40] sm:$0xff]   ;;  %v1095_v5 = vld [vmem:[%s1241_s8 + $0x48] sm:$0xff]   ;;  %v1099_v9 = vld [vmem:[%s1241_s8 + $0x50] sm:$0xff]   ;;  %v400_v30 = vlaneseq  ;;  %v1169_v36 = vmov 1983009808   ;;  %v1170_v38 = vmov 0.0  }
  0x1d   : > { %v1092_v2 = vld [vmem:[%s1241_s8 + $0xc0] sm:$0xff]   ;;  %983 = vmatprep.subr.bf16.mxu0 %v1091_v1  ;;  %v1096_v6 = vld [vmem:[%s1241_s8 + $0xc8] sm:$0xff]   ;;  %v1100_v10 = vld [vmem:[%s1241_s8 + $0xd0] sm:$0xff]   ;;  %v398_v37 = vunpack.c.l.s4 %v1169_v36  ;;  %vm1171_vm0 = vmmov 0   ;;  %vm640_vm1 = vcmask 523264   ;;  %p979_p9 = scmp.ne.s32.totalorder %s1150_s12, 2 }
  0x1e   : > { %v1093_v3 = vld [vmem:[%s1241_s8] sm:$0xff]   ;;  %1005 = vmatprep.subr.bf16.mxu1 %v1092_v2  ;;  %v1097_v7 = vld [vmem:[%s1241_s8 + $0x8] sm:$0xff]   ;;  %v1101_v11 = vld [vmem:[%s1241_s8 + $0x10] sm:$0xff]   ;;  %v401_v35 = vshrl.u32 %v400_v30, 7 }
  0x1f   : > { %v1094_v4 = vld [vmem:[%s1241_s8 + $0x80] sm:$0xff]   ;;  %984 = vmatpush3.bf16.msra.mxu0 %v1093_v3  ;;  %v1098_v8 = vld [vmem:[%s1241_s8 + $0x88] sm:$0xff]   ;;  %v1102_v12 = vld [vmem:[%s1241_s8 + $0x90] sm:$0xff]   ;;  %v399_v39 = vunpack.c.0.s8 %v398_v37 }
  0x20   : > { %1006 = vmatpush3.bf16.msra.mxu1 %v1094_v4  ;;  %985 = vmatprep.subr.bf16.mxu0 %v1095_v5  ;;  %v1103_v13 = vld [vmem:[%s1241_s8 + $0x58] sm:$0xff]   ;;  %v1107_v17 = vld [vmem:[%s1241_s8 + $0x60] sm:$0xff]   ;;  %v1111_v21 = vld [vmem:[%s1241_s8 + $0x68] sm:$0xff]  }
  0x21   : > { %1007 = vmatprep.subr.bf16.mxu1 %v1096_v6  ;;  %v1104_v14 = vld [vmem:[%s1241_s8 + $0xd8] sm:$0xff]   ;;  %v1108_v18 = vld [vmem:[%s1241_s8 + $0xe0] sm:$0xff]   ;;  %v1112_v22 = vld [vmem:[%s1241_s8 + $0xe8] sm:$0xff]   ;;  %v402_v41 = vsub.s32 %v399_v39, %v401_v35 }
  0x22   : > { %v1105_v15 = vld [vmem:[%s1241_s8 + $0x18] sm:$0xff]   ;;  %v1109_v19 = vld [vmem:[%s1241_s8 + $0x20] sm:$0xff]   ;;  %v1113_v23 = vld [vmem:[%s1241_s8 + $0x28] sm:$0xff]  }
  0x23   : > { %986 = vmatpush3.bf16.msra.mxu0 %v1097_v7  ;;  %v1106_v16 = vld [vmem:[%s1241_s8 + $0x98] sm:$0xff]   ;;  %v1110_v20 = vld [vmem:[%s1241_s8 + $0xa0] sm:$0xff]   ;;  %v1114_v24 = vld [vmem:[%s1241_s8 + $0xa8] sm:$0xff]  }
  0x24   : > { %1008 = vmatpush3.bf16.msra.mxu1 %v1098_v8  ;;  %987 = vmatprep.subr.bf16.mxu0 %v1099_v9  ;;  %v1115_v25 = vld [vmem:[%s1241_s8 + $0x70] sm:$0xff]   ;;  %v1119_v29 = vld [vmem:[%s1241_s8 + $0x78] sm:$0xff]   ;;  %v320_v34 = vld [vmem:[%s1236_s5] sm:$0xff] }
  0x25   : > { %1009 = vmatprep.subr.bf16.mxu1 %v1100_v10  ;;  %v1116_v26 = vld [vmem:[%s1241_s8 + $0xf0] sm:$0xff]   ;;  %v1120_v31 = vld [vmem:[%s1241_s8 + $0xf8] sm:$0xff]   ;;  %v396_v40 = vcombine.high %v320_v34, %v320_v34  ;;  %v403_v42 = vrot.slane %v320_v34, %v402_v41  ;;  %v1124_v46 = vld [vmem:[%s1241_s8 + $0x100] sm:$0xff]  }
  0x26   : > { %v1117_v27 = vld [vmem:[%s1241_s8 + $0x30] sm:$0xff]   ;;  %v1121_v32 = vld [vmem:[%s1241_s8 + $0x38] sm:$0xff]   ;;  %v1125_v47 = vld [vmem:[%s1241_s8 + $0x108] sm:$0xff]  }
  0x27   : > { %988 = vmatpush3.bf16.msra.mxu0 %v1101_v11  ;;  %v1118_v28 = vld [vmem:[%s1241_s8 + $0xb0] sm:$0xff]   ;;  %v1122_v33 = vld [vmem:[%s1241_s8 + $0xb8] sm:$0xff]   ;;  %v410_v43 = vrot.slane %v396_v40, %v402_v41  ;;  %v411_v44 = vcombine.high %v403_v42, %v403_v42  ;;  %v941_v50 = vld.sshfl [vmem:[%s1236_s5 + $0x8] sm:$0x3 pattern:$0x76325410] }
  0x28   : > { %1010 = vmatpush3.bf16.msra.mxu1 %v1102_v12  ;;  %989 = vmatprep.subr.bf16.mxu0 %v1103_v13  ;;  %v1126_v48 = vld [vmem:[%s1241_s8 + $0x110] sm:$0xff]   ;;  %v1127_v49 = vld [vmem:[%s1241_s8 + $0x118] sm:$0xff]   ;;  %v980_v6 = vld [vmem:[%s1304_s2] ss:$0 sm:$0xff] (!%p979_p9) }
  0x29   : > { %1011 = vmatprep.subr.bf16.mxu1 %v1104_v14  ;;  %v412_v45 = vcombine.high %v410_v43, %v410_v43  ;;  %676 = vmatprep.mubr.bf16.mxu0 %v411_v44  ;;  %v319_v62 = vld [vmem:[#allocation2] sm:$0xf] }
  0x2b   : > { %990 = vmatpush3.bf16.msra.mxu0 %v1105_v15  ;;  %716 = vmatprep.mubr.bf16.mxu1 %v412_v45 }
  0x2c   : > { %1012 = vmatpush3.bf16.msra.mxu1 %v1106_v16  ;;  %991 = vmatprep.subr.bf16.mxu0 %v1107_v17 }
  0x2d   : > { %1013 = vmatprep.subr.bf16.mxu1 %v1108_v18 }
  0x2f   : > { %992 = vmatpush3.bf16.msra.mxu0 %v1109_v19 }
  0x30   : > { %1014 = vmatpush3.bf16.msra.mxu1 %v1110_v20  ;;  %993 = vmatprep.subr.bf16.mxu0 %v1111_v21 }
  0x31   : > { %1015 = vmatprep.subr.bf16.mxu1 %v1112_v22 }
  0x33   : > { %994 = vmatpush3.bf16.msra.mxu0 %v1113_v23 }
  0x34   : > { %1016 = vmatpush3.bf16.msra.mxu1 %v1114_v24  ;;  %995 = vmatprep.subr.bf16.mxu0 %v1115_v25 }
  0x35   : > { %1017 = vmatprep.subr.bf16.mxu1 %v1116_v26 }
  0x37   : > { %996 = vmatpush3.bf16.msra.mxu0 %v1117_v27 }
  0x38   : > { %1018 = vmatpush3.bf16.msra.mxu1 %v1118_v28  ;;  %997 = vmatprep.subr.bf16.mxu0 %v1119_v29 }
  0x39   : > { %1019 = vmatprep.subr.bf16.mxu1 %v1120_v31 }
  0x3b   : > { %998 = vmatpush3.bf16.msra.mxu0 %v1121_v32 }
  0x3c   : > { %1020 = vmatpush3.bf16.msra.mxu1 %v1122_v33  ;;  %1032 = vmatprep.subr.bf16.mxu0 %v1170_v38 }
  0x3e   : > { %677 = vmatmul.mubr.bf16.vlgmr.msra.gmra.mrb[0].mxu0 %v403_v42 }
  0x3f   : > { %717 = vmatmul.mubr.bf16.vlgmr.msra.gmra.mrb[0].mxu1 %v410_v43  ;;  %1033 = vmatpush3.bf16.msra.mxu0 %v1124_v46 }
  0x40   : > { %1040 = vmatprep.mubr.msk.bf16.mxu0 %vm1171_vm0, %v1170_v38  ;;  %1034 = vmatprep.subr.bf16.mxu0 %v1170_v38 }
  0x43   : > { %1035 = vmatpush3.bf16.msra.mxu0 %v1125_v47 }
  0x44   : > { %1036 = vmatprep.subr.bf16.mxu0 %v1170_v38 }
  0x47   : > { %1037 = vmatpush3.bf16.msra.mxu0 %v1126_v48 }
  0x48   : > { %1038 = vmatprep.subr.bf16.mxu0 %v1170_v38 }
  0x4b   : > { %1039 = vmatpush3.bf16.msra.mxu0 %v1127_v49 }
  0x4e   : > { %1041 = vmatmul.mubr.msk.bf16.vlgmr.msra.gmra.mrb[4].mxu0 %vm640_vm1, %v941_v50 }
 0x111   : > { %v999_v51 = vpop.f32.mrb[0].mxu0 }
 0x112   : > { %v1021_v52 = vpop.f32.mrb[0].mxu1  ;;  %v1000_v53 = vpop.f32.mrb[1].mxu0 }
 0x113   : > { %v1022_v54 = vpop.f32.mrb[1].mxu1  ;;  %v1001_v55 = vadd.f32 %v1000_v53, %v999_v51  ;;  %v1002_v57 = vpop.f32.mrb[2].mxu0 }
 0x114   : > { %v1023_v56 = vadd.f32 %v1022_v54, %v1021_v52  ;;  %v1024_v58 = vpop.f32.mrb[2].mxu1  ;;  %v1003_v59 = vpop.f32.mrb[3].mxu0 }
 0x115   : > { %v1025_v60 = vpop.f32.mrb[3].mxu1 }
 0x116   : > { %v719_v61 = vadd.f32 %v1023_v56, %v1001_v55 }
 0x120   : > { %769 = sbr.rel (%p979_p9) target bundleno = 309 (0x135), region = 40 }
 0x121   : > { %v758_v63 = vpop.f32.mrb[4].mxu0 }
 0x122   : > { %v759_v0 = vadd.f32 %v758_v63, %v719_v61  ;;  %v1042_v1 = vpop.f32.mrb[5].mxu0 }
 0x123   : > { %v761_v2 = vpop.f32.mrb[6].mxu0 }
 0x124   : > { %v764_v3 = vadd.f32 %v759_v0, %v319_v62  ;;  %v1043_v4 = vpop.f32.mrb[7].mxu0 }
 0x126   : > { %765 = vst [vmem:[#allocation2] sm:$0xf] %v764_v3 }
 0x12d   : > { %v770_v5 = vld [vmem:[#allocation2] sm:$0xf] }
 0x12e   : > { %v778_v7 = vadd.f32 %v980_v6, %v770_v5 }
 0x130   : > { %v779_v8 = vmax.f32 %v778_v7, 0.0 }
 0x132   : > { %v780_v9 = vpack.c.bf16 %v779_v8, %v779_v8 }
 0x134   : > { %781 = vst [vmem:[%s1230_s25] sm:$0x3] %v780_v9 }
 0x135 PF: > { %s13_s16 = sadd.s32 1, %s1166_s16   ;;  %s1306_s12 = smov %s1158_s14 }
 0x136   : > { %p10_p10 = scmp.ge.s32.totalorder %s13_s16, 8   ;;  %s1307_s13 = smov %s1162_s15 }
 0x137   : > { %s1308_s14 = smov %s1311_s17  ;;  %s1309_s15 = smov %s1315_s18 }
 0x138   :  { %12 = sbr.rel (!%p10_p10) target bundleno = 3 (0x3), region = 76 }

// kernel: medicalnet_encoder_forward.22
= control target key start
LH: loop header
LB: loop body
LE: loop exit
PB: predicated region body
PF: predicated region fallthrough
CT: control target
= control target key end

     0   :  { %v134_v0 = vmov 0.0   ;;  %vm135_vm0 = vmmov 0   ;;  %vm55_vm1 = vcmask 523264   ;;  %s177_s1 = inlined_call_operand.vmem [shape: bf16[64,128], index: 1, kind: input, shape index: {}]   ;;  %s178_s0 = inlined_call_operand.vmem [shape: bf16[8,64], index: 0, kind: input, shape index: {}]   ;;  %s179_s2 = inlined_call_operand.vmem [shape: f32[1,128], index: 2, kind: input, shape index: {}]   ;;  %s180_s3 = inlined_call_operand.vmem [shape: bf16[8,128], index: 3, kind: output, shape index: {}]  }
   0x1   :  { %116 = vmatprep.subr.bf16.mxu0 %v134_v0  ;;  %v130_v1 = vld [vmem:[%s177_s1] sm:$0xff]   ;;  %124 = vmatprep.mubr.msk.bf16.mxu0 %vm135_vm0, %v134_v0  ;;  %v131_v2 = vld [vmem:[%s177_s1 + $0x8] sm:$0xff]   ;;  %v132_v3 = vld [vmem:[%s177_s1 + $0x10] sm:$0xff]  }
   0x2   :  { %117 = vmatpush3.bf16.msra.mxu0 %v130_v1  ;;  %v133_v4 = vld [vmem:[%s177_s1 + $0x18] sm:$0xff]   ;;  %v15_v5 = vld [vmem:[%s178_s0] sm:$0xf] }
   0x3   :  { %118 = vmatprep.subr.bf16.mxu0 %v134_v0  ;;  %v105_v6 = vld [vmem:[%s179_s2] ss:$0 sm:$0xff] }
   0x6   :  { %119 = vmatpush3.bf16.msra.mxu0 %v131_v2 }
   0x7   :  { %120 = vmatprep.subr.bf16.mxu0 %v134_v0 }
   0xa   :  { %121 = vmatpush3.bf16.msra.mxu0 %v132_v3 }
   0xb   :  { %122 = vmatprep.subr.bf16.mxu0 %v134_v0 }
   0xe   :  { %123 = vmatpush3.bf16.msra.mxu0 %v133_v4 }
  0x11   :  { %125 = vmatmul.mubr.msk.bf16.vlgmr.msra.gmra.mrb[0].mxu0 %vm55_vm1, %v15_v5 }
  0xe4   :  { %v93_v7 = vpop.f32.mrb[0].mxu0 }
  0xe5   :  { %v94_v8 = vadd.f32 %v105_v6, %v93_v7  ;;  %v126_v9 = vpop.f32.mrb[1].mxu0 }
  0xe6   :  { %v96_v10 = vpop.f32.mrb[2].mxu0 }
  0xe7   :  { %v99_v11 = vpack.c.bf16 %v94_v8, %v94_v8  ;;  %v127_v12 = vpop.f32.mrb[3].mxu0 }
  0xe9   :  { %100 = vst [vmem:[%s180_s3] sm:$0xf] %v99_v11 }

// kernel: medicalnet_encoder_forward.24
= control target key start
LH: loop header
LB: loop body
LE: loop exit
PB: predicated region body
PF: predicated region fallthrough
CT: control target
= control target key end

     0   :  { %s1808_s15 = smov 0   ;;  %s1810_s16 = smov 0   ;;  %s1965_s0 = inlined_call_operand.vmem [shape: bf16[2,3,4,1152], index: 0, kind: input, shape index: {}]   ;;  %s1966_s1 = inlined_call_operand.vmem [shape: bf16[3,1152,128], index: 1, kind: input, shape index: {}]   ;;  %s1967_s2 = inlined_call_operand.vmem [shape: f32[1,128], index: 2, kind: input, shape index: {}]   ;;  %s1968_s3 = inlined_call_operand.vmem [shape: bf16[2,1,4,128], index: 3, kind: input, shape index: {}]   ;;  %s1969_s4 = inlined_call_operand.vmem [shape: bf16[2,1,4,128], index: 4, kind: output, shape index: {}]  }
   0x1   :  { %s1812_s17 = smov 0   ;;  %s1814_s18 = smov 0  }
   0x2   :  { %s1816_s19 = smov 0  }
   0x3 LB: > { %s32_s20 = sadd.s32 1, %s1769_s17  ;;  %s47_s21 = sadd.s32 1, %s1773_s18  ;;  %s1777_s19 = sphi %s1816_s19, %s14_s19   ;;  %s1773_s18 = sphi %s1814_s18, %s1973_s18   ;;  %s1769_s17 = sphi %s1812_s17, %s1972_s17   ;;  %s1765_s16 = sphi %s1810_s16, %s1971_s16   ;;  %s1761_s15 = sphi %s1808_s15, %s1970_s15  }
   0x4   : > { %p33_p0 = scmp.ge.s32.totalorder %s32_s20, 3  ;;  %p1418_p1 = scmp.ge.s32.totalorder %s1777_s19, 1 }
   0x5   : > { %p264_p2 = scmp.lt.s32.totalorder %s1777_s19, 7 }
   0x6   : > { %s1975_s20 = smov (%p33_p0, %s32_s20), 0  ;;  %s1977_s21 = smov (!%p33_p0, %s47_s21), %s1773_s18 }
   0x7   : > { %p265_p3 = pnand %p1418_p1, %p264_p2  ;;  %p49_p4 = scmp.ge.s32.totalorder %s1977_s21, 2 }
   0x8   : > { %p332_p5 = scmp.lt.s32.totalorder (!%p265_p3), %s1765_s16, 1  ;;  %p334_p6 = scmp.lt.s32.totalorder (!%p265_p3), %s1761_s15, 2 }
   0x9   : > { %s1979_s21 = smov (%p49_p4, %s1977_s21), 0  ;;  %268 = sbr.rel (%p265_p3) target bundleno = 359 (0x167), region = 36 }
   0xa   : > { %p1423_p7 = scmp.ne.s32.totalorder (!%p265_p3), %s1761_s15, 0 }
  0x10   : > { %s1981_s16 = smov (!%p332_p5, %s1765_s16), 1  ;;  %v1779_v0 = vmov (!%p1423_p7), 0.0  }
  0x11   : > { %s335_s22 = scalar_select %p334_p6, %s1761_s15, 2 }
  0x12   : > { %s1619_s23 = smul.u32 27, %s1981_s16  ;;  %s1421_s24 = sshll.u32 %s1981_s16, 1  ;;  %388 = vst [vmem:[#allocation2] sm:$0xf] (!%p1423_p7), %v1779_v0 }
  0x13   : > { %s1618_s25 = smul.u32 9, %s335_s22  ;;  %s1845_s28 = scalar_lea.vmem %s1968_s3, %s1421_s24 }
  0x14   : > { %s1620_s29 = smul.u32 576, %s335_s22  ;;  %s1850_s6 = scalar_lea.vmem %s1969_s4, %s1421_s24 }
  0x15   : > { %s342_s7 = sadd.s32 %s1619_s23, %s1618_s25  ;;  %387 = sbr.rel (%p1423_p7) target bundleno = 28 (0x1c), region = 40 }
  0x16   : > { %s1419_s8 = sshll.u32 %s342_s7, 1  ;;  %s1855_s11 = scalar_lea.vmem %s1966_s1, %s1620_s29 }
  0x17   : > { %s1860_s14 = scalar_lea.vmem %s1965_s0, %s1419_s8 }
  0x1c PF: > { %v1665_v1 = vld [vmem:[%s1855_s11 + $0x40] sm:$0xff]   ;;  %v1669_v5 = vld [vmem:[%s1855_s11 + $0x48] sm:$0xff]   ;;  %v1673_v9 = vld [vmem:[%s1855_s11 + $0x50] sm:$0xff]   ;;  %v544_v29 = vlaneseq  ;;  %v1780_v37 = vmov 1983009808   ;;  %vm1782_vm0 = vmmov 0  }
  0x1d   : > { %v1666_v2 = vld [vmem:[%s1855_s11 + $0xc0] sm:$0xff]   ;;  %1501 = vmatprep.subr.bf16.mxu0 %v1665_v1  ;;  %v1670_v6 = vld [vmem:[%s1855_s11 + $0xc8] sm:$0xff]   ;;  %v1674_v10 = vld [vmem:[%s1855_s11 + $0xd0] sm:$0xff]   ;;  %v542_v38 = vunpack.c.l.s4 %v1780_v37  ;;  %p1497_p8 = scmp.ne.s32.totalorder %s1761_s15, 2 }
  0x1e   : > { %v1667_v3 = vld [vmem:[%s1855_s11] sm:$0xff]   ;;  %1523 = vmatprep.subr.bf16.mxu1 %v1666_v2  ;;  %v1671_v7 = vld [vmem:[%s1855_s11 + $0x8] sm:$0xff]   ;;  %v1675_v11 = vld [vmem:[%s1855_s11 + $0x10] sm:$0xff]   ;;  %v545_v34 = vshrl.u32 %v544_v29, 7 }
  0x1f   : > { %v1668_v4 = vld [vmem:[%s1855_s11 + $0x80] sm:$0xff]   ;;  %1502 = vmatpush3.bf16.msra.mxu0 %v1667_v3  ;;  %v1672_v8 = vld [vmem:[%s1855_s11 + $0x88] sm:$0xff]   ;;  %v1676_v12 = vld [vmem:[%s1855_s11 + $0x90] sm:$0xff]   ;;  %v543_v39 = vunpack.c.0.s8 %v542_v38 }
  0x20   : > { %1524 = vmatpush3.bf16.msra.mxu1 %v1668_v4  ;;  %1503 = vmatprep.subr.bf16.mxu0 %v1669_v5  ;;  %v1677_v13 = vld [vmem:[%s1855_s11 + $0x58] sm:$0xff]   ;;  %v1681_v17 = vld [vmem:[%s1855_s11 + $0x60] sm:$0xff]   ;;  %v1685_v21 = vld [vmem:[%s1855_s11 + $0x68] sm:$0xff]  }
  0x21   : > { %1525 = vmatprep.subr.bf16.mxu1 %v1670_v6  ;;  %v1678_v14 = vld [vmem:[%s1855_s11 + $0xd8] sm:$0xff]   ;;  %v1682_v18 = vld [vmem:[%s1855_s11 + $0xe0] sm:$0xff]   ;;  %v1686_v22 = vld [vmem:[%s1855_s11 + $0xe8] sm:$0xff]   ;;  %v1898_v42 = vsub.s32 %v543_v39, %v545_v34 }
  0x22   : > { %v1679_v15 = vld [vmem:[%s1855_s11 + $0x18] sm:$0xff]   ;;  %v1683_v19 = vld [vmem:[%s1855_s11 + $0x20] sm:$0xff]   ;;  %v1687_v23 = vld [vmem:[%s1855_s11 + $0x28] sm:$0xff]  }
  0x23   : > { %1504 = vmatpush3.bf16.msra.mxu0 %v1671_v7  ;;  %v1680_v16 = vld [vmem:[%s1855_s11 + $0x98] sm:$0xff]   ;;  %v1684_v20 = vld [vmem:[%s1855_s11 + $0xa0] sm:$0xff]   ;;  %v1688_v24 = vld [vmem:[%s1855_s11 + $0xa8] sm:$0xff]  }
  0x24   : > { %1526 = vmatpush3.bf16.msra.mxu1 %v1672_v8  ;;  %1505 = vmatprep.subr.bf16.mxu0 %v1673_v9  ;;  %v1689_v25 = vld [vmem:[%s1855_s11 + $0x70] sm:$0xff]   ;;  %v1693_v30 = vld [vmem:[%s1855_s11 + $0x78] sm:$0xff]   ;;  %v390_v35 = vld [vmem:[%s1860_s14] sm:$0xff] }
  0x25   : > { %1527 = vmatprep.subr.bf16.mxu1 %v1674_v10  ;;  %v1690_v26 = vld [vmem:[%s1855_s11 + $0xf0] sm:$0xff]   ;;  %v1694_v31 = vld [vmem:[%s1855_s11 + $0xf8] sm:$0xff]   ;;  %v1698_v36 = vld [vmem:[%s1855_s11 + $0x140] sm:$0xff]   ;;  %v540_v40 = vcombine.high %v390_v35, %v390_v35  ;;  %v547_v43 = vrot.slane %v390_v35, %v1898_v42 }
  0x26   : > { %v1691_v27 = vld [vmem:[%s1855_s11 + $0x30] sm:$0xff]   ;;  %v1695_v32 = vld [vmem:[%s1855_s11 + $0x38] sm:$0xff]   ;;  %v1700_v41 = vld [vmem:[%s1855_s11 + $0x1c0] sm:$0xff]  }
  0x27   : > { %1506 = vmatpush3.bf16.msra.mxu0 %v1675_v11  ;;  %v1692_v28 = vld [vmem:[%s1855_s11 + $0xb0] sm:$0xff]   ;;  %v1696_v33 = vld [vmem:[%s1855_s11 + $0xb8] sm:$0xff]   ;;  %v554_v44 = vrot.slane %v540_v40, %v1898_v42  ;;  %v1699_v45 = vld [vmem:[%s1855_s11 + $0x100] sm:$0xff]   ;;  %v555_v47 = vcombine.high %v547_v43, %v547_v43 }
  0x28   : > { %1528 = vmatpush3.bf16.msra.mxu1 %v1676_v12  ;;  %1507 = vmatprep.subr.bf16.mxu0 %v1677_v13  ;;  %v1701_v46 = vld [vmem:[%s1855_s11 + $0x180] sm:$0xff]   ;;  %v1702_v49 = vld [vmem:[%s1855_s11 + $0x148] sm:$0xff]   ;;  %v1706_v53 = vld [vmem:[%s1855_s11 + $0x150] sm:$0xff]  }
  0x29   : > { %1529 = vmatprep.subr.bf16.mxu1 %v1678_v14  ;;  %v556_v48 = vcombine.high %v554_v44, %v554_v44  ;;  %v1704_v50 = vld [vmem:[%s1855_s11 + $0x1c8] sm:$0xff]   ;;  %1054 = vmatprep.mubr.bf16.mxu0 %v555_v47  ;;  %v1708_v54 = vld [vmem:[%s1855_s11 + $0x1d0] sm:$0xff]   ;;  %v1710_v57 = vld [vmem:[%s1855_s11 + $0x158] sm:$0xff]  }
  0x2a   : > { %v1703_v51 = vld [vmem:[%s1855_s11 + $0x108] sm:$0xff]   ;;  %v1707_v55 = vld [vmem:[%s1855_s11 + $0x110] sm:$0xff]   ;;  %v1712_v58 = vld [vmem:[%s1855_s11 + $0x1d8] sm:$0xff]  }
  0x2b   : > { %1508 = vmatpush3.bf16.msra.mxu0 %v1679_v15  ;;  %1094 = vmatprep.mubr.bf16.mxu1 %v556_v48  ;;  %v1705_v52 = vld [vmem:[%s1855_s11 + $0x188] sm:$0xff]   ;;  %v1709_v56 = vld [vmem:[%s1855_s11 + $0x190] sm:$0xff]   ;;  %v1711_v59 = vld [vmem:[%s1855_s11 + $0x118] sm:$0xff]  }
  0x2c   : > { %1530 = vmatpush3.bf16.msra.mxu1 %v1680_v16  ;;  %1509 = vmatprep.subr.bf16.mxu0 %v1681_v17  ;;  %v1713_v60 = vld [vmem:[%s1855_s11 + $0x198] sm:$0xff]   ;;  %v1714_v61 = vld [vmem:[%s1855_s11 + $0x160] sm:$0xff]   ;;  %v1718_v1 = vld [vmem:[%s1855_s11 + $0x168] sm:$0xff]  }
  0x2d   : > { %1531 = vmatprep.subr.bf16.mxu1 %v1682_v18  ;;  %v1716_v62 = vld [vmem:[%s1855_s11 + $0x1e0] sm:$0xff]   ;;  %v1720_v2 = vld [vmem:[%s1855_s11 + $0x1e8] sm:$0xff]   ;;  %v1722_v5 = vld [vmem:[%s1855_s11 + $0x170] sm:$0xff]  }
  0x2e   : > { %v1715_v63 = vld [vmem:[%s1855_s11 + $0x120] sm:$0xff]   ;;  %v1719_v3 = vld [vmem:[%s1855_s11 + $0x128] sm:$0xff]   ;;  %v1724_v6 = vld [vmem:[%s1855_s11 + $0x1f0] sm:$0xff]  }
  0x2f   : > { %1510 = vmatpush3.bf16.msra.mxu0 %v1683_v19  ;;  %v1717_v0 = vld [vmem:[%s1855_s11 + $0x1a0] sm:$0xff]   ;;  %v1721_v4 = vld [vmem:[%s1855_s11 + $0x1a8] sm:$0xff]   ;;  %v1723_v7 = vld [vmem:[%s1855_s11 + $0x130] sm:$0xff]  }
  0x30   : > { %1532 = vmatpush3.bf16.msra.mxu1 %v1684_v20  ;;  %1511 = vmatprep.subr.bf16.mxu0 %v1685_v21  ;;  %v391_v8 = vld [vmem:[%s1860_s14 + $0x8] sm:$0xff]  ;;  %v1725_v9 = vld [vmem:[%s1855_s11 + $0x1b0] sm:$0xff]   ;;  %v1726_v12 = vld [vmem:[%s1855_s11 + $0x178] sm:$0xff]   ;;  %v1781_v20 = vmov 0.0  }
  0x31   : > { %1533 = vmatprep.subr.bf16.mxu1 %v1686_v22  ;;  %v564_v10 = vrot.slane %v391_v8, %v1898_v42  ;;  %v557_v11 = vcombine.high %v391_v8, %v391_v8  ;;  %v1728_v13 = vld [vmem:[%s1855_s11 + $0x1f8] sm:$0xff]   ;;  %v1731_v19 = vld [vmem:[%s1855_s11 + $0x200] sm:$0xff]   ;;  %v1732_v21 = vld [vmem:[%s1855_s11 + $0x208] sm:$0xff]  }
  0x32   : > { %v1727_v16 = vld [vmem:[%s1855_s11 + $0x138] sm:$0xff]   ;;  %v1733_v22 = vld [vmem:[%s1855_s11 + $0x210] sm:$0xff]  }
  0x33   : > { %1512 = vmatpush3.bf16.msra.mxu0 %v1687_v23  ;;  %v572_v14 = vcombine.high %v564_v10, %v564_v10  ;;  %v571_v15 = vrot.slane %v557_v11, %v1898_v42  ;;  %v1729_v18 = vld [vmem:[%s1855_s11 + $0x1b8] sm:$0xff]  }
  0x34   : > { %1534 = vmatpush3.bf16.msra.mxu1 %v1688_v24  ;;  %1513 = vmatprep.subr.bf16.mxu0 %v1689_v25  ;;  %v1734_v23 = vld [vmem:[%s1855_s11 + $0x218] sm:$0xff]   ;;  %v1735_v24 = vld [vmem:[%s1855_s11 + $0x220] sm:$0xff]   ;;  %v1736_v25 = vld [vmem:[%s1855_s11 + $0x228] sm:$0xff]  }
  0x35   : > { %1535 = vmatprep.subr.bf16.mxu1 %v1690_v26  ;;  %v573_v17 = vcombine.high %v571_v15, %v571_v15  ;;  %v1737_v26 = vld [vmem:[%s1855_s11 + $0x230] sm:$0xff]  }
  0x37   : > { %1514 = vmatpush3.bf16.msra.mxu0 %v1691_v27  ;;  %v1738_v27 = vld [vmem:[%s1855_s11 + $0x238] sm:$0xff]  }
  0x38   : > { %1536 = vmatpush3.bf16.msra.mxu1 %v1692_v28  ;;  %1515 = vmatprep.subr.bf16.mxu0 %v1693_v30  ;;  %v1424_v28 = vld.sshfl [vmem:[%s1860_s14 + $0x10] sm:$0x3 pattern:$0x76325410] }
  0x39   : > { %1537 = vmatprep.subr.bf16.mxu1 %v1694_v31 }
  0x3b   : > { %1516 = vmatpush3.bf16.msra.mxu0 %v1695_v32 }
  0x3c   : > { %1538 = vmatpush3.bf16.msra.mxu1 %v1696_v33  ;;  %1545 = vmatprep.subr.bf16.mxu0 %v1698_v36 }
  0x3d   : > { %1567 = vmatprep.subr.bf16.mxu1 %v1700_v41 }
  0x3e   : > { %1055 = vmatmul.mubr.bf16.vlgmr.msra.gmra.mrb[0].mxu0 %v547_v43 }
  0x3f   : > { %1095 = vmatmul.mubr.bf16.vlgmr.msra.gmra.mrb[0].mxu1 %v554_v44  ;;  %1546 = vmatpush3.bf16.msra.mxu0 %v1699_v45 }
  0x40   : > { %1568 = vmatpush3.bf16.msra.mxu1 %v1701_v46  ;;  %1547 = vmatprep.subr.bf16.mxu0 %v1702_v49 }
  0x41   : > { %1569 = vmatprep.subr.bf16.mxu1 %v1704_v50  ;;  %1134 = vmatprep.mubr.bf16.mxu0 %v572_v14 }
  0x42   : > { %1174 = vmatprep.mubr.bf16.mxu1 %v573_v17 }
  0x43   : > { %1548 = vmatpush3.bf16.msra.mxu0 %v1703_v51 }
  0x44   : > { %1570 = vmatpush3.bf16.msra.mxu1 %v1705_v52  ;;  %1549 = vmatprep.subr.bf16.mxu0 %v1706_v53  ;;  %v389_v52 = vld [vmem:[#allocation2] sm:$0xf] }
  0x45   : > { %1571 = vmatprep.subr.bf16.mxu1 %v1708_v54 }
  0x47   : > { %1550 = vmatpush3.bf16.msra.mxu0 %v1707_v55 }
  0x48   : > { %1572 = vmatpush3.bf16.msra.mxu1 %v1709_v56  ;;  %1551 = vmatprep.subr.bf16.mxu0 %v1710_v57 }
  0x49   : > { %1573 = vmatprep.subr.bf16.mxu1 %v1712_v58 }
  0x4b   : > { %1552 = vmatpush3.bf16.msra.mxu0 %v1711_v59 }
  0x4c   : > { %1574 = vmatpush3.bf16.msra.mxu1 %v1713_v60  ;;  %1553 = vmatprep.subr.bf16.mxu0 %v1714_v61  ;;  %v1498_v60 = vld [vmem:[%s1967_s2] ss:$0 sm:$0xff] (!%p1497_p8) }
  0x4d   : > { %1575 = vmatprep.subr.bf16.mxu1 %v1716_v62  ;;  %v1237_v61 = vld [vmem:[%s1845_s28] sm:$0x3] (!%p1497_p8) }
  0x4f   : > { %1554 = vmatpush3.bf16.msra.mxu0 %v1715_v63  ;;  %v1238_v63 = vunpack.c.l.bf16 (!%p1497_p8), %v1237_v61 }
  0x50   : > { %1576 = vmatpush3.bf16.msra.mxu1 %v1717_v0  ;;  %1555 = vmatprep.subr.bf16.mxu0 %v1718_v1 }
  0x51   : > { %1577 = vmatprep.subr.bf16.mxu1 %v1720_v2 }
  0x53   : > { %1556 = vmatpush3.bf16.msra.mxu0 %v1719_v3 }
  0x54   : > { %1578 = vmatpush3.bf16.msra.mxu1 %v1721_v4  ;;  %1557 = vmatprep.subr.bf16.mxu0 %v1722_v5 }
  0x55   : > { %1579 = vmatprep.subr.bf16.mxu1 %v1724_v6 }
  0x57   : > { %1558 = vmatpush3.bf16.msra.mxu0 %v1723_v7 }
  0x58   : > { %1580 = vmatpush3.bf16.msra.mxu1 %v1725_v9  ;;  %1559 = vmatprep.subr.bf16.mxu0 %v1726_v12 }
  0x59   : > { %1581 = vmatprep.subr.bf16.mxu1 %v1728_v13 }
  0x5b   : > { %1560 = vmatpush3.bf16.msra.mxu0 %v1727_v16 }
  0x5c   : > { %1582 = vmatpush3.bf16.msra.mxu1 %v1729_v18  ;;  %1598 = vmatprep.subr.bf16.mxu0 %v1781_v20 }
  0x5e   : > { %1135 = vmatmul.mubr.bf16.vlgmr.msra.gmra.mrb[4].mxu0 %v564_v10 }
  0x5f   : > { %1175 = vmatmul.mubr.bf16.vlgmr.msra.gmra.mrb[4].mxu1 %v571_v15  ;;  %1599 = vmatpush3.bf16.msra.mxu0 %v1731_v19 }
  0x60   : > { %1614 = vmatprep.mubr.msk.bf16.mxu0 %vm1782_vm0, %v1781_v20  ;;  %1600 = vmatprep.subr.bf16.mxu0 %v1781_v20 }
  0x63   : > { %1601 = vmatpush3.bf16.msra.mxu0 %v1732_v21 }
  0x64   : > { %1602 = vmatprep.subr.bf16.mxu0 %v1781_v20 }
  0x67   : > { %1603 = vmatpush3.bf16.msra.mxu0 %v1733_v22 }
  0x68   : > { %1604 = vmatprep.subr.bf16.mxu0 %v1781_v20 }
  0x6b   : > { %1605 = vmatpush3.bf16.msra.mxu0 %v1734_v23 }
  0x6c   : > { %1606 = vmatprep.subr.bf16.mxu0 %v1781_v20 }
  0x6f   : > { %1607 = vmatpush3.bf16.msra.mxu0 %v1735_v24 }
  0x70   : > { %1608 = vmatprep.subr.bf16.mxu0 %v1781_v20 }
  0x73   : > { %1609 = vmatpush3.bf16.msra.mxu0 %v1736_v25 }
  0x74   : > { %1610 = vmatprep.subr.bf16.mxu0 %v1781_v20 }
  0x77   : > { %1611 = vmatpush3.bf16.msra.mxu0 %v1737_v26 }
  0x78   : > { %1612 = vmatprep.subr.bf16.mxu0 %v1781_v20 }
  0x7b   : > { %1613 = vmatpush3.bf16.msra.mxu0 %v1738_v27 }
  0x7e   : > { %1615 = vmatmul.mubr.bf16.vlgmr.msra.gmra.mrb[8].mxu0 %v1424_v28 }
 0x111   : > { %v1517_v29 = vpop.f32.mrb[0].mxu0 }
 0x112   : > { %v1539_v30 = vpop.f32.mrb[0].mxu1  ;;  %v1518_v31 = vpop.f32.mrb[1].mxu0 }
 0x113   : > { %v1540_v32 = vpop.f32.mrb[1].mxu1  ;;  %v1519_v33 = vadd.f32 %v1518_v31, %v1517_v29  ;;  %v1520_v35 = vpop.f32.mrb[2].mxu0 }
 0x114   : > { %v1541_v34 = vadd.f32 %v1540_v32, %v1539_v30  ;;  %v1542_v36 = vpop.f32.mrb[2].mxu1  ;;  %v1521_v37 = vpop.f32.mrb[3].mxu0 }
 0x115   : > { %v1543_v38 = vpop.f32.mrb[3].mxu1 }
 0x116   : > { %v1097_v39 = vadd.f32 %v1541_v34, %v1519_v33 }
 0x131   : > { %v1561_v40 = vpop.f32.mrb[4].mxu0 }
 0x132   : > { %v1583_v41 = vpop.f32.mrb[4].mxu1  ;;  %v1562_v42 = vpop.f32.mrb[5].mxu0 }
 0x133   : > { %v1584_v43 = vpop.f32.mrb[5].mxu1  ;;  %v1563_v44 = vadd.f32 %v1562_v42, %v1561_v40  ;;  %v1564_v45 = vpop.f32.mrb[6].mxu0 }
 0x134   : > { %v1585_v46 = vadd.f32 %v1584_v43, %v1583_v41  ;;  %v1586_v47 = vpop.f32.mrb[6].mxu1  ;;  %v1565_v48 = vpop.f32.mrb[7].mxu0 }
 0x135   : > { %v1587_v49 = vpop.f32.mrb[7].mxu1  ;;  %v1137_v50 = vadd.f32 %v1563_v44, %v1097_v39 }
 0x137   : > { %v1177_v51 = vadd.f32 %v1585_v46, %v1137_v50 }
 0x150   : > { %1227 = sbr.rel (%p1497_p8) target bundleno = 359 (0x167), region = 44 }
 0x151   : > { %v1216_v53 = vpop.f32.mrb[8].mxu0 }
 0x152   : > { %v1217_v54 = vadd.f32 %v1216_v53, %v1177_v51  ;;  %v1616_v55 = vpop.f32.mrb[9].mxu0 }
 0x153   : > { %v1219_v56 = vpop.f32.mrb[10].mxu0 }
 0x154   : > { %v1222_v57 = vadd.f32 %v1217_v54, %v389_v52  ;;  %v1617_v58 = vpop.f32.mrb[11].mxu0 }
 0x156   : > { %1223 = vst [vmem:[#allocation2] sm:$0xf] %v1222_v57 }
 0x15d   : > { %v1228_v59 = vld [vmem:[#allocation2] sm:$0xf] }
 0x15e   : > { %v1236_v62 = vadd.f32 %v1498_v60, %v1228_v59 }
 0x160   : > { %v1239_v0 = vadd.f32 %v1238_v63, %v1236_v62 }
 0x162   : > { %v1240_v1 = vmax.f32 %v1239_v0, 0.0 }
 0x164   : > { %v1241_v2 = vpack.c.bf16 %v1240_v1, %v1240_v1 }
 0x166   : > { %1242 = vst [vmem:[%s1850_s6] sm:$0x3] %v1241_v2 }
 0x167 PF: > { %s14_s19 = sadd.s32 1, %s1777_s19   ;;  %s1970_s15 = smov %s1769_s17 }
 0x168   : > { %p11_p9 = scmp.ge.s32.totalorder %s14_s19, 8   ;;  %s1971_s16 = smov %s1773_s18 }
 0x169   : > { %s1972_s17 = smov %s1975_s20  ;;  %s1973_s18 = smov %s1979_s21 }
 0x16a   :  { %13 = sbr.rel (!%p11_p9) target bundleno = 3 (0x3), region = 83 }

// kernel: medicalnet_encoder_forward.26
= control target key start
LH: loop header
LB: loop body
LE: loop exit
PB: predicated region body
PF: predicated region fallthrough
CT: control target
= control target key end

     0   :  { %s2215_s12 = smov 0   ;;  %s2217_s13 = smov 0   ;;  %s2462_s0 = inlined_call_operand.vmem [shape: bf16[2,3,1,1152], index: 0, kind: input, shape index: {}]   ;;  %s2463_s1 = inlined_call_operand.vmem [shape: bf16[3,1152,256], index: 1, kind: input, shape index: {}]   ;;  %s2464_s2 = inlined_call_operand.vmem [shape: f32[1,256], index: 2, kind: input, shape index: {}]   ;;  %s2465_s3 = inlined_call_operand.vmem [shape: bf16[2,1,1,256], index: 3, kind: output, shape index: {}]  }
   0x1   :  { %s2219_s14 = smov 0   ;;  %s2221_s15 = smov 0  }
   0x2   :  { %s2223_s16 = smov 0  }
   0x3 LB: > { %s31_s17 = sadd.s32 1, %s2182_s14  ;;  %s46_s18 = sadd.s32 1, %s2186_s15  ;;  %s2190_s16 = sphi %s2223_s16, %s13_s16   ;;  %s2186_s15 = sphi %s2221_s15, %s2469_s15   ;;  %s2182_s14 = sphi %s2219_s14, %s2468_s14   ;;  %s2178_s13 = sphi %s2217_s13, %s2467_s13   ;;  %s2174_s12 = sphi %s2215_s12, %s2466_s12  }
   0x4   : > { %p32_p0 = scmp.ge.s32.totalorder %s31_s17, 3  ;;  %p1722_p1 = scmp.ge.s32.totalorder %s2190_s16, 1 }
   0x5   : > { %p222_p2 = scmp.lt.s32.totalorder %s2190_s16, 7 }
   0x6   : > { %s2471_s17 = smov (%p32_p0, %s31_s17), 0  ;;  %s2473_s18 = smov (!%p32_p0, %s46_s18), %s2186_s15 }
   0x7   : > { %p223_p3 = pnand %p1722_p1, %p222_p2  ;;  %p48_p4 = scmp.ge.s32.totalorder %s2473_s18, 2 }
   0x8   : > { %p281_p5 = scmp.lt.s32.totalorder (!%p223_p3), %s2178_s13, 1  ;;  %p283_p6 = scmp.lt.s32.totalorder (!%p223_p3), %s2174_s12, 2 }
   0x9   : > { %s2475_s18 = smov (%p48_p4, %s2473_s18), 0  ;;  %226 = sbr.rel (%p223_p3) target bundleno = 430 (0x1ae), region = 32 }
   0xa   : > { %p1725_p7 = scmp.ne.s32.totalorder (!%p223_p3), %s2174_s12, 0 }
  0x10   : > { %s2477_s13 = smov (!%p281_p5, %s2178_s13), 1  ;;  %331 = sbr.rel (%p1725_p7) target bundleno = 23 (0x17), region = 36 }
  0x11   : > { %s284_s19 = scalar_select %p283_p6, %s2174_s12, 2 }
  0x12   : > { %s1890_s20 = smul.u32 27, %s2477_s13  ;;  %s1724_s21 = sshll.u32 %s2477_s13, 1  ;;  %v332_v0 = vlaneseq (!%p1725_p7)  ;;  %v2192_v1 = vmov (!%p1725_p7), 0.0  }
  0x13   : > { %s1889_s22 = smul.u32 9, %s284_s19  ;;  %s2252_s25 = scalar_lea.vmem %s2465_s3, %s1724_s21 }
  0x14   : > { %s1891_s26 = smul.u32 1152, %s284_s19  ;;  %vm334_vm0 = vcmp.lt.s32.totalorder (!%p1725_p7), %v332_v0, 256 }
  0x15   : > { %s291_s27 = sadd.s32 %s1890_s20, %s1889_s22  ;;  %336 = vst.msk [vmem:[#allocation2] sm:$0x3] (!%p1725_p7), %vm334_vm0, %v2192_v1 }
  0x16   : > { %s2257_s30 = scalar_lea.vmem %s2462_s0, %s291_s27  ;;  %s2262_s6 = scalar_lea.vmem %s2463_s1, %s1891_s26 }
  0x17 PF: > { %v1935_v2 = vld [vmem:[%s2262_s6 + $0x4] ss:$8 sps:$4 sm:$0xff]   ;;  %v1939_v4 = vld [vmem:[%s2262_s6] ss:$8 sps:$4 sm:$0xff]   ;;  %v1941_v6 = vld [vmem:[%s2262_s6 + $0x14] ss:$8 sps:$4 sm:$0xff]   ;;  %v490_v40 = vlaneseq }
  0x18   : > { %v1937_v3 = vld [vmem:[%s2262_s6 + $0x204] ss:$8 sps:$4 sm:$0xff]   ;;  %1278 = vmatprep.subr.bf16.mxu1 %v1935_v2  ;;  %v1940_v5 = vld [vmem:[%s2262_s6 + $0x200] ss:$8 sps:$4 sm:$0xff]   ;;  %v1943_v7 = vld [vmem:[%s2262_s6 + $0x214] ss:$8 sps:$4 sm:$0xff]  }
  0x19   : > { %1360 = vmatprep.subr.bf16.mxu0 %v1937_v3  ;;  %1279 = vmatpush1.bf16.msra.mxu1 %v1939_v4  ;;  %v1945_v8 = vld [vmem:[%s2262_s6 + $0x10] ss:$8 sps:$4 sm:$0xff]   ;;  %v1947_v10 = vld [vmem:[%s2262_s6 + $0x24] ss:$8 sps:$4 sm:$0xff]   ;;  %v1951_v12 = vld [vmem:[%s2262_s6 + $0x20] ss:$8 sps:$4 sm:$0xff]  }
  0x1a   : > { %1361 = vmatpush1.bf16.msra.mxu0 %v1940_v5  ;;  %1280 = vmatprep.subr.bf16.mxu1 %v1941_v6  ;;  %v1946_v9 = vld [vmem:[%s2262_s6 + $0x210] ss:$8 sps:$4 sm:$0xff]   ;;  %v1949_v11 = vld [vmem:[%s2262_s6 + $0x224] ss:$8 sps:$4 sm:$0xff]   ;;  %v1952_v13 = vld [vmem:[%s2262_s6 + $0x220] ss:$8 sps:$4 sm:$0xff]  }
  0x1b   : > { %1362 = vmatprep.subr.bf16.mxu0 %v1943_v7  ;;  %v1953_v14 = vld [vmem:[%s2262_s6 + $0x34] ss:$8 sps:$4 sm:$0xff]   ;;  %v1957_v16 = vld [vmem:[%s2262_s6 + $0x30] ss:$8 sps:$4 sm:$0xff]   ;;  %v1959_v18 = vld [vmem:[%s2262_s6 + $0x44] ss:$8 sps:$4 sm:$0xff]  }
  0x1c   : > { %v1955_v15 = vld [vmem:[%s2262_s6 + $0x234] ss:$8 sps:$4 sm:$0xff]   ;;  %v1958_v17 = vld [vmem:[%s2262_s6 + $0x230] ss:$8 sps:$4 sm:$0xff]   ;;  %v1961_v19 = vld [vmem:[%s2262_s6 + $0x244] ss:$8 sps:$4 sm:$0xff]  }
  0x1d   : > { %1281 = vmatpush1.bf16.msra.mxu1 %v1945_v8  ;;  %v1963_v20 = vld [vmem:[%s2262_s6 + $0x40] ss:$8 sps:$4 sm:$0xff]   ;;  %v1965_v22 = vld [vmem:[%s2262_s6 + $0x54] ss:$8 sps:$4 sm:$0xff]   ;;  %v1969_v24 = vld [vmem:[%s2262_s6 + $0x50] ss:$8 sps:$4 sm:$0xff]  }
  0x1e   : > { %1363 = vmatpush1.bf16.msra.mxu0 %v1946_v9  ;;  %1282 = vmatprep.subr.bf16.mxu1 %v1947_v10  ;;  %v1964_v21 = vld [vmem:[%s2262_s6 + $0x240] ss:$8 sps:$4 sm:$0xff]   ;;  %v1967_v23 = vld [vmem:[%s2262_s6 + $0x254] ss:$8 sps:$4 sm:$0xff]   ;;  %v1970_v25 = vld [vmem:[%s2262_s6 + $0x250] ss:$8 sps:$4 sm:$0xff]  }
  0x1f   : > { %1364 = vmatprep.subr.bf16.mxu0 %v1949_v11  ;;  %v1971_v26 = vld [vmem:[%s2262_s6 + $0x64] ss:$8 sps:$4 sm:$0xff]   ;;  %v1975_v28 = vld [vmem:[%s2262_s6 + $0x60] ss:$8 sps:$4 sm:$0xff]   ;;  %v1977_v30 = vld [vmem:[%s2262_s6 + $0x74] ss:$8 sps:$4 sm:$0xff]  }
  0x20   : > { %v1973_v27 = vld [vmem:[%s2262_s6 + $0x264] ss:$8 sps:$4 sm:$0xff]   ;;  %v1976_v29 = vld [vmem:[%s2262_s6 + $0x260] ss:$8 sps:$4 sm:$0xff]   ;;  %v1979_v31 = vld [vmem:[%s2262_s6 + $0x274] ss:$8 sps:$4 sm:$0xff]  }
  0x21   : > { %1283 = vmatpush1.bf16.msra.mxu1 %v1951_v12  ;;  %v1981_v32 = vld [vmem:[%s2262_s6 + $0x70] ss:$8 sps:$4 sm:$0xff]   ;;  %v1983_v34 = vld [vmem:[%s2262_s6 + $0x84] ss:$8 sps:$4 sm:$0xff]   ;;  %v1987_v36 = vld [vmem:[%s2262_s6 + $0x80] ss:$8 sps:$4 sm:$0xff]  }
  0x22   : > { %1365 = vmatpush1.bf16.msra.mxu0 %v1952_v13  ;;  %1284 = vmatprep.subr.bf16.mxu1 %v1953_v14  ;;  %v1982_v33 = vld [vmem:[%s2262_s6 + $0x270] ss:$8 sps:$4 sm:$0xff]   ;;  %v1985_v35 = vld [vmem:[%s2262_s6 + $0x284] ss:$8 sps:$4 sm:$0xff]   ;;  %v1988_v37 = vld [vmem:[%s2262_s6 + $0x280] ss:$8 sps:$4 sm:$0xff]  }
  0x23   : > { %1366 = vmatprep.subr.bf16.mxu0 %v1955_v15  ;;  %v2193_v38 = vmov 1966171168   ;;  %v1989_v41 = vld [vmem:[%s2262_s6 + $0x94] ss:$8 sps:$4 sm:$0xff]   ;;  %v1993_v43 = vld [vmem:[%s2262_s6 + $0x90] ss:$8 sps:$4 sm:$0xff]  }
  0x24   : > { %v488_v39 = vunpack.c.l.s4 %v2193_v38  ;;  %v1991_v42 = vld [vmem:[%s2262_s6 + $0x294] ss:$8 sps:$4 sm:$0xff]   ;;  %v2305_v45 = vshrl.u32 %v490_v40, 7  ;;  %v1994_v46 = vld [vmem:[%s2262_s6 + $0x290] ss:$8 sps:$4 sm:$0xff]   ;;  %v338_v54 = vld [vmem:[%s2257_s30] sm:$0xff] }
  0x25   : > { %1285 = vmatpush1.bf16.msra.mxu1 %v1957_v16  ;;  %v1995_v47 = vld [vmem:[%s2262_s6 + $0xa4] ss:$8 sps:$4 sm:$0xff]   ;;  %v1999_v49 = vld [vmem:[%s2262_s6 + $0xa0] ss:$8 sps:$4 sm:$0xff]   ;;  %v2001_v52 = vld [vmem:[%s2262_s6 + $0xb4] ss:$8 sps:$4 sm:$0xff]   ;;  %v486_v57 = vcombine.high %v338_v54, %v338_v54 }
  0x26   : > { %1367 = vmatpush1.bf16.msra.mxu0 %v1958_v17  ;;  %1286 = vmatprep.subr.bf16.mxu1 %v1959_v18  ;;  %v489_v44 = vunpack.c.0.s8 %v488_v39  ;;  %v1997_v48 = vld [vmem:[%s2262_s6 + $0x2a4] ss:$8 sps:$4 sm:$0xff]   ;;  %v2000_v50 = vld [vmem:[%s2262_s6 + $0x2a0] ss:$8 sps:$4 sm:$0xff]   ;;  %v2003_v53 = vld [vmem:[%s2262_s6 + $0x2b4] ss:$8 sps:$4 sm:$0xff]  }
  0x27   : > { %1368 = vmatprep.subr.bf16.mxu0 %v1961_v19  ;;  %v2005_v55 = vld [vmem:[%s2262_s6 + $0xb0] ss:$8 sps:$4 sm:$0xff]   ;;  %v2007_v59 = vld [vmem:[%s2262_s6 + $0xc4] ss:$8 sps:$4 sm:$0xff]   ;;  %v2011_v63 = vld [vmem:[%s2262_s6 + $0xc0] ss:$8 sps:$4 sm:$0xff]  }
  0x28   : > { %v2313_v51 = vsub.s32 %v489_v44, %v2305_v45  ;;  %v2006_v58 = vld [vmem:[%s2262_s6 + $0x2b0] ss:$8 sps:$4 sm:$0xff]   ;;  %v2009_v60 = vld [vmem:[%s2262_s6 + $0x2c4] ss:$8 sps:$4 sm:$0xff]   ;;  %v2012_v2 = vld [vmem:[%s2262_s6 + $0x2c0] ss:$8 sps:$4 sm:$0xff]  }
  0x29   : > { %1287 = vmatpush1.bf16.msra.mxu1 %v1963_v20  ;;  %v2013_v3 = vld [vmem:[%s2262_s6 + $0xd4] ss:$8 sps:$4 sm:$0xff]   ;;  %v2017_v6 = vld [vmem:[%s2262_s6 + $0xd0] ss:$8 sps:$4 sm:$0xff]   ;;  %v2019_v8 = vld [vmem:[%s2262_s6 + $0xe4] ss:$8 sps:$4 sm:$0xff]  }
  0x2a   : > { %1369 = vmatpush1.bf16.msra.mxu0 %v1964_v21  ;;  %1288 = vmatprep.subr.bf16.mxu1 %v1965_v22  ;;  %v493_v56 = vrot.slane %v338_v54, %v2313_v51  ;;  %v500_v62 = vrot.slane %v486_v57, %v2313_v51  ;;  %v2015_v4 = vld [vmem:[%s2262_s6 + $0x2d4] ss:$8 sps:$4 sm:$0xff]   ;;  %v2018_v7 = vld [vmem:[%s2262_s6 + $0x2d0] ss:$8 sps:$4 sm:$0xff]   ;;  %v2021_v9 = vld [vmem:[%s2262_s6 + $0x2e4] ss:$8 sps:$4 sm:$0xff]  }
  0x2b   : > { %1370 = vmatprep.subr.bf16.mxu0 %v1967_v23  ;;  %v2023_v10 = vld [vmem:[%s2262_s6 + $0xe0] ss:$8 sps:$4 sm:$0xff]   ;;  %v2025_v12 = vld [vmem:[%s2262_s6 + $0xf4] ss:$8 sps:$4 sm:$0xff]   ;;  %v2029_v14 = vld [vmem:[%s2262_s6 + $0xf0] ss:$8 sps:$4 sm:$0xff]  }
  0x2c   : > { %v501_v61 = vcombine.high %v493_v56, %v493_v56  ;;  %v502_v1 = vcombine.high %v500_v62, %v500_v62  ;;  %v2024_v11 = vld [vmem:[%s2262_s6 + $0x2e0] ss:$8 sps:$4 sm:$0xff]   ;;  %v2027_v13 = vld [vmem:[%s2262_s6 + $0x2f4] ss:$8 sps:$4 sm:$0xff]   ;;  %v2030_v15 = vld [vmem:[%s2262_s6 + $0x2f0] ss:$8 sps:$4 sm:$0xff]   ;;  %v2344_v19 = vrot.slane %v493_v56, %v2313_v51  ;;  %v2347_v20 = vrot.slane %v500_v62, %v2313_v51 }
  0x2d   : > { %1289 = vmatpush1.bf16.msra.mxu1 %v1969_v24  ;;  %v2033_v16 = vld [vmem:[%s2262_s6 + $0x104] ss:$8 sps:$4 sm:$0xff]   ;;  %v2031_v18 = vld [vmem:[%s2262_s6 + $0x100] ss:$8 sps:$4 sm:$0xff]   ;;  %v2040_v22 = vld [vmem:[%s2262_s6 + $0x114] ss:$8 sps:$4 sm:$0xff]  }
  0x2e   : > { %1371 = vmatpush1.bf16.msra.mxu0 %v1970_v25  ;;  %1290 = vmatprep.subr.bf16.mxu1 %v1971_v26  ;;  %v523_v0 = vrot.slane %v501_v61, %v2313_v51  ;;  %v530_v5 = vrot.slane %v502_v1, %v2313_v51  ;;  %v2037_v17 = vld [vmem:[%s2262_s6 + $0x304] ss:$8 sps:$4 sm:$0xff]   ;;  %v2035_v21 = vld [vmem:[%s2262_s6 + $0x300] ss:$8 sps:$4 sm:$0xff]   ;;  %v2043_v23 = vld [vmem:[%s2262_s6 + $0x314] ss:$8 sps:$4 sm:$0xff]  }
  0x2f   : > { %1372 = vmatprep.subr.bf16.mxu0 %v1973_v27  ;;  %v2038_v26 = vld [vmem:[%s2262_s6 + $0x110] ss:$8 sps:$4 sm:$0xff]   ;;  %v2056_v38 = vld [vmem:[%s2262_s6 + $0x140] ss:$8 sps:$4 sm:$0xff]   ;;  %v2085_v56 = vld [vmem:[%s2262_s6 + $0x384] ss:$8 sps:$4 sm:$0xff]  }
  0x30   : > { %1310 = vmatprep.mubr.bf16.mxu1 %v523_v0  ;;  %1392 = vmatprep.mubr.bf16.mxu0 %v530_v5  ;;  %v533_v24 = vcombine.high %v523_v0, %v523_v0  ;;  %v534_v25 = vcombine.high %v530_v5, %v530_v5  ;;  %v2041_v27 = vld [vmem:[%s2262_s6 + $0x310] ss:$8 sps:$4 sm:$0xff]   ;;  %v2059_v39 = vld [vmem:[%s2262_s6 + $0x340] ss:$8 sps:$4 sm:$0xff]   ;;  %v2097_v0 = vld [vmem:[%s2262_s6 + $0x3a4] ss:$8 sps:$4 sm:$0xff]  }
  0x31   : > { %1291 = vmatpush1.bf16.msra.mxu1 %v1975_v28  ;;  %v2046_v28 = vld [vmem:[%s2262_s6 + $0x124] ss:$8 sps:$4 sm:$0xff]   ;;  %v2065_v44 = vld [vmem:[%s2262_s6 + $0x350] ss:$8 sps:$4 sm:$0xff]   ;;  %v2080_v57 = vld [vmem:[%s2262_s6 + $0x180] ss:$8 sps:$4 sm:$0xff]  }
  0x32   : > { %1373 = vmatpush1.bf16.msra.mxu0 %v1976_v29  ;;  %1292 = vmatprep.subr.bf16.mxu1 %v1977_v30  ;;  %v2049_v29 = vld [vmem:[%s2262_s6 + $0x324] ss:$8 sps:$4 sm:$0xff]   ;;  %v2044_v30 = vld [vmem:[%s2262_s6 + $0x120] ss:$8 sps:$4 sm:$0xff]   ;;  %v2077_v54 = vld [vmem:[%s2262_s6 + $0x370] ss:$8 sps:$4 sm:$0xff]  }
  0x33   : > { %1374 = vmatprep.subr.bf16.mxu0 %v1979_v31  ;;  %v2047_v31 = vld [vmem:[%s2262_s6 + $0x320] ss:$8 sps:$4 sm:$0xff]   ;;  %v2086_v61 = vld [vmem:[%s2262_s6 + $0x190] ss:$8 sps:$4 sm:$0xff]   ;;  %vm1504_vm1 = vcmp.lt.s32.totalorder %v490_v40, 256  ;;  %p1871_p8 = scmp.ne.s32.totalorder %s2174_s12, 2 }
  0x34   : > { %v2089_v62 = vld [vmem:[%s2262_s6 + $0x390] ss:$8 sps:$4 sm:$0xff]   ;;  %v2092_v1 = vld [vmem:[%s2262_s6 + $0x1a0] ss:$8 sps:$4 sm:$0xff]   ;;  %vm1546_vm2 = vcmask (!%p1871_p8), 1040384   ;;  %vm1549_vm4 = vcmask (!%p1871_p8), 1041409  }
  0x35   : > { %1293 = vmatpush1.bf16.msra.mxu1 %v1981_v32  ;;  %v2052_v32 = vld [vmem:[%s2262_s6 + $0x134] ss:$8 sps:$4 sm:$0xff]   ;;  %v2098_v5 = vld [vmem:[%s2262_s6 + $0x1b0] ss:$8 sps:$4 sm:$0xff]   ;;  %vm1547_vm3 = vsmask.f32 (!%p1871_p8), 256 }
  0x36   : > { %1375 = vmatpush1.bf16.msra.mxu0 %v1982_v33  ;;  %1294 = vmatprep.subr.bf16.mxu1 %v1983_v34  ;;  %v2055_v33 = vld [vmem:[%s2262_s6 + $0x334] ss:$8 sps:$4 sm:$0xff]   ;;  %v2050_v34 = vld [vmem:[%s2262_s6 + $0x130] ss:$8 sps:$4 sm:$0xff]   ;;  %vm1550_vm5 = vsmask.f32 (!%p1871_p8), 1280  ;;  %vm1548_vm6 = vmand (!%p1871_p8), %vm1546_vm2, %vm1547_vm3 }
  0x37   : > { %1376 = vmatprep.subr.bf16.mxu0 %v1985_v35  ;;  %v2053_v35 = vld [vmem:[%s2262_s6 + $0x330] ss:$8 sps:$4 sm:$0xff]   ;;  %vm1551_vm7 = vmand (!%p1871_p8), %vm1549_vm4, %vm1550_vm5 }
  0x38   : > { %vm1552_vm8 = vmor (!%p1871_p8), %vm1551_vm7, %vm1548_vm6 }
  0x39   : > { %1295 = vmatpush1.bf16.msra.mxu1 %v1987_v36  ;;  %v2058_v36 = vld [vmem:[%s2262_s6 + $0x144] ss:$8 sps:$4 sm:$0xff]  }
  0x3a   : > { %1377 = vmatpush1.bf16.msra.mxu0 %v1988_v37  ;;  %1296 = vmatprep.subr.bf16.mxu1 %v1989_v41  ;;  %v2061_v37 = vld [vmem:[%s2262_s6 + $0x344] ss:$8 sps:$4 sm:$0xff]   ;;  %v2064_v41 = vld [vmem:[%s2262_s6 + $0x154] ss:$8 sps:$4 sm:$0xff]  }
  0x3b   : > { %1378 = vmatprep.subr.bf16.mxu0 %v1991_v42  ;;  %v2067_v42 = vld [vmem:[%s2262_s6 + $0x354] ss:$8 sps:$4 sm:$0xff]  }
  0x3d   : > { %1297 = vmatpush1.bf16.msra.mxu1 %v1993_v43  ;;  %v2062_v43 = vld [vmem:[%s2262_s6 + $0x150] ss:$8 sps:$4 sm:$0xff]  }
  0x3e   : > { %1379 = vmatpush1.bf16.msra.mxu0 %v1994_v46  ;;  %1298 = vmatprep.subr.bf16.mxu1 %v1995_v47  ;;  %v2070_v46 = vld [vmem:[%s2262_s6 + $0x164] ss:$8 sps:$4 sm:$0xff]  }
  0x3f   : > { %1380 = vmatprep.subr.bf16.mxu0 %v1997_v48  ;;  %v2073_v47 = vld [vmem:[%s2262_s6 + $0x364] ss:$8 sps:$4 sm:$0xff]   ;;  %v2068_v48 = vld [vmem:[%s2262_s6 + $0x160] ss:$8 sps:$4 sm:$0xff]  }
  0x41   : > { %1299 = vmatpush1.bf16.msra.mxu1 %v1999_v49  ;;  %v2071_v49 = vld [vmem:[%s2262_s6 + $0x360] ss:$8 sps:$4 sm:$0xff]  }
  0x42   : > { %1381 = vmatpush1.bf16.msra.mxu0 %v2000_v50  ;;  %1300 = vmatprep.subr.bf16.mxu1 %v2001_v52  ;;  %v2076_v50 = vld [vmem:[%s2262_s6 + $0x174] ss:$8 sps:$4 sm:$0xff]  }
  0x43   : > { %1382 = vmatprep.subr.bf16.mxu0 %v2003_v53  ;;  %v2079_v52 = vld [vmem:[%s2262_s6 + $0x374] ss:$8 sps:$4 sm:$0xff]   ;;  %v2074_v53 = vld [vmem:[%s2262_s6 + $0x170] ss:$8 sps:$4 sm:$0xff]  }
  0x45   : > { %1301 = vmatpush1.bf16.msra.mxu1 %v2005_v55  ;;  %v2082_v55 = vld [vmem:[%s2262_s6 + $0x184] ss:$8 sps:$4 sm:$0xff]  }
  0x46   : > { %1383 = vmatpush1.bf16.msra.mxu0 %v2006_v58  ;;  %1302 = vmatprep.subr.bf16.mxu1 %v2007_v59  ;;  %v2083_v58 = vld [vmem:[%s2262_s6 + $0x380] ss:$8 sps:$4 sm:$0xff]   ;;  %v2088_v59 = vld [vmem:[%s2262_s6 + $0x194] ss:$8 sps:$4 sm:$0xff]  }
  0x47   : > { %1384 = vmatprep.subr.bf16.mxu0 %v2009_v60  ;;  %v2091_v60 = vld [vmem:[%s2262_s6 + $0x394] ss:$8 sps:$4 sm:$0xff]  }
  0x49   : > { %1303 = vmatpush1.bf16.msra.mxu1 %v2011_v63  ;;  %v2094_v63 = vld [vmem:[%s2262_s6 + $0x1a4] ss:$8 sps:$4 sm:$0xff]  }
  0x4a   : > { %1385 = vmatpush1.bf16.msra.mxu0 %v2012_v2  ;;  %1304 = vmatprep.subr.bf16.mxu1 %v2013_v3  ;;  %v2095_v2 = vld [vmem:[%s2262_s6 + $0x3a0] ss:$8 sps:$4 sm:$0xff]   ;;  %v2100_v3 = vld [vmem:[%s2262_s6 + $0x1b4] ss:$8 sps:$4 sm:$0xff]  }
  0x4b   : > { %1386 = vmatprep.subr.bf16.mxu0 %v2015_v4  ;;  %v2103_v4 = vld [vmem:[%s2262_s6 + $0x3b4] ss:$8 sps:$4 sm:$0xff]  }
  0x4d   : > { %1305 = vmatpush1.bf16.msra.mxu1 %v2017_v6  ;;  %v2101_v6 = vld [vmem:[%s2262_s6 + $0x3b0] ss:$8 sps:$4 sm:$0xff]  }
  0x4e   : > { %1387 = vmatpush1.bf16.msra.mxu0 %v2018_v7  ;;  %1306 = vmatprep.subr.bf16.mxu1 %v2019_v8  ;;  %v2106_v7 = vld [vmem:[%s2262_s6 + $0x1c4] ss:$8 sps:$4 sm:$0xff]  }
  0x4f   : > { %1388 = vmatprep.subr.bf16.mxu0 %v2021_v9  ;;  %v2109_v8 = vld [vmem:[%s2262_s6 + $0x3c4] ss:$8 sps:$4 sm:$0xff]   ;;  %v2104_v9 = vld [vmem:[%s2262_s6 + $0x1c0] ss:$8 sps:$4 sm:$0xff]  }
  0x51   : > { %1307 = vmatpush1.bf16.msra.mxu1 %v2023_v10  ;;  %v2107_v10 = vld [vmem:[%s2262_s6 + $0x3c0] ss:$8 sps:$4 sm:$0xff]  }
  0x52   : > { %1389 = vmatpush1.bf16.msra.mxu0 %v2024_v11  ;;  %1308 = vmatprep.subr.bf16.mxu1 %v2025_v12  ;;  %v2112_v11 = vld [vmem:[%s2262_s6 + $0x1d4] ss:$8 sps:$4 sm:$0xff]  }
  0x53   : > { %1390 = vmatprep.subr.bf16.mxu0 %v2027_v13  ;;  %v2115_v12 = vld [vmem:[%s2262_s6 + $0x3d4] ss:$8 sps:$4 sm:$0xff]   ;;  %v2110_v13 = vld [vmem:[%s2262_s6 + $0x1d0] ss:$8 sps:$4 sm:$0xff]  }
  0x55   : > { %1309 = vmatpush1.bf16.msra.mxu1 %v2029_v14  ;;  %v2113_v14 = vld [vmem:[%s2262_s6 + $0x3d0] ss:$8 sps:$4 sm:$0xff]  }
  0x56   : > { %1391 = vmatpush1.bf16.msra.mxu0 %v2030_v15  ;;  %1319 = vmatprep.subr.bf16.mxu1 %v2033_v16  ;;  %v2118_v15 = vld [vmem:[%s2262_s6 + $0x1e4] ss:$8 sps:$4 sm:$0xff]  }
  0x57   : > { %1401 = vmatprep.subr.bf16.mxu0 %v2037_v17  ;;  %v2121_v16 = vld [vmem:[%s2262_s6 + $0x3e4] ss:$8 sps:$4 sm:$0xff]   ;;  %v2116_v17 = vld [vmem:[%s2262_s6 + $0x1e0] ss:$8 sps:$4 sm:$0xff]  }
  0x58   : > { %1311 = vmatmul.mubr.bf16.vlgmr.msra.gmra.mrb[0].mxu1 %v2344_v19 }
  0x59   : > { %1393 = vmatmul.mubr.bf16.vlgmr.msra.gmra.mrb[0].mxu0 %v2347_v20  ;;  %1320 = vmatpush1.bf16.msra.mxu1 %v2031_v18  ;;  %v2119_v18 = vld [vmem:[%s2262_s6 + $0x3e0] ss:$8 sps:$4 sm:$0xff]  }
  0x5a   : > { %1402 = vmatpush1.bf16.msra.mxu0 %v2035_v21  ;;  %1321 = vmatprep.subr.bf16.mxu1 %v2040_v22  ;;  %v2124_v21 = vld [vmem:[%s2262_s6 + $0x1f4] ss:$8 sps:$4 sm:$0xff]  }
  0x5b   : > { %1403 = vmatprep.subr.bf16.mxu0 %v2043_v23  ;;  %1351 = vmatprep.mubr.bf16.mxu1 %v533_v24  ;;  %v2127_v22 = vld [vmem:[%s2262_s6 + $0x3f4] ss:$8 sps:$4 sm:$0xff]   ;;  %v2122_v23 = vld [vmem:[%s2262_s6 + $0x1f0] ss:$8 sps:$4 sm:$0xff]  }
  0x5c   : > { %1433 = vmatprep.mubr.bf16.mxu0 %v534_v25  ;;  %v2125_v24 = vld [vmem:[%s2262_s6 + $0x3f0] ss:$8 sps:$4 sm:$0xff]   ;;  %v2130_v25 = vld [vmem:[%s2262_s6 + $0x404] ss:$8 sps:$4 sm:$0xff]  }
  0x5d   : > { %1322 = vmatpush1.bf16.msra.mxu1 %v2038_v26  ;;  %v531_v26 = vcombine.high %v2344_v19, %v2344_v19  ;;  %v2136_v19 = vld [vmem:[%s2262_s6 + $0x424] ss:$8 sps:$4 sm:$0xff]  }
  0x5e   : > { %1404 = vmatpush1.bf16.msra.mxu0 %v2041_v27  ;;  %1323 = vmatprep.subr.bf16.mxu1 %v2046_v28  ;;  %v532_v27 = vcombine.high %v2347_v20, %v2347_v20  ;;  %v2128_v28 = vld [vmem:[%s2262_s6 + $0x400] ss:$8 sps:$4 sm:$0xff]  }
  0x5f   : > { %1405 = vmatprep.subr.bf16.mxu0 %v2049_v29  ;;  %v2133_v29 = vld [vmem:[%s2262_s6 + $0x414] ss:$8 sps:$4 sm:$0xff]   ;;  %v2134_v20 = vld [vmem:[%s2262_s6 + $0x420] ss:$8 sps:$4 sm:$0xff]  }
  0x61   : > { %1324 = vmatpush1.bf16.msra.mxu1 %v2044_v30  ;;  %v2131_v30 = vld [vmem:[%s2262_s6 + $0x410] ss:$8 sps:$4 sm:$0xff]  }
  0x62   : > { %1406 = vmatpush1.bf16.msra.mxu0 %v2047_v31  ;;  %1325 = vmatprep.subr.bf16.mxu1 %v2052_v32  ;;  %v2194_v31 = vmov 0   ;;  %v2139_v32 = vld [vmem:[%s2262_s6 + $0x434] ss:$8 sps:$4 sm:$0xff]  }
  0x63   : > { %1407 = vmatprep.subr.bf16.mxu0 %v2055_v33  ;;  %v2137_v33 = vld [vmem:[%s2262_s6 + $0x430] ss:$8 sps:$4 sm:$0xff]  }
  0x65   : > { %1326 = vmatpush1.bf16.msra.mxu1 %v2050_v34  ;;  %v2142_v34 = vld [vmem:[%s2262_s6 + $0x444] ss:$8 sps:$4 sm:$0xff]  }
  0x66   : > { %1408 = vmatpush1.bf16.msra.mxu0 %v2053_v35  ;;  %1327 = vmatprep.subr.bf16.mxu1 %v2058_v36  ;;  %v2140_v35 = vld [vmem:[%s2262_s6 + $0x440] ss:$8 sps:$4 sm:$0xff]   ;;  %v2145_v36 = vld [vmem:[%s2262_s6 + $0x454] ss:$8 sps:$4 sm:$0xff]  }
  0x67   : > { %1409 = vmatprep.subr.bf16.mxu0 %v2061_v37  ;;  %v2143_v37 = vld [vmem:[%s2262_s6 + $0x450] ss:$8 sps:$4 sm:$0xff]  }
  0x69   : > { %1328 = vmatpush1.bf16.msra.mxu1 %v2056_v38  ;;  %v2148_v38 = vld [vmem:[%s2262_s6 + $0x464] ss:$8 sps:$4 sm:$0xff]  }
  0x6a   : > { %1410 = vmatpush1.bf16.msra.mxu0 %v2059_v39  ;;  %1329 = vmatprep.subr.bf16.mxu1 %v2064_v41  ;;  %v2146_v39 = vld [vmem:[%s2262_s6 + $0x460] ss:$8 sps:$4 sm:$0xff]   ;;  %v2151_v41 = vld [vmem:[%s2262_s6 + $0x474] ss:$8 sps:$4 sm:$0xff]  }
  0x6b   : > { %1411 = vmatprep.subr.bf16.mxu0 %v2067_v42  ;;  %v2149_v42 = vld [vmem:[%s2262_s6 + $0x470] ss:$8 sps:$4 sm:$0xff]  }
  0x6d   : > { %1330 = vmatpush1.bf16.msra.mxu1 %v2062_v43  ;;  %v1726_v43 = vld.sshfl [vmem:[%s2257_s30 + $0x8] sm:$0x1 pattern:$0x75316420] }
  0x6e   : > { %1412 = vmatpush1.bf16.msra.mxu0 %v2065_v44  ;;  %1331 = vmatprep.subr.bf16.mxu1 %v2070_v46  ;;  %v548_v44 = vrot.slane %v1726_v43, %v2313_v51 }
  0x6f   : > { %1413 = vmatprep.subr.bf16.mxu0 %v2073_v47 }
  0x71   : > { %1332 = vmatpush1.bf16.msra.mxu1 %v2068_v48 }
  0x72   : > { %1414 = vmatpush1.bf16.msra.mxu0 %v2071_v49  ;;  %1333 = vmatprep.subr.bf16.mxu1 %v2076_v50 }
  0x73   : > { %1415 = vmatprep.subr.bf16.mxu0 %v2079_v52 }
  0x75   : > { %1334 = vmatpush1.bf16.msra.mxu1 %v2074_v53 }
  0x76   : > { %1416 = vmatpush1.bf16.msra.mxu0 %v2077_v54  ;;  %1335 = vmatprep.subr.bf16.mxu1 %v2082_v55 }
  0x77   : > { %1417 = vmatprep.subr.bf16.mxu0 %v2085_v56 }
  0x79   : > { %1336 = vmatpush1.bf16.msra.mxu1 %v2080_v57 }
  0x7a   : > { %1418 = vmatpush1.bf16.msra.mxu0 %v2083_v58  ;;  %1337 = vmatprep.subr.bf16.mxu1 %v2088_v59  ;;  %v337_v59 = vld [vmem:[#allocation2] sm:$0x3] }
  0x7b   : > { %1419 = vmatprep.subr.bf16.mxu0 %v2091_v60 }
  0x7d   : > { %1338 = vmatpush1.bf16.msra.mxu1 %v2086_v61 }
  0x7e   : > { %1420 = vmatpush1.bf16.msra.mxu0 %v2089_v62  ;;  %1339 = vmatprep.subr.bf16.mxu1 %v2094_v63  ;;  %v1512_v63 = vld [vmem:[%s2464_s2] sm:$0x3] (!%p1871_p8) }
  0x7f   : > { %1421 = vmatprep.subr.bf16.mxu0 %v2097_v0 }
  0x81   : > { %1340 = vmatpush1.bf16.msra.mxu1 %v2092_v1  ;;  %v1518_v1 = vsub.s32 (!%p1871_p8), 0, %v2305_v45 }
  0x82   : > { %1422 = vmatpush1.bf16.msra.mxu0 %v2095_v2  ;;  %1341 = vmatprep.subr.bf16.mxu1 %v2100_v3  ;;  %v1522_v2 = vsub.s32 (!%p1871_p8), 1, %v2305_v45 }
  0x83   : > { %1423 = vmatprep.subr.bf16.mxu0 %v2103_v4 }
  0x85   : > { %1342 = vmatpush1.bf16.msra.mxu1 %v2098_v5 }
  0x86   : > { %1424 = vmatpush1.bf16.msra.mxu0 %v2101_v6  ;;  %1343 = vmatprep.subr.bf16.mxu1 %v2106_v7  ;;  %v1553_v7 = vld [vmem:[%s2252_s25] sm:$0x3] (!%p1871_p8) }
  0x87   : > { %1425 = vmatprep.subr.bf16.mxu0 %v2109_v8 }
  0x89   : > { %1344 = vmatpush1.bf16.msra.mxu1 %v2104_v9 }
  0x8a   : > { %1426 = vmatpush1.bf16.msra.mxu0 %v2107_v10  ;;  %1345 = vmatprep.subr.bf16.mxu1 %v2112_v11 }
  0x8b   : > { %1427 = vmatprep.subr.bf16.mxu0 %v2115_v12 }
  0x8d   : > { %1346 = vmatpush1.bf16.msra.mxu1 %v2110_v13 }
  0x8e   : > { %1428 = vmatpush1.bf16.msra.mxu0 %v2113_v14  ;;  %1347 = vmatprep.subr.bf16.mxu1 %v2118_v15 }
  0x8f   : > { %1429 = vmatprep.subr.bf16.mxu0 %v2121_v16 }
  0x91   : > { %1348 = vmatpush1.bf16.msra.mxu1 %v2116_v17 }
  0x92   : > { %1430 = vmatpush1.bf16.msra.mxu0 %v2119_v18  ;;  %1349 = vmatprep.subr.bf16.mxu1 %v2124_v21 }
  0x93   : > { %1431 = vmatprep.subr.bf16.mxu0 %v2127_v22 }
  0x95   : > { %1350 = vmatpush1.bf16.msra.mxu1 %v2122_v23 }
  0x96   : > { %1432 = vmatpush1.bf16.msra.mxu0 %v2125_v24 }
  0x97   : > { %1442 = vmatprep.subr.bf16.mxu0 %v2130_v25 }
  0x98   : > { %1352 = vmatmul.mubr.bf16.vlgmr.msra.gmra.mrb[0].mxu1 %v531_v26 }
  0x99   : > { %1434 = vmatmul.mubr.bf16.vlgmr.msra.gmra.mrb[0].mxu0 %v532_v27 }
  0x9a   : > { %1443 = vmatpush1.bf16.msra.mxu0 %v2128_v28  ;;  %1474 = vmatprep.mubr.bf16.mxu0 %v2194_v31 }
  0x9b   : > { %1444 = vmatprep.subr.bf16.mxu0 %v2133_v29 }
  0x9e   : > { %1445 = vmatpush1.bf16.msra.mxu0 %v2131_v30 }
  0x9f   : > { %1446 = vmatprep.subr.bf16.mxu0 %v2136_v19 }
  0xa2   : > { %1447 = vmatpush1.bf16.msra.mxu0 %v2134_v20 }
  0xa3   : > { %1448 = vmatprep.subr.bf16.mxu0 %v2139_v32 }
  0xa6   : > { %1449 = vmatpush1.bf16.msra.mxu0 %v2137_v33 }
  0xa7   : > { %1450 = vmatprep.subr.bf16.mxu0 %v2142_v34 }
  0xaa   : > { %1451 = vmatpush1.bf16.msra.mxu0 %v2140_v35 }
  0xab   : > { %1452 = vmatprep.subr.bf16.mxu0 %v2145_v36 }
  0xae   : > { %1453 = vmatpush1.bf16.msra.mxu0 %v2143_v37 }
  0xaf   : > { %1454 = vmatprep.subr.bf16.mxu0 %v2148_v38 }
  0xb2   : > { %1455 = vmatpush1.bf16.msra.mxu0 %v2146_v39 }
  0xb3   : > { %1456 = vmatprep.subr.bf16.mxu0 %v2151_v41 }
  0xb6   : > { %1457 = vmatpush1.bf16.msra.mxu0 %v2149_v42 }
  0xb9   : > { %1475 = vmatmul.mubr.bf16.vlgmr.msra.gmra.mrb[0].mxu0 %v548_v44 }
 0x16b   : > { %v1353_v46 = vpop.f32.mrb[0].mxu1 }
 0x16c   : > { %v1355_v47 = vpop.f32.mrb[1].mxu1 }
 0x16d   : > { %v1357_v48 = vpop.f32.mrb[2].mxu1 }
 0x16e   : > { %v1358_v49 = vpop.f32.mrb[3].mxu1 }
 0x18c   : > { %v1476_v50 = vpop.f32.mrb[0].mxu0 }
 0x18d   : > { %v1875_v52 = vadd.f32 %v1476_v50, %v1353_v46  ;;  %v1478_v53 = vpop.f32.mrb[1].mxu0 }
 0x18e   : > { %v1876_v54 = vadd.f32 %v1478_v53, %v1355_v47  ;;  %v1480_v55 = vpop.f32.mrb[2].mxu0 }
 0x18f   : > { %v1481_v56 = vpop.f32.mrb[3].mxu0 }
 0x190   : > { %v1485_v57 = vcombine.low %v1875_v52, %v1876_v54 }
 0x192   : > { %v1492_v58 = vrot.slane %v1485_v57, %v2313_v51  ;;  %1510 = sbr.rel (%p1871_p8) target bundleno = 430 (0x1ae), region = 40 }
 0x194   : > { %v1499_v60 = vrot.slane %v1492_v58, %v2313_v51 }
 0x196   : > { %v1501_v61 = vadd.f32 %v1499_v60, %v337_v59 }
 0x198   : > { %1506 = vst.msk [vmem:[#allocation2] sm:$0x3] %vm1504_vm1, %v1501_v61 }
 0x19f   : > { %v1511_v62 = vld [vmem:[#allocation2] sm:$0x3] }
 0x1a0   : > { %v1513_v0 = vadd.f32 %v1512_v63, %v1511_v62 }
 0x1a2   : > { %v1514_v3 = vmax.f32 %v1513_v0, 0.0 }
 0x1a4   : > { %v1519_v40 = vrot.slane %v1514_v3, %v1518_v1  ;;  %v1523_v4 = vrot.slane %v1514_v3, %v1522_v2 }
 0x1a6   : > { %v1872_v5 = vpack.c.bf16 %v1523_v4, %v1519_v40 }
 0x1a8   : > { %v1537_v6 = vrot.slane %v1872_v5, %v2313_v51 }
 0x1aa   : > { %v1544_v8 = vrot.slane %v1537_v6, %v2313_v51 }
 0x1ac   : > { %v1554_v9 = vsel %vm1552_vm8, %v1544_v8, %v1553_v7 }
 0x1ad   : > { %1555 = vst [vmem:[%s2252_s25] sm:$0x3] %v1554_v9 }
 0x1ae PF: > { %s13_s16 = sadd.s32 1, %s2190_s16   ;;  %s2466_s12 = smov %s2182_s14 }
 0x1af   : > { %p10_p9 = scmp.ge.s32.totalorder %s13_s16, 8   ;;  %s2467_s13 = smov %s2186_s15 }
 0x1b0   : > { %s2468_s14 = smov %s2471_s17  ;;  %s2469_s15 = smov %s2475_s18 }
 0x1b1   :  { %12 = sbr.rel (!%p10_p9) target bundleno = 3 (0x3), region = 76 }

// kernel: medicalnet_encoder_forward.25
= control target key start
LH: loop header
LB: loop body
LE: loop exit
PB: predicated region body
PF: predicated region fallthrough
CT: control target
= control target key end

     0   :  { %s693_s12 = smov 0   ;;  %s695_s13 = smov 0   ;;  %s783_s0 = inlined_call_operand.vmem [shape: bf16[2,128], index: 0, kind: input, shape index: {}]   ;;  %s784_s1 = inlined_call_operand.vmem [shape: bf16[128,256], index: 1, kind: input, shape index: {}]   ;;  %s785_s2 = inlined_call_operand.vmem [shape: f32[1,256], index: 2, kind: input, shape index: {}]   ;;  %s786_s3 = inlined_call_operand.vmem [shape: bf16[2,256], index: 3, kind: output, shape index: {}]  }
   0x1   :  { %s697_s14 = smov 0   ;;  %s699_s15 = smov 0  }
   0x2   :  { %s701_s16 = smov 0  }
   0x3 LB: > { %s22_s17 = sadd.s32 1, %s665_s15  ;;  %p65_p1 = scmp.ne.s32.totalorder %s657_s13, %s653_s12  ;;  %s669_s16 = sphi %s701_s16, %s13_s16   ;;  %s665_s15 = sphi %s699_s15, %s790_s15   ;;  %s661_s14 = sphi %s697_s14, %s789_s14   ;;  %s657_s13 = sphi %s695_s13, %s788_s13   ;;  %s653_s12 = sphi %s693_s12, %s787_s12  }
   0x4   : > { %p23_p0 = scmp.ge.s32.totalorder %s22_s17, 2  ;;  %p66_p2 = scmp.eq.s32.totalorder %s669_s16, 0 }
   0x5   : > { %s58_s19 = sadd.s32 1, %s657_s13  ;;  %p536_p5 = scmp.ge.s32.totalorder %s669_s16, 2 }
   0x6   : > { %s792_s17 = smov (%p23_p0, %s22_s17), 0  ;;  %p67_p3 = por %p66_p2, %p65_p1 }
   0x7   : > { %s55_s18 = ssub.s32 %s665_s15, %s792_s17  ;;  %151 = sbr.rel (%p536_p5) target bundleno = 28 (0x1c), region = 20 }
   0x8   : > { %p56_p4 = scmp.eq.s32.totalorder %s55_s18, 0 }
   0xa   : > { %s728_s20 = scalar_select %p56_p4, %s657_s13, %s58_s19  }
   0xe   : > { %154 = sbr.rel (!%p67_p3) target bundleno = 28 (0x1c), region = 24  ;;  %s156_s21 = sand.u32 (%p67_p3), 1, %s657_s13  }
   0xf   : > { %s538_s22 = sshll.u32 (%p67_p3), %s665_s15, 2  ;;  %s537_s23 = sshll.u32 (%p67_p3), %s156_s21, 6 }
  0x10   : > { %s736_s26 = scalar_lea.vmem (%p67_p3), %s784_s1, %s538_s22  ;;  %s158_s27 = scalar_lea.vmem (%p67_p3), [#allocation2], %s537_s23 }
  0x11   : > { %v176_v0 = vld [vmem:[%s736_s26] sm:$0xf] (%p67_p3)  ;;  %v178_v1 = vld [vmem:[%s736_s26 + $0x8] sm:$0xf] (%p67_p3)  ;;  %v180_v2 = vld [vmem:[%s736_s26 + $0x10] sm:$0xf] (%p67_p3) }
  0x12   : > { %177 = vst [vmem:[%s158_s27] sm:$0xf] (%p67_p3), %v176_v0  ;;  %179 = vst [vmem:[%s158_s27 + $0x4] sm:$0xf] (%p67_p3), %v178_v1  ;;  %v182_v3 = vld [vmem:[%s736_s26 + $0x18] sm:$0xf] (%p67_p3) }
  0x13   : > { %v184_v4 = vld [vmem:[%s736_s26 + $0x20] sm:$0xf] (%p67_p3)  ;;  %181 = vst [vmem:[%s158_s27 + $0x8] sm:$0xf] (%p67_p3), %v180_v2  ;;  %183 = vst [vmem:[%s158_s27 + $0xc] sm:$0xf] (%p67_p3), %v182_v3 }
  0x14   : > { %185 = vst [vmem:[%s158_s27 + $0x10] sm:$0xf] (%p67_p3), %v184_v4  ;;  %v186_v5 = vld [vmem:[%s736_s26 + $0x28] sm:$0xf] (%p67_p3)  ;;  %v188_v6 = vld [vmem:[%s736_s26 + $0x30] sm:$0xf] (%p67_p3) }
  0x15   : > { %v190_v7 = vld [vmem:[%s736_s26 + $0x38] sm:$0xf]  ;;  %187 = vst [vmem:[%s158_s27 + $0x14] sm:$0xf] %v186_v5  ;;  %189 = vst [vmem:[%s158_s27 + $0x18] sm:$0xf] %v188_v6 }
  0x16   : > { %191 = vst [vmem:[%s158_s27 + $0x1c] sm:$0xf] %v190_v7  ;;  %v192_v8 = vld [vmem:[%s736_s26 + $0x40] sm:$0xf]  ;;  %v194_v9 = vld [vmem:[%s736_s26 + $0x48] sm:$0xf] }
  0x17   : > { %v196_v10 = vld [vmem:[%s736_s26 + $0x50] sm:$0xf]  ;;  %193 = vst [vmem:[%s158_s27 + $0x20] sm:$0xf] %v192_v8  ;;  %195 = vst [vmem:[%s158_s27 + $0x24] sm:$0xf] %v194_v9 }
  0x18   : > { %197 = vst [vmem:[%s158_s27 + $0x28] sm:$0xf] %v196_v10  ;;  %v198_v11 = vld [vmem:[%s736_s26 + $0x58] sm:$0xf]  ;;  %v200_v12 = vld [vmem:[%s736_s26 + $0x60] sm:$0xf] }
  0x19   : > { %v202_v13 = vld [vmem:[%s736_s26 + $0x68] sm:$0xf]  ;;  %199 = vst [vmem:[%s158_s27 + $0x2c] sm:$0xf] %v198_v11  ;;  %201 = vst [vmem:[%s158_s27 + $0x30] sm:$0xf] %v200_v12 }
  0x1a   : > { %203 = vst [vmem:[%s158_s27 + $0x34] sm:$0xf] %v202_v13  ;;  %v204_v14 = vld [vmem:[%s736_s26 + $0x70] sm:$0xf]  ;;  %v206_v15 = vld [vmem:[%s736_s26 + $0x78] sm:$0xf] }
  0x1b   : > { %205 = vst [vmem:[%s158_s27 + $0x38] sm:$0xf] %v204_v14  ;;  %207 = vst [vmem:[%s158_s27 + $0x3c] sm:$0xf] %v206_v15 }
  0x1c PF: > { %p539_p6 = scmp.ge.s32.totalorder %s669_s16, 1  ;;  %p267_p7 = scmp.lt.s32.totalorder %s669_s16, 3 }
  0x1e   : > { %p268_p8 = pnand %p539_p6, %p267_p7 }
  0x1f   : > { %s274_s28 = sand.u32 (!%p268_p8), 1, %s653_s12   ;;  %v671_v16 = vmov (!%p268_p8), 0.0   ;;  %vm672_vm0 = vmmov (!%p268_p8), 0   ;;  %v319_v25 = vld [vmem:[%s783_s0] sm:$0x1] (!%p268_p8)  ;;  %p308_p9 = scmp.lt.s32.totalorder (!%p268_p8), %s661_s14, 1 }
  0x20   : > { %271 = sbr.rel (%p268_p8) target bundleno = 283 (0x11b), region = 69  ;;  %561 = vmatprep.subr.bf16.mxu0 (!%p268_p8), %v671_v16  ;;  %s540_s29 = sshll.u32 (!%p268_p8), %s274_s28, 6  ;;  %577 = vmatprep.mubr.msk.bf16.mxu0 (!%p268_p8), %vm672_vm0, %v671_v16 }
  0x21   : > { %s276_s30 = scalar_lea.vmem (!%p268_p8), [#allocation2], %s540_s29 }
  0x22   : > { %v623_v17 = vld [vmem:[%s276_s30] sm:$0xff] (!%p268_p8)   ;;  %v624_v18 = vld [vmem:[%s276_s30 + $0x8] sm:$0xff] (!%p268_p8)   ;;  %v625_v19 = vld [vmem:[%s276_s30 + $0x10] sm:$0xff] (!%p268_p8)  }
  0x23   : > { %562 = vmatpush3.bf16.msra.mxu0 (!%p268_p8), %v623_v17  ;;  %v626_v20 = vld [vmem:[%s276_s30 + $0x18] sm:$0xff] (!%p268_p8)   ;;  %v627_v21 = vld [vmem:[%s276_s30 + $0x20] sm:$0xff] (!%p268_p8)   ;;  %v628_v22 = vld [vmem:[%s276_s30 + $0x28] sm:$0xff] (!%p268_p8)  }
  0x24   : > { %563 = vmatprep.subr.bf16.mxu0 (!%p268_p8), %v671_v16  ;;  %v629_v23 = vld [vmem:[%s276_s30 + $0x30] sm:$0xff] (!%p268_p8)   ;;  %v630_v24 = vld [vmem:[%s276_s30 + $0x38] sm:$0xff] (!%p268_p8)  }
  0x27   : > { %564 = vmatpush3.bf16.msra.mxu0 %v624_v18  ;;  %s794_s14 = smov (!%p308_p9, %s661_s14), 1 }
  0x28   : > { %565 = vmatprep.subr.bf16.mxu0 %v671_v16  ;;  %s310_s8 = scalar_lea.vmem %s785_s2, %s794_s14  ;;  %s317_s11 = scalar_lea.vmem %s786_s3, %s794_s14 }
  0x29   : > { %v541_v26 = vld [vmem:[%s310_s8] ss:$0 sm:$0xff] }
  0x2b   : > { %566 = vmatpush3.bf16.msra.mxu0 %v625_v19 }
  0x2c   : > { %567 = vmatprep.subr.bf16.mxu0 %v671_v16 }
  0x2f   : > { %568 = vmatpush3.bf16.msra.mxu0 %v626_v20 }
  0x30   : > { %569 = vmatprep.subr.bf16.mxu0 %v671_v16 }
  0x33   : > { %570 = vmatpush3.bf16.msra.mxu0 %v627_v21 }
  0x34   : > { %571 = vmatprep.subr.bf16.mxu0 %v671_v16 }
  0x37   : > { %572 = vmatpush3.bf16.msra.mxu0 %v628_v22 }
  0x38   : > { %573 = vmatprep.subr.bf16.mxu0 %v671_v16 }
  0x3b   : > { %574 = vmatpush3.bf16.msra.mxu0 %v629_v23 }
  0x3c   : > { %575 = vmatprep.subr.bf16.mxu0 %v671_v16 }
  0x3f   : > { %576 = vmatpush3.bf16.msra.mxu0 %v630_v24 }
  0x42   : > { %578 = vmatmul.mubr.bf16.vlgmr.msra.gmra.mrb[0].mxu0 %v319_v25 }
 0x115   : > { %v425_v27 = vpop.f32.mrb[0].mxu0 }
 0x116   : > { %v426_v28 = vadd.f32 %v541_v26, %v425_v27  ;;  %v579_v29 = vpop.f32.mrb[1].mxu0 }
 0x117   : > { %v428_v30 = vpop.f32.mrb[2].mxu0 }
 0x118   : > { %v431_v31 = vpack.c.bf16 %v426_v28, %v426_v28  ;;  %v580_v32 = vpop.f32.mrb[3].mxu0 }
 0x11a   : > { %432 = vst [vmem:[%s317_s11] sm:$0x1] %v431_v31 }
 0x11b PF: > { %s13_s16 = sadd.s32 1, %s669_s16   ;;  %s787_s12 = smov %s657_s13 }
 0x11c   : > { %p10_p10 = scmp.ge.s32.totalorder %s13_s16, 4   ;;  %s788_s13 = smov %s728_s20 }
 0x11d   : > { %s789_s14 = smov %s665_s15  ;;  %s790_s15 = smov %s792_s17 }
 0x11e   :  { %12 = sbr.rel (!%p10_p10) target bundleno = 3 (0x3), region = 114 }

// kernel: medicalnet_encoder_forward.27
= control target key start
LH: loop header
LB: loop body
LE: loop exit
PB: predicated region body
PF: predicated region fallthrough
CT: control target
= control target key end

     0   :  { %s3811_s15 = smov 0   ;;  %s3813_s16 = smov 0   ;;  %s4262_s0 = inlined_call_operand.vmem [shape: bf16[2,3,1,2304], index: 0, kind: input, shape index: {}]   ;;  %s4263_s1 = inlined_call_operand.vmem [shape: bf16[3,2304,256], index: 1, kind: input, shape index: {}]   ;;  %s4264_s2 = inlined_call_operand.vmem [shape: f32[1,256], index: 2, kind: input, shape index: {}]   ;;  %s4265_s3 = inlined_call_operand.vmem [shape: bf16[2,1,1,256], index: 3, kind: input, shape index: {}]   ;;  %s4266_s4 = inlined_call_operand.vmem [shape: bf16[2,1,1,256], index: 4, kind: output, shape index: {}]  }
   0x1   :  { %s3815_s17 = smov 0   ;;  %s3817_s18 = smov 0  }
   0x2   :  { %s3819_s19 = smov 0  }
   0x3 LB: > { %s32_s20 = sadd.s32 1, %s3774_s17  ;;  %s47_s21 = sadd.s32 1, %s3778_s18  ;;  %s3782_s19 = sphi %s3819_s19, %s14_s19   ;;  %s3778_s18 = sphi %s3817_s18, %s4270_s18   ;;  %s3774_s17 = sphi %s3815_s17, %s4269_s17   ;;  %s3770_s16 = sphi %s3813_s16, %s4268_s16   ;;  %s3766_s15 = sphi %s3811_s15, %s4267_s15  }
   0x4   : > { %p33_p0 = scmp.ge.s32.totalorder %s32_s20, 3  ;;  %p2937_p1 = scmp.ge.s32.totalorder %s3782_s19, 1 }
   0x5   : > { %p271_p2 = scmp.lt.s32.totalorder %s3782_s19, 7 }
   0x6   : > { %s4272_s20 = smov (%p33_p0, %s32_s20), 0  ;;  %s4274_s21 = smov (!%p33_p0, %s47_s21), %s3778_s18 }
   0x7   : > { %p272_p3 = pnand %p2937_p1, %p271_p2  ;;  %p49_p4 = scmp.ge.s32.totalorder %s4274_s21, 2 }
   0x8   : > { %p346_p5 = scmp.lt.s32.totalorder (!%p272_p3), %s3770_s16, 1  ;;  %p348_p6 = scmp.lt.s32.totalorder (!%p272_p3), %s3766_s15, 2 }
   0x9   : > { %s4276_s21 = smov (%p49_p4, %s4274_s21), 0  ;;  %275 = sbr.rel (%p272_p3) target bundleno = 592 (0x250), region = 36 }
   0xa   : > { %p2941_p7 = scmp.ne.s32.totalorder (!%p272_p3), %s3766_s15, 0 }
  0x10   : > { %s4278_s16 = smov (!%p346_p5, %s3770_s16), 1  ;;  %411 = sbr.rel (%p2941_p7) target bundleno = 23 (0x17), region = 40 }
  0x11   : > { %s349_s22 = scalar_select %p348_p6, %s3766_s15, 2 }
  0x12   : > { %s3266_s23 = smul.u32 54, %s4278_s16  ;;  %s2939_s24 = sshll.u32 %s4278_s16, 1  ;;  %v412_v0 = vlaneseq (!%p2941_p7)  ;;  %v3784_v1 = vmov (!%p2941_p7), 0.0  }
  0x13   : > { %s3265_s25 = smul.u32 18, %s349_s22  ;;  %s3848_s28 = scalar_lea.vmem %s4265_s3, %s2939_s24 }
  0x14   : > { %s3267_s29 = smul.u32 2304, %s349_s22  ;;  %s3853_s6 = scalar_lea.vmem %s4266_s4, %s2939_s24  ;;  %vm414_vm0 = vcmp.lt.s32.totalorder (!%p2941_p7), %v412_v0, 256 }
  0x15   : > { %s356_s7 = sadd.s32 %s3266_s23, %s3265_s25  ;;  %416 = vst.msk [vmem:[#allocation2] sm:$0x3] (!%p2941_p7), %vm414_vm0, %v3784_v1 }
  0x16   : > { %s3858_s10 = scalar_lea.vmem %s4262_s0, %s356_s7  ;;  %s3863_s13 = scalar_lea.vmem %s4263_s1, %s3267_s29 }
  0x17 PF: > { %v3310_v2 = vld [vmem:[%s3863_s13 + $0x4] ss:$8 sps:$4 sm:$0xff]   ;;  %v3314_v4 = vld [vmem:[%s3863_s13] ss:$8 sps:$4 sm:$0xff]   ;;  %v3316_v6 = vld [vmem:[%s3863_s13 + $0x14] ss:$8 sps:$4 sm:$0xff]   ;;  %v716_v40 = vlaneseq }
  0x18   : > { %v3312_v3 = vld [vmem:[%s3863_s13 + $0x404] ss:$8 sps:$4 sm:$0xff]   ;;  %2290 = vmatprep.subr.bf16.mxu1 %v3310_v2  ;;  %v3315_v5 = vld [vmem:[%s3863_s13 + $0x400] ss:$8 sps:$4 sm:$0xff]   ;;  %v3318_v7 = vld [vmem:[%s3863_s13 + $0x414] ss:$8 sps:$4 sm:$0xff]  }
  0x19   : > { %2454 = vmatprep.subr.bf16.mxu0 %v3312_v3  ;;  %2291 = vmatpush1.bf16.msra.mxu1 %v3314_v4  ;;  %v3320_v8 = vld [vmem:[%s3863_s13 + $0x10] ss:$8 sps:$4 sm:$0xff]   ;;  %v3322_v10 = vld [vmem:[%s3863_s13 + $0x24] ss:$8 sps:$4 sm:$0xff]   ;;  %v3326_v12 = vld [vmem:[%s3863_s13 + $0x20] ss:$8 sps:$4 sm:$0xff]  }
  0x1a   : > { %2455 = vmatpush1.bf16.msra.mxu0 %v3315_v5  ;;  %2292 = vmatprep.subr.bf16.mxu1 %v3316_v6  ;;  %v3321_v9 = vld [vmem:[%s3863_s13 + $0x410] ss:$8 sps:$4 sm:$0xff]   ;;  %v3324_v11 = vld [vmem:[%s3863_s13 + $0x424] ss:$8 sps:$4 sm:$0xff]   ;;  %v3327_v13 = vld [vmem:[%s3863_s13 + $0x420] ss:$8 sps:$4 sm:$0xff]  }
  0x1b   : > { %2456 = vmatprep.subr.bf16.mxu0 %v3318_v7  ;;  %v3328_v14 = vld [vmem:[%s3863_s13 + $0x34] ss:$8 sps:$4 sm:$0xff]   ;;  %v3332_v16 = vld [vmem:[%s3863_s13 + $0x30] ss:$8 sps:$4 sm:$0xff]   ;;  %v3334_v18 = vld [vmem:[%s3863_s13 + $0x44] ss:$8 sps:$4 sm:$0xff]  }
  0x1c   : > { %v3330_v15 = vld [vmem:[%s3863_s13 + $0x434] ss:$8 sps:$4 sm:$0xff]   ;;  %v3333_v17 = vld [vmem:[%s3863_s13 + $0x430] ss:$8 sps:$4 sm:$0xff]   ;;  %v3336_v19 = vld [vmem:[%s3863_s13 + $0x444] ss:$8 sps:$4 sm:$0xff]  }
  0x1d   : > { %2293 = vmatpush1.bf16.msra.mxu1 %v3320_v8  ;;  %v3338_v20 = vld [vmem:[%s3863_s13 + $0x40] ss:$8 sps:$4 sm:$0xff]   ;;  %v3340_v22 = vld [vmem:[%s3863_s13 + $0x54] ss:$8 sps:$4 sm:$0xff]   ;;  %v3344_v24 = vld [vmem:[%s3863_s13 + $0x50] ss:$8 sps:$4 sm:$0xff]  }
  0x1e   : > { %2457 = vmatpush1.bf16.msra.mxu0 %v3321_v9  ;;  %2294 = vmatprep.subr.bf16.mxu1 %v3322_v10  ;;  %v3339_v21 = vld [vmem:[%s3863_s13 + $0x440] ss:$8 sps:$4 sm:$0xff]   ;;  %v3342_v23 = vld [vmem:[%s3863_s13 + $0x454] ss:$8 sps:$4 sm:$0xff]   ;;  %v3345_v25 = vld [vmem:[%s3863_s13 + $0x450] ss:$8 sps:$4 sm:$0xff]  }
  0x1f   : > { %2458 = vmatprep.subr.bf16.mxu0 %v3324_v11  ;;  %v3346_v26 = vld [vmem:[%s3863_s13 + $0x64] ss:$8 sps:$4 sm:$0xff]   ;;  %v3350_v28 = vld [vmem:[%s3863_s13 + $0x60] ss:$8 sps:$4 sm:$0xff]   ;;  %v3352_v30 = vld [vmem:[%s3863_s13 + $0x74] ss:$8 sps:$4 sm:$0xff]  }
  0x20   : > { %v3348_v27 = vld [vmem:[%s3863_s13 + $0x464] ss:$8 sps:$4 sm:$0xff]   ;;  %v3351_v29 = vld [vmem:[%s3863_s13 + $0x460] ss:$8 sps:$4 sm:$0xff]   ;;  %v3354_v31 = vld [vmem:[%s3863_s13 + $0x474] ss:$8 sps:$4 sm:$0xff]  }
  0x21   : > { %2295 = vmatpush1.bf16.msra.mxu1 %v3326_v12  ;;  %v3356_v32 = vld [vmem:[%s3863_s13 + $0x70] ss:$8 sps:$4 sm:$0xff]   ;;  %v3358_v34 = vld [vmem:[%s3863_s13 + $0x84] ss:$8 sps:$4 sm:$0xff]   ;;  %v3362_v36 = vld [vmem:[%s3863_s13 + $0x80] ss:$8 sps:$4 sm:$0xff]  }
  0x22   : > { %2459 = vmatpush1.bf16.msra.mxu0 %v3327_v13  ;;  %2296 = vmatprep.subr.bf16.mxu1 %v3328_v14  ;;  %v3357_v33 = vld [vmem:[%s3863_s13 + $0x470] ss:$8 sps:$4 sm:$0xff]   ;;  %v3360_v35 = vld [vmem:[%s3863_s13 + $0x484] ss:$8 sps:$4 sm:$0xff]   ;;  %v3363_v37 = vld [vmem:[%s3863_s13 + $0x480] ss:$8 sps:$4 sm:$0xff]  }
  0x23   : > { %2460 = vmatprep.subr.bf16.mxu0 %v3330_v15  ;;  %v3785_v38 = vmov 1966171168   ;;  %v3364_v41 = vld [vmem:[%s3863_s13 + $0x94] ss:$8 sps:$4 sm:$0xff]   ;;  %v3368_v43 = vld [vmem:[%s3863_s13 + $0x90] ss:$8 sps:$4 sm:$0xff]  }
  0x24   : > { %v714_v39 = vunpack.c.l.s4 %v3785_v38  ;;  %v3366_v42 = vld [vmem:[%s3863_s13 + $0x494] ss:$8 sps:$4 sm:$0xff]   ;;  %v3906_v45 = vshrl.u32 %v716_v40, 7  ;;  %v3369_v46 = vld [vmem:[%s3863_s13 + $0x490] ss:$8 sps:$4 sm:$0xff]   ;;  %v3919_v54 = vld [vmem:[%s3858_s10] sm:$0xff] }
  0x25   : > { %2297 = vmatpush1.bf16.msra.mxu1 %v3332_v16  ;;  %v3370_v47 = vld [vmem:[%s3863_s13 + $0xa4] ss:$8 sps:$4 sm:$0xff]   ;;  %v3374_v49 = vld [vmem:[%s3863_s13 + $0xa0] ss:$8 sps:$4 sm:$0xff]   ;;  %v3376_v52 = vld [vmem:[%s3863_s13 + $0xb4] ss:$8 sps:$4 sm:$0xff]  }
  0x26   : > { %2461 = vmatpush1.bf16.msra.mxu0 %v3333_v17  ;;  %2298 = vmatprep.subr.bf16.mxu1 %v3334_v18  ;;  %v715_v44 = vunpack.c.0.s8 %v714_v39  ;;  %v3372_v48 = vld [vmem:[%s3863_s13 + $0x4a4] ss:$8 sps:$4 sm:$0xff]   ;;  %v3375_v50 = vld [vmem:[%s3863_s13 + $0x4a0] ss:$8 sps:$4 sm:$0xff]   ;;  %v3378_v53 = vld [vmem:[%s3863_s13 + $0x4b4] ss:$8 sps:$4 sm:$0xff]  }
  0x27   : > { %2462 = vmatprep.subr.bf16.mxu0 %v3336_v19  ;;  %v3380_v55 = vld [vmem:[%s3863_s13 + $0xb0] ss:$8 sps:$4 sm:$0xff]   ;;  %v3926_v58 = vld [vmem:[%s3858_s10 + $0x8] sm:$0xff]  ;;  %v3388_v3 = vld [vmem:[%s3863_s13 + $0xd4] ss:$8 sps:$4 sm:$0xff]   ;;  %vm2680_vm1 = vcmp.lt.s32.totalorder %v716_v40, 256 }
  0x28   : > { %v3914_v51 = vsub.s32 %v715_v44, %v3906_v45  ;;  %v3381_v57 = vld [vmem:[%s3863_s13 + $0x4b0] ss:$8 sps:$4 sm:$0xff]   ;;  %v3382_v59 = vld [vmem:[%s3863_s13 + $0xc4] ss:$8 sps:$4 sm:$0xff]   ;;  %v3386_v1 = vld [vmem:[%s3863_s13 + $0xc0] ss:$8 sps:$4 sm:$0xff]  }
  0x29   : > { %2299 = vmatpush1.bf16.msra.mxu1 %v3338_v20  ;;  %v3384_v60 = vld [vmem:[%s3863_s13 + $0x4c4] ss:$8 sps:$4 sm:$0xff]   ;;  %v3387_v2 = vld [vmem:[%s3863_s13 + $0x4c0] ss:$8 sps:$4 sm:$0xff]   ;;  %v3390_v4 = vld [vmem:[%s3863_s13 + $0x4d4] ss:$8 sps:$4 sm:$0xff]  }
  0x2a   : > { %2463 = vmatpush1.bf16.msra.mxu0 %v3339_v21  ;;  %2300 = vmatprep.subr.bf16.mxu1 %v3340_v22  ;;  %v719_v56 = vrot.slane %v3919_v54, %v3914_v51  ;;  %v768_v62 = vrot.slane %v3926_v58, %v3914_v51  ;;  %v3392_v6 = vld [vmem:[%s3863_s13 + $0xd0] ss:$8 sps:$4 sm:$0xff]   ;;  %v3394_v8 = vld [vmem:[%s3863_s13 + $0xe4] ss:$8 sps:$4 sm:$0xff]   ;;  %v3398_v10 = vld [vmem:[%s3863_s13 + $0xe0] ss:$8 sps:$4 sm:$0xff]  }
  0x2b   : > { %2464 = vmatprep.subr.bf16.mxu0 %v3342_v23  ;;  %v3393_v7 = vld [vmem:[%s3863_s13 + $0x4d0] ss:$8 sps:$4 sm:$0xff]   ;;  %v3396_v9 = vld [vmem:[%s3863_s13 + $0x4e4] ss:$8 sps:$4 sm:$0xff]   ;;  %v3399_v11 = vld [vmem:[%s3863_s13 + $0x4e0] ss:$8 sps:$4 sm:$0xff]  }
  0x2c   : > { %v727_v61 = vcombine.high %v719_v56, %v719_v56  ;;  %v776_v0 = vcombine.high %v768_v62, %v768_v62  ;;  %v3400_v12 = vld [vmem:[%s3863_s13 + $0xf4] ss:$8 sps:$4 sm:$0xff]   ;;  %v3404_v14 = vld [vmem:[%s3863_s13 + $0xf0] ss:$8 sps:$4 sm:$0xff]   ;;  %v3409_v16 = vld [vmem:[%s3863_s13 + $0x104] ss:$8 sps:$4 sm:$0xff]   ;;  %v3951_v18 = vrot.slane %v719_v56, %v3914_v51  ;;  %v3954_v19 = vrot.slane %v768_v62, %v3914_v51 }
  0x2d   : > { %2301 = vmatpush1.bf16.msra.mxu1 %v3344_v24  ;;  %v3402_v13 = vld [vmem:[%s3863_s13 + $0x4f4] ss:$8 sps:$4 sm:$0xff]   ;;  %v3405_v15 = vld [vmem:[%s3863_s13 + $0x4f0] ss:$8 sps:$4 sm:$0xff]   ;;  %v3413_v17 = vld [vmem:[%s3863_s13 + $0x504] ss:$8 sps:$4 sm:$0xff]  }
  0x2e   : > { %2465 = vmatpush1.bf16.msra.mxu0 %v3345_v25  ;;  %2302 = vmatprep.subr.bf16.mxu1 %v3346_v26  ;;  %v749_v63 = vrot.slane %v727_v61, %v3914_v51  ;;  %v798_v5 = vrot.slane %v776_v0, %v3914_v51  ;;  %v3407_v20 = vld [vmem:[%s3863_s13 + $0x100] ss:$8 sps:$4 sm:$0xff]   ;;  %v3416_v22 = vld [vmem:[%s3863_s13 + $0x114] ss:$8 sps:$4 sm:$0xff]   ;;  %v3414_v26 = vld [vmem:[%s3863_s13 + $0x110] ss:$8 sps:$4 sm:$0xff]  }
  0x2f   : > { %2466 = vmatprep.subr.bf16.mxu0 %v3348_v27  ;;  %v3411_v21 = vld [vmem:[%s3863_s13 + $0x500] ss:$8 sps:$4 sm:$0xff]   ;;  %v3419_v23 = vld [vmem:[%s3863_s13 + $0x514] ss:$8 sps:$4 sm:$0xff]   ;;  %v3417_v27 = vld [vmem:[%s3863_s13 + $0x510] ss:$8 sps:$4 sm:$0xff]  }
  0x30   : > { %2322 = vmatprep.mubr.bf16.mxu1 %v749_v63  ;;  %2486 = vmatprep.mubr.bf16.mxu0 %v798_v5  ;;  %v759_v24 = vcombine.high %v749_v63, %v749_v63  ;;  %v808_v25 = vcombine.high %v798_v5, %v798_v5  ;;  %v3432_v38 = vld [vmem:[%s3863_s13 + $0x140] ss:$8 sps:$4 sm:$0xff]   ;;  %v3441_v44 = vld [vmem:[%s3863_s13 + $0x550] ss:$8 sps:$4 sm:$0xff]   ;;  %v3458_v56 = vld [vmem:[%s3863_s13 + $0x184] ss:$8 sps:$4 sm:$0xff]  }
  0x31   : > { %2303 = vmatpush1.bf16.msra.mxu1 %v3350_v28  ;;  %v3422_v28 = vld [vmem:[%s3863_s13 + $0x124] ss:$8 sps:$4 sm:$0xff]   ;;  %v3435_v39 = vld [vmem:[%s3863_s13 + $0x540] ss:$8 sps:$4 sm:$0xff]   ;;  %v3464_v61 = vld [vmem:[%s3863_s13 + $0x194] ss:$8 sps:$4 sm:$0xff]  }
  0x32   : > { %2467 = vmatpush1.bf16.msra.mxu0 %v3351_v29  ;;  %2304 = vmatprep.subr.bf16.mxu1 %v3352_v30  ;;  %v3425_v29 = vld [vmem:[%s3863_s13 + $0x524] ss:$8 sps:$4 sm:$0xff]   ;;  %v3420_v30 = vld [vmem:[%s3863_s13 + $0x120] ss:$8 sps:$4 sm:$0xff]   ;;  %v3467_v62 = vld [vmem:[%s3863_s13 + $0x594] ss:$8 sps:$4 sm:$0xff]  }
  0x33   : > { %2468 = vmatprep.subr.bf16.mxu0 %v3354_v31  ;;  %v3423_v31 = vld [vmem:[%s3863_s13 + $0x520] ss:$8 sps:$4 sm:$0xff]   ;;  %v3462_v63 = vld [vmem:[%s3863_s13 + $0x190] ss:$8 sps:$4 sm:$0xff]   ;;  %v3476_v5 = vld [vmem:[%s3863_s13 + $0x1b4] ss:$8 sps:$4 sm:$0xff]  }
  0x34   : > { %v3465_v0 = vld [vmem:[%s3863_s13 + $0x590] ss:$8 sps:$4 sm:$0xff]   ;;  %p3231_p8 = scmp.ne.s32.totalorder %s3766_s15, 2 }
  0x35   : > { %2305 = vmatpush1.bf16.msra.mxu1 %v3356_v32  ;;  %v3428_v32 = vld [vmem:[%s3863_s13 + $0x134] ss:$8 sps:$4 sm:$0xff]   ;;  %v2706_v40 = vsub.s32 (!%p3231_p8), 0, %v3906_v45  ;;  %vm2734_vm2 = vcmask (!%p3231_p8), 1040384   ;;  %vm2735_vm3 = vsmask.f32 (!%p3231_p8), 256 }
  0x36   : > { %2469 = vmatpush1.bf16.msra.mxu0 %v3357_v33  ;;  %2306 = vmatprep.subr.bf16.mxu1 %v3358_v34  ;;  %v3431_v33 = vld [vmem:[%s3863_s13 + $0x534] ss:$8 sps:$4 sm:$0xff]   ;;  %v3426_v34 = vld [vmem:[%s3863_s13 + $0x130] ss:$8 sps:$4 sm:$0xff]   ;;  %vm2737_vm4 = vcmask (!%p3231_p8), 1041409   ;;  %vm2736_vm6 = vmand (!%p3231_p8), %vm2734_vm2, %vm2735_vm3 }
  0x37   : > { %2470 = vmatprep.subr.bf16.mxu0 %v3360_v35  ;;  %v3429_v35 = vld [vmem:[%s3863_s13 + $0x530] ss:$8 sps:$4 sm:$0xff]   ;;  %vm2738_vm5 = vsmask.f32 (!%p3231_p8), 1280 }
  0x38   : > { %vm2739_vm7 = vmand (!%p3231_p8), %vm2737_vm4, %vm2738_vm5 }
  0x39   : > { %2307 = vmatpush1.bf16.msra.mxu1 %v3362_v36  ;;  %v3434_v36 = vld [vmem:[%s3863_s13 + $0x144] ss:$8 sps:$4 sm:$0xff]   ;;  %vm2740_vm8 = vmor (!%p3231_p8), %vm2739_vm7, %vm2736_vm6 }
  0x3a   : > { %2471 = vmatpush1.bf16.msra.mxu0 %v3363_v37  ;;  %2308 = vmatprep.subr.bf16.mxu1 %v3364_v41  ;;  %v3437_v37 = vld [vmem:[%s3863_s13 + $0x544] ss:$8 sps:$4 sm:$0xff]   ;;  %v3440_v41 = vld [vmem:[%s3863_s13 + $0x154] ss:$8 sps:$4 sm:$0xff]  }
  0x3b   : > { %2472 = vmatprep.subr.bf16.mxu0 %v3366_v42  ;;  %v3443_v42 = vld [vmem:[%s3863_s13 + $0x554] ss:$8 sps:$4 sm:$0xff]  }
  0x3d   : > { %2309 = vmatpush1.bf16.msra.mxu1 %v3368_v43  ;;  %v3438_v43 = vld [vmem:[%s3863_s13 + $0x150] ss:$8 sps:$4 sm:$0xff]  }
  0x3e   : > { %2473 = vmatpush1.bf16.msra.mxu0 %v3369_v46  ;;  %2310 = vmatprep.subr.bf16.mxu1 %v3370_v47  ;;  %v3446_v46 = vld [vmem:[%s3863_s13 + $0x164] ss:$8 sps:$4 sm:$0xff]  }
  0x3f   : > { %2474 = vmatprep.subr.bf16.mxu0 %v3372_v48  ;;  %v3449_v47 = vld [vmem:[%s3863_s13 + $0x564] ss:$8 sps:$4 sm:$0xff]   ;;  %v3444_v48 = vld [vmem:[%s3863_s13 + $0x160] ss:$8 sps:$4 sm:$0xff]  }
  0x41   : > { %2311 = vmatpush1.bf16.msra.mxu1 %v3374_v49  ;;  %v3447_v49 = vld [vmem:[%s3863_s13 + $0x560] ss:$8 sps:$4 sm:$0xff]  }
  0x42   : > { %2475 = vmatpush1.bf16.msra.mxu0 %v3375_v50  ;;  %2312 = vmatprep.subr.bf16.mxu1 %v3376_v52  ;;  %v3452_v50 = vld [vmem:[%s3863_s13 + $0x174] ss:$8 sps:$4 sm:$0xff]  }
  0x43   : > { %2476 = vmatprep.subr.bf16.mxu0 %v3378_v53  ;;  %v3455_v52 = vld [vmem:[%s3863_s13 + $0x574] ss:$8 sps:$4 sm:$0xff]   ;;  %v3450_v53 = vld [vmem:[%s3863_s13 + $0x170] ss:$8 sps:$4 sm:$0xff]  }
  0x45   : > { %2313 = vmatpush1.bf16.msra.mxu1 %v3380_v55  ;;  %v3453_v55 = vld [vmem:[%s3863_s13 + $0x570] ss:$8 sps:$4 sm:$0xff]  }
  0x46   : > { %2477 = vmatpush1.bf16.msra.mxu0 %v3381_v57  ;;  %2314 = vmatprep.subr.bf16.mxu1 %v3382_v59  ;;  %v3461_v57 = vld [vmem:[%s3863_s13 + $0x584] ss:$8 sps:$4 sm:$0xff]   ;;  %v3456_v59 = vld [vmem:[%s3863_s13 + $0x180] ss:$8 sps:$4 sm:$0xff]  }
  0x47   : > { %2478 = vmatprep.subr.bf16.mxu0 %v3384_v60  ;;  %v3459_v60 = vld [vmem:[%s3863_s13 + $0x580] ss:$8 sps:$4 sm:$0xff]  }
  0x49   : > { %2315 = vmatpush1.bf16.msra.mxu1 %v3386_v1  ;;  %v3470_v1 = vld [vmem:[%s3863_s13 + $0x1a4] ss:$8 sps:$4 sm:$0xff]  }
  0x4a   : > { %2479 = vmatpush1.bf16.msra.mxu0 %v3387_v2  ;;  %2316 = vmatprep.subr.bf16.mxu1 %v3388_v3  ;;  %v3473_v2 = vld [vmem:[%s3863_s13 + $0x5a4] ss:$8 sps:$4 sm:$0xff]   ;;  %v3468_v3 = vld [vmem:[%s3863_s13 + $0x1a0] ss:$8 sps:$4 sm:$0xff]  }
  0x4b   : > { %2480 = vmatprep.subr.bf16.mxu0 %v3390_v4  ;;  %v3471_v4 = vld [vmem:[%s3863_s13 + $0x5a0] ss:$8 sps:$4 sm:$0xff]  }
  0x4d   : > { %2317 = vmatpush1.bf16.msra.mxu1 %v3392_v6  ;;  %v3479_v6 = vld [vmem:[%s3863_s13 + $0x5b4] ss:$8 sps:$4 sm:$0xff]  }
  0x4e   : > { %2481 = vmatpush1.bf16.msra.mxu0 %v3393_v7  ;;  %2318 = vmatprep.subr.bf16.mxu1 %v3394_v8  ;;  %v3474_v7 = vld [vmem:[%s3863_s13 + $0x1b0] ss:$8 sps:$4 sm:$0xff]  }
  0x4f   : > { %2482 = vmatprep.subr.bf16.mxu0 %v3396_v9  ;;  %v3477_v8 = vld [vmem:[%s3863_s13 + $0x5b0] ss:$8 sps:$4 sm:$0xff]   ;;  %v3482_v9 = vld [vmem:[%s3863_s13 + $0x1c4] ss:$8 sps:$4 sm:$0xff]  }
  0x51   : > { %2319 = vmatpush1.bf16.msra.mxu1 %v3398_v10  ;;  %v3485_v10 = vld [vmem:[%s3863_s13 + $0x5c4] ss:$8 sps:$4 sm:$0xff]  }
  0x52   : > { %2483 = vmatpush1.bf16.msra.mxu0 %v3399_v11  ;;  %2320 = vmatprep.subr.bf16.mxu1 %v3400_v12  ;;  %v3480_v11 = vld [vmem:[%s3863_s13 + $0x1c0] ss:$8 sps:$4 sm:$0xff]  }
  0x53   : > { %2484 = vmatprep.subr.bf16.mxu0 %v3402_v13  ;;  %v3483_v12 = vld [vmem:[%s3863_s13 + $0x5c0] ss:$8 sps:$4 sm:$0xff]   ;;  %v3488_v13 = vld [vmem:[%s3863_s13 + $0x1d4] ss:$8 sps:$4 sm:$0xff]  }
  0x55   : > { %2321 = vmatpush1.bf16.msra.mxu1 %v3404_v14  ;;  %v3491_v14 = vld [vmem:[%s3863_s13 + $0x5d4] ss:$8 sps:$4 sm:$0xff]  }
  0x56   : > { %2485 = vmatpush1.bf16.msra.mxu0 %v3405_v15  ;;  %2331 = vmatprep.subr.bf16.mxu1 %v3409_v16  ;;  %v3486_v15 = vld [vmem:[%s3863_s13 + $0x1d0] ss:$8 sps:$4 sm:$0xff]  }
  0x57   : > { %2495 = vmatprep.subr.bf16.mxu0 %v3413_v17  ;;  %v3489_v16 = vld [vmem:[%s3863_s13 + $0x5d0] ss:$8 sps:$4 sm:$0xff]   ;;  %v3494_v17 = vld [vmem:[%s3863_s13 + $0x1e4] ss:$8 sps:$4 sm:$0xff]  }
  0x58   : > { %2323 = vmatmul.mubr.bf16.vlgmr.msra.gmra.mrb[0].mxu1 %v3951_v18 }
  0x59   : > { %2487 = vmatmul.mubr.bf16.vlgmr.msra.gmra.mrb[0].mxu0 %v3954_v19  ;;  %2332 = vmatpush1.bf16.msra.mxu1 %v3407_v20  ;;  %v3497_v20 = vld [vmem:[%s3863_s13 + $0x5e4] ss:$8 sps:$4 sm:$0xff]  }
  0x5a   : > { %2496 = vmatpush1.bf16.msra.mxu0 %v3411_v21  ;;  %2333 = vmatprep.subr.bf16.mxu1 %v3416_v22  ;;  %v712_v21 = vcombine.high %v3919_v54, %v3919_v54  ;;  %v761_v22 = vcombine.high %v3926_v58, %v3926_v58  ;;  %v3498_v54 = vld [vmem:[%s3863_s13 + $0x1f0] ss:$8 sps:$4 sm:$0xff]  }
  0x5b   : > { %2497 = vmatprep.subr.bf16.mxu0 %v3419_v23  ;;  %2363 = vmatprep.mubr.bf16.mxu1 %v759_v24  ;;  %v3492_v23 = vld [vmem:[%s3863_s13 + $0x1e0] ss:$8 sps:$4 sm:$0xff]   ;;  %v3501_v58 = vld [vmem:[%s3863_s13 + $0x5f0] ss:$8 sps:$4 sm:$0xff]  }
  0x5c   : > { %2527 = vmatprep.mubr.bf16.mxu0 %v808_v25  ;;  %v3495_v24 = vld [vmem:[%s3863_s13 + $0x5e0] ss:$8 sps:$4 sm:$0xff]   ;;  %v3500_v25 = vld [vmem:[%s3863_s13 + $0x1f4] ss:$8 sps:$4 sm:$0xff]  }
  0x5d   : > { %2334 = vmatpush1.bf16.msra.mxu1 %v3414_v26  ;;  %v3503_v26 = vld [vmem:[%s3863_s13 + $0x5f4] ss:$8 sps:$4 sm:$0xff]  }
  0x5e   : > { %2498 = vmatpush1.bf16.msra.mxu0 %v3417_v27  ;;  %2335 = vmatprep.subr.bf16.mxu1 %v3422_v28  ;;  %v4023_v27 = vrot.slane %v712_v21, %v3914_v51  ;;  %v4026_v28 = vrot.slane %v761_v22, %v3914_v51  ;;  %v3575_v21 = vld [vmem:[%s3863_s13 + $0x6b4] ss:$8 sps:$4 sm:$0xff]   ;;  %v3570_v22 = vld [vmem:[%s3863_s13 + $0x2b0] ss:$8 sps:$4 sm:$0xff]  }
  0x5f   : > { %2499 = vmatprep.subr.bf16.mxu0 %v3425_v29  ;;  %v3506_v29 = vld [vmem:[%s3863_s13 + $0x204] ss:$8 sps:$4 sm:$0xff]  }
  0x61   : > { %2336 = vmatpush1.bf16.msra.mxu1 %v3420_v30  ;;  %v3509_v30 = vld [vmem:[%s3863_s13 + $0x604] ss:$8 sps:$4 sm:$0xff]  }
  0x62   : > { %2500 = vmatpush1.bf16.msra.mxu0 %v3423_v31  ;;  %2337 = vmatprep.subr.bf16.mxu1 %v3428_v32  ;;  %v728_v31 = vcombine.high %v4023_v27, %v4023_v27  ;;  %v777_v32 = vcombine.high %v4026_v28, %v4026_v28 }
  0x63   : > { %2501 = vmatprep.subr.bf16.mxu0 %v3431_v33  ;;  %v757_v33 = vcombine.high %v3951_v18, %v3951_v18 }
  0x64   : > { %v4048_v18 = vrot.slane %v777_v32, %v3914_v51  ;;  %v3590_v32 = vld [vmem:[%s3863_s13 + $0x2e4] ss:$8 sps:$4 sm:$0xff]  }
  0x65   : > { %2338 = vmatpush1.bf16.msra.mxu1 %v3426_v34  ;;  %v806_v34 = vcombine.high %v3954_v19, %v3954_v19  ;;  %v3510_v19 = vld [vmem:[%s3863_s13 + $0x210] ss:$8 sps:$4 sm:$0xff]  }
  0x66   : > { %2502 = vmatpush1.bf16.msra.mxu0 %v3429_v35  ;;  %2339 = vmatprep.subr.bf16.mxu1 %v3434_v36  ;;  %v3504_v35 = vld [vmem:[%s3863_s13 + $0x200] ss:$8 sps:$4 sm:$0xff]  }
  0x67   : > { %2503 = vmatprep.subr.bf16.mxu0 %v3437_v37  ;;  %v3507_v36 = vld [vmem:[%s3863_s13 + $0x600] ss:$8 sps:$4 sm:$0xff]   ;;  %v3512_v37 = vld [vmem:[%s3863_s13 + $0x214] ss:$8 sps:$4 sm:$0xff]  }
  0x69   : > { %2340 = vmatpush1.bf16.msra.mxu1 %v3432_v38  ;;  %v3515_v38 = vld [vmem:[%s3863_s13 + $0x614] ss:$8 sps:$4 sm:$0xff]  }
  0x6a   : > { %2504 = vmatpush1.bf16.msra.mxu0 %v3435_v39  ;;  %2341 = vmatprep.subr.bf16.mxu1 %v3440_v41  ;;  %v4045_v39 = vrot.slane %v728_v31, %v3914_v51  ;;  %v3513_v41 = vld [vmem:[%s3863_s13 + $0x610] ss:$8 sps:$4 sm:$0xff]  }
  0x6b   : > { %2505 = vmatprep.subr.bf16.mxu0 %v3443_v42  ;;  %v3518_v42 = vld [vmem:[%s3863_s13 + $0x224] ss:$8 sps:$4 sm:$0xff]   ;;  %v3585_v31 = vld [vmem:[%s3863_s13 + $0x6d0] ss:$8 sps:$4 sm:$0xff]  }
  0x6d   : > { %2342 = vmatpush1.bf16.msra.mxu1 %v3438_v43  ;;  %v3521_v43 = vld [vmem:[%s3863_s13 + $0x624] ss:$8 sps:$4 sm:$0xff]  }
  0x6e   : > { %2506 = vmatpush1.bf16.msra.mxu0 %v3441_v44  ;;  %2343 = vmatprep.subr.bf16.mxu1 %v3446_v46  ;;  %v3516_v44 = vld [vmem:[%s3863_s13 + $0x220] ss:$8 sps:$4 sm:$0xff]  }
  0x6f   : > { %2507 = vmatprep.subr.bf16.mxu0 %v3449_v47  ;;  %v3519_v46 = vld [vmem:[%s3863_s13 + $0x620] ss:$8 sps:$4 sm:$0xff]   ;;  %v3524_v47 = vld [vmem:[%s3863_s13 + $0x234] ss:$8 sps:$4 sm:$0xff]  }
  0x71   : > { %2344 = vmatpush1.bf16.msra.mxu1 %v3444_v48  ;;  %v3527_v48 = vld [vmem:[%s3863_s13 + $0x634] ss:$8 sps:$4 sm:$0xff]  }
  0x72   : > { %2508 = vmatpush1.bf16.msra.mxu0 %v3447_v49  ;;  %2345 = vmatprep.subr.bf16.mxu1 %v3452_v50  ;;  %v3522_v49 = vld [vmem:[%s3863_s13 + $0x230] ss:$8 sps:$4 sm:$0xff]  }
  0x73   : > { %2509 = vmatprep.subr.bf16.mxu0 %v3455_v52  ;;  %v3525_v50 = vld [vmem:[%s3863_s13 + $0x630] ss:$8 sps:$4 sm:$0xff]   ;;  %v3530_v52 = vld [vmem:[%s3863_s13 + $0x244] ss:$8 sps:$4 sm:$0xff]  }
  0x75   : > { %2346 = vmatpush1.bf16.msra.mxu1 %v3450_v53  ;;  %v3533_v53 = vld [vmem:[%s3863_s13 + $0x644] ss:$8 sps:$4 sm:$0xff]  }
  0x76   : > { %2510 = vmatpush1.bf16.msra.mxu0 %v3453_v55  ;;  %2347 = vmatprep.subr.bf16.mxu1 %v3458_v56  ;;  %v3528_v55 = vld [vmem:[%s3863_s13 + $0x240] ss:$8 sps:$4 sm:$0xff]  }
  0x77   : > { %2511 = vmatprep.subr.bf16.mxu0 %v3461_v57  ;;  %v3531_v56 = vld [vmem:[%s3863_s13 + $0x640] ss:$8 sps:$4 sm:$0xff]   ;;  %v3536_v57 = vld [vmem:[%s3863_s13 + $0x254] ss:$8 sps:$4 sm:$0xff]  }
  0x79   : > { %2348 = vmatpush1.bf16.msra.mxu1 %v3456_v59  ;;  %v3539_v59 = vld [vmem:[%s3863_s13 + $0x654] ss:$8 sps:$4 sm:$0xff]  }
  0x7a   : > { %2512 = vmatpush1.bf16.msra.mxu0 %v3459_v60  ;;  %2349 = vmatprep.subr.bf16.mxu1 %v3464_v61  ;;  %v3534_v60 = vld [vmem:[%s3863_s13 + $0x250] ss:$8 sps:$4 sm:$0xff]  }
  0x7b   : > { %2513 = vmatprep.subr.bf16.mxu0 %v3467_v62  ;;  %v3537_v61 = vld [vmem:[%s3863_s13 + $0x650] ss:$8 sps:$4 sm:$0xff]   ;;  %v3542_v62 = vld [vmem:[%s3863_s13 + $0x264] ss:$8 sps:$4 sm:$0xff]  }
  0x7d   : > { %2350 = vmatpush1.bf16.msra.mxu1 %v3462_v63  ;;  %v3545_v63 = vld [vmem:[%s3863_s13 + $0x664] ss:$8 sps:$4 sm:$0xff]  }
  0x7e   : > { %2514 = vmatpush1.bf16.msra.mxu0 %v3465_v0  ;;  %2351 = vmatprep.subr.bf16.mxu1 %v3470_v1  ;;  %v3540_v0 = vld [vmem:[%s3863_s13 + $0x260] ss:$8 sps:$4 sm:$0xff]  }
  0x7f   : > { %2515 = vmatprep.subr.bf16.mxu0 %v3473_v2  ;;  %v3543_v1 = vld [vmem:[%s3863_s13 + $0x660] ss:$8 sps:$4 sm:$0xff]   ;;  %v3548_v2 = vld [vmem:[%s3863_s13 + $0x274] ss:$8 sps:$4 sm:$0xff]  }
  0x81   : > { %2352 = vmatpush1.bf16.msra.mxu1 %v3468_v3  ;;  %v3551_v3 = vld [vmem:[%s3863_s13 + $0x674] ss:$8 sps:$4 sm:$0xff]  }
  0x82   : > { %2516 = vmatpush1.bf16.msra.mxu0 %v3471_v4  ;;  %2353 = vmatprep.subr.bf16.mxu1 %v3476_v5  ;;  %v3546_v4 = vld [vmem:[%s3863_s13 + $0x270] ss:$8 sps:$4 sm:$0xff]  }
  0x83   : > { %2517 = vmatprep.subr.bf16.mxu0 %v3479_v6  ;;  %v3549_v5 = vld [vmem:[%s3863_s13 + $0x670] ss:$8 sps:$4 sm:$0xff]   ;;  %v3554_v6 = vld [vmem:[%s3863_s13 + $0x284] ss:$8 sps:$4 sm:$0xff]  }
  0x85   : > { %2354 = vmatpush1.bf16.msra.mxu1 %v3474_v7  ;;  %v3557_v7 = vld [vmem:[%s3863_s13 + $0x684] ss:$8 sps:$4 sm:$0xff]  }
  0x86   : > { %2518 = vmatpush1.bf16.msra.mxu0 %v3477_v8  ;;  %2355 = vmatprep.subr.bf16.mxu1 %v3482_v9  ;;  %v3552_v8 = vld [vmem:[%s3863_s13 + $0x280] ss:$8 sps:$4 sm:$0xff]  }
  0x87   : > { %2519 = vmatprep.subr.bf16.mxu0 %v3485_v10  ;;  %v3555_v9 = vld [vmem:[%s3863_s13 + $0x680] ss:$8 sps:$4 sm:$0xff]   ;;  %v3560_v10 = vld [vmem:[%s3863_s13 + $0x294] ss:$8 sps:$4 sm:$0xff]  }
  0x89   : > { %2356 = vmatpush1.bf16.msra.mxu1 %v3480_v11  ;;  %v3563_v11 = vld [vmem:[%s3863_s13 + $0x694] ss:$8 sps:$4 sm:$0xff]  }
  0x8a   : > { %2520 = vmatpush1.bf16.msra.mxu0 %v3483_v12  ;;  %2357 = vmatprep.subr.bf16.mxu1 %v3488_v13  ;;  %v3558_v12 = vld [vmem:[%s3863_s13 + $0x290] ss:$8 sps:$4 sm:$0xff]  }
  0x8b   : > { %2521 = vmatprep.subr.bf16.mxu0 %v3491_v14  ;;  %v3561_v13 = vld [vmem:[%s3863_s13 + $0x690] ss:$8 sps:$4 sm:$0xff]   ;;  %v3566_v14 = vld [vmem:[%s3863_s13 + $0x2a4] ss:$8 sps:$4 sm:$0xff]  }
  0x8d   : > { %2358 = vmatpush1.bf16.msra.mxu1 %v3486_v15  ;;  %v3569_v15 = vld [vmem:[%s3863_s13 + $0x6a4] ss:$8 sps:$4 sm:$0xff]  }
  0x8e   : > { %2522 = vmatpush1.bf16.msra.mxu0 %v3489_v16  ;;  %2359 = vmatprep.subr.bf16.mxu1 %v3494_v17  ;;  %v3564_v16 = vld [vmem:[%s3863_s13 + $0x2a0] ss:$8 sps:$4 sm:$0xff]  }
  0x8f   : > { %2523 = vmatprep.subr.bf16.mxu0 %v3497_v20  ;;  %v3567_v17 = vld [vmem:[%s3863_s13 + $0x6a0] ss:$8 sps:$4 sm:$0xff]   ;;  %v3572_v20 = vld [vmem:[%s3863_s13 + $0x2b4] ss:$8 sps:$4 sm:$0xff]  }
  0x91   : > { %2360 = vmatpush1.bf16.msra.mxu1 %v3492_v23  ;;  %v3573_v23 = vld [vmem:[%s3863_s13 + $0x6b0] ss:$8 sps:$4 sm:$0xff]  }
  0x92   : > { %2524 = vmatpush1.bf16.msra.mxu0 %v3495_v24  ;;  %2361 = vmatprep.subr.bf16.mxu1 %v3500_v25  ;;  %v3578_v24 = vld [vmem:[%s3863_s13 + $0x2c4] ss:$8 sps:$4 sm:$0xff]  }
  0x93   : > { %2525 = vmatprep.subr.bf16.mxu0 %v3503_v26  ;;  %v3581_v25 = vld [vmem:[%s3863_s13 + $0x6c4] ss:$8 sps:$4 sm:$0xff]   ;;  %v3576_v26 = vld [vmem:[%s3863_s13 + $0x2c0] ss:$8 sps:$4 sm:$0xff]  }
  0x95   : > { %2362 = vmatpush1.bf16.msra.mxu1 %v3498_v54  ;;  %v3579_v54 = vld [vmem:[%s3863_s13 + $0x6c0] ss:$8 sps:$4 sm:$0xff]  }
  0x96   : > { %2526 = vmatpush1.bf16.msra.mxu0 %v3501_v58  ;;  %2372 = vmatprep.subr.bf16.mxu1 %v3506_v29  ;;  %v3584_v58 = vld [vmem:[%s3863_s13 + $0x2d4] ss:$8 sps:$4 sm:$0xff]  }
  0x97   : > { %2536 = vmatprep.subr.bf16.mxu0 %v3509_v30  ;;  %v3587_v29 = vld [vmem:[%s3863_s13 + $0x6d4] ss:$8 sps:$4 sm:$0xff]   ;;  %v3582_v30 = vld [vmem:[%s3863_s13 + $0x2d0] ss:$8 sps:$4 sm:$0xff]  }
  0x98   : > { %2364 = vmatmul.mubr.bf16.vlgmr.msra.gmra.mrb[0].mxu1 %v757_v33  ;;  %v3593_v33 = vld [vmem:[%s3863_s13 + $0x6e4] ss:$8 sps:$4 sm:$0xff]  }
  0x99   : > { %2528 = vmatmul.mubr.bf16.vlgmr.msra.gmra.mrb[0].mxu0 %v806_v34  ;;  %2373 = vmatpush1.bf16.msra.mxu1 %v3504_v35  ;;  %v3588_v34 = vld [vmem:[%s3863_s13 + $0x2e0] ss:$8 sps:$4 sm:$0xff]  }
  0x9a   : > { %2537 = vmatpush1.bf16.msra.mxu0 %v3507_v36  ;;  %2374 = vmatprep.subr.bf16.mxu1 %v3512_v37  ;;  %v3591_v35 = vld [vmem:[%s3863_s13 + $0x6e0] ss:$8 sps:$4 sm:$0xff]   ;;  %v3596_v36 = vld [vmem:[%s3863_s13 + $0x2f4] ss:$8 sps:$4 sm:$0xff]  }
  0x9b   : > { %2538 = vmatprep.subr.bf16.mxu0 %v3515_v38  ;;  %2404 = vmatprep.mubr.bf16.mxu1 %v4045_v39  ;;  %v3599_v37 = vld [vmem:[%s3863_s13 + $0x6f4] ss:$8 sps:$4 sm:$0xff]   ;;  %v3594_v38 = vld [vmem:[%s3863_s13 + $0x2f0] ss:$8 sps:$4 sm:$0xff]  }
  0x9c   : > { %2568 = vmatprep.mubr.bf16.mxu0 %v4048_v18 }
  0x9d   : > { %2375 = vmatpush1.bf16.msra.mxu1 %v3510_v19  ;;  %v3597_v19 = vld [vmem:[%s3863_s13 + $0x6f0] ss:$8 sps:$4 sm:$0xff]  }
  0x9e   : > { %2539 = vmatpush1.bf16.msra.mxu0 %v3513_v41  ;;  %2376 = vmatprep.subr.bf16.mxu1 %v3518_v42  ;;  %v3602_v41 = vld [vmem:[%s3863_s13 + $0x304] ss:$8 sps:$4 sm:$0xff]  }
  0x9f   : > { %2540 = vmatprep.subr.bf16.mxu0 %v3521_v43  ;;  %v3605_v42 = vld [vmem:[%s3863_s13 + $0x704] ss:$8 sps:$4 sm:$0xff]   ;;  %v4114_v43 = vrot.slane %v4023_v27, %v3914_v51  ;;  %v760_v27 = vcombine.high %v4045_v39, %v4045_v39 }
  0xa0   : > { %v3614_v39 = vld [vmem:[%s3863_s13 + $0x324] ss:$8 sps:$4 sm:$0xff]  }
  0xa1   : > { %2377 = vmatpush1.bf16.msra.mxu1 %v3516_v44  ;;  %v4118_v44 = vrot.slane %v4026_v28, %v3914_v51  ;;  %v3606_v28 = vld [vmem:[%s3863_s13 + $0x310] ss:$8 sps:$4 sm:$0xff]  }
  0xa2   : > { %2541 = vmatpush1.bf16.msra.mxu0 %v3519_v46  ;;  %2378 = vmatprep.subr.bf16.mxu1 %v3524_v47  ;;  %v3600_v46 = vld [vmem:[%s3863_s13 + $0x300] ss:$8 sps:$4 sm:$0xff]  }
  0xa3   : > { %2542 = vmatprep.subr.bf16.mxu0 %v3527_v48  ;;  %v3603_v47 = vld [vmem:[%s3863_s13 + $0x700] ss:$8 sps:$4 sm:$0xff]   ;;  %v3608_v48 = vld [vmem:[%s3863_s13 + $0x314] ss:$8 sps:$4 sm:$0xff]  }
  0xa5   : > { %2379 = vmatpush1.bf16.msra.mxu1 %v3522_v49  ;;  %v3611_v49 = vld [vmem:[%s3863_s13 + $0x714] ss:$8 sps:$4 sm:$0xff]  }
  0xa6   : > { %2543 = vmatpush1.bf16.msra.mxu0 %v3525_v50  ;;  %2380 = vmatprep.subr.bf16.mxu1 %v3530_v52  ;;  %v809_v50 = vcombine.high %v4048_v18, %v4048_v18  ;;  %v3609_v52 = vld [vmem:[%s3863_s13 + $0x710] ss:$8 sps:$4 sm:$0xff]   ;;  %v3612_v18 = vld [vmem:[%s3863_s13 + $0x320] ss:$8 sps:$4 sm:$0xff]  }
  0xa7   : > { %2544 = vmatprep.subr.bf16.mxu0 %v3533_v53  ;;  %v3617_v53 = vld [vmem:[%s3863_s13 + $0x724] ss:$8 sps:$4 sm:$0xff]  }
  0xa9   : > { %2381 = vmatpush1.bf16.msra.mxu1 %v3528_v55  ;;  %v3615_v55 = vld [vmem:[%s3863_s13 + $0x720] ss:$8 sps:$4 sm:$0xff]  }
  0xaa   : > { %2545 = vmatpush1.bf16.msra.mxu0 %v3531_v56  ;;  %2382 = vmatprep.subr.bf16.mxu1 %v3536_v57  ;;  %v3620_v56 = vld [vmem:[%s3863_s13 + $0x334] ss:$8 sps:$4 sm:$0xff]  }
  0xab   : > { %2546 = vmatprep.subr.bf16.mxu0 %v3539_v59  ;;  %v3623_v57 = vld [vmem:[%s3863_s13 + $0x734] ss:$8 sps:$4 sm:$0xff]   ;;  %v3618_v59 = vld [vmem:[%s3863_s13 + $0x330] ss:$8 sps:$4 sm:$0xff]  }
  0xad   : > { %2383 = vmatpush1.bf16.msra.mxu1 %v3534_v60  ;;  %v3621_v60 = vld [vmem:[%s3863_s13 + $0x730] ss:$8 sps:$4 sm:$0xff]  }
  0xae   : > { %2547 = vmatpush1.bf16.msra.mxu0 %v3537_v61  ;;  %2384 = vmatprep.subr.bf16.mxu1 %v3542_v62  ;;  %v3626_v61 = vld [vmem:[%s3863_s13 + $0x344] ss:$8 sps:$4 sm:$0xff]  }
  0xaf   : > { %2548 = vmatprep.subr.bf16.mxu0 %v3545_v63  ;;  %v3629_v62 = vld [vmem:[%s3863_s13 + $0x744] ss:$8 sps:$4 sm:$0xff]   ;;  %v3624_v63 = vld [vmem:[%s3863_s13 + $0x340] ss:$8 sps:$4 sm:$0xff]  }
  0xb1   : > { %2385 = vmatpush1.bf16.msra.mxu1 %v3540_v0  ;;  %v3627_v0 = vld [vmem:[%s3863_s13 + $0x740] ss:$8 sps:$4 sm:$0xff]  }
  0xb2   : > { %2549 = vmatpush1.bf16.msra.mxu0 %v3543_v1  ;;  %2386 = vmatprep.subr.bf16.mxu1 %v3548_v2  ;;  %v3632_v1 = vld [vmem:[%s3863_s13 + $0x354] ss:$8 sps:$4 sm:$0xff]  }
  0xb3   : > { %2550 = vmatprep.subr.bf16.mxu0 %v3551_v3  ;;  %v3635_v2 = vld [vmem:[%s3863_s13 + $0x754] ss:$8 sps:$4 sm:$0xff]   ;;  %v3630_v3 = vld [vmem:[%s3863_s13 + $0x350] ss:$8 sps:$4 sm:$0xff]  }
  0xb5   : > { %2387 = vmatpush1.bf16.msra.mxu1 %v3546_v4  ;;  %v3633_v4 = vld [vmem:[%s3863_s13 + $0x750] ss:$8 sps:$4 sm:$0xff]  }
  0xb6   : > { %2551 = vmatpush1.bf16.msra.mxu0 %v3549_v5  ;;  %2388 = vmatprep.subr.bf16.mxu1 %v3554_v6  ;;  %v3638_v5 = vld [vmem:[%s3863_s13 + $0x364] ss:$8 sps:$4 sm:$0xff]  }
  0xb7   : > { %2552 = vmatprep.subr.bf16.mxu0 %v3557_v7  ;;  %v3641_v6 = vld [vmem:[%s3863_s13 + $0x764] ss:$8 sps:$4 sm:$0xff]   ;;  %v3636_v7 = vld [vmem:[%s3863_s13 + $0x360] ss:$8 sps:$4 sm:$0xff]  }
  0xb9   : > { %2389 = vmatpush1.bf16.msra.mxu1 %v3552_v8  ;;  %v3639_v8 = vld [vmem:[%s3863_s13 + $0x760] ss:$8 sps:$4 sm:$0xff]  }
  0xba   : > { %2553 = vmatpush1.bf16.msra.mxu0 %v3555_v9  ;;  %2390 = vmatprep.subr.bf16.mxu1 %v3560_v10  ;;  %v3644_v9 = vld [vmem:[%s3863_s13 + $0x374] ss:$8 sps:$4 sm:$0xff]  }
  0xbb   : > { %2554 = vmatprep.subr.bf16.mxu0 %v3563_v11  ;;  %v3647_v10 = vld [vmem:[%s3863_s13 + $0x774] ss:$8 sps:$4 sm:$0xff]   ;;  %v3642_v11 = vld [vmem:[%s3863_s13 + $0x370] ss:$8 sps:$4 sm:$0xff]  }
  0xbd   : > { %2391 = vmatpush1.bf16.msra.mxu1 %v3558_v12  ;;  %v3645_v12 = vld [vmem:[%s3863_s13 + $0x770] ss:$8 sps:$4 sm:$0xff]  }
  0xbe   : > { %2555 = vmatpush1.bf16.msra.mxu0 %v3561_v13  ;;  %2392 = vmatprep.subr.bf16.mxu1 %v3566_v14  ;;  %v3650_v13 = vld [vmem:[%s3863_s13 + $0x384] ss:$8 sps:$4 sm:$0xff]  }
  0xbf   : > { %2556 = vmatprep.subr.bf16.mxu0 %v3569_v15  ;;  %v3653_v14 = vld [vmem:[%s3863_s13 + $0x784] ss:$8 sps:$4 sm:$0xff]   ;;  %v3648_v15 = vld [vmem:[%s3863_s13 + $0x380] ss:$8 sps:$4 sm:$0xff]  }
  0xc1   : > { %2393 = vmatpush1.bf16.msra.mxu1 %v3564_v16  ;;  %v3651_v16 = vld [vmem:[%s3863_s13 + $0x780] ss:$8 sps:$4 sm:$0xff]  }
  0xc2   : > { %2557 = vmatpush1.bf16.msra.mxu0 %v3567_v17  ;;  %2394 = vmatprep.subr.bf16.mxu1 %v3572_v20  ;;  %v3656_v17 = vld [vmem:[%s3863_s13 + $0x394] ss:$8 sps:$4 sm:$0xff]  }
  0xc3   : > { %2558 = vmatprep.subr.bf16.mxu0 %v3575_v21  ;;  %v3659_v20 = vld [vmem:[%s3863_s13 + $0x794] ss:$8 sps:$4 sm:$0xff]   ;;  %v3654_v21 = vld [vmem:[%s3863_s13 + $0x390] ss:$8 sps:$4 sm:$0xff]  }
  0xc5   : > { %2395 = vmatpush1.bf16.msra.mxu1 %v3570_v22  ;;  %v3657_v22 = vld [vmem:[%s3863_s13 + $0x790] ss:$8 sps:$4 sm:$0xff]  }
  0xc6   : > { %2559 = vmatpush1.bf16.msra.mxu0 %v3573_v23  ;;  %2396 = vmatprep.subr.bf16.mxu1 %v3578_v24  ;;  %v3662_v23 = vld [vmem:[%s3863_s13 + $0x3a4] ss:$8 sps:$4 sm:$0xff]  }
  0xc7   : > { %2560 = vmatprep.subr.bf16.mxu0 %v3581_v25  ;;  %v3665_v24 = vld [vmem:[%s3863_s13 + $0x7a4] ss:$8 sps:$4 sm:$0xff]   ;;  %v3660_v25 = vld [vmem:[%s3863_s13 + $0x3a0] ss:$8 sps:$4 sm:$0xff]  }
  0xc9   : > { %2397 = vmatpush1.bf16.msra.mxu1 %v3576_v26  ;;  %v3663_v26 = vld [vmem:[%s3863_s13 + $0x7a0] ss:$8 sps:$4 sm:$0xff]  }
  0xca   : > { %2561 = vmatpush1.bf16.msra.mxu0 %v3579_v54  ;;  %2398 = vmatprep.subr.bf16.mxu1 %v3584_v58  ;;  %v3668_v54 = vld [vmem:[%s3863_s13 + $0x3b4] ss:$8 sps:$4 sm:$0xff]  }
  0xcb   : > { %2562 = vmatprep.subr.bf16.mxu0 %v3587_v29  ;;  %v3671_v58 = vld [vmem:[%s3863_s13 + $0x7b4] ss:$8 sps:$4 sm:$0xff]   ;;  %v3666_v29 = vld [vmem:[%s3863_s13 + $0x3b0] ss:$8 sps:$4 sm:$0xff]  }
  0xcd   : > { %2399 = vmatpush1.bf16.msra.mxu1 %v3582_v30  ;;  %v3669_v30 = vld [vmem:[%s3863_s13 + $0x7b0] ss:$8 sps:$4 sm:$0xff]  }
  0xce   : > { %2563 = vmatpush1.bf16.msra.mxu0 %v3585_v31  ;;  %2400 = vmatprep.subr.bf16.mxu1 %v3590_v32  ;;  %v3674_v31 = vld [vmem:[%s3863_s13 + $0x3c4] ss:$8 sps:$4 sm:$0xff]  }
  0xcf   : > { %2564 = vmatprep.subr.bf16.mxu0 %v3593_v33  ;;  %v3677_v32 = vld [vmem:[%s3863_s13 + $0x7c4] ss:$8 sps:$4 sm:$0xff]   ;;  %v3672_v33 = vld [vmem:[%s3863_s13 + $0x3c0] ss:$8 sps:$4 sm:$0xff]  }
  0xd1   : > { %2401 = vmatpush1.bf16.msra.mxu1 %v3588_v34  ;;  %v3675_v34 = vld [vmem:[%s3863_s13 + $0x7c0] ss:$8 sps:$4 sm:$0xff]  }
  0xd2   : > { %2565 = vmatpush1.bf16.msra.mxu0 %v3591_v35  ;;  %2402 = vmatprep.subr.bf16.mxu1 %v3596_v36  ;;  %v3680_v35 = vld [vmem:[%s3863_s13 + $0x3d4] ss:$8 sps:$4 sm:$0xff]  }
  0xd3   : > { %2566 = vmatprep.subr.bf16.mxu0 %v3599_v37  ;;  %v3683_v36 = vld [vmem:[%s3863_s13 + $0x7d4] ss:$8 sps:$4 sm:$0xff]   ;;  %v3678_v37 = vld [vmem:[%s3863_s13 + $0x3d0] ss:$8 sps:$4 sm:$0xff]  }
  0xd5   : > { %2403 = vmatpush1.bf16.msra.mxu1 %v3594_v38  ;;  %v3681_v38 = vld [vmem:[%s3863_s13 + $0x7d0] ss:$8 sps:$4 sm:$0xff]  }
  0xd6   : > { %2567 = vmatpush1.bf16.msra.mxu0 %v3597_v19  ;;  %2413 = vmatprep.subr.bf16.mxu1 %v3602_v41  ;;  %v3686_v19 = vld [vmem:[%s3863_s13 + $0x3e4] ss:$8 sps:$4 sm:$0xff]  }
  0xd7   : > { %2577 = vmatprep.subr.bf16.mxu0 %v3605_v42  ;;  %v3689_v41 = vld [vmem:[%s3863_s13 + $0x7e4] ss:$8 sps:$4 sm:$0xff]   ;;  %v3684_v42 = vld [vmem:[%s3863_s13 + $0x3e0] ss:$8 sps:$4 sm:$0xff]  }
  0xd8   : > { %2405 = vmatmul.mubr.bf16.vlgmr.msra.gmra.mrb[0].mxu1 %v4114_v43 }
  0xd9   : > { %2569 = vmatmul.mubr.bf16.vlgmr.msra.gmra.mrb[0].mxu0 %v4118_v44  ;;  %2414 = vmatpush1.bf16.msra.mxu1 %v3600_v46  ;;  %v3687_v46 = vld [vmem:[%s3863_s13 + $0x7e0] ss:$8 sps:$4 sm:$0xff]  }
  0xda   : > { %2578 = vmatpush1.bf16.msra.mxu0 %v3603_v47  ;;  %2415 = vmatprep.subr.bf16.mxu1 %v3608_v48  ;;  %v3692_v47 = vld [vmem:[%s3863_s13 + $0x3f4] ss:$8 sps:$4 sm:$0xff]  }
  0xdb   : > { %2579 = vmatprep.subr.bf16.mxu0 %v3611_v49  ;;  %2445 = vmatprep.mubr.bf16.mxu1 %v760_v27  ;;  %v3695_v48 = vld [vmem:[%s3863_s13 + $0x7f4] ss:$8 sps:$4 sm:$0xff]   ;;  %v4187_v49 = vld.sshfl [vmem:[%s3858_s10 + $0x10] sm:$0x11 pattern:$0x75316420] }
  0xdc   : > { %2609 = vmatprep.mubr.bf16.mxu0 %v809_v50  ;;  %v3690_v27 = vld [vmem:[%s3863_s13 + $0x3f0] ss:$8 sps:$4 sm:$0xff]  }
  0xdd   : > { %2416 = vmatpush1.bf16.msra.mxu1 %v3606_v28  ;;  %v3693_v50 = vld [vmem:[%s3863_s13 + $0x7f0] ss:$8 sps:$4 sm:$0xff]   ;;  %v817_v28 = vcombine.high %v4187_v49, %v4187_v49 }
  0xde   : > { %2580 = vmatpush1.bf16.msra.mxu0 %v3609_v52  ;;  %2417 = vmatprep.subr.bf16.mxu1 %v3614_v39  ;;  %v3698_v52 = vld [vmem:[%s3863_s13 + $0x804] ss:$8 sps:$4 sm:$0xff]   ;;  %v758_v39 = vcombine.high %v4114_v43, %v4114_v43  ;;  %v3699_v43 = vld [vmem:[%s3863_s13 + $0x810] ss:$8 sps:$4 sm:$0xff]  }
  0xdf   : > { %2581 = vmatprep.subr.bf16.mxu0 %v3617_v53  ;;  %v807_v53 = vcombine.high %v4118_v44, %v4118_v44  ;;  %v3704_v44 = vld [vmem:[%s3863_s13 + $0x824] ss:$8 sps:$4 sm:$0xff]  }
  0xe1   : > { %2418 = vmatpush1.bf16.msra.mxu1 %v3612_v18  ;;  %v3696_v18 = vld [vmem:[%s3863_s13 + $0x800] ss:$8 sps:$4 sm:$0xff]  }
  0xe2   : > { %2582 = vmatpush1.bf16.msra.mxu0 %v3615_v55  ;;  %2419 = vmatprep.subr.bf16.mxu1 %v3620_v56  ;;  %v831_v55 = vrot.slane %v817_v28, %v3914_v51  ;;  %v3701_v56 = vld [vmem:[%s3863_s13 + $0x814] ss:$8 sps:$4 sm:$0xff]  }
  0xe3   : > { %2583 = vmatprep.subr.bf16.mxu0 %v3623_v57  ;;  %v3702_v57 = vld [vmem:[%s3863_s13 + $0x820] ss:$8 sps:$4 sm:$0xff]  }
  0xe5   : > { %2420 = vmatpush1.bf16.msra.mxu1 %v3618_v59  ;;  %v3707_v59 = vld [vmem:[%s3863_s13 + $0x834] ss:$8 sps:$4 sm:$0xff]  }
  0xe6   : > { %2584 = vmatpush1.bf16.msra.mxu0 %v3621_v60  ;;  %2421 = vmatprep.subr.bf16.mxu1 %v3626_v61  ;;  %v3705_v60 = vld [vmem:[%s3863_s13 + $0x830] ss:$8 sps:$4 sm:$0xff]   ;;  %v3710_v61 = vld [vmem:[%s3863_s13 + $0x844] ss:$8 sps:$4 sm:$0xff]  }
  0xe7   : > { %2585 = vmatprep.subr.bf16.mxu0 %v3629_v62  ;;  %v3708_v62 = vld [vmem:[%s3863_s13 + $0x840] ss:$8 sps:$4 sm:$0xff]  }
  0xe9   : > { %2422 = vmatpush1.bf16.msra.mxu1 %v3624_v63  ;;  %v3713_v63 = vld [vmem:[%s3863_s13 + $0x854] ss:$8 sps:$4 sm:$0xff]  }
  0xea   : > { %2586 = vmatpush1.bf16.msra.mxu0 %v3627_v0  ;;  %2423 = vmatprep.subr.bf16.mxu1 %v3632_v1  ;;  %v3711_v0 = vld [vmem:[%s3863_s13 + $0x850] ss:$8 sps:$4 sm:$0xff]   ;;  %v3716_v1 = vld [vmem:[%s3863_s13 + $0x864] ss:$8 sps:$4 sm:$0xff]  }
  0xeb   : > { %2587 = vmatprep.subr.bf16.mxu0 %v3635_v2  ;;  %v3714_v2 = vld [vmem:[%s3863_s13 + $0x860] ss:$8 sps:$4 sm:$0xff]  }
  0xed   : > { %2424 = vmatpush1.bf16.msra.mxu1 %v3630_v3  ;;  %v3719_v3 = vld [vmem:[%s3863_s13 + $0x874] ss:$8 sps:$4 sm:$0xff]  }
  0xee   : > { %2588 = vmatpush1.bf16.msra.mxu0 %v3633_v4  ;;  %2425 = vmatprep.subr.bf16.mxu1 %v3638_v5  ;;  %v3717_v4 = vld [vmem:[%s3863_s13 + $0x870] ss:$8 sps:$4 sm:$0xff]   ;;  %v3722_v5 = vld [vmem:[%s3863_s13 + $0x884] ss:$8 sps:$4 sm:$0xff]  }
  0xef   : > { %2589 = vmatprep.subr.bf16.mxu0 %v3641_v6  ;;  %v3720_v6 = vld [vmem:[%s3863_s13 + $0x880] ss:$8 sps:$4 sm:$0xff]  }
  0xf1   : > { %2426 = vmatpush1.bf16.msra.mxu1 %v3636_v7  ;;  %v3725_v7 = vld [vmem:[%s3863_s13 + $0x894] ss:$8 sps:$4 sm:$0xff]  }
  0xf2   : > { %2590 = vmatpush1.bf16.msra.mxu0 %v3639_v8  ;;  %2427 = vmatprep.subr.bf16.mxu1 %v3644_v9  ;;  %v3723_v8 = vld [vmem:[%s3863_s13 + $0x890] ss:$8 sps:$4 sm:$0xff]   ;;  %v3728_v9 = vld [vmem:[%s3863_s13 + $0x8a4] ss:$8 sps:$4 sm:$0xff]  }
  0xf3   : > { %2591 = vmatprep.subr.bf16.mxu0 %v3647_v10  ;;  %v3726_v10 = vld [vmem:[%s3863_s13 + $0x8a0] ss:$8 sps:$4 sm:$0xff]  }
  0xf5   : > { %2428 = vmatpush1.bf16.msra.mxu1 %v3642_v11  ;;  %v3731_v11 = vld [vmem:[%s3863_s13 + $0x8b4] ss:$8 sps:$4 sm:$0xff]  }
  0xf6   : > { %2592 = vmatpush1.bf16.msra.mxu0 %v3645_v12  ;;  %2429 = vmatprep.subr.bf16.mxu1 %v3650_v13  ;;  %v3729_v12 = vld [vmem:[%s3863_s13 + $0x8b0] ss:$8 sps:$4 sm:$0xff]   ;;  %v3734_v13 = vld [vmem:[%s3863_s13 + $0x8c4] ss:$8 sps:$4 sm:$0xff]  }
  0xf7   : > { %2593 = vmatprep.subr.bf16.mxu0 %v3653_v14  ;;  %v3732_v14 = vld [vmem:[%s3863_s13 + $0x8c0] ss:$8 sps:$4 sm:$0xff]  }
  0xf9   : > { %2430 = vmatpush1.bf16.msra.mxu1 %v3648_v15  ;;  %v3737_v15 = vld [vmem:[%s3863_s13 + $0x8d4] ss:$8 sps:$4 sm:$0xff]  }
  0xfa   : > { %2594 = vmatpush1.bf16.msra.mxu0 %v3651_v16  ;;  %2431 = vmatprep.subr.bf16.mxu1 %v3656_v17  ;;  %v3735_v16 = vld [vmem:[%s3863_s13 + $0x8d0] ss:$8 sps:$4 sm:$0xff]   ;;  %v3740_v17 = vld [vmem:[%s3863_s13 + $0x8e4] ss:$8 sps:$4 sm:$0xff]  }
  0xfb   : > { %2595 = vmatprep.subr.bf16.mxu0 %v3659_v20  ;;  %v3738_v20 = vld [vmem:[%s3863_s13 + $0x8e0] ss:$8 sps:$4 sm:$0xff]  }
  0xfd   : > { %2432 = vmatpush1.bf16.msra.mxu1 %v3654_v21  ;;  %v3743_v21 = vld [vmem:[%s3863_s13 + $0x8f4] ss:$8 sps:$4 sm:$0xff]  }
  0xfe   : > { %2596 = vmatpush1.bf16.msra.mxu0 %v3657_v22  ;;  %2433 = vmatprep.subr.bf16.mxu1 %v3662_v23  ;;  %v3741_v22 = vld [vmem:[%s3863_s13 + $0x8f0] ss:$8 sps:$4 sm:$0xff]   ;;  %v824_v23 = vrot.slane %v4187_v49, %v3914_v51 }
  0xff   : > { %2597 = vmatprep.subr.bf16.mxu0 %v3665_v24 }
 0x101   : > { %2434 = vmatpush1.bf16.msra.mxu1 %v3660_v25 }
 0x102   : > { %2598 = vmatpush1.bf16.msra.mxu0 %v3663_v26  ;;  %2435 = vmatprep.subr.bf16.mxu1 %v3668_v54 }
 0x103   : > { %2599 = vmatprep.subr.bf16.mxu0 %v3671_v58 }
 0x105   : > { %2436 = vmatpush1.bf16.msra.mxu1 %v3666_v29 }
 0x106   : > { %2600 = vmatpush1.bf16.msra.mxu0 %v3669_v30  ;;  %2437 = vmatprep.subr.bf16.mxu1 %v3674_v31 }
 0x107   : > { %2601 = vmatprep.subr.bf16.mxu0 %v3677_v32 }
 0x109   : > { %2438 = vmatpush1.bf16.msra.mxu1 %v3672_v33 }
 0x10a   : > { %2602 = vmatpush1.bf16.msra.mxu0 %v3675_v34  ;;  %2439 = vmatprep.subr.bf16.mxu1 %v3680_v35 }
 0x10b   : > { %2603 = vmatprep.subr.bf16.mxu0 %v3683_v36  ;;  %v417_v36 = vld [vmem:[#allocation2] sm:$0x3] }
 0x10d   : > { %2440 = vmatpush1.bf16.msra.mxu1 %v3678_v37 }
 0x10e   : > { %2604 = vmatpush1.bf16.msra.mxu0 %v3681_v38  ;;  %2441 = vmatprep.subr.bf16.mxu1 %v3686_v19 }
 0x10f   : > { %2605 = vmatprep.subr.bf16.mxu0 %v3689_v41  ;;  %v2688_v41 = vld [vmem:[%s4264_s2] sm:$0x3] (!%p3231_p8) }
 0x111   : > { %2442 = vmatpush1.bf16.msra.mxu1 %v3684_v42  ;;  %v2690_v42 = vld [vmem:[%s3848_s28] sm:$0x3] (!%p3231_p8) }
 0x112   : > { %2606 = vmatpush1.bf16.msra.mxu0 %v3687_v46  ;;  %2443 = vmatprep.subr.bf16.mxu1 %v3692_v47  ;;  %v2691_v47 = vunpack.c.l.bf16 (!%p3231_p8), %v2690_v42 }
 0x113   : > { %2607 = vmatprep.subr.bf16.mxu0 %v3695_v48 }
 0x114   : > { %v2699_v48 = vrot.slane (!%p3231_p8), %v2691_v47, %v3914_v51 }
 0x115   : > { %2444 = vmatpush1.bf16.msra.mxu1 %v3690_v27  ;;  %v2710_v27 = vsub.s32 (!%p3231_p8), 1, %v3906_v45 }
 0x116   : > { %2608 = vmatpush1.bf16.msra.mxu0 %v3693_v50 }
 0x117   : > { %2618 = vmatprep.subr.bf16.mxu0 %v3698_v52 }
 0x118   : > { %2446 = vmatmul.mubr.bf16.vlgmr.msra.gmra.mrb[0].mxu1 %v758_v39 }
 0x119   : > { %2610 = vmatmul.mubr.bf16.vlgmr.msra.gmra.mrb[0].mxu0 %v807_v53 }
 0x11a   : > { %2619 = vmatpush1.bf16.msra.mxu0 %v3696_v18  ;;  %2650 = vmatprep.mubr.bf16.mxu0 %v831_v55  ;;  %v2741_v18 = vld [vmem:[%s3853_s6] sm:$0x3] (!%p3231_p8) }
 0x11b   : > { %2620 = vmatprep.subr.bf16.mxu0 %v3701_v56 }
 0x11e   : > { %2621 = vmatpush1.bf16.msra.mxu0 %v3699_v43 }
 0x11f   : > { %2622 = vmatprep.subr.bf16.mxu0 %v3704_v44 }
 0x122   : > { %2623 = vmatpush1.bf16.msra.mxu0 %v3702_v57 }
 0x123   : > { %2624 = vmatprep.subr.bf16.mxu0 %v3707_v59 }
 0x126   : > { %2625 = vmatpush1.bf16.msra.mxu0 %v3705_v60 }
 0x127   : > { %2626 = vmatprep.subr.bf16.mxu0 %v3710_v61 }
 0x12a   : > { %2627 = vmatpush1.bf16.msra.mxu0 %v3708_v62 }
 0x12b   : > { %2628 = vmatprep.subr.bf16.mxu0 %v3713_v63 }
 0x12e   : > { %2629 = vmatpush1.bf16.msra.mxu0 %v3711_v0 }
 0x12f   : > { %2630 = vmatprep.subr.bf16.mxu0 %v3716_v1 }
 0x132   : > { %2631 = vmatpush1.bf16.msra.mxu0 %v3714_v2 }
 0x133   : > { %2632 = vmatprep.subr.bf16.mxu0 %v3719_v3 }
 0x136   : > { %2633 = vmatpush1.bf16.msra.mxu0 %v3717_v4 }
 0x137   : > { %2634 = vmatprep.subr.bf16.mxu0 %v3722_v5 }
 0x13a   : > { %2635 = vmatpush1.bf16.msra.mxu0 %v3720_v6 }
 0x13b   : > { %2636 = vmatprep.subr.bf16.mxu0 %v3725_v7 }
 0x13e   : > { %2637 = vmatpush1.bf16.msra.mxu0 %v3723_v8 }
 0x13f   : > { %2638 = vmatprep.subr.bf16.mxu0 %v3728_v9 }
 0x142   : > { %2639 = vmatpush1.bf16.msra.mxu0 %v3726_v10 }
 0x143   : > { %2640 = vmatprep.subr.bf16.mxu0 %v3731_v11 }
 0x146   : > { %2641 = vmatpush1.bf16.msra.mxu0 %v3729_v12 }
 0x147   : > { %2642 = vmatprep.subr.bf16.mxu0 %v3734_v13 }
 0x14a   : > { %2643 = vmatpush1.bf16.msra.mxu0 %v3732_v14 }
 0x14b   : > { %2644 = vmatprep.subr.bf16.mxu0 %v3737_v15 }
 0x14e   : > { %2645 = vmatpush1.bf16.msra.mxu0 %v3735_v16 }
 0x14f   : > { %2646 = vmatprep.subr.bf16.mxu0 %v3740_v17 }
 0x152   : > { %2647 = vmatpush1.bf16.msra.mxu0 %v3738_v20 }
 0x153   : > { %2648 = vmatprep.subr.bf16.mxu0 %v3743_v21 }
 0x156   : > { %2649 = vmatpush1.bf16.msra.mxu0 %v3741_v22 }
 0x159   : > { %2651 = vmatmul.mubr.bf16.vlgmr.msra.gmra.mrb[0].mxu0 %v824_v23 }
 0x1eb   : > { %v2447_v24 = vpop.f32.mrb[0].mxu1 }
 0x1ec   : > { %v2449_v25 = vpop.f32.mrb[1].mxu1 }
 0x1ed   : > { %v2451_v26 = vpop.f32.mrb[2].mxu1 }
 0x1ee   : > { %v2452_v54 = vpop.f32.mrb[3].mxu1 }
 0x22c   : > { %v2652_v58 = vpop.f32.mrb[0].mxu0 }
 0x22d   : > { %v3235_v29 = vadd.f32 %v2652_v58, %v2447_v24  ;;  %v2654_v30 = vpop.f32.mrb[1].mxu0 }
 0x22e   : > { %v3236_v31 = vadd.f32 %v2654_v30, %v2449_v25  ;;  %v2656_v32 = vpop.f32.mrb[2].mxu0 }
 0x22f   : > { %v2657_v33 = vpop.f32.mrb[3].mxu0 }
 0x230   : > { %v2661_v34 = vcombine.low %v3235_v29, %v3236_v31 }
 0x232   : > { %v2668_v35 = vrot.slane %v2661_v34, %v3914_v51  ;;  %2686 = sbr.rel (%p3231_p8) target bundleno = 592 (0x250), region = 44 }
 0x234   : > { %v2675_v37 = vrot.slane %v2668_v35, %v3914_v51 }
 0x236   : > { %v2677_v38 = vadd.f32 %v2675_v37, %v417_v36 }
 0x238   : > { %2682 = vst.msk [vmem:[#allocation2] sm:$0x3] %vm2680_vm1, %v2677_v38 }
 0x23f   : > { %v2687_v19 = vld [vmem:[#allocation2] sm:$0x3] }
 0x240   : > { %v2689_v46 = vadd.f32 %v2688_v41, %v2687_v19 }
 0x242   : > { %v2701_v49 = vadd.f32 %v2699_v48, %v2689_v46 }
 0x244   : > { %v2702_v50 = vmax.f32 %v2701_v49, 0.0 }
 0x246   : > { %v2707_v28 = vrot.slane %v2702_v50, %v2706_v40  ;;  %v2711_v52 = vrot.slane %v2702_v50, %v2710_v27 }
 0x248   : > { %v3232_v39 = vpack.c.bf16 %v2711_v52, %v2707_v28 }
 0x24a   : > { %v2725_v53 = vrot.slane %v3232_v39, %v3914_v51 }
 0x24c   : > { %v2732_v55 = vrot.slane %v2725_v53, %v3914_v51 }
 0x24e   : > { %v2742_v56 = vsel %vm2740_vm8, %v2732_v55, %v2741_v18 }
 0x24f   : > { %2743 = vst [vmem:[%s3853_s6] sm:$0x3] %v2742_v56 }
 0x250 PF: > { %s14_s19 = sadd.s32 1, %s3782_s19   ;;  %s4267_s15 = smov %s3774_s17 }
 0x251   : > { %p11_p9 = scmp.ge.s32.totalorder %s14_s19, 8   ;;  %s4268_s16 = smov %s3778_s18 }
 0x252   : > { %s4269_s17 = smov %s4272_s20  ;;  %s4270_s18 = smov %s4276_s21 }
 0x253   :  { %13 = sbr.rel (!%p11_p9) target bundleno = 3 (0x3), region = 83 }

// kernel: medicalnet_encoder_forward.29
= control target key start
LH: loop header
LB: loop body
LE: loop exit
PB: predicated region body
PF: predicated region fallthrough
CT: control target
= control target key end

     0   :  { %s4928_s12 = smov 0   ;;  %s4930_s13 = smov 0   ;;  %s6018_s0 = inlined_call_operand.vmem [shape: bf16[2,3,1,2304], index: 0, kind: input, shape index: {}]   ;;  %s6019_s1 = inlined_call_operand.vmem [shape: bf16[3,2304,512], index: 1, kind: input, shape index: {}]   ;;  %s6020_s2 = inlined_call_operand.vmem [shape: f32[1,512], index: 2, kind: input, shape index: {}]   ;;  %s6021_s3 = inlined_call_operand.vmem [shape: bf16[2,1,1,512], index: 3, kind: output, shape index: {}]  }
   0x1   :  { %s4932_s14 = smov 0   ;;  %s4934_s15 = smov 0  }
   0x2   :  { %s4936_s16 = smov 0   ;;  %s4938_s17 = smov 0  }
   0x3   :  { %s4940_s18 = smov 0   ;;  %s4942_s19 = smov 0  }
   0x4   :  { %s4944_s20 = smov 0  }
   0x5 LB: > { %s31_s21 = sadd.s32 1, %s4892_s17  ;;  %s34_s22 = sadd.s32 1, %s4896_s18  ;;  %s4904_s20 = sphi %s4944_s20, %s13_s20   ;;  %s4900_s19 = sphi %s4942_s19, %s6029_s19   ;;  %s4896_s18 = sphi %s4940_s18, %s6028_s18   ;;  %s4892_s17 = sphi %s4938_s17, %s6027_s17   ;;  %s4888_s16 = sphi %s4936_s16, %s6026_s16   ;;  %s4884_s15 = sphi %s4934_s15, %s6025_s15   ;;  %s4880_s14 = sphi %s4932_s14, %s6024_s14   ;;  %s4876_s13 = sphi %s4930_s13, %s6023_s13   ;;  %s4872_s12 = sphi %s4928_s12, %s6022_s12  }
   0x6   : > { %p32_p0 = scmp.ge.s32.totalorder %s31_s21, 3  ;;  %p96_p1 = scmp.ne.s32.totalorder %s4876_s13, %s4872_s12 }
   0x7   : > { %p97_p2 = scmp.eq.s32.totalorder %s4904_s20, 0  ;;  %s46_s23 = sadd.s32 1, %s4900_s19 }
   0x8   : > { %s6031_s21 = smov (%p32_p0, %s31_s21), 0  ;;  %s6033_s22 = smov (!%p32_p0, %s34_s22), %s4896_s18 }
   0x9   : > { %p36_p3 = scmp.ge.s32.totalorder %s6033_s22, 2  ;;  %s84_s24 = ssub.s32 %s4892_s17, %s6031_s21 }
   0xa   : > { %p98_p4 = por %p97_p2, %p96_p1  ;;  %s89_s26 = sadd.s32 1, %s4876_s13 }
   0xb   : > { %s6035_s22 = smov (%p36_p3, %s6033_s22), 0  ;;  %s6037_s23 = smov (!%p36_p3, %s46_s23), %s4900_s19 }
   0xc   : > { %s85_s25 = ssub.s32 %s4896_s18, %s6035_s22  ;;  %p48_p5 = scmp.ge.s32.totalorder %s6037_s23, 2 }
   0xd   : > { %s86_s27 = sor.u32 %s85_s25, %s84_s24  ;;  %p3990_p7 = scmp.ge.s32.totalorder %s4904_s20, 12 }
   0xe   : > { %p87_p6 = scmp.eq.s32.totalorder %s86_s27, 0  ;;  %s6039_s23 = smov (%p48_p5, %s6037_s23), 0 }
   0xf   : > { %180 = sbr.rel (%p3990_p7) target bundleno = 174 (0xae), region = 16 }
  0x10   : > { %s4993_s28 = scalar_select %p87_p6, %s4876_s13, %s89_s26  }
  0x16   : > { %202 = sbr.rel (!%p98_p4) target bundleno = 174 (0xae), region = 24  ;;  %s204_s29 = sand.u32 (%p98_p4), 1, %s4876_s13  }
  0x17   : > { %s4321_s30 = smul.u32 (%p98_p4), 2304, %s204_s29  ;;  %s3991_s4 = sshll.u32 (%p98_p4), %s4896_s18, 1 }
  0x18   : > { %s4322_s5 = smul.u32 (%p98_p4), 1152, %s4892_s17 }
  0x19   : > { %s5007_s11 = scalar_lea.vmem (%p98_p4), [#allocation3], %s4321_s30 }
  0x1a   : > { %s209_s6 = sadd.s32 (%p98_p4), %s4322_s5, %s3991_s4 }
  0x1b   : > { %s3992_s7 = sshll.u32 (%p98_p4), %s209_s6, 2 }
  0x1c   : > { %s5002_s10 = scalar_lea.vmem (%p98_p4), %s6019_s1, %s3992_s7 }
  0x1d   : > { %v813_v0 = vld [vmem:[%s5002_s10] sm:$0xff]  ;;  %v815_v1 = vld [vmem:[%s5002_s10 + $0x10] sm:$0xff] }
  0x1e   : > { %v817_v2 = vld [vmem:[%s5002_s10 + $0x20] sm:$0xff]  ;;  %814 = vst [vmem:[%s5007_s11] sm:$0xff] %v813_v0  ;;  %816 = vst [vmem:[%s5007_s11 + $0x8] sm:$0xff] %v815_v1  ;;  %v819_v3 = vld [vmem:[%s5002_s10 + $0x30] sm:$0xff] }
  0x1f   : > { %818 = vst [vmem:[%s5007_s11 + $0x10] sm:$0xff] %v817_v2  ;;  %v821_v4 = vld [vmem:[%s5002_s10 + $0x40] sm:$0xff]  ;;  %v823_v5 = vld [vmem:[%s5002_s10 + $0x50] sm:$0xff]  ;;  %820 = vst [vmem:[%s5007_s11 + $0x18] sm:$0xff] %v819_v3 }
  0x20   : > { %822 = vst [vmem:[%s5007_s11 + $0x20] sm:$0xff] %v821_v4  ;;  %824 = vst [vmem:[%s5007_s11 + $0x28] sm:$0xff] %v823_v5  ;;  %v825_v6 = vld [vmem:[%s5002_s10 + $0x60] sm:$0xff]  ;;  %v827_v7 = vld [vmem:[%s5002_s10 + $0x70] sm:$0xff] }
  0x21   : > { %v829_v8 = vld [vmem:[%s5002_s10 + $0x80] sm:$0xff]  ;;  %826 = vst [vmem:[%s5007_s11 + $0x30] sm:$0xff] %v825_v6  ;;  %828 = vst [vmem:[%s5007_s11 + $0x38] sm:$0xff] %v827_v7  ;;  %v831_v9 = vld [vmem:[%s5002_s10 + $0x90] sm:$0xff] }
  0x22   : > { %830 = vst [vmem:[%s5007_s11 + $0x40] sm:$0xff] %v829_v8  ;;  %v833_v10 = vld [vmem:[%s5002_s10 + $0xa0] sm:$0xff]  ;;  %v835_v11 = vld [vmem:[%s5002_s10 + $0xb0] sm:$0xff]  ;;  %832 = vst [vmem:[%s5007_s11 + $0x48] sm:$0xff] %v831_v9 }
  0x23   : > { %834 = vst [vmem:[%s5007_s11 + $0x50] sm:$0xff] %v833_v10  ;;  %836 = vst [vmem:[%s5007_s11 + $0x58] sm:$0xff] %v835_v11  ;;  %v837_v12 = vld [vmem:[%s5002_s10 + $0xc0] sm:$0xff]  ;;  %v839_v13 = vld [vmem:[%s5002_s10 + $0xd0] sm:$0xff] }
  0x24   : > { %v841_v14 = vld [vmem:[%s5002_s10 + $0xe0] sm:$0xff]  ;;  %838 = vst [vmem:[%s5007_s11 + $0x60] sm:$0xff] %v837_v12  ;;  %840 = vst [vmem:[%s5007_s11 + $0x68] sm:$0xff] %v839_v13  ;;  %v843_v15 = vld [vmem:[%s5002_s10 + $0xf0] sm:$0xff] }
  0x25   : > { %842 = vst [vmem:[%s5007_s11 + $0x70] sm:$0xff] %v841_v14  ;;  %v845_v16 = vld [vmem:[%s5002_s10 + $0x100] sm:$0xff]  ;;  %v847_v17 = vld [vmem:[%s5002_s10 + $0x110] sm:$0xff]  ;;  %844 = vst [vmem:[%s5007_s11 + $0x78] sm:$0xff] %v843_v15 }
  0x26   : > { %846 = vst [vmem:[%s5007_s11 + $0x80] sm:$0xff] %v845_v16  ;;  %848 = vst [vmem:[%s5007_s11 + $0x88] sm:$0xff] %v847_v17  ;;  %v849_v18 = vld [vmem:[%s5002_s10 + $0x120] sm:$0xff]  ;;  %v851_v19 = vld [vmem:[%s5002_s10 + $0x130] sm:$0xff] }
  0x27   : > { %v853_v20 = vld [vmem:[%s5002_s10 + $0x140] sm:$0xff]  ;;  %850 = vst [vmem:[%s5007_s11 + $0x90] sm:$0xff] %v849_v18  ;;  %852 = vst [vmem:[%s5007_s11 + $0x98] sm:$0xff] %v851_v19  ;;  %v855_v21 = vld [vmem:[%s5002_s10 + $0x150] sm:$0xff] }
  0x28   : > { %854 = vst [vmem:[%s5007_s11 + $0xa0] sm:$0xff] %v853_v20  ;;  %v857_v22 = vld [vmem:[%s5002_s10 + $0x160] sm:$0xff]  ;;  %v859_v23 = vld [vmem:[%s5002_s10 + $0x170] sm:$0xff]  ;;  %856 = vst [vmem:[%s5007_s11 + $0xa8] sm:$0xff] %v855_v21 }
  0x29   : > { %858 = vst [vmem:[%s5007_s11 + $0xb0] sm:$0xff] %v857_v22  ;;  %860 = vst [vmem:[%s5007_s11 + $0xb8] sm:$0xff] %v859_v23  ;;  %v861_v24 = vld [vmem:[%s5002_s10 + $0x180] sm:$0xff]  ;;  %v863_v25 = vld [vmem:[%s5002_s10 + $0x190] sm:$0xff] }
  0x2a   : > { %v865_v26 = vld [vmem:[%s5002_s10 + $0x1a0] sm:$0xff]  ;;  %862 = vst [vmem:[%s5007_s11 + $0xc0] sm:$0xff] %v861_v24  ;;  %864 = vst [vmem:[%s5007_s11 + $0xc8] sm:$0xff] %v863_v25  ;;  %v867_v27 = vld [vmem:[%s5002_s10 + $0x1b0] sm:$0xff] }
  0x2b   : > { %866 = vst [vmem:[%s5007_s11 + $0xd0] sm:$0xff] %v865_v26  ;;  %v869_v28 = vld [vmem:[%s5002_s10 + $0x1c0] sm:$0xff]  ;;  %v871_v29 = vld [vmem:[%s5002_s10 + $0x1d0] sm:$0xff]  ;;  %868 = vst [vmem:[%s5007_s11 + $0xd8] sm:$0xff] %v867_v27 }
  0x2c   : > { %870 = vst [vmem:[%s5007_s11 + $0xe0] sm:$0xff] %v869_v28  ;;  %872 = vst [vmem:[%s5007_s11 + $0xe8] sm:$0xff] %v871_v29  ;;  %v873_v30 = vld [vmem:[%s5002_s10 + $0x1e0] sm:$0xff]  ;;  %v875_v31 = vld [vmem:[%s5002_s10 + $0x1f0] sm:$0xff] }
  0x2d   : > { %v877_v32 = vld [vmem:[%s5002_s10 + $0x200] sm:$0xff]  ;;  %874 = vst [vmem:[%s5007_s11 + $0xf0] sm:$0xff] %v873_v30  ;;  %876 = vst [vmem:[%s5007_s11 + $0xf8] sm:$0xff] %v875_v31  ;;  %v879_v33 = vld [vmem:[%s5002_s10 + $0x210] sm:$0xff] }
  0x2e   : > { %878 = vst [vmem:[%s5007_s11 + $0x100] sm:$0xff] %v877_v32  ;;  %v881_v34 = vld [vmem:[%s5002_s10 + $0x220] sm:$0xff]  ;;  %v883_v35 = vld [vmem:[%s5002_s10 + $0x230] sm:$0xff]  ;;  %880 = vst [vmem:[%s5007_s11 + $0x108] sm:$0xff] %v879_v33 }
  0x2f   : > { %882 = vst [vmem:[%s5007_s11 + $0x110] sm:$0xff] %v881_v34  ;;  %884 = vst [vmem:[%s5007_s11 + $0x118] sm:$0xff] %v883_v35  ;;  %v885_v36 = vld [vmem:[%s5002_s10 + $0x240] sm:$0xff]  ;;  %v887_v37 = vld [vmem:[%s5002_s10 + $0x250] sm:$0xff] }
  0x30   : > { %v889_v38 = vld [vmem:[%s5002_s10 + $0x260] sm:$0xff]  ;;  %886 = vst [vmem:[%s5007_s11 + $0x120] sm:$0xff] %v885_v36  ;;  %888 = vst [vmem:[%s5007_s11 + $0x128] sm:$0xff] %v887_v37  ;;  %v891_v39 = vld [vmem:[%s5002_s10 + $0x270] sm:$0xff] }
  0x31   : > { %890 = vst [vmem:[%s5007_s11 + $0x130] sm:$0xff] %v889_v38  ;;  %v893_v40 = vld [vmem:[%s5002_s10 + $0x280] sm:$0xff]  ;;  %v895_v41 = vld [vmem:[%s5002_s10 + $0x290] sm:$0xff]  ;;  %892 = vst [vmem:[%s5007_s11 + $0x138] sm:$0xff] %v891_v39 }
  0x32   : > { %894 = vst [vmem:[%s5007_s11 + $0x140] sm:$0xff] %v893_v40  ;;  %896 = vst [vmem:[%s5007_s11 + $0x148] sm:$0xff] %v895_v41  ;;  %v897_v42 = vld [vmem:[%s5002_s10 + $0x2a0] sm:$0xff]  ;;  %v899_v43 = vld [vmem:[%s5002_s10 + $0x2b0] sm:$0xff] }
  0x33   : > { %v901_v44 = vld [vmem:[%s5002_s10 + $0x2c0] sm:$0xff]  ;;  %898 = vst [vmem:[%s5007_s11 + $0x150] sm:$0xff] %v897_v42  ;;  %900 = vst [vmem:[%s5007_s11 + $0x158] sm:$0xff] %v899_v43  ;;  %v903_v45 = vld [vmem:[%s5002_s10 + $0x2d0] sm:$0xff] }
  0x34   : > { %902 = vst [vmem:[%s5007_s11 + $0x160] sm:$0xff] %v901_v44  ;;  %v905_v46 = vld [vmem:[%s5002_s10 + $0x2e0] sm:$0xff]  ;;  %v907_v47 = vld [vmem:[%s5002_s10 + $0x2f0] sm:$0xff]  ;;  %904 = vst [vmem:[%s5007_s11 + $0x168] sm:$0xff] %v903_v45 }
  0x35   : > { %906 = vst [vmem:[%s5007_s11 + $0x170] sm:$0xff] %v905_v46  ;;  %908 = vst [vmem:[%s5007_s11 + $0x178] sm:$0xff] %v907_v47  ;;  %v909_v48 = vld [vmem:[%s5002_s10 + $0x300] sm:$0xff]  ;;  %v911_v49 = vld [vmem:[%s5002_s10 + $0x310] sm:$0xff] }
  0x36   : > { %v913_v50 = vld [vmem:[%s5002_s10 + $0x320] sm:$0xff]  ;;  %910 = vst [vmem:[%s5007_s11 + $0x180] sm:$0xff] %v909_v48  ;;  %912 = vst [vmem:[%s5007_s11 + $0x188] sm:$0xff] %v911_v49  ;;  %v915_v51 = vld [vmem:[%s5002_s10 + $0x330] sm:$0xff] }
  0x37   : > { %914 = vst [vmem:[%s5007_s11 + $0x190] sm:$0xff] %v913_v50  ;;  %v917_v52 = vld [vmem:[%s5002_s10 + $0x340] sm:$0xff]  ;;  %v919_v53 = vld [vmem:[%s5002_s10 + $0x350] sm:$0xff]  ;;  %916 = vst [vmem:[%s5007_s11 + $0x198] sm:$0xff] %v915_v51 }
  0x38   : > { %918 = vst [vmem:[%s5007_s11 + $0x1a0] sm:$0xff] %v917_v52  ;;  %920 = vst [vmem:[%s5007_s11 + $0x1a8] sm:$0xff] %v919_v53  ;;  %v921_v54 = vld [vmem:[%s5002_s10 + $0x360] sm:$0xff]  ;;  %v923_v55 = vld [vmem:[%s5002_s10 + $0x370] sm:$0xff] }
  0x39   : > { %v925_v56 = vld [vmem:[%s5002_s10 + $0x380] sm:$0xff]  ;;  %922 = vst [vmem:[%s5007_s11 + $0x1b0] sm:$0xff] %v921_v54  ;;  %924 = vst [vmem:[%s5007_s11 + $0x1b8] sm:$0xff] %v923_v55  ;;  %v927_v57 = vld [vmem:[%s5002_s10 + $0x390] sm:$0xff] }
  0x3a   : > { %926 = vst [vmem:[%s5007_s11 + $0x1c0] sm:$0xff] %v925_v56  ;;  %v929_v58 = vld [vmem:[%s5002_s10 + $0x3a0] sm:$0xff]  ;;  %v931_v59 = vld [vmem:[%s5002_s10 + $0x3b0] sm:$0xff]  ;;  %928 = vst [vmem:[%s5007_s11 + $0x1c8] sm:$0xff] %v927_v57 }
  0x3b   : > { %930 = vst [vmem:[%s5007_s11 + $0x1d0] sm:$0xff] %v929_v58  ;;  %932 = vst [vmem:[%s5007_s11 + $0x1d8] sm:$0xff] %v931_v59  ;;  %v933_v60 = vld [vmem:[%s5002_s10 + $0x3c0] sm:$0xff]  ;;  %v935_v61 = vld [vmem:[%s5002_s10 + $0x3d0] sm:$0xff] }
  0x3c   : > { %v937_v62 = vld [vmem:[%s5002_s10 + $0x3e0] sm:$0xff]  ;;  %934 = vst [vmem:[%s5007_s11 + $0x1e0] sm:$0xff] %v933_v60  ;;  %936 = vst [vmem:[%s5007_s11 + $0x1e8] sm:$0xff] %v935_v61  ;;  %v939_v63 = vld [vmem:[%s5002_s10 + $0x3f0] sm:$0xff] }
  0x3d   : > { %938 = vst [vmem:[%s5007_s11 + $0x1f0] sm:$0xff] %v937_v62  ;;  %v941_v0 = vld [vmem:[%s5002_s10 + $0x400] sm:$0xff]  ;;  %v943_v1 = vld [vmem:[%s5002_s10 + $0x410] sm:$0xff]  ;;  %940 = vst [vmem:[%s5007_s11 + $0x1f8] sm:$0xff] %v939_v63 }
  0x3e   : > { %942 = vst [vmem:[%s5007_s11 + $0x200] sm:$0xff] %v941_v0  ;;  %944 = vst [vmem:[%s5007_s11 + $0x208] sm:$0xff] %v943_v1  ;;  %v945_v2 = vld [vmem:[%s5002_s10 + $0x420] sm:$0xff]  ;;  %v947_v3 = vld [vmem:[%s5002_s10 + $0x430] sm:$0xff] }
  0x3f   : > { %v949_v4 = vld [vmem:[%s5002_s10 + $0x440] sm:$0xff]  ;;  %946 = vst [vmem:[%s5007_s11 + $0x210] sm:$0xff] %v945_v2  ;;  %948 = vst [vmem:[%s5007_s11 + $0x218] sm:$0xff] %v947_v3  ;;  %v951_v5 = vld [vmem:[%s5002_s10 + $0x450] sm:$0xff] }
  0x40   : > { %950 = vst [vmem:[%s5007_s11 + $0x220] sm:$0xff] %v949_v4  ;;  %v953_v6 = vld [vmem:[%s5002_s10 + $0x460] sm:$0xff]  ;;  %v955_v7 = vld [vmem:[%s5002_s10 + $0x470] sm:$0xff]  ;;  %952 = vst [vmem:[%s5007_s11 + $0x228] sm:$0xff] %v951_v5 }
  0x41   : > { %954 = vst [vmem:[%s5007_s11 + $0x230] sm:$0xff] %v953_v6  ;;  %956 = vst [vmem:[%s5007_s11 + $0x238] sm:$0xff] %v955_v7  ;;  %v957_v8 = vld [vmem:[%s5002_s10 + $0x480] sm:$0xff]  ;;  %v959_v9 = vld [vmem:[%s5002_s10 + $0x490] sm:$0xff] }
  0x42   : > { %v961_v10 = vld [vmem:[%s5002_s10 + $0x4a0] sm:$0xff]  ;;  %958 = vst [vmem:[%s5007_s11 + $0x240] sm:$0xff] %v957_v8  ;;  %960 = vst [vmem:[%s5007_s11 + $0x248] sm:$0xff] %v959_v9  ;;  %v963_v11 = vld [vmem:[%s5002_s10 + $0x4b0] sm:$0xff] }
  0x43   : > { %962 = vst [vmem:[%s5007_s11 + $0x250] sm:$0xff] %v961_v10  ;;  %v965_v12 = vld [vmem:[%s5002_s10 + $0x4c0] sm:$0xff]  ;;  %v967_v13 = vld [vmem:[%s5002_s10 + $0x4d0] sm:$0xff]  ;;  %964 = vst [vmem:[%s5007_s11 + $0x258] sm:$0xff] %v963_v11 }
  0x44   : > { %966 = vst [vmem:[%s5007_s11 + $0x260] sm:$0xff] %v965_v12  ;;  %968 = vst [vmem:[%s5007_s11 + $0x268] sm:$0xff] %v967_v13  ;;  %v969_v14 = vld [vmem:[%s5002_s10 + $0x4e0] sm:$0xff]  ;;  %v971_v15 = vld [vmem:[%s5002_s10 + $0x4f0] sm:$0xff] }
  0x45   : > { %v973_v16 = vld [vmem:[%s5002_s10 + $0x500] sm:$0xff]  ;;  %970 = vst [vmem:[%s5007_s11 + $0x270] sm:$0xff] %v969_v14  ;;  %972 = vst [vmem:[%s5007_s11 + $0x278] sm:$0xff] %v971_v15  ;;  %v975_v17 = vld [vmem:[%s5002_s10 + $0x510] sm:$0xff] }
  0x46   : > { %974 = vst [vmem:[%s5007_s11 + $0x280] sm:$0xff] %v973_v16  ;;  %v977_v18 = vld [vmem:[%s5002_s10 + $0x520] sm:$0xff]  ;;  %v979_v19 = vld [vmem:[%s5002_s10 + $0x530] sm:$0xff]  ;;  %976 = vst [vmem:[%s5007_s11 + $0x288] sm:$0xff] %v975_v17 }
  0x47   : > { %978 = vst [vmem:[%s5007_s11 + $0x290] sm:$0xff] %v977_v18  ;;  %980 = vst [vmem:[%s5007_s11 + $0x298] sm:$0xff] %v979_v19  ;;  %v981_v20 = vld [vmem:[%s5002_s10 + $0x540] sm:$0xff]  ;;  %v983_v21 = vld [vmem:[%s5002_s10 + $0x550] sm:$0xff] }
  0x48   : > { %v985_v22 = vld [vmem:[%s5002_s10 + $0x560] sm:$0xff]  ;;  %982 = vst [vmem:[%s5007_s11 + $0x2a0] sm:$0xff] %v981_v20  ;;  %984 = vst [vmem:[%s5007_s11 + $0x2a8] sm:$0xff] %v983_v21  ;;  %v987_v23 = vld [vmem:[%s5002_s10 + $0x570] sm:$0xff] }
  0x49   : > { %986 = vst [vmem:[%s5007_s11 + $0x2b0] sm:$0xff] %v985_v22  ;;  %v989_v24 = vld [vmem:[%s5002_s10 + $0x580] sm:$0xff]  ;;  %v991_v25 = vld [vmem:[%s5002_s10 + $0x590] sm:$0xff]  ;;  %988 = vst [vmem:[%s5007_s11 + $0x2b8] sm:$0xff] %v987_v23 }
  0x4a   : > { %990 = vst [vmem:[%s5007_s11 + $0x2c0] sm:$0xff] %v989_v24  ;;  %992 = vst [vmem:[%s5007_s11 + $0x2c8] sm:$0xff] %v991_v25  ;;  %v993_v26 = vld [vmem:[%s5002_s10 + $0x5a0] sm:$0xff]  ;;  %v995_v27 = vld [vmem:[%s5002_s10 + $0x5b0] sm:$0xff] }
  0x4b   : > { %v997_v28 = vld [vmem:[%s5002_s10 + $0x5c0] sm:$0xff]  ;;  %994 = vst [vmem:[%s5007_s11 + $0x2d0] sm:$0xff] %v993_v26  ;;  %996 = vst [vmem:[%s5007_s11 + $0x2d8] sm:$0xff] %v995_v27  ;;  %v999_v29 = vld [vmem:[%s5002_s10 + $0x5d0] sm:$0xff] }
  0x4c   : > { %998 = vst [vmem:[%s5007_s11 + $0x2e0] sm:$0xff] %v997_v28  ;;  %v1001_v30 = vld [vmem:[%s5002_s10 + $0x5e0] sm:$0xff]  ;;  %v1003_v31 = vld [vmem:[%s5002_s10 + $0x5f0] sm:$0xff]  ;;  %1000 = vst [vmem:[%s5007_s11 + $0x2e8] sm:$0xff] %v999_v29 }
  0x4d   : > { %1002 = vst [vmem:[%s5007_s11 + $0x2f0] sm:$0xff] %v1001_v30  ;;  %1004 = vst [vmem:[%s5007_s11 + $0x2f8] sm:$0xff] %v1003_v31  ;;  %v1005_v32 = vld [vmem:[%s5002_s10 + $0x600] sm:$0xff]  ;;  %v1007_v33 = vld [vmem:[%s5002_s10 + $0x610] sm:$0xff] }
  0x4e   : > { %v1009_v34 = vld [vmem:[%s5002_s10 + $0x620] sm:$0xff]  ;;  %1006 = vst [vmem:[%s5007_s11 + $0x300] sm:$0xff] %v1005_v32  ;;  %1008 = vst [vmem:[%s5007_s11 + $0x308] sm:$0xff] %v1007_v33  ;;  %v1011_v35 = vld [vmem:[%s5002_s10 + $0x630] sm:$0xff] }
  0x4f   : > { %1010 = vst [vmem:[%s5007_s11 + $0x310] sm:$0xff] %v1009_v34  ;;  %v1013_v36 = vld [vmem:[%s5002_s10 + $0x640] sm:$0xff]  ;;  %v1015_v37 = vld [vmem:[%s5002_s10 + $0x650] sm:$0xff]  ;;  %1012 = vst [vmem:[%s5007_s11 + $0x318] sm:$0xff] %v1011_v35 }
  0x50   : > { %1014 = vst [vmem:[%s5007_s11 + $0x320] sm:$0xff] %v1013_v36  ;;  %1016 = vst [vmem:[%s5007_s11 + $0x328] sm:$0xff] %v1015_v37  ;;  %v1017_v38 = vld [vmem:[%s5002_s10 + $0x660] sm:$0xff]  ;;  %v1019_v39 = vld [vmem:[%s5002_s10 + $0x670] sm:$0xff] }
  0x51   : > { %v1021_v40 = vld [vmem:[%s5002_s10 + $0x680] sm:$0xff]  ;;  %1018 = vst [vmem:[%s5007_s11 + $0x330] sm:$0xff] %v1017_v38  ;;  %1020 = vst [vmem:[%s5007_s11 + $0x338] sm:$0xff] %v1019_v39  ;;  %v1023_v41 = vld [vmem:[%s5002_s10 + $0x690] sm:$0xff] }
  0x52   : > { %1022 = vst [vmem:[%s5007_s11 + $0x340] sm:$0xff] %v1021_v40  ;;  %v1025_v42 = vld [vmem:[%s5002_s10 + $0x6a0] sm:$0xff]  ;;  %v1027_v43 = vld [vmem:[%s5002_s10 + $0x6b0] sm:$0xff]  ;;  %1024 = vst [vmem:[%s5007_s11 + $0x348] sm:$0xff] %v1023_v41 }
  0x53   : > { %1026 = vst [vmem:[%s5007_s11 + $0x350] sm:$0xff] %v1025_v42  ;;  %1028 = vst [vmem:[%s5007_s11 + $0x358] sm:$0xff] %v1027_v43  ;;  %v1029_v44 = vld [vmem:[%s5002_s10 + $0x6c0] sm:$0xff]  ;;  %v1031_v45 = vld [vmem:[%s5002_s10 + $0x6d0] sm:$0xff] }
  0x54   : > { %v1033_v46 = vld [vmem:[%s5002_s10 + $0x6e0] sm:$0xff]  ;;  %1030 = vst [vmem:[%s5007_s11 + $0x360] sm:$0xff] %v1029_v44  ;;  %1032 = vst [vmem:[%s5007_s11 + $0x368] sm:$0xff] %v1031_v45  ;;  %v1035_v47 = vld [vmem:[%s5002_s10 + $0x6f0] sm:$0xff] }
  0x55   : > { %1034 = vst [vmem:[%s5007_s11 + $0x370] sm:$0xff] %v1033_v46  ;;  %v1037_v48 = vld [vmem:[%s5002_s10 + $0x700] sm:$0xff]  ;;  %v1039_v49 = vld [vmem:[%s5002_s10 + $0x710] sm:$0xff]  ;;  %1036 = vst [vmem:[%s5007_s11 + $0x378] sm:$0xff] %v1035_v47 }
  0x56   : > { %1038 = vst [vmem:[%s5007_s11 + $0x380] sm:$0xff] %v1037_v48  ;;  %1040 = vst [vmem:[%s5007_s11 + $0x388] sm:$0xff] %v1039_v49  ;;  %v1041_v50 = vld [vmem:[%s5002_s10 + $0x720] sm:$0xff]  ;;  %v1043_v51 = vld [vmem:[%s5002_s10 + $0x730] sm:$0xff] }
  0x57   : > { %v1045_v52 = vld [vmem:[%s5002_s10 + $0x740] sm:$0xff]  ;;  %1042 = vst [vmem:[%s5007_s11 + $0x390] sm:$0xff] %v1041_v50  ;;  %1044 = vst [vmem:[%s5007_s11 + $0x398] sm:$0xff] %v1043_v51  ;;  %v1047_v53 = vld [vmem:[%s5002_s10 + $0x750] sm:$0xff] }
  0x58   : > { %1046 = vst [vmem:[%s5007_s11 + $0x3a0] sm:$0xff] %v1045_v52  ;;  %v1049_v54 = vld [vmem:[%s5002_s10 + $0x760] sm:$0xff]  ;;  %v1051_v55 = vld [vmem:[%s5002_s10 + $0x770] sm:$0xff]  ;;  %1048 = vst [vmem:[%s5007_s11 + $0x3a8] sm:$0xff] %v1047_v53 }
  0x59   : > { %1050 = vst [vmem:[%s5007_s11 + $0x3b0] sm:$0xff] %v1049_v54  ;;  %1052 = vst [vmem:[%s5007_s11 + $0x3b8] sm:$0xff] %v1051_v55  ;;  %v1053_v56 = vld [vmem:[%s5002_s10 + $0x780] sm:$0xff]  ;;  %v1055_v57 = vld [vmem:[%s5002_s10 + $0x790] sm:$0xff] }
  0x5a   : > { %v1057_v58 = vld [vmem:[%s5002_s10 + $0x7a0] sm:$0xff]  ;;  %1054 = vst [vmem:[%s5007_s11 + $0x3c0] sm:$0xff] %v1053_v56  ;;  %1056 = vst [vmem:[%s5007_s11 + $0x3c8] sm:$0xff] %v1055_v57  ;;  %v1059_v59 = vld [vmem:[%s5002_s10 + $0x7b0] sm:$0xff] }
  0x5b   : > { %1058 = vst [vmem:[%s5007_s11 + $0x3d0] sm:$0xff] %v1057_v58  ;;  %v1061_v60 = vld [vmem:[%s5002_s10 + $0x7c0] sm:$0xff]  ;;  %v1063_v61 = vld [vmem:[%s5002_s10 + $0x7d0] sm:$0xff]  ;;  %1060 = vst [vmem:[%s5007_s11 + $0x3d8] sm:$0xff] %v1059_v59 }
  0x5c   : > { %1062 = vst [vmem:[%s5007_s11 + $0x3e0] sm:$0xff] %v1061_v60  ;;  %1064 = vst [vmem:[%s5007_s11 + $0x3e8] sm:$0xff] %v1063_v61  ;;  %v1065_v62 = vld [vmem:[%s5002_s10 + $0x7e0] sm:$0xff]  ;;  %v1067_v63 = vld [vmem:[%s5002_s10 + $0x7f0] sm:$0xff] }
  0x5d   : > { %v1069_v0 = vld [vmem:[%s5002_s10 + $0x800] sm:$0xff]  ;;  %1066 = vst [vmem:[%s5007_s11 + $0x3f0] sm:$0xff] %v1065_v62  ;;  %1068 = vst [vmem:[%s5007_s11 + $0x3f8] sm:$0xff] %v1067_v63  ;;  %v1071_v1 = vld [vmem:[%s5002_s10 + $0x810] sm:$0xff] }
  0x5e   : > { %1070 = vst [vmem:[%s5007_s11 + $0x400] sm:$0xff] %v1069_v0  ;;  %v1073_v2 = vld [vmem:[%s5002_s10 + $0x820] sm:$0xff]  ;;  %v1075_v3 = vld [vmem:[%s5002_s10 + $0x830] sm:$0xff]  ;;  %1072 = vst [vmem:[%s5007_s11 + $0x408] sm:$0xff] %v1071_v1 }
  0x5f   : > { %1074 = vst [vmem:[%s5007_s11 + $0x410] sm:$0xff] %v1073_v2  ;;  %1076 = vst [vmem:[%s5007_s11 + $0x418] sm:$0xff] %v1075_v3  ;;  %v1077_v4 = vld [vmem:[%s5002_s10 + $0x840] sm:$0xff]  ;;  %v1079_v5 = vld [vmem:[%s5002_s10 + $0x850] sm:$0xff] }
  0x60   : > { %v1081_v6 = vld [vmem:[%s5002_s10 + $0x860] sm:$0xff]  ;;  %1078 = vst [vmem:[%s5007_s11 + $0x420] sm:$0xff] %v1077_v4  ;;  %1080 = vst [vmem:[%s5007_s11 + $0x428] sm:$0xff] %v1079_v5  ;;  %v1083_v7 = vld [vmem:[%s5002_s10 + $0x870] sm:$0xff] }
  0x61   : > { %1082 = vst [vmem:[%s5007_s11 + $0x430] sm:$0xff] %v1081_v6  ;;  %v1085_v8 = vld [vmem:[%s5002_s10 + $0x880] sm:$0xff]  ;;  %v1087_v9 = vld [vmem:[%s5002_s10 + $0x890] sm:$0xff]  ;;  %1084 = vst [vmem:[%s5007_s11 + $0x438] sm:$0xff] %v1083_v7 }
  0x62   : > { %1086 = vst [vmem:[%s5007_s11 + $0x440] sm:$0xff] %v1085_v8  ;;  %1088 = vst [vmem:[%s5007_s11 + $0x448] sm:$0xff] %v1087_v9  ;;  %v1089_v10 = vld [vmem:[%s5002_s10 + $0x8a0] sm:$0xff]  ;;  %v1091_v11 = vld [vmem:[%s5002_s10 + $0x8b0] sm:$0xff] }
  0x63   : > { %v1093_v12 = vld [vmem:[%s5002_s10 + $0x8c0] sm:$0xff]  ;;  %1090 = vst [vmem:[%s5007_s11 + $0x450] sm:$0xff] %v1089_v10  ;;  %1092 = vst [vmem:[%s5007_s11 + $0x458] sm:$0xff] %v1091_v11  ;;  %v1095_v13 = vld [vmem:[%s5002_s10 + $0x8d0] sm:$0xff] }
  0x64   : > { %1094 = vst [vmem:[%s5007_s11 + $0x460] sm:$0xff] %v1093_v12  ;;  %v1097_v14 = vld [vmem:[%s5002_s10 + $0x8e0] sm:$0xff]  ;;  %v1099_v15 = vld [vmem:[%s5002_s10 + $0x8f0] sm:$0xff]  ;;  %1096 = vst [vmem:[%s5007_s11 + $0x468] sm:$0xff] %v1095_v13 }
  0x65   : > { %1098 = vst [vmem:[%s5007_s11 + $0x470] sm:$0xff] %v1097_v14  ;;  %1100 = vst [vmem:[%s5007_s11 + $0x478] sm:$0xff] %v1099_v15  ;;  %v1101_v16 = vld [vmem:[%s5002_s10 + $0x900] sm:$0xff]  ;;  %v1103_v17 = vld [vmem:[%s5002_s10 + $0x910] sm:$0xff] }
  0x66   : > { %v1105_v18 = vld [vmem:[%s5002_s10 + $0x920] sm:$0xff]  ;;  %1102 = vst [vmem:[%s5007_s11 + $0x480] sm:$0xff] %v1101_v16  ;;  %1104 = vst [vmem:[%s5007_s11 + $0x488] sm:$0xff] %v1103_v17  ;;  %v1107_v19 = vld [vmem:[%s5002_s10 + $0x930] sm:$0xff] }
  0x67   : > { %1106 = vst [vmem:[%s5007_s11 + $0x490] sm:$0xff] %v1105_v18  ;;  %v1109_v20 = vld [vmem:[%s5002_s10 + $0x940] sm:$0xff]  ;;  %v1111_v21 = vld [vmem:[%s5002_s10 + $0x950] sm:$0xff]  ;;  %1108 = vst [vmem:[%s5007_s11 + $0x498] sm:$0xff] %v1107_v19 }
  0x68   : > { %1110 = vst [vmem:[%s5007_s11 + $0x4a0] sm:$0xff] %v1109_v20  ;;  %1112 = vst [vmem:[%s5007_s11 + $0x4a8] sm:$0xff] %v1111_v21  ;;  %v1113_v22 = vld [vmem:[%s5002_s10 + $0x960] sm:$0xff]  ;;  %v1115_v23 = vld [vmem:[%s5002_s10 + $0x970] sm:$0xff] }
  0x69   : > { %v1117_v24 = vld [vmem:[%s5002_s10 + $0x980] sm:$0xff]  ;;  %1114 = vst [vmem:[%s5007_s11 + $0x4b0] sm:$0xff] %v1113_v22  ;;  %1116 = vst [vmem:[%s5007_s11 + $0x4b8] sm:$0xff] %v1115_v23  ;;  %v1119_v25 = vld [vmem:[%s5002_s10 + $0x990] sm:$0xff] }
  0x6a   : > { %1118 = vst [vmem:[%s5007_s11 + $0x4c0] sm:$0xff] %v1117_v24  ;;  %v1121_v26 = vld [vmem:[%s5002_s10 + $0x9a0] sm:$0xff]  ;;  %v1123_v27 = vld [vmem:[%s5002_s10 + $0x9b0] sm:$0xff]  ;;  %1120 = vst [vmem:[%s5007_s11 + $0x4c8] sm:$0xff] %v1119_v25 }
  0x6b   : > { %1122 = vst [vmem:[%s5007_s11 + $0x4d0] sm:$0xff] %v1121_v26  ;;  %1124 = vst [vmem:[%s5007_s11 + $0x4d8] sm:$0xff] %v1123_v27  ;;  %v1125_v28 = vld [vmem:[%s5002_s10 + $0x9c0] sm:$0xff]  ;;  %v1127_v29 = vld [vmem:[%s5002_s10 + $0x9d0] sm:$0xff] }
  0x6c   : > { %v1129_v30 = vld [vmem:[%s5002_s10 + $0x9e0] sm:$0xff]  ;;  %1126 = vst [vmem:[%s5007_s11 + $0x4e0] sm:$0xff] %v1125_v28  ;;  %1128 = vst [vmem:[%s5007_s11 + $0x4e8] sm:$0xff] %v1127_v29  ;;  %v1131_v31 = vld [vmem:[%s5002_s10 + $0x9f0] sm:$0xff] }
  0x6d   : > { %1130 = vst [vmem:[%s5007_s11 + $0x4f0] sm:$0xff] %v1129_v30  ;;  %v1133_v32 = vld [vmem:[%s5002_s10 + $0xa00] sm:$0xff]  ;;  %v1135_v33 = vld [vmem:[%s5002_s10 + $0xa10] sm:$0xff]  ;;  %1132 = vst [vmem:[%s5007_s11 + $0x4f8] sm:$0xff] %v1131_v31 }
  0x6e   : > { %1134 = vst [vmem:[%s5007_s11 + $0x500] sm:$0xff] %v1133_v32  ;;  %1136 = vst [vmem:[%s5007_s11 + $0x508] sm:$0xff] %v1135_v33  ;;  %v1137_v34 = vld [vmem:[%s5002_s10 + $0xa20] sm:$0xff]  ;;  %v1139_v35 = vld [vmem:[%s5002_s10 + $0xa30] sm:$0xff] }
  0x6f   : > { %v1141_v36 = vld [vmem:[%s5002_s10 + $0xa40] sm:$0xff]  ;;  %1138 = vst [vmem:[%s5007_s11 + $0x510] sm:$0xff] %v1137_v34  ;;  %1140 = vst [vmem:[%s5007_s11 + $0x518] sm:$0xff] %v1139_v35  ;;  %v1143_v37 = vld [vmem:[%s5002_s10 + $0xa50] sm:$0xff] }
  0x70   : > { %1142 = vst [vmem:[%s5007_s11 + $0x520] sm:$0xff] %v1141_v36  ;;  %v1145_v38 = vld [vmem:[%s5002_s10 + $0xa60] sm:$0xff]  ;;  %v1147_v39 = vld [vmem:[%s5002_s10 + $0xa70] sm:$0xff]  ;;  %1144 = vst [vmem:[%s5007_s11 + $0x528] sm:$0xff] %v1143_v37 }
  0x71   : > { %1146 = vst [vmem:[%s5007_s11 + $0x530] sm:$0xff] %v1145_v38  ;;  %1148 = vst [vmem:[%s5007_s11 + $0x538] sm:$0xff] %v1147_v39  ;;  %v1149_v40 = vld [vmem:[%s5002_s10 + $0xa80] sm:$0xff]  ;;  %v1151_v41 = vld [vmem:[%s5002_s10 + $0xa90] sm:$0xff] }
  0x72   : > { %v1153_v42 = vld [vmem:[%s5002_s10 + $0xaa0] sm:$0xff]  ;;  %1150 = vst [vmem:[%s5007_s11 + $0x540] sm:$0xff] %v1149_v40  ;;  %1152 = vst [vmem:[%s5007_s11 + $0x548] sm:$0xff] %v1151_v41  ;;  %v1155_v43 = vld [vmem:[%s5002_s10 + $0xab0] sm:$0xff] }
  0x73   : > { %1154 = vst [vmem:[%s5007_s11 + $0x550] sm:$0xff] %v1153_v42  ;;  %v1157_v44 = vld [vmem:[%s5002_s10 + $0xac0] sm:$0xff]  ;;  %v1159_v45 = vld [vmem:[%s5002_s10 + $0xad0] sm:$0xff]  ;;  %1156 = vst [vmem:[%s5007_s11 + $0x558] sm:$0xff] %v1155_v43 }
  0x74   : > { %1158 = vst [vmem:[%s5007_s11 + $0x560] sm:$0xff] %v1157_v44  ;;  %1160 = vst [vmem:[%s5007_s11 + $0x568] sm:$0xff] %v1159_v45  ;;  %v1161_v46 = vld [vmem:[%s5002_s10 + $0xae0] sm:$0xff]  ;;  %v1163_v47 = vld [vmem:[%s5002_s10 + $0xaf0] sm:$0xff] }
  0x75   : > { %v1165_v48 = vld [vmem:[%s5002_s10 + $0xb00] sm:$0xff]  ;;  %1162 = vst [vmem:[%s5007_s11 + $0x570] sm:$0xff] %v1161_v46  ;;  %1164 = vst [vmem:[%s5007_s11 + $0x578] sm:$0xff] %v1163_v47  ;;  %v1167_v49 = vld [vmem:[%s5002_s10 + $0xb10] sm:$0xff] }
  0x76   : > { %1166 = vst [vmem:[%s5007_s11 + $0x580] sm:$0xff] %v1165_v48  ;;  %v1169_v50 = vld [vmem:[%s5002_s10 + $0xb20] sm:$0xff]  ;;  %v1171_v51 = vld [vmem:[%s5002_s10 + $0xb30] sm:$0xff]  ;;  %1168 = vst [vmem:[%s5007_s11 + $0x588] sm:$0xff] %v1167_v49 }
  0x77   : > { %1170 = vst [vmem:[%s5007_s11 + $0x590] sm:$0xff] %v1169_v50  ;;  %1172 = vst [vmem:[%s5007_s11 + $0x598] sm:$0xff] %v1171_v51  ;;  %v1173_v52 = vld [vmem:[%s5002_s10 + $0xb40] sm:$0xff]  ;;  %v1175_v53 = vld [vmem:[%s5002_s10 + $0xb50] sm:$0xff] }
  0x78   : > { %v1177_v54 = vld [vmem:[%s5002_s10 + $0xb60] sm:$0xff]  ;;  %1174 = vst [vmem:[%s5007_s11 + $0x5a0] sm:$0xff] %v1173_v52  ;;  %1176 = vst [vmem:[%s5007_s11 + $0x5a8] sm:$0xff] %v1175_v53  ;;  %v1179_v55 = vld [vmem:[%s5002_s10 + $0xb70] sm:$0xff] }
  0x79   : > { %1178 = vst [vmem:[%s5007_s11 + $0x5b0] sm:$0xff] %v1177_v54  ;;  %v1181_v56 = vld [vmem:[%s5002_s10 + $0xb80] sm:$0xff]  ;;  %v1183_v57 = vld [vmem:[%s5002_s10 + $0xb90] sm:$0xff]  ;;  %1180 = vst [vmem:[%s5007_s11 + $0x5b8] sm:$0xff] %v1179_v55 }
  0x7a   : > { %1182 = vst [vmem:[%s5007_s11 + $0x5c0] sm:$0xff] %v1181_v56  ;;  %1184 = vst [vmem:[%s5007_s11 + $0x5c8] sm:$0xff] %v1183_v57  ;;  %v1185_v58 = vld [vmem:[%s5002_s10 + $0xba0] sm:$0xff]  ;;  %v1187_v59 = vld [vmem:[%s5002_s10 + $0xbb0] sm:$0xff] }
  0x7b   : > { %v1189_v60 = vld [vmem:[%s5002_s10 + $0xbc0] sm:$0xff]  ;;  %1186 = vst [vmem:[%s5007_s11 + $0x5d0] sm:$0xff] %v1185_v58  ;;  %1188 = vst [vmem:[%s5007_s11 + $0x5d8] sm:$0xff] %v1187_v59  ;;  %v1191_v61 = vld [vmem:[%s5002_s10 + $0xbd0] sm:$0xff] }
  0x7c   : > { %1190 = vst [vmem:[%s5007_s11 + $0x5e0] sm:$0xff] %v1189_v60  ;;  %v1193_v62 = vld [vmem:[%s5002_s10 + $0xbe0] sm:$0xff]  ;;  %v1195_v63 = vld [vmem:[%s5002_s10 + $0xbf0] sm:$0xff]  ;;  %1192 = vst [vmem:[%s5007_s11 + $0x5e8] sm:$0xff] %v1191_v61 }
  0x7d   : > { %1194 = vst [vmem:[%s5007_s11 + $0x5f0] sm:$0xff] %v1193_v62  ;;  %1196 = vst [vmem:[%s5007_s11 + $0x5f8] sm:$0xff] %v1195_v63  ;;  %v1197_v0 = vld [vmem:[%s5002_s10 + $0xc00] sm:$0xff]  ;;  %v1199_v1 = vld [vmem:[%s5002_s10 + $0xc10] sm:$0xff] }
  0x7e   : > { %v1201_v2 = vld [vmem:[%s5002_s10 + $0xc20] sm:$0xff]  ;;  %1198 = vst [vmem:[%s5007_s11 + $0x600] sm:$0xff] %v1197_v0  ;;  %1200 = vst [vmem:[%s5007_s11 + $0x608] sm:$0xff] %v1199_v1  ;;  %v1203_v3 = vld [vmem:[%s5002_s10 + $0xc30] sm:$0xff] }
  0x7f   : > { %1202 = vst [vmem:[%s5007_s11 + $0x610] sm:$0xff] %v1201_v2  ;;  %v1205_v4 = vld [vmem:[%s5002_s10 + $0xc40] sm:$0xff]  ;;  %v1207_v5 = vld [vmem:[%s5002_s10 + $0xc50] sm:$0xff]  ;;  %1204 = vst [vmem:[%s5007_s11 + $0x618] sm:$0xff] %v1203_v3 }
  0x80   : > { %1206 = vst [vmem:[%s5007_s11 + $0x620] sm:$0xff] %v1205_v4  ;;  %1208 = vst [vmem:[%s5007_s11 + $0x628] sm:$0xff] %v1207_v5  ;;  %v1209_v6 = vld [vmem:[%s5002_s10 + $0xc60] sm:$0xff]  ;;  %v1211_v7 = vld [vmem:[%s5002_s10 + $0xc70] sm:$0xff] }
  0x81   : > { %v1213_v8 = vld [vmem:[%s5002_s10 + $0xc80] sm:$0xff]  ;;  %1210 = vst [vmem:[%s5007_s11 + $0x630] sm:$0xff] %v1209_v6  ;;  %1212 = vst [vmem:[%s5007_s11 + $0x638] sm:$0xff] %v1211_v7  ;;  %v1215_v9 = vld [vmem:[%s5002_s10 + $0xc90] sm:$0xff] }
  0x82   : > { %1214 = vst [vmem:[%s5007_s11 + $0x640] sm:$0xff] %v1213_v8  ;;  %v1217_v10 = vld [vmem:[%s5002_s10 + $0xca0] sm:$0xff]  ;;  %v1219_v11 = vld [vmem:[%s5002_s10 + $0xcb0] sm:$0xff]  ;;  %1216 = vst [vmem:[%s5007_s11 + $0x648] sm:$0xff] %v1215_v9 }
  0x83   : > { %1218 = vst [vmem:[%s5007_s11 + $0x650] sm:$0xff] %v1217_v10  ;;  %1220 = vst [vmem:[%s5007_s11 + $0x658] sm:$0xff] %v1219_v11  ;;  %v1221_v12 = vld [vmem:[%s5002_s10 + $0xcc0] sm:$0xff]  ;;  %v1223_v13 = vld [vmem:[%s5002_s10 + $0xcd0] sm:$0xff] }
  0x84   : > { %v1225_v14 = vld [vmem:[%s5002_s10 + $0xce0] sm:$0xff]  ;;  %1222 = vst [vmem:[%s5007_s11 + $0x660] sm:$0xff] %v1221_v12  ;;  %1224 = vst [vmem:[%s5007_s11 + $0x668] sm:$0xff] %v1223_v13  ;;  %v1227_v15 = vld [vmem:[%s5002_s10 + $0xcf0] sm:$0xff] }
  0x85   : > { %1226 = vst [vmem:[%s5007_s11 + $0x670] sm:$0xff] %v1225_v14  ;;  %v1229_v16 = vld [vmem:[%s5002_s10 + $0xd00] sm:$0xff]  ;;  %v1231_v17 = vld [vmem:[%s5002_s10 + $0xd10] sm:$0xff]  ;;  %1228 = vst [vmem:[%s5007_s11 + $0x678] sm:$0xff] %v1227_v15 }
  0x86   : > { %1230 = vst [vmem:[%s5007_s11 + $0x680] sm:$0xff] %v1229_v16  ;;  %1232 = vst [vmem:[%s5007_s11 + $0x688] sm:$0xff] %v1231_v17  ;;  %v1233_v18 = vld [vmem:[%s5002_s10 + $0xd20] sm:$0xff]  ;;  %v1235_v19 = vld [vmem:[%s5002_s10 + $0xd30] sm:$0xff] }
  0x87   : > { %v1237_v20 = vld [vmem:[%s5002_s10 + $0xd40] sm:$0xff]  ;;  %1234 = vst [vmem:[%s5007_s11 + $0x690] sm:$0xff] %v1233_v18  ;;  %1236 = vst [vmem:[%s5007_s11 + $0x698] sm:$0xff] %v1235_v19  ;;  %v1239_v21 = vld [vmem:[%s5002_s10 + $0xd50] sm:$0xff] }
  0x88   : > { %1238 = vst [vmem:[%s5007_s11 + $0x6a0] sm:$0xff] %v1237_v20  ;;  %v1241_v22 = vld [vmem:[%s5002_s10 + $0xd60] sm:$0xff]  ;;  %v1243_v23 = vld [vmem:[%s5002_s10 + $0xd70] sm:$0xff]  ;;  %1240 = vst [vmem:[%s5007_s11 + $0x6a8] sm:$0xff] %v1239_v21 }
  0x89   : > { %1242 = vst [vmem:[%s5007_s11 + $0x6b0] sm:$0xff] %v1241_v22  ;;  %1244 = vst [vmem:[%s5007_s11 + $0x6b8] sm:$0xff] %v1243_v23  ;;  %v1245_v24 = vld [vmem:[%s5002_s10 + $0xd80] sm:$0xff]  ;;  %v1247_v25 = vld [vmem:[%s5002_s10 + $0xd90] sm:$0xff] }
  0x8a   : > { %v1249_v26 = vld [vmem:[%s5002_s10 + $0xda0] sm:$0xff]  ;;  %1246 = vst [vmem:[%s5007_s11 + $0x6c0] sm:$0xff] %v1245_v24  ;;  %1248 = vst [vmem:[%s5007_s11 + $0x6c8] sm:$0xff] %v1247_v25  ;;  %v1251_v27 = vld [vmem:[%s5002_s10 + $0xdb0] sm:$0xff] }
  0x8b   : > { %1250 = vst [vmem:[%s5007_s11 + $0x6d0] sm:$0xff] %v1249_v26  ;;  %v1253_v28 = vld [vmem:[%s5002_s10 + $0xdc0] sm:$0xff]  ;;  %v1255_v29 = vld [vmem:[%s5002_s10 + $0xdd0] sm:$0xff]  ;;  %1252 = vst [vmem:[%s5007_s11 + $0x6d8] sm:$0xff] %v1251_v27 }
  0x8c   : > { %1254 = vst [vmem:[%s5007_s11 + $0x6e0] sm:$0xff] %v1253_v28  ;;  %1256 = vst [vmem:[%s5007_s11 + $0x6e8] sm:$0xff] %v1255_v29  ;;  %v1257_v30 = vld [vmem:[%s5002_s10 + $0xde0] sm:$0xff]  ;;  %v1259_v31 = vld [vmem:[%s5002_s10 + $0xdf0] sm:$0xff] }
  0x8d   : > { %v1261_v32 = vld [vmem:[%s5002_s10 + $0xe00] sm:$0xff]  ;;  %1258 = vst [vmem:[%s5007_s11 + $0x6f0] sm:$0xff] %v1257_v30  ;;  %1260 = vst [vmem:[%s5007_s11 + $0x6f8] sm:$0xff] %v1259_v31  ;;  %v1263_v33 = vld [vmem:[%s5002_s10 + $0xe10] sm:$0xff] }
  0x8e   : > { %1262 = vst [vmem:[%s5007_s11 + $0x700] sm:$0xff] %v1261_v32  ;;  %v1265_v34 = vld [vmem:[%s5002_s10 + $0xe20] sm:$0xff]  ;;  %v1267_v35 = vld [vmem:[%s5002_s10 + $0xe30] sm:$0xff]  ;;  %1264 = vst [vmem:[%s5007_s11 + $0x708] sm:$0xff] %v1263_v33 }
  0x8f   : > { %1266 = vst [vmem:[%s5007_s11 + $0x710] sm:$0xff] %v1265_v34  ;;  %1268 = vst [vmem:[%s5007_s11 + $0x718] sm:$0xff] %v1267_v35  ;;  %v1269_v36 = vld [vmem:[%s5002_s10 + $0xe40] sm:$0xff]  ;;  %v1271_v37 = vld [vmem:[%s5002_s10 + $0xe50] sm:$0xff] }
  0x90   : > { %v1273_v38 = vld [vmem:[%s5002_s10 + $0xe60] sm:$0xff]  ;;  %1270 = vst [vmem:[%s5007_s11 + $0x720] sm:$0xff] %v1269_v36  ;;  %1272 = vst [vmem:[%s5007_s11 + $0x728] sm:$0xff] %v1271_v37  ;;  %v1275_v39 = vld [vmem:[%s5002_s10 + $0xe70] sm:$0xff] }
  0x91   : > { %1274 = vst [vmem:[%s5007_s11 + $0x730] sm:$0xff] %v1273_v38  ;;  %v1277_v40 = vld [vmem:[%s5002_s10 + $0xe80] sm:$0xff]  ;;  %v1279_v41 = vld [vmem:[%s5002_s10 + $0xe90] sm:$0xff]  ;;  %1276 = vst [vmem:[%s5007_s11 + $0x738] sm:$0xff] %v1275_v39 }
  0x92   : > { %1278 = vst [vmem:[%s5007_s11 + $0x740] sm:$0xff] %v1277_v40  ;;  %1280 = vst [vmem:[%s5007_s11 + $0x748] sm:$0xff] %v1279_v41  ;;  %v1281_v42 = vld [vmem:[%s5002_s10 + $0xea0] sm:$0xff]  ;;  %v1283_v43 = vld [vmem:[%s5002_s10 + $0xeb0] sm:$0xff] }
  0x93   : > { %v1285_v44 = vld [vmem:[%s5002_s10 + $0xec0] sm:$0xff]  ;;  %1282 = vst [vmem:[%s5007_s11 + $0x750] sm:$0xff] %v1281_v42  ;;  %1284 = vst [vmem:[%s5007_s11 + $0x758] sm:$0xff] %v1283_v43  ;;  %v1287_v45 = vld [vmem:[%s5002_s10 + $0xed0] sm:$0xff] }
  0x94   : > { %1286 = vst [vmem:[%s5007_s11 + $0x760] sm:$0xff] %v1285_v44  ;;  %v1289_v46 = vld [vmem:[%s5002_s10 + $0xee0] sm:$0xff]  ;;  %v1291_v47 = vld [vmem:[%s5002_s10 + $0xef0] sm:$0xff]  ;;  %1288 = vst [vmem:[%s5007_s11 + $0x768] sm:$0xff] %v1287_v45 }
  0x95   : > { %1290 = vst [vmem:[%s5007_s11 + $0x770] sm:$0xff] %v1289_v46  ;;  %1292 = vst [vmem:[%s5007_s11 + $0x778] sm:$0xff] %v1291_v47  ;;  %v1293_v48 = vld [vmem:[%s5002_s10 + $0xf00] sm:$0xff]  ;;  %v1295_v49 = vld [vmem:[%s5002_s10 + $0xf10] sm:$0xff] }
  0x96   : > { %v1297_v50 = vld [vmem:[%s5002_s10 + $0xf20] sm:$0xff]  ;;  %1294 = vst [vmem:[%s5007_s11 + $0x780] sm:$0xff] %v1293_v48  ;;  %1296 = vst [vmem:[%s5007_s11 + $0x788] sm:$0xff] %v1295_v49  ;;  %v1299_v51 = vld [vmem:[%s5002_s10 + $0xf30] sm:$0xff] }
  0x97   : > { %1298 = vst [vmem:[%s5007_s11 + $0x790] sm:$0xff] %v1297_v50  ;;  %v1301_v52 = vld [vmem:[%s5002_s10 + $0xf40] sm:$0xff]  ;;  %v1303_v53 = vld [vmem:[%s5002_s10 + $0xf50] sm:$0xff]  ;;  %1300 = vst [vmem:[%s5007_s11 + $0x798] sm:$0xff] %v1299_v51 }
  0x98   : > { %1302 = vst [vmem:[%s5007_s11 + $0x7a0] sm:$0xff] %v1301_v52  ;;  %1304 = vst [vmem:[%s5007_s11 + $0x7a8] sm:$0xff] %v1303_v53  ;;  %v1305_v54 = vld [vmem:[%s5002_s10 + $0xf60] sm:$0xff]  ;;  %v1307_v55 = vld [vmem:[%s5002_s10 + $0xf70] sm:$0xff] }
  0x99   : > { %v1309_v56 = vld [vmem:[%s5002_s10 + $0xf80] sm:$0xff]  ;;  %1306 = vst [vmem:[%s5007_s11 + $0x7b0] sm:$0xff] %v1305_v54  ;;  %1308 = vst [vmem:[%s5007_s11 + $0x7b8] sm:$0xff] %v1307_v55  ;;  %v1311_v57 = vld [vmem:[%s5002_s10 + $0xf90] sm:$0xff] }
  0x9a   : > { %1310 = vst [vmem:[%s5007_s11 + $0x7c0] sm:$0xff] %v1309_v56  ;;  %v1313_v58 = vld [vmem:[%s5002_s10 + $0xfa0] sm:$0xff]  ;;  %v1315_v59 = vld [vmem:[%s5002_s10 + $0xfb0] sm:$0xff]  ;;  %1312 = vst [vmem:[%s5007_s11 + $0x7c8] sm:$0xff] %v1311_v57 }
  0x9b   : > { %1314 = vst [vmem:[%s5007_s11 + $0x7d0] sm:$0xff] %v1313_v58  ;;  %1316 = vst [vmem:[%s5007_s11 + $0x7d8] sm:$0xff] %v1315_v59  ;;  %v1317_v60 = vld [vmem:[%s5002_s10 + $0xfc0] sm:$0xff]  ;;  %v1319_v61 = vld [vmem:[%s5002_s10 + $0xfd0] sm:$0xff] }
  0x9c   : > { %v1321_v62 = vld [vmem:[%s5002_s10 + $0xfe0] sm:$0xff]  ;;  %1318 = vst [vmem:[%s5007_s11 + $0x7e0] sm:$0xff] %v1317_v60  ;;  %1320 = vst [vmem:[%s5007_s11 + $0x7e8] sm:$0xff] %v1319_v61  ;;  %v1323_v63 = vld [vmem:[%s5002_s10 + $0xff0] sm:$0xff] }
  0x9d   : > { %1322 = vst [vmem:[%s5007_s11 + $0x7f0] sm:$0xff] %v1321_v62  ;;  %v1325_v0 = vld [vmem:[%s5002_s10 + $0x1000] sm:$0xff]  ;;  %v1327_v1 = vld [vmem:[%s5002_s10 + $0x1010] sm:$0xff]  ;;  %1324 = vst [vmem:[%s5007_s11 + $0x7f8] sm:$0xff] %v1323_v63 }
  0x9e   : > { %1326 = vst [vmem:[%s5007_s11 + $0x800] sm:$0xff] %v1325_v0  ;;  %1328 = vst [vmem:[%s5007_s11 + $0x808] sm:$0xff] %v1327_v1  ;;  %v1329_v2 = vld [vmem:[%s5002_s10 + $0x1020] sm:$0xff]  ;;  %v1331_v3 = vld [vmem:[%s5002_s10 + $0x1030] sm:$0xff] }
  0x9f   : > { %v1333_v4 = vld [vmem:[%s5002_s10 + $0x1040] sm:$0xff]  ;;  %1330 = vst [vmem:[%s5007_s11 + $0x810] sm:$0xff] %v1329_v2  ;;  %1332 = vst [vmem:[%s5007_s11 + $0x818] sm:$0xff] %v1331_v3  ;;  %v1335_v5 = vld [vmem:[%s5002_s10 + $0x1050] sm:$0xff] }
  0xa0   : > { %1334 = vst [vmem:[%s5007_s11 + $0x820] sm:$0xff] %v1333_v4  ;;  %v1337_v6 = vld [vmem:[%s5002_s10 + $0x1060] sm:$0xff]  ;;  %v1339_v7 = vld [vmem:[%s5002_s10 + $0x1070] sm:$0xff]  ;;  %1336 = vst [vmem:[%s5007_s11 + $0x828] sm:$0xff] %v1335_v5 }
  0xa1   : > { %1338 = vst [vmem:[%s5007_s11 + $0x830] sm:$0xff] %v1337_v6  ;;  %1340 = vst [vmem:[%s5007_s11 + $0x838] sm:$0xff] %v1339_v7  ;;  %v1341_v8 = vld [vmem:[%s5002_s10 + $0x1080] sm:$0xff]  ;;  %v1343_v9 = vld [vmem:[%s5002_s10 + $0x1090] sm:$0xff] }
  0xa2   : > { %v1345_v10 = vld [vmem:[%s5002_s10 + $0x10a0] sm:$0xff]  ;;  %1342 = vst [vmem:[%s5007_s11 + $0x840] sm:$0xff] %v1341_v8  ;;  %1344 = vst [vmem:[%s5007_s11 + $0x848] sm:$0xff] %v1343_v9  ;;  %v1347_v11 = vld [vmem:[%s5002_s10 + $0x10b0] sm:$0xff] }
  0xa3   : > { %1346 = vst [vmem:[%s5007_s11 + $0x850] sm:$0xff] %v1345_v10  ;;  %v1349_v12 = vld [vmem:[%s5002_s10 + $0x10c0] sm:$0xff]  ;;  %v1351_v13 = vld [vmem:[%s5002_s10 + $0x10d0] sm:$0xff]  ;;  %1348 = vst [vmem:[%s5007_s11 + $0x858] sm:$0xff] %v1347_v11 }
  0xa4   : > { %1350 = vst [vmem:[%s5007_s11 + $0x860] sm:$0xff] %v1349_v12  ;;  %1352 = vst [vmem:[%s5007_s11 + $0x868] sm:$0xff] %v1351_v13  ;;  %v1353_v14 = vld [vmem:[%s5002_s10 + $0x10e0] sm:$0xff]  ;;  %v1355_v15 = vld [vmem:[%s5002_s10 + $0x10f0] sm:$0xff] }
  0xa5   : > { %v1357_v16 = vld [vmem:[%s5002_s10 + $0x1100] sm:$0xff]  ;;  %1354 = vst [vmem:[%s5007_s11 + $0x870] sm:$0xff] %v1353_v14  ;;  %1356 = vst [vmem:[%s5007_s11 + $0x878] sm:$0xff] %v1355_v15  ;;  %v1359_v17 = vld [vmem:[%s5002_s10 + $0x1110] sm:$0xff] }
  0xa6   : > { %1358 = vst [vmem:[%s5007_s11 + $0x880] sm:$0xff] %v1357_v16  ;;  %v1361_v18 = vld [vmem:[%s5002_s10 + $0x1120] sm:$0xff]  ;;  %v1363_v19 = vld [vmem:[%s5002_s10 + $0x1130] sm:$0xff]  ;;  %1360 = vst [vmem:[%s5007_s11 + $0x888] sm:$0xff] %v1359_v17 }
  0xa7   : > { %1362 = vst [vmem:[%s5007_s11 + $0x890] sm:$0xff] %v1361_v18  ;;  %1364 = vst [vmem:[%s5007_s11 + $0x898] sm:$0xff] %v1363_v19  ;;  %v1365_v20 = vld [vmem:[%s5002_s10 + $0x1140] sm:$0xff]  ;;  %v1367_v21 = vld [vmem:[%s5002_s10 + $0x1150] sm:$0xff] }
  0xa8   : > { %v1369_v22 = vld [vmem:[%s5002_s10 + $0x1160] sm:$0xff]  ;;  %1366 = vst [vmem:[%s5007_s11 + $0x8a0] sm:$0xff] %v1365_v20  ;;  %1368 = vst [vmem:[%s5007_s11 + $0x8a8] sm:$0xff] %v1367_v21  ;;  %v1371_v23 = vld [vmem:[%s5002_s10 + $0x1170] sm:$0xff] }
  0xa9   : > { %1370 = vst [vmem:[%s5007_s11 + $0x8b0] sm:$0xff] %v1369_v22  ;;  %v1373_v24 = vld [vmem:[%s5002_s10 + $0x1180] sm:$0xff]  ;;  %v1375_v25 = vld [vmem:[%s5002_s10 + $0x1190] sm:$0xff]  ;;  %1372 = vst [vmem:[%s5007_s11 + $0x8b8] sm:$0xff] %v1371_v23 }
  0xaa   : > { %1374 = vst [vmem:[%s5007_s11 + $0x8c0] sm:$0xff] %v1373_v24  ;;  %1376 = vst [vmem:[%s5007_s11 + $0x8c8] sm:$0xff] %v1375_v25  ;;  %v1377_v26 = vld [vmem:[%s5002_s10 + $0x11a0] sm:$0xff]  ;;  %v1379_v27 = vld [vmem:[%s5002_s10 + $0x11b0] sm:$0xff] }
  0xab   : > { %v1381_v28 = vld [vmem:[%s5002_s10 + $0x11c0] sm:$0xff]  ;;  %1378 = vst [vmem:[%s5007_s11 + $0x8d0] sm:$0xff] %v1377_v26  ;;  %1380 = vst [vmem:[%s5007_s11 + $0x8d8] sm:$0xff] %v1379_v27  ;;  %v1383_v29 = vld [vmem:[%s5002_s10 + $0x11d0] sm:$0xff] }
  0xac   : > { %1382 = vst [vmem:[%s5007_s11 + $0x8e0] sm:$0xff] %v1381_v28  ;;  %v1385_v30 = vld [vmem:[%s5002_s10 + $0x11e0] sm:$0xff]  ;;  %v1387_v31 = vld [vmem:[%s5002_s10 + $0x11f0] sm:$0xff]  ;;  %1384 = vst [vmem:[%s5007_s11 + $0x8e8] sm:$0xff] %v1383_v29 }
  0xad   : > { %1386 = vst [vmem:[%s5007_s11 + $0x8f0] sm:$0xff] %v1385_v30  ;;  %1388 = vst [vmem:[%s5007_s11 + $0x8f8] sm:$0xff] %v1387_v31 }
  0xae PF: > { %p3993_p8 = scmp.ge.s32.totalorder %s4904_s20, 1  ;;  %p1401_p9 = scmp.lt.s32.totalorder %s4904_s20, 13 }
  0xb0   : > { %p1402_p10 = pnand %p3993_p8, %p1401_p9 }
  0xb1   : > { %s1408_s24 = sand.u32 (!%p1402_p10), 1, %s4872_s12   ;;  %p1462_p11 = scmp.lt.s32.totalorder (!%p1402_p10), %s4888_s16, 1 }
  0xb2   : > { %1405 = sbr.rel (%p1402_p10) target bundleno = 765 (0x2fd), region = 66  ;;  %p1464_p12 = scmp.lt.s32.totalorder (!%p1402_p10), %s4880_s14, 2 }
  0xb3   : > { %s4323_s25 = smul.u32 (!%p1402_p10), 2304, %s1408_s24  ;;  %s3994_s26 = sshll.u32 (!%p1402_p10), %s4884_s15, 1 }
  0xb4   : > { %p1478_p13 = scmp.lt.s32.totalorder (!%p1402_p10), %s3994_s26, 3  ;;  %p3997_p0 = scmp.ne.s32.totalorder (!%p1402_p10), %s4880_s14, 0 }
  0xb9   : > { %s6041_s16 = smov (!%p1462_p11, %s4888_s16), 1  ;;  %s6043_s26 = smov (!%p1478_p13, %s3994_s26), 3 }
  0xba   : > { %s1465_s27 = scalar_select %p1464_p12, %s4880_s14, 2 }
  0xbb   : > { %s4325_s29 = smul.u32 54, %s6041_s16  ;;  %s3996_s4 = sshll.u32 %s6041_s16, 2  ;;  %v1503_v32 = vlaneseq (!%p3997_p0)  ;;  %v4906_v33 = vmov (!%p3997_p0), 0.0  }
  0xbc   : > { %s4324_s30 = smul.u32 18, %s1465_s27  ;;  %s1480_s10 = scalar_lea.vmem %s6020_s2, %s6043_s26 }
  0xbd   : > { %s1496_s15 = sadd.s32 %s3996_s4, %s6043_s26  ;;  %s5607_s16 = scalar_lea.vmem [#allocation3], %s4323_s25  ;;  %vm1505_vm0 = vcmp.lt.s32.totalorder (!%p3997_p0), %v1503_v32, 256 }
  0xbe   : > { %s1472_s5 = sadd.s32 %s4325_s29, %s4324_s30  ;;  %s5605_s27 = scalar_lea.vmem %s6021_s3, %s1496_s15  ;;  %1507 = vst.msk [vmem:[#allocation2] sm:$0x3] (!%p3997_p0), %vm1505_vm0, %v4906_v33 }
  0xbf   : > { %s5595_s8 = scalar_lea.vmem %s6018_s0, %s1472_s5  ;;  %1502 = sbr.rel (%p3997_p0) target bundleno = 198 (0xc6), region = 74 }
  0xc6 PF: > { %v4400_v34 = vld [vmem:[%s5607_s16 + $0x4] ss:$8 sps:$4 sm:$0xff]   ;;  %v4404_v36 = vld [vmem:[%s5607_s16] ss:$8 sps:$4 sm:$0xff]   ;;  %v4406_v38 = vld [vmem:[%s5607_s16 + $0x14] ss:$8 sps:$4 sm:$0xff]   ;;  %v1807_v8 = vlaneseq }
  0xc7   : > { %v4402_v35 = vld [vmem:[%s5607_s16 + $0x404] ss:$8 sps:$4 sm:$0xff]   ;;  %3381 = vmatprep.subr.bf16.mxu1 %v4400_v34  ;;  %v4405_v37 = vld [vmem:[%s5607_s16 + $0x400] ss:$8 sps:$4 sm:$0xff]   ;;  %v4408_v39 = vld [vmem:[%s5607_s16 + $0x414] ss:$8 sps:$4 sm:$0xff]  }
  0xc8   : > { %3545 = vmatprep.subr.bf16.mxu0 %v4402_v35  ;;  %3382 = vmatpush1.bf16.msra.mxu1 %v4404_v36  ;;  %v4410_v40 = vld [vmem:[%s5607_s16 + $0x10] ss:$8 sps:$4 sm:$0xff]   ;;  %v4412_v42 = vld [vmem:[%s5607_s16 + $0x24] ss:$8 sps:$4 sm:$0xff]   ;;  %v4416_v44 = vld [vmem:[%s5607_s16 + $0x20] ss:$8 sps:$4 sm:$0xff]  }
  0xc9   : > { %3546 = vmatpush1.bf16.msra.mxu0 %v4405_v37  ;;  %3383 = vmatprep.subr.bf16.mxu1 %v4406_v38  ;;  %v4411_v41 = vld [vmem:[%s5607_s16 + $0x410] ss:$8 sps:$4 sm:$0xff]   ;;  %v4414_v43 = vld [vmem:[%s5607_s16 + $0x424] ss:$8 sps:$4 sm:$0xff]   ;;  %v4417_v45 = vld [vmem:[%s5607_s16 + $0x420] ss:$8 sps:$4 sm:$0xff]  }
  0xca   : > { %3547 = vmatprep.subr.bf16.mxu0 %v4408_v39  ;;  %v4418_v46 = vld [vmem:[%s5607_s16 + $0x34] ss:$8 sps:$4 sm:$0xff]   ;;  %v4422_v48 = vld [vmem:[%s5607_s16 + $0x30] ss:$8 sps:$4 sm:$0xff]   ;;  %v4424_v50 = vld [vmem:[%s5607_s16 + $0x44] ss:$8 sps:$4 sm:$0xff]  }
  0xcb   : > { %v4420_v47 = vld [vmem:[%s5607_s16 + $0x434] ss:$8 sps:$4 sm:$0xff]   ;;  %v4423_v49 = vld [vmem:[%s5607_s16 + $0x430] ss:$8 sps:$4 sm:$0xff]   ;;  %v4426_v51 = vld [vmem:[%s5607_s16 + $0x444] ss:$8 sps:$4 sm:$0xff]  }
  0xcc   : > { %3384 = vmatpush1.bf16.msra.mxu1 %v4410_v40  ;;  %v4428_v52 = vld [vmem:[%s5607_s16 + $0x40] ss:$8 sps:$4 sm:$0xff]   ;;  %v4430_v54 = vld [vmem:[%s5607_s16 + $0x54] ss:$8 sps:$4 sm:$0xff]   ;;  %v4434_v56 = vld [vmem:[%s5607_s16 + $0x50] ss:$8 sps:$4 sm:$0xff]  }
  0xcd   : > { %3548 = vmatpush1.bf16.msra.mxu0 %v4411_v41  ;;  %3385 = vmatprep.subr.bf16.mxu1 %v4412_v42  ;;  %v4429_v53 = vld [vmem:[%s5607_s16 + $0x440] ss:$8 sps:$4 sm:$0xff]   ;;  %v4432_v55 = vld [vmem:[%s5607_s16 + $0x454] ss:$8 sps:$4 sm:$0xff]   ;;  %v4435_v57 = vld [vmem:[%s5607_s16 + $0x450] ss:$8 sps:$4 sm:$0xff]  }
  0xce   : > { %3549 = vmatprep.subr.bf16.mxu0 %v4414_v43  ;;  %v4436_v58 = vld [vmem:[%s5607_s16 + $0x64] ss:$8 sps:$4 sm:$0xff]   ;;  %v4440_v60 = vld [vmem:[%s5607_s16 + $0x60] ss:$8 sps:$4 sm:$0xff]   ;;  %v4442_v62 = vld [vmem:[%s5607_s16 + $0x74] ss:$8 sps:$4 sm:$0xff]  }
  0xcf   : > { %v4438_v59 = vld [vmem:[%s5607_s16 + $0x464] ss:$8 sps:$4 sm:$0xff]   ;;  %v4441_v61 = vld [vmem:[%s5607_s16 + $0x460] ss:$8 sps:$4 sm:$0xff]   ;;  %v4444_v63 = vld [vmem:[%s5607_s16 + $0x474] ss:$8 sps:$4 sm:$0xff]  }
  0xd0   : > { %3386 = vmatpush1.bf16.msra.mxu1 %v4416_v44  ;;  %v4446_v0 = vld [vmem:[%s5607_s16 + $0x70] ss:$8 sps:$4 sm:$0xff]   ;;  %v4448_v2 = vld [vmem:[%s5607_s16 + $0x84] ss:$8 sps:$4 sm:$0xff]   ;;  %v4452_v4 = vld [vmem:[%s5607_s16 + $0x80] ss:$8 sps:$4 sm:$0xff]  }
  0xd1   : > { %3550 = vmatpush1.bf16.msra.mxu0 %v4417_v45  ;;  %3387 = vmatprep.subr.bf16.mxu1 %v4418_v46  ;;  %v4447_v1 = vld [vmem:[%s5607_s16 + $0x470] ss:$8 sps:$4 sm:$0xff]   ;;  %v4450_v3 = vld [vmem:[%s5607_s16 + $0x484] ss:$8 sps:$4 sm:$0xff]   ;;  %v4453_v5 = vld [vmem:[%s5607_s16 + $0x480] ss:$8 sps:$4 sm:$0xff]  }
  0xd2   : > { %3551 = vmatprep.subr.bf16.mxu0 %v4420_v47  ;;  %v4907_v6 = vmov 1966171168   ;;  %v4454_v9 = vld [vmem:[%s5607_s16 + $0x94] ss:$8 sps:$4 sm:$0xff]   ;;  %v4458_v11 = vld [vmem:[%s5607_s16 + $0x90] ss:$8 sps:$4 sm:$0xff]  }
  0xd3   : > { %v1805_v7 = vunpack.c.l.s4 %v4907_v6  ;;  %v4456_v10 = vld [vmem:[%s5607_s16 + $0x494] ss:$8 sps:$4 sm:$0xff]   ;;  %v5650_v13 = vshrl.u32 %v1807_v8, 7  ;;  %v4459_v14 = vld [vmem:[%s5607_s16 + $0x490] ss:$8 sps:$4 sm:$0xff]   ;;  %v5663_v22 = vld [vmem:[%s5595_s8] sm:$0xff] }
  0xd4   : > { %3388 = vmatpush1.bf16.msra.mxu1 %v4422_v48  ;;  %v4460_v15 = vld [vmem:[%s5607_s16 + $0xa4] ss:$8 sps:$4 sm:$0xff]   ;;  %v4464_v17 = vld [vmem:[%s5607_s16 + $0xa0] ss:$8 sps:$4 sm:$0xff]   ;;  %v4466_v20 = vld [vmem:[%s5607_s16 + $0xb4] ss:$8 sps:$4 sm:$0xff]  }
  0xd5   : > { %3552 = vmatpush1.bf16.msra.mxu0 %v4423_v49  ;;  %3389 = vmatprep.subr.bf16.mxu1 %v4424_v50  ;;  %v1806_v12 = vunpack.c.0.s8 %v1805_v7  ;;  %v4462_v16 = vld [vmem:[%s5607_s16 + $0x4a4] ss:$8 sps:$4 sm:$0xff]   ;;  %v4465_v18 = vld [vmem:[%s5607_s16 + $0x4a0] ss:$8 sps:$4 sm:$0xff]   ;;  %v4468_v21 = vld [vmem:[%s5607_s16 + $0x4b4] ss:$8 sps:$4 sm:$0xff]  }
  0xd6   : > { %3553 = vmatprep.subr.bf16.mxu0 %v4426_v51  ;;  %v4470_v23 = vld [vmem:[%s5607_s16 + $0xb0] ss:$8 sps:$4 sm:$0xff]   ;;  %v4472_v27 = vld [vmem:[%s5607_s16 + $0xc4] ss:$8 sps:$4 sm:$0xff]   ;;  %v4476_v33 = vld [vmem:[%s5607_s16 + $0xc0] ss:$8 sps:$4 sm:$0xff]  }
  0xd7   : > { %v5658_v19 = vsub.s32 %v1806_v12, %v5650_v13  ;;  %v4471_v25 = vld [vmem:[%s5607_s16 + $0x4b0] ss:$8 sps:$4 sm:$0xff]   ;;  %v4474_v28 = vld [vmem:[%s5607_s16 + $0x4c4] ss:$8 sps:$4 sm:$0xff]   ;;  %v4477_v34 = vld [vmem:[%s5607_s16 + $0x4c0] ss:$8 sps:$4 sm:$0xff]  }
  0xd8   : > { %3390 = vmatpush1.bf16.msra.mxu1 %v4428_v52  ;;  %v5670_v26 = vld [vmem:[%s5595_s8 + $0x8] sm:$0xff]  ;;  %v4488_v42 = vld [vmem:[%s5607_s16 + $0xe0] ss:$8 sps:$4 sm:$0xff]   ;;  %vm3771_vm1 = vcmp.lt.s32.totalorder %v1807_v8, 256  ;;  %p4287_p1 = scmp.ne.s32.totalorder %s4880_s14, 2 }
  0xd9   : > { %3554 = vmatpush1.bf16.msra.mxu0 %v4429_v53  ;;  %3391 = vmatprep.subr.bf16.mxu1 %v4430_v54  ;;  %v1810_v24 = vrot.slane %v5663_v22, %v5658_v19  ;;  %v1859_v30 = vrot.slane %v5670_v26, %v5658_v19  ;;  %v4478_v35 = vld [vmem:[%s5607_s16 + $0xd4] ss:$8 sps:$4 sm:$0xff]   ;;  %v4482_v38 = vld [vmem:[%s5607_s16 + $0xd0] ss:$8 sps:$4 sm:$0xff]   ;;  %v4484_v40 = vld [vmem:[%s5607_s16 + $0xe4] ss:$8 sps:$4 sm:$0xff]  }
  0xda   : > { %3555 = vmatprep.subr.bf16.mxu0 %v4432_v55  ;;  %v4480_v36 = vld [vmem:[%s5607_s16 + $0x4d4] ss:$8 sps:$4 sm:$0xff]   ;;  %v4483_v39 = vld [vmem:[%s5607_s16 + $0x4d0] ss:$8 sps:$4 sm:$0xff]   ;;  %v4486_v41 = vld [vmem:[%s5607_s16 + $0x4e4] ss:$8 sps:$4 sm:$0xff]  }
  0xdb   : > { %v1818_v29 = vcombine.high %v1810_v24, %v1810_v24  ;;  %v1867_v32 = vcombine.high %v1859_v30, %v1859_v30  ;;  %v4489_v43 = vld [vmem:[%s5607_s16 + $0x4e0] ss:$8 sps:$4 sm:$0xff]   ;;  %v4490_v44 = vld [vmem:[%s5607_s16 + $0xf4] ss:$8 sps:$4 sm:$0xff]   ;;  %v4494_v46 = vld [vmem:[%s5607_s16 + $0xf0] ss:$8 sps:$4 sm:$0xff]   ;;  %v5695_v50 = vrot.slane %v1810_v24, %v5658_v19  ;;  %v5698_v51 = vrot.slane %v1859_v30, %v5658_v19 }
  0xdc   : > { %3392 = vmatpush1.bf16.msra.mxu1 %v4434_v56  ;;  %v4492_v45 = vld [vmem:[%s5607_s16 + $0x4f4] ss:$8 sps:$4 sm:$0xff]   ;;  %v4495_v47 = vld [vmem:[%s5607_s16 + $0x4f0] ss:$8 sps:$4 sm:$0xff]   ;;  %v4499_v48 = vld [vmem:[%s5607_s16 + $0x104] ss:$8 sps:$4 sm:$0xff]  }
  0xdd   : > { %3556 = vmatpush1.bf16.msra.mxu0 %v4435_v57  ;;  %3393 = vmatprep.subr.bf16.mxu1 %v4436_v58  ;;  %v1840_v31 = vrot.slane %v1818_v29, %v5658_v19  ;;  %v1889_v37 = vrot.slane %v1867_v32, %v5658_v19  ;;  %v4503_v49 = vld [vmem:[%s5607_s16 + $0x504] ss:$8 sps:$4 sm:$0xff]   ;;  %v4497_v52 = vld [vmem:[%s5607_s16 + $0x100] ss:$8 sps:$4 sm:$0xff]   ;;  %v4506_v54 = vld [vmem:[%s5607_s16 + $0x114] ss:$8 sps:$4 sm:$0xff]  }
  0xde   : > { %3557 = vmatprep.subr.bf16.mxu0 %v4438_v59  ;;  %v4501_v53 = vld [vmem:[%s5607_s16 + $0x500] ss:$8 sps:$4 sm:$0xff]   ;;  %v4509_v55 = vld [vmem:[%s5607_s16 + $0x514] ss:$8 sps:$4 sm:$0xff]   ;;  %v4504_v58 = vld [vmem:[%s5607_s16 + $0x110] ss:$8 sps:$4 sm:$0xff]  }
  0xdf   : > { %3413 = vmatprep.mubr.bf16.mxu1 %v1840_v31  ;;  %3577 = vmatprep.mubr.bf16.mxu0 %v1889_v37  ;;  %v1850_v56 = vcombine.high %v1840_v31, %v1840_v31  ;;  %v1899_v57 = vcombine.high %v1889_v37, %v1889_v37  ;;  %v4507_v59 = vld [vmem:[%s5607_s16 + $0x510] ss:$8 sps:$4 sm:$0xff]   ;;  %v4522_v6 = vld [vmem:[%s5607_s16 + $0x140] ss:$8 sps:$4 sm:$0xff]   ;;  %v4548_v24 = vld [vmem:[%s5607_s16 + $0x184] ss:$8 sps:$4 sm:$0xff]  }
  0xe0   : > { %3394 = vmatpush1.bf16.msra.mxu1 %v4440_v60  ;;  %v4512_v60 = vld [vmem:[%s5607_s16 + $0x124] ss:$8 sps:$4 sm:$0xff]   ;;  %v4525_v7 = vld [vmem:[%s5607_s16 + $0x540] ss:$8 sps:$4 sm:$0xff]   ;;  %v4531_v12 = vld [vmem:[%s5607_s16 + $0x550] ss:$8 sps:$4 sm:$0xff]  }
  0xe1   : > { %3558 = vmatpush1.bf16.msra.mxu0 %v4441_v61  ;;  %3395 = vmatprep.subr.bf16.mxu1 %v4442_v62  ;;  %v4515_v61 = vld [vmem:[%s5607_s16 + $0x524] ss:$8 sps:$4 sm:$0xff]   ;;  %v4510_v62 = vld [vmem:[%s5607_s16 + $0x120] ss:$8 sps:$4 sm:$0xff]   ;;  %v4554_v29 = vld [vmem:[%s5607_s16 + $0x194] ss:$8 sps:$4 sm:$0xff]  }
  0xe2   : > { %3559 = vmatprep.subr.bf16.mxu0 %v4444_v63  ;;  %v4513_v63 = vld [vmem:[%s5607_s16 + $0x520] ss:$8 sps:$4 sm:$0xff]   ;;  %v4557_v30 = vld [vmem:[%s5607_s16 + $0x594] ss:$8 sps:$4 sm:$0xff]   ;;  %v4552_v31 = vld [vmem:[%s5607_s16 + $0x190] ss:$8 sps:$4 sm:$0xff]  }
  0xe3   : > { %v4555_v32 = vld [vmem:[%s5607_s16 + $0x590] ss:$8 sps:$4 sm:$0xff]   ;;  %v4566_v37 = vld [vmem:[%s5607_s16 + $0x1b4] ss:$8 sps:$4 sm:$0xff]   ;;  %vm3813_vm2 = vcmask (!%p4287_p1), 1040384   ;;  %vm3816_vm4 = vcmask (!%p4287_p1), 1041409  }
  0xe4   : > { %3396 = vmatpush1.bf16.msra.mxu1 %v4446_v0  ;;  %v4518_v0 = vld [vmem:[%s5607_s16 + $0x134] ss:$8 sps:$4 sm:$0xff]   ;;  %vm3814_vm3 = vsmask.f32 (!%p4287_p1), 256  ;;  %vm3817_vm5 = vsmask.f32 (!%p4287_p1), 1280 }
  0xe5   : > { %3560 = vmatpush1.bf16.msra.mxu0 %v4447_v1  ;;  %3397 = vmatprep.subr.bf16.mxu1 %v4448_v2  ;;  %v4521_v1 = vld [vmem:[%s5607_s16 + $0x534] ss:$8 sps:$4 sm:$0xff]   ;;  %v4516_v2 = vld [vmem:[%s5607_s16 + $0x130] ss:$8 sps:$4 sm:$0xff]   ;;  %vm3815_vm6 = vmand (!%p4287_p1), %vm3813_vm2, %vm3814_vm3 }
  0xe6   : > { %3561 = vmatprep.subr.bf16.mxu0 %v4450_v3  ;;  %v4519_v3 = vld [vmem:[%s5607_s16 + $0x530] ss:$8 sps:$4 sm:$0xff]   ;;  %vm3818_vm7 = vmand (!%p4287_p1), %vm3816_vm4, %vm3817_vm5 }
  0xe7   : > { %vm3819_vm8 = vmor (!%p4287_p1), %vm3818_vm7, %vm3815_vm6 }
  0xe8   : > { %3398 = vmatpush1.bf16.msra.mxu1 %v4452_v4  ;;  %v4524_v4 = vld [vmem:[%s5607_s16 + $0x144] ss:$8 sps:$4 sm:$0xff]  }
  0xe9   : > { %3562 = vmatpush1.bf16.msra.mxu0 %v4453_v5  ;;  %3399 = vmatprep.subr.bf16.mxu1 %v4454_v9  ;;  %v4527_v5 = vld [vmem:[%s5607_s16 + $0x544] ss:$8 sps:$4 sm:$0xff]   ;;  %v4530_v9 = vld [vmem:[%s5607_s16 + $0x154] ss:$8 sps:$4 sm:$0xff]  }
  0xea   : > { %3563 = vmatprep.subr.bf16.mxu0 %v4456_v10  ;;  %v4533_v10 = vld [vmem:[%s5607_s16 + $0x554] ss:$8 sps:$4 sm:$0xff]  }
  0xec   : > { %3400 = vmatpush1.bf16.msra.mxu1 %v4458_v11  ;;  %v4528_v11 = vld [vmem:[%s5607_s16 + $0x150] ss:$8 sps:$4 sm:$0xff]  }
  0xed   : > { %3564 = vmatpush1.bf16.msra.mxu0 %v4459_v14  ;;  %3401 = vmatprep.subr.bf16.mxu1 %v4460_v15  ;;  %v4536_v14 = vld [vmem:[%s5607_s16 + $0x164] ss:$8 sps:$4 sm:$0xff]  }
  0xee   : > { %3565 = vmatprep.subr.bf16.mxu0 %v4462_v16  ;;  %v4539_v15 = vld [vmem:[%s5607_s16 + $0x564] ss:$8 sps:$4 sm:$0xff]   ;;  %v4534_v16 = vld [vmem:[%s5607_s16 + $0x160] ss:$8 sps:$4 sm:$0xff]  }
  0xf0   : > { %3402 = vmatpush1.bf16.msra.mxu1 %v4464_v17  ;;  %v4537_v17 = vld [vmem:[%s5607_s16 + $0x560] ss:$8 sps:$4 sm:$0xff]  }
  0xf1   : > { %3566 = vmatpush1.bf16.msra.mxu0 %v4465_v18  ;;  %3403 = vmatprep.subr.bf16.mxu1 %v4466_v20  ;;  %v4542_v18 = vld [vmem:[%s5607_s16 + $0x174] ss:$8 sps:$4 sm:$0xff]  }
  0xf2   : > { %3567 = vmatprep.subr.bf16.mxu0 %v4468_v21  ;;  %v4545_v20 = vld [vmem:[%s5607_s16 + $0x574] ss:$8 sps:$4 sm:$0xff]   ;;  %v4540_v21 = vld [vmem:[%s5607_s16 + $0x170] ss:$8 sps:$4 sm:$0xff]  }
  0xf4   : > { %3404 = vmatpush1.bf16.msra.mxu1 %v4470_v23  ;;  %v4543_v23 = vld [vmem:[%s5607_s16 + $0x570] ss:$8 sps:$4 sm:$0xff]  }
  0xf5   : > { %3568 = vmatpush1.bf16.msra.mxu0 %v4471_v25  ;;  %3405 = vmatprep.subr.bf16.mxu1 %v4472_v27  ;;  %v4551_v25 = vld [vmem:[%s5607_s16 + $0x584] ss:$8 sps:$4 sm:$0xff]   ;;  %v4546_v27 = vld [vmem:[%s5607_s16 + $0x180] ss:$8 sps:$4 sm:$0xff]  }
  0xf6   : > { %3569 = vmatprep.subr.bf16.mxu0 %v4474_v28  ;;  %v4549_v28 = vld [vmem:[%s5607_s16 + $0x580] ss:$8 sps:$4 sm:$0xff]  }
  0xf8   : > { %3406 = vmatpush1.bf16.msra.mxu1 %v4476_v33  ;;  %v4560_v33 = vld [vmem:[%s5607_s16 + $0x1a4] ss:$8 sps:$4 sm:$0xff]  }
  0xf9   : > { %3570 = vmatpush1.bf16.msra.mxu0 %v4477_v34  ;;  %3407 = vmatprep.subr.bf16.mxu1 %v4478_v35  ;;  %v4563_v34 = vld [vmem:[%s5607_s16 + $0x5a4] ss:$8 sps:$4 sm:$0xff]   ;;  %v4558_v35 = vld [vmem:[%s5607_s16 + $0x1a0] ss:$8 sps:$4 sm:$0xff]  }
  0xfa   : > { %3571 = vmatprep.subr.bf16.mxu0 %v4480_v36  ;;  %v4561_v36 = vld [vmem:[%s5607_s16 + $0x5a0] ss:$8 sps:$4 sm:$0xff]  }
  0xfc   : > { %3408 = vmatpush1.bf16.msra.mxu1 %v4482_v38  ;;  %v4569_v38 = vld [vmem:[%s5607_s16 + $0x5b4] ss:$8 sps:$4 sm:$0xff]  }
  0xfd   : > { %3572 = vmatpush1.bf16.msra.mxu0 %v4483_v39  ;;  %3409 = vmatprep.subr.bf16.mxu1 %v4484_v40  ;;  %v4564_v39 = vld [vmem:[%s5607_s16 + $0x1b0] ss:$8 sps:$4 sm:$0xff]  }
  0xfe   : > { %3573 = vmatprep.subr.bf16.mxu0 %v4486_v41  ;;  %v4567_v40 = vld [vmem:[%s5607_s16 + $0x5b0] ss:$8 sps:$4 sm:$0xff]   ;;  %v4572_v41 = vld [vmem:[%s5607_s16 + $0x1c4] ss:$8 sps:$4 sm:$0xff]  }
 0x100   : > { %3410 = vmatpush1.bf16.msra.mxu1 %v4488_v42  ;;  %v4575_v42 = vld [vmem:[%s5607_s16 + $0x5c4] ss:$8 sps:$4 sm:$0xff]  }
 0x101   : > { %3574 = vmatpush1.bf16.msra.mxu0 %v4489_v43  ;;  %3411 = vmatprep.subr.bf16.mxu1 %v4490_v44  ;;  %v4570_v43 = vld [vmem:[%s5607_s16 + $0x1c0] ss:$8 sps:$4 sm:$0xff]  }
 0x102   : > { %3575 = vmatprep.subr.bf16.mxu0 %v4492_v45  ;;  %v4573_v44 = vld [vmem:[%s5607_s16 + $0x5c0] ss:$8 sps:$4 sm:$0xff]   ;;  %v4578_v45 = vld [vmem:[%s5607_s16 + $0x1d4] ss:$8 sps:$4 sm:$0xff]  }
 0x104   : > { %3412 = vmatpush1.bf16.msra.mxu1 %v4494_v46  ;;  %v4581_v46 = vld [vmem:[%s5607_s16 + $0x5d4] ss:$8 sps:$4 sm:$0xff]  }
 0x105   : > { %3576 = vmatpush1.bf16.msra.mxu0 %v4495_v47  ;;  %3422 = vmatprep.subr.bf16.mxu1 %v4499_v48  ;;  %v4576_v47 = vld [vmem:[%s5607_s16 + $0x1d0] ss:$8 sps:$4 sm:$0xff]  }
 0x106   : > { %3586 = vmatprep.subr.bf16.mxu0 %v4503_v49  ;;  %v4579_v48 = vld [vmem:[%s5607_s16 + $0x5d0] ss:$8 sps:$4 sm:$0xff]   ;;  %v4584_v49 = vld [vmem:[%s5607_s16 + $0x1e4] ss:$8 sps:$4 sm:$0xff]  }
 0x107   : > { %3414 = vmatmul.mubr.bf16.vlgmr.msra.gmra.mrb[0].mxu1 %v5695_v50 }
 0x108   : > { %3578 = vmatmul.mubr.bf16.vlgmr.msra.gmra.mrb[0].mxu0 %v5698_v51  ;;  %3423 = vmatpush1.bf16.msra.mxu1 %v4497_v52  ;;  %v4587_v52 = vld [vmem:[%s5607_s16 + $0x5e4] ss:$8 sps:$4 sm:$0xff]  }
 0x109   : > { %3587 = vmatpush1.bf16.msra.mxu0 %v4501_v53  ;;  %3424 = vmatprep.subr.bf16.mxu1 %v4506_v54  ;;  %v1803_v53 = vcombine.high %v5663_v22, %v5663_v22  ;;  %v1852_v54 = vcombine.high %v5670_v26, %v5670_v26  ;;  %v4588_v22 = vld [vmem:[%s5607_s16 + $0x1f0] ss:$8 sps:$4 sm:$0xff]  }
 0x10a   : > { %3588 = vmatprep.subr.bf16.mxu0 %v4509_v55  ;;  %3454 = vmatprep.mubr.bf16.mxu1 %v1850_v56  ;;  %v4582_v55 = vld [vmem:[%s5607_s16 + $0x1e0] ss:$8 sps:$4 sm:$0xff]   ;;  %v4591_v26 = vld [vmem:[%s5607_s16 + $0x5f0] ss:$8 sps:$4 sm:$0xff]  }
 0x10b   : > { %3618 = vmatprep.mubr.bf16.mxu0 %v1899_v57  ;;  %v4585_v56 = vld [vmem:[%s5607_s16 + $0x5e0] ss:$8 sps:$4 sm:$0xff]   ;;  %v4590_v57 = vld [vmem:[%s5607_s16 + $0x1f4] ss:$8 sps:$4 sm:$0xff]  }
 0x10c   : > { %3425 = vmatpush1.bf16.msra.mxu1 %v4504_v58  ;;  %v4593_v58 = vld [vmem:[%s5607_s16 + $0x5f4] ss:$8 sps:$4 sm:$0xff]  }
 0x10d   : > { %3589 = vmatpush1.bf16.msra.mxu0 %v4507_v59  ;;  %3426 = vmatprep.subr.bf16.mxu1 %v4512_v60  ;;  %v5767_v59 = vrot.slane %v1803_v53, %v5658_v19  ;;  %v5770_v60 = vrot.slane %v1852_v54, %v5658_v19  ;;  %v4665_v53 = vld [vmem:[%s5607_s16 + $0x6b4] ss:$8 sps:$4 sm:$0xff]   ;;  %v4660_v54 = vld [vmem:[%s5607_s16 + $0x2b0] ss:$8 sps:$4 sm:$0xff]  }
 0x10e   : > { %3590 = vmatprep.subr.bf16.mxu0 %v4515_v61  ;;  %v4596_v61 = vld [vmem:[%s5607_s16 + $0x204] ss:$8 sps:$4 sm:$0xff]  }
 0x110   : > { %3427 = vmatpush1.bf16.msra.mxu1 %v4510_v62  ;;  %v4599_v62 = vld [vmem:[%s5607_s16 + $0x604] ss:$8 sps:$4 sm:$0xff]  }
 0x111   : > { %3591 = vmatpush1.bf16.msra.mxu0 %v4513_v63  ;;  %3428 = vmatprep.subr.bf16.mxu1 %v4518_v0  ;;  %v1819_v63 = vcombine.high %v5767_v59, %v5767_v59  ;;  %v1868_v0 = vcombine.high %v5770_v60, %v5770_v60 }
 0x112   : > { %3592 = vmatprep.subr.bf16.mxu0 %v4521_v1  ;;  %v1848_v1 = vcombine.high %v5695_v50, %v5695_v50 }
 0x113   : > { %v5792_v50 = vrot.slane %v1868_v0, %v5658_v19  ;;  %v4680_v0 = vld [vmem:[%s5607_s16 + $0x2e4] ss:$8 sps:$4 sm:$0xff]  }
 0x114   : > { %3429 = vmatpush1.bf16.msra.mxu1 %v4516_v2  ;;  %v1897_v2 = vcombine.high %v5698_v51, %v5698_v51  ;;  %v4600_v51 = vld [vmem:[%s5607_s16 + $0x210] ss:$8 sps:$4 sm:$0xff]  }
 0x115   : > { %3593 = vmatpush1.bf16.msra.mxu0 %v4519_v3  ;;  %3430 = vmatprep.subr.bf16.mxu1 %v4524_v4  ;;  %v4594_v3 = vld [vmem:[%s5607_s16 + $0x200] ss:$8 sps:$4 sm:$0xff]  }
 0x116   : > { %3594 = vmatprep.subr.bf16.mxu0 %v4527_v5  ;;  %v4597_v4 = vld [vmem:[%s5607_s16 + $0x600] ss:$8 sps:$4 sm:$0xff]   ;;  %v4602_v5 = vld [vmem:[%s5607_s16 + $0x214] ss:$8 sps:$4 sm:$0xff]  }
 0x118   : > { %3431 = vmatpush1.bf16.msra.mxu1 %v4522_v6  ;;  %v4605_v6 = vld [vmem:[%s5607_s16 + $0x614] ss:$8 sps:$4 sm:$0xff]  }
 0x119   : > { %3595 = vmatpush1.bf16.msra.mxu0 %v4525_v7  ;;  %3432 = vmatprep.subr.bf16.mxu1 %v4530_v9  ;;  %v5789_v7 = vrot.slane %v1819_v63, %v5658_v19  ;;  %v4603_v9 = vld [vmem:[%s5607_s16 + $0x610] ss:$8 sps:$4 sm:$0xff]  }
 0x11a   : > { %3596 = vmatprep.subr.bf16.mxu0 %v4533_v10  ;;  %v4608_v10 = vld [vmem:[%s5607_s16 + $0x224] ss:$8 sps:$4 sm:$0xff]   ;;  %v4675_v63 = vld [vmem:[%s5607_s16 + $0x6d0] ss:$8 sps:$4 sm:$0xff]  }
 0x11c   : > { %3433 = vmatpush1.bf16.msra.mxu1 %v4528_v11  ;;  %v4611_v11 = vld [vmem:[%s5607_s16 + $0x624] ss:$8 sps:$4 sm:$0xff]  }
 0x11d   : > { %3597 = vmatpush1.bf16.msra.mxu0 %v4531_v12  ;;  %3434 = vmatprep.subr.bf16.mxu1 %v4536_v14  ;;  %v4606_v12 = vld [vmem:[%s5607_s16 + $0x220] ss:$8 sps:$4 sm:$0xff]  }
 0x11e   : > { %3598 = vmatprep.subr.bf16.mxu0 %v4539_v15  ;;  %v4609_v14 = vld [vmem:[%s5607_s16 + $0x620] ss:$8 sps:$4 sm:$0xff]   ;;  %v4614_v15 = vld [vmem:[%s5607_s16 + $0x234] ss:$8 sps:$4 sm:$0xff]  }
 0x120   : > { %3435 = vmatpush1.bf16.msra.mxu1 %v4534_v16  ;;  %v4617_v16 = vld [vmem:[%s5607_s16 + $0x634] ss:$8 sps:$4 sm:$0xff]  }
 0x121   : > { %3599 = vmatpush1.bf16.msra.mxu0 %v4537_v17  ;;  %3436 = vmatprep.subr.bf16.mxu1 %v4542_v18  ;;  %v4612_v17 = vld [vmem:[%s5607_s16 + $0x230] ss:$8 sps:$4 sm:$0xff]  }
 0x122   : > { %3600 = vmatprep.subr.bf16.mxu0 %v4545_v20  ;;  %v4615_v18 = vld [vmem:[%s5607_s16 + $0x630] ss:$8 sps:$4 sm:$0xff]   ;;  %v4620_v20 = vld [vmem:[%s5607_s16 + $0x244] ss:$8 sps:$4 sm:$0xff]  }
 0x124   : > { %3437 = vmatpush1.bf16.msra.mxu1 %v4540_v21  ;;  %v4623_v21 = vld [vmem:[%s5607_s16 + $0x644] ss:$8 sps:$4 sm:$0xff]  }
 0x125   : > { %3601 = vmatpush1.bf16.msra.mxu0 %v4543_v23  ;;  %3438 = vmatprep.subr.bf16.mxu1 %v4548_v24  ;;  %v4618_v23 = vld [vmem:[%s5607_s16 + $0x240] ss:$8 sps:$4 sm:$0xff]  }
 0x126   : > { %3602 = vmatprep.subr.bf16.mxu0 %v4551_v25  ;;  %v4621_v24 = vld [vmem:[%s5607_s16 + $0x640] ss:$8 sps:$4 sm:$0xff]   ;;  %v4626_v25 = vld [vmem:[%s5607_s16 + $0x254] ss:$8 sps:$4 sm:$0xff]  }
 0x128   : > { %3439 = vmatpush1.bf16.msra.mxu1 %v4546_v27  ;;  %v4629_v27 = vld [vmem:[%s5607_s16 + $0x654] ss:$8 sps:$4 sm:$0xff]  }
 0x129   : > { %3603 = vmatpush1.bf16.msra.mxu0 %v4549_v28  ;;  %3440 = vmatprep.subr.bf16.mxu1 %v4554_v29  ;;  %v4624_v28 = vld [vmem:[%s5607_s16 + $0x250] ss:$8 sps:$4 sm:$0xff]  }
 0x12a   : > { %3604 = vmatprep.subr.bf16.mxu0 %v4557_v30  ;;  %v4627_v29 = vld [vmem:[%s5607_s16 + $0x650] ss:$8 sps:$4 sm:$0xff]   ;;  %v4632_v30 = vld [vmem:[%s5607_s16 + $0x264] ss:$8 sps:$4 sm:$0xff]  }
 0x12c   : > { %3441 = vmatpush1.bf16.msra.mxu1 %v4552_v31  ;;  %v4635_v31 = vld [vmem:[%s5607_s16 + $0x664] ss:$8 sps:$4 sm:$0xff]  }
 0x12d   : > { %3605 = vmatpush1.bf16.msra.mxu0 %v4555_v32  ;;  %3442 = vmatprep.subr.bf16.mxu1 %v4560_v33  ;;  %v4630_v32 = vld [vmem:[%s5607_s16 + $0x260] ss:$8 sps:$4 sm:$0xff]  }
 0x12e   : > { %3606 = vmatprep.subr.bf16.mxu0 %v4563_v34  ;;  %v4633_v33 = vld [vmem:[%s5607_s16 + $0x660] ss:$8 sps:$4 sm:$0xff]   ;;  %v4638_v34 = vld [vmem:[%s5607_s16 + $0x274] ss:$8 sps:$4 sm:$0xff]  }
 0x130   : > { %3443 = vmatpush1.bf16.msra.mxu1 %v4558_v35  ;;  %v4641_v35 = vld [vmem:[%s5607_s16 + $0x674] ss:$8 sps:$4 sm:$0xff]  }
 0x131   : > { %3607 = vmatpush1.bf16.msra.mxu0 %v4561_v36  ;;  %3444 = vmatprep.subr.bf16.mxu1 %v4566_v37  ;;  %v4636_v36 = vld [vmem:[%s5607_s16 + $0x270] ss:$8 sps:$4 sm:$0xff]  }
 0x132   : > { %3608 = vmatprep.subr.bf16.mxu0 %v4569_v38  ;;  %v4639_v37 = vld [vmem:[%s5607_s16 + $0x670] ss:$8 sps:$4 sm:$0xff]   ;;  %v4644_v38 = vld [vmem:[%s5607_s16 + $0x284] ss:$8 sps:$4 sm:$0xff]  }
 0x134   : > { %3445 = vmatpush1.bf16.msra.mxu1 %v4564_v39  ;;  %v4647_v39 = vld [vmem:[%s5607_s16 + $0x684] ss:$8 sps:$4 sm:$0xff]  }
 0x135   : > { %3609 = vmatpush1.bf16.msra.mxu0 %v4567_v40  ;;  %3446 = vmatprep.subr.bf16.mxu1 %v4572_v41  ;;  %v4642_v40 = vld [vmem:[%s5607_s16 + $0x280] ss:$8 sps:$4 sm:$0xff]  }
 0x136   : > { %3610 = vmatprep.subr.bf16.mxu0 %v4575_v42  ;;  %v4645_v41 = vld [vmem:[%s5607_s16 + $0x680] ss:$8 sps:$4 sm:$0xff]   ;;  %v4650_v42 = vld [vmem:[%s5607_s16 + $0x294] ss:$8 sps:$4 sm:$0xff]  }
 0x138   : > { %3447 = vmatpush1.bf16.msra.mxu1 %v4570_v43  ;;  %v4653_v43 = vld [vmem:[%s5607_s16 + $0x694] ss:$8 sps:$4 sm:$0xff]  }
 0x139   : > { %3611 = vmatpush1.bf16.msra.mxu0 %v4573_v44  ;;  %3448 = vmatprep.subr.bf16.mxu1 %v4578_v45  ;;  %v4648_v44 = vld [vmem:[%s5607_s16 + $0x290] ss:$8 sps:$4 sm:$0xff]  }
 0x13a   : > { %3612 = vmatprep.subr.bf16.mxu0 %v4581_v46  ;;  %v4651_v45 = vld [vmem:[%s5607_s16 + $0x690] ss:$8 sps:$4 sm:$0xff]   ;;  %v4656_v46 = vld [vmem:[%s5607_s16 + $0x2a4] ss:$8 sps:$4 sm:$0xff]  }
 0x13c   : > { %3449 = vmatpush1.bf16.msra.mxu1 %v4576_v47  ;;  %v4659_v47 = vld [vmem:[%s5607_s16 + $0x6a4] ss:$8 sps:$4 sm:$0xff]  }
 0x13d   : > { %3613 = vmatpush1.bf16.msra.mxu0 %v4579_v48  ;;  %3450 = vmatprep.subr.bf16.mxu1 %v4584_v49  ;;  %v4654_v48 = vld [vmem:[%s5607_s16 + $0x2a0] ss:$8 sps:$4 sm:$0xff]  }
 0x13e   : > { %3614 = vmatprep.subr.bf16.mxu0 %v4587_v52  ;;  %v4657_v49 = vld [vmem:[%s5607_s16 + $0x6a0] ss:$8 sps:$4 sm:$0xff]   ;;  %v4662_v52 = vld [vmem:[%s5607_s16 + $0x2b4] ss:$8 sps:$4 sm:$0xff]  }
 0x140   : > { %3451 = vmatpush1.bf16.msra.mxu1 %v4582_v55  ;;  %v4663_v55 = vld [vmem:[%s5607_s16 + $0x6b0] ss:$8 sps:$4 sm:$0xff]  }
 0x141   : > { %3615 = vmatpush1.bf16.msra.mxu0 %v4585_v56  ;;  %3452 = vmatprep.subr.bf16.mxu1 %v4590_v57  ;;  %v4668_v56 = vld [vmem:[%s5607_s16 + $0x2c4] ss:$8 sps:$4 sm:$0xff]  }
 0x142   : > { %3616 = vmatprep.subr.bf16.mxu0 %v4593_v58  ;;  %v4671_v57 = vld [vmem:[%s5607_s16 + $0x6c4] ss:$8 sps:$4 sm:$0xff]   ;;  %v4666_v58 = vld [vmem:[%s5607_s16 + $0x2c0] ss:$8 sps:$4 sm:$0xff]  }
 0x144   : > { %3453 = vmatpush1.bf16.msra.mxu1 %v4588_v22  ;;  %v4669_v22 = vld [vmem:[%s5607_s16 + $0x6c0] ss:$8 sps:$4 sm:$0xff]  }
 0x145   : > { %3617 = vmatpush1.bf16.msra.mxu0 %v4591_v26  ;;  %3463 = vmatprep.subr.bf16.mxu1 %v4596_v61  ;;  %v4674_v26 = vld [vmem:[%s5607_s16 + $0x2d4] ss:$8 sps:$4 sm:$0xff]  }
 0x146   : > { %3627 = vmatprep.subr.bf16.mxu0 %v4599_v62  ;;  %v4677_v61 = vld [vmem:[%s5607_s16 + $0x6d4] ss:$8 sps:$4 sm:$0xff]   ;;  %v4672_v62 = vld [vmem:[%s5607_s16 + $0x2d0] ss:$8 sps:$4 sm:$0xff]  }
 0x147   : > { %3455 = vmatmul.mubr.bf16.vlgmr.msra.gmra.mrb[0].mxu1 %v1848_v1  ;;  %v4683_v1 = vld [vmem:[%s5607_s16 + $0x6e4] ss:$8 sps:$4 sm:$0xff]  }
 0x148   : > { %3619 = vmatmul.mubr.bf16.vlgmr.msra.gmra.mrb[0].mxu0 %v1897_v2  ;;  %3464 = vmatpush1.bf16.msra.mxu1 %v4594_v3  ;;  %v4678_v2 = vld [vmem:[%s5607_s16 + $0x2e0] ss:$8 sps:$4 sm:$0xff]  }
 0x149   : > { %3628 = vmatpush1.bf16.msra.mxu0 %v4597_v4  ;;  %3465 = vmatprep.subr.bf16.mxu1 %v4602_v5  ;;  %v4681_v3 = vld [vmem:[%s5607_s16 + $0x6e0] ss:$8 sps:$4 sm:$0xff]   ;;  %v4686_v4 = vld [vmem:[%s5607_s16 + $0x2f4] ss:$8 sps:$4 sm:$0xff]  }
 0x14a   : > { %3629 = vmatprep.subr.bf16.mxu0 %v4605_v6  ;;  %3495 = vmatprep.mubr.bf16.mxu1 %v5789_v7  ;;  %v4689_v5 = vld [vmem:[%s5607_s16 + $0x6f4] ss:$8 sps:$4 sm:$0xff]   ;;  %v4684_v6 = vld [vmem:[%s5607_s16 + $0x2f0] ss:$8 sps:$4 sm:$0xff]  }
 0x14b   : > { %3659 = vmatprep.mubr.bf16.mxu0 %v5792_v50 }
 0x14c   : > { %3466 = vmatpush1.bf16.msra.mxu1 %v4600_v51  ;;  %v4687_v51 = vld [vmem:[%s5607_s16 + $0x6f0] ss:$8 sps:$4 sm:$0xff]  }
 0x14d   : > { %3630 = vmatpush1.bf16.msra.mxu0 %v4603_v9  ;;  %3467 = vmatprep.subr.bf16.mxu1 %v4608_v10  ;;  %v4692_v9 = vld [vmem:[%s5607_s16 + $0x304] ss:$8 sps:$4 sm:$0xff]  }
 0x14e   : > { %3631 = vmatprep.subr.bf16.mxu0 %v4611_v11  ;;  %v4695_v10 = vld [vmem:[%s5607_s16 + $0x704] ss:$8 sps:$4 sm:$0xff]   ;;  %v5858_v11 = vrot.slane %v5767_v59, %v5658_v19  ;;  %v1851_v59 = vcombine.high %v5789_v7, %v5789_v7 }
 0x14f   : > { %v4704_v7 = vld [vmem:[%s5607_s16 + $0x324] ss:$8 sps:$4 sm:$0xff]  }
 0x150   : > { %3468 = vmatpush1.bf16.msra.mxu1 %v4606_v12  ;;  %v5862_v12 = vrot.slane %v5770_v60, %v5658_v19  ;;  %v4696_v60 = vld [vmem:[%s5607_s16 + $0x310] ss:$8 sps:$4 sm:$0xff]  }
 0x151   : > { %3632 = vmatpush1.bf16.msra.mxu0 %v4609_v14  ;;  %3469 = vmatprep.subr.bf16.mxu1 %v4614_v15  ;;  %v4690_v14 = vld [vmem:[%s5607_s16 + $0x300] ss:$8 sps:$4 sm:$0xff]  }
 0x152   : > { %3633 = vmatprep.subr.bf16.mxu0 %v4617_v16  ;;  %v4693_v15 = vld [vmem:[%s5607_s16 + $0x700] ss:$8 sps:$4 sm:$0xff]   ;;  %v4698_v16 = vld [vmem:[%s5607_s16 + $0x314] ss:$8 sps:$4 sm:$0xff]  }
 0x154   : > { %3470 = vmatpush1.bf16.msra.mxu1 %v4612_v17  ;;  %v4701_v17 = vld [vmem:[%s5607_s16 + $0x714] ss:$8 sps:$4 sm:$0xff]  }
 0x155   : > { %3634 = vmatpush1.bf16.msra.mxu0 %v4615_v18  ;;  %3471 = vmatprep.subr.bf16.mxu1 %v4620_v20  ;;  %v1900_v18 = vcombine.high %v5792_v50, %v5792_v50  ;;  %v4699_v20 = vld [vmem:[%s5607_s16 + $0x710] ss:$8 sps:$4 sm:$0xff]   ;;  %v4702_v50 = vld [vmem:[%s5607_s16 + $0x320] ss:$8 sps:$4 sm:$0xff]  }
 0x156   : > { %3635 = vmatprep.subr.bf16.mxu0 %v4623_v21  ;;  %v4707_v21 = vld [vmem:[%s5607_s16 + $0x724] ss:$8 sps:$4 sm:$0xff]  }
 0x158   : > { %3472 = vmatpush1.bf16.msra.mxu1 %v4618_v23  ;;  %v4705_v23 = vld [vmem:[%s5607_s16 + $0x720] ss:$8 sps:$4 sm:$0xff]  }
 0x159   : > { %3636 = vmatpush1.bf16.msra.mxu0 %v4621_v24  ;;  %3473 = vmatprep.subr.bf16.mxu1 %v4626_v25  ;;  %v4710_v24 = vld [vmem:[%s5607_s16 + $0x334] ss:$8 sps:$4 sm:$0xff]  }
 0x15a   : > { %3637 = vmatprep.subr.bf16.mxu0 %v4629_v27  ;;  %v4713_v25 = vld [vmem:[%s5607_s16 + $0x734] ss:$8 sps:$4 sm:$0xff]   ;;  %v4708_v27 = vld [vmem:[%s5607_s16 + $0x330] ss:$8 sps:$4 sm:$0xff]  }
 0x15c   : > { %3474 = vmatpush1.bf16.msra.mxu1 %v4624_v28  ;;  %v4711_v28 = vld [vmem:[%s5607_s16 + $0x730] ss:$8 sps:$4 sm:$0xff]  }
 0x15d   : > { %3638 = vmatpush1.bf16.msra.mxu0 %v4627_v29  ;;  %3475 = vmatprep.subr.bf16.mxu1 %v4632_v30  ;;  %v4716_v29 = vld [vmem:[%s5607_s16 + $0x344] ss:$8 sps:$4 sm:$0xff]  }
 0x15e   : > { %3639 = vmatprep.subr.bf16.mxu0 %v4635_v31  ;;  %v4719_v30 = vld [vmem:[%s5607_s16 + $0x744] ss:$8 sps:$4 sm:$0xff]   ;;  %v4714_v31 = vld [vmem:[%s5607_s16 + $0x340] ss:$8 sps:$4 sm:$0xff]  }
 0x160   : > { %3476 = vmatpush1.bf16.msra.mxu1 %v4630_v32  ;;  %v4717_v32 = vld [vmem:[%s5607_s16 + $0x740] ss:$8 sps:$4 sm:$0xff]  }
 0x161   : > { %3640 = vmatpush1.bf16.msra.mxu0 %v4633_v33  ;;  %3477 = vmatprep.subr.bf16.mxu1 %v4638_v34  ;;  %v4722_v33 = vld [vmem:[%s5607_s16 + $0x354] ss:$8 sps:$4 sm:$0xff]  }
 0x162   : > { %3641 = vmatprep.subr.bf16.mxu0 %v4641_v35  ;;  %v4725_v34 = vld [vmem:[%s5607_s16 + $0x754] ss:$8 sps:$4 sm:$0xff]   ;;  %v4720_v35 = vld [vmem:[%s5607_s16 + $0x350] ss:$8 sps:$4 sm:$0xff]  }
 0x164   : > { %3478 = vmatpush1.bf16.msra.mxu1 %v4636_v36  ;;  %v4723_v36 = vld [vmem:[%s5607_s16 + $0x750] ss:$8 sps:$4 sm:$0xff]  }
 0x165   : > { %3642 = vmatpush1.bf16.msra.mxu0 %v4639_v37  ;;  %3479 = vmatprep.subr.bf16.mxu1 %v4644_v38  ;;  %v4728_v37 = vld [vmem:[%s5607_s16 + $0x364] ss:$8 sps:$4 sm:$0xff]  }
 0x166   : > { %3643 = vmatprep.subr.bf16.mxu0 %v4647_v39  ;;  %v4731_v38 = vld [vmem:[%s5607_s16 + $0x764] ss:$8 sps:$4 sm:$0xff]   ;;  %v4726_v39 = vld [vmem:[%s5607_s16 + $0x360] ss:$8 sps:$4 sm:$0xff]  }
 0x168   : > { %3480 = vmatpush1.bf16.msra.mxu1 %v4642_v40  ;;  %v4729_v40 = vld [vmem:[%s5607_s16 + $0x760] ss:$8 sps:$4 sm:$0xff]  }
 0x169   : > { %3644 = vmatpush1.bf16.msra.mxu0 %v4645_v41  ;;  %3481 = vmatprep.subr.bf16.mxu1 %v4650_v42  ;;  %v4734_v41 = vld [vmem:[%s5607_s16 + $0x374] ss:$8 sps:$4 sm:$0xff]  }
 0x16a   : > { %3645 = vmatprep.subr.bf16.mxu0 %v4653_v43  ;;  %v4737_v42 = vld [vmem:[%s5607_s16 + $0x774] ss:$8 sps:$4 sm:$0xff]   ;;  %v4732_v43 = vld [vmem:[%s5607_s16 + $0x370] ss:$8 sps:$4 sm:$0xff]  }
 0x16c   : > { %3482 = vmatpush1.bf16.msra.mxu1 %v4648_v44  ;;  %v4735_v44 = vld [vmem:[%s5607_s16 + $0x770] ss:$8 sps:$4 sm:$0xff]  }
 0x16d   : > { %3646 = vmatpush1.bf16.msra.mxu0 %v4651_v45  ;;  %3483 = vmatprep.subr.bf16.mxu1 %v4656_v46  ;;  %v4740_v45 = vld [vmem:[%s5607_s16 + $0x384] ss:$8 sps:$4 sm:$0xff]  }
 0x16e   : > { %3647 = vmatprep.subr.bf16.mxu0 %v4659_v47  ;;  %v4743_v46 = vld [vmem:[%s5607_s16 + $0x784] ss:$8 sps:$4 sm:$0xff]   ;;  %v4738_v47 = vld [vmem:[%s5607_s16 + $0x380] ss:$8 sps:$4 sm:$0xff]  }
 0x170   : > { %3484 = vmatpush1.bf16.msra.mxu1 %v4654_v48  ;;  %v4741_v48 = vld [vmem:[%s5607_s16 + $0x780] ss:$8 sps:$4 sm:$0xff]  }
 0x171   : > { %3648 = vmatpush1.bf16.msra.mxu0 %v4657_v49  ;;  %3485 = vmatprep.subr.bf16.mxu1 %v4662_v52  ;;  %v4746_v49 = vld [vmem:[%s5607_s16 + $0x394] ss:$8 sps:$4 sm:$0xff]  }
 0x172   : > { %3649 = vmatprep.subr.bf16.mxu0 %v4665_v53  ;;  %v4749_v52 = vld [vmem:[%s5607_s16 + $0x794] ss:$8 sps:$4 sm:$0xff]   ;;  %v4744_v53 = vld [vmem:[%s5607_s16 + $0x390] ss:$8 sps:$4 sm:$0xff]  }
 0x174   : > { %3486 = vmatpush1.bf16.msra.mxu1 %v4660_v54  ;;  %v4747_v54 = vld [vmem:[%s5607_s16 + $0x790] ss:$8 sps:$4 sm:$0xff]  }
 0x175   : > { %3650 = vmatpush1.bf16.msra.mxu0 %v4663_v55  ;;  %3487 = vmatprep.subr.bf16.mxu1 %v4668_v56  ;;  %v4752_v55 = vld [vmem:[%s5607_s16 + $0x3a4] ss:$8 sps:$4 sm:$0xff]  }
 0x176   : > { %3651 = vmatprep.subr.bf16.mxu0 %v4671_v57  ;;  %v4755_v56 = vld [vmem:[%s5607_s16 + $0x7a4] ss:$8 sps:$4 sm:$0xff]   ;;  %v4750_v57 = vld [vmem:[%s5607_s16 + $0x3a0] ss:$8 sps:$4 sm:$0xff]  }
 0x178   : > { %3488 = vmatpush1.bf16.msra.mxu1 %v4666_v58  ;;  %v4753_v58 = vld [vmem:[%s5607_s16 + $0x7a0] ss:$8 sps:$4 sm:$0xff]  }
 0x179   : > { %3652 = vmatpush1.bf16.msra.mxu0 %v4669_v22  ;;  %3489 = vmatprep.subr.bf16.mxu1 %v4674_v26  ;;  %v4758_v22 = vld [vmem:[%s5607_s16 + $0x3b4] ss:$8 sps:$4 sm:$0xff]  }
 0x17a   : > { %3653 = vmatprep.subr.bf16.mxu0 %v4677_v61  ;;  %v4761_v26 = vld [vmem:[%s5607_s16 + $0x7b4] ss:$8 sps:$4 sm:$0xff]   ;;  %v4756_v61 = vld [vmem:[%s5607_s16 + $0x3b0] ss:$8 sps:$4 sm:$0xff]  }
 0x17c   : > { %3490 = vmatpush1.bf16.msra.mxu1 %v4672_v62  ;;  %v4759_v62 = vld [vmem:[%s5607_s16 + $0x7b0] ss:$8 sps:$4 sm:$0xff]  }
 0x17d   : > { %3654 = vmatpush1.bf16.msra.mxu0 %v4675_v63  ;;  %3491 = vmatprep.subr.bf16.mxu1 %v4680_v0  ;;  %v4764_v63 = vld [vmem:[%s5607_s16 + $0x3c4] ss:$8 sps:$4 sm:$0xff]  }
 0x17e   : > { %3655 = vmatprep.subr.bf16.mxu0 %v4683_v1  ;;  %v4767_v0 = vld [vmem:[%s5607_s16 + $0x7c4] ss:$8 sps:$4 sm:$0xff]   ;;  %v4762_v1 = vld [vmem:[%s5607_s16 + $0x3c0] ss:$8 sps:$4 sm:$0xff]  }
 0x180   : > { %3492 = vmatpush1.bf16.msra.mxu1 %v4678_v2  ;;  %v4765_v2 = vld [vmem:[%s5607_s16 + $0x7c0] ss:$8 sps:$4 sm:$0xff]  }
 0x181   : > { %3656 = vmatpush1.bf16.msra.mxu0 %v4681_v3  ;;  %3493 = vmatprep.subr.bf16.mxu1 %v4686_v4  ;;  %v4770_v3 = vld [vmem:[%s5607_s16 + $0x3d4] ss:$8 sps:$4 sm:$0xff]  }
 0x182   : > { %3657 = vmatprep.subr.bf16.mxu0 %v4689_v5  ;;  %v4773_v4 = vld [vmem:[%s5607_s16 + $0x7d4] ss:$8 sps:$4 sm:$0xff]   ;;  %v4768_v5 = vld [vmem:[%s5607_s16 + $0x3d0] ss:$8 sps:$4 sm:$0xff]  }
 0x184   : > { %3494 = vmatpush1.bf16.msra.mxu1 %v4684_v6  ;;  %v4771_v6 = vld [vmem:[%s5607_s16 + $0x7d0] ss:$8 sps:$4 sm:$0xff]  }
 0x185   : > { %3658 = vmatpush1.bf16.msra.mxu0 %v4687_v51  ;;  %3504 = vmatprep.subr.bf16.mxu1 %v4692_v9  ;;  %v4776_v51 = vld [vmem:[%s5607_s16 + $0x3e4] ss:$8 sps:$4 sm:$0xff]  }
 0x186   : > { %3668 = vmatprep.subr.bf16.mxu0 %v4695_v10  ;;  %v4779_v9 = vld [vmem:[%s5607_s16 + $0x7e4] ss:$8 sps:$4 sm:$0xff]   ;;  %v4774_v10 = vld [vmem:[%s5607_s16 + $0x3e0] ss:$8 sps:$4 sm:$0xff]  }
 0x187   : > { %3496 = vmatmul.mubr.bf16.vlgmr.msra.gmra.mrb[0].mxu1 %v5858_v11 }
 0x188   : > { %3660 = vmatmul.mubr.bf16.vlgmr.msra.gmra.mrb[0].mxu0 %v5862_v12  ;;  %3505 = vmatpush1.bf16.msra.mxu1 %v4690_v14  ;;  %v4777_v14 = vld [vmem:[%s5607_s16 + $0x7e0] ss:$8 sps:$4 sm:$0xff]  }
 0x189   : > { %3669 = vmatpush1.bf16.msra.mxu0 %v4693_v15  ;;  %3506 = vmatprep.subr.bf16.mxu1 %v4698_v16  ;;  %v4782_v15 = vld [vmem:[%s5607_s16 + $0x3f4] ss:$8 sps:$4 sm:$0xff]  }
 0x18a   : > { %3670 = vmatprep.subr.bf16.mxu0 %v4701_v17  ;;  %3536 = vmatprep.mubr.bf16.mxu1 %v1851_v59  ;;  %v4785_v16 = vld [vmem:[%s5607_s16 + $0x7f4] ss:$8 sps:$4 sm:$0xff]   ;;  %v4780_v59 = vld [vmem:[%s5607_s16 + $0x3f0] ss:$8 sps:$4 sm:$0xff]  }
 0x18b   : > { %3700 = vmatprep.mubr.bf16.mxu0 %v1900_v18  ;;  %v5931_v17 = vld.sshfl [vmem:[%s5595_s8 + $0x10] sm:$0x11 pattern:$0x75316420]  ;;  %v4783_v18 = vld [vmem:[%s5607_s16 + $0x7f0] ss:$8 sps:$4 sm:$0xff]  }
 0x18c   : > { %3507 = vmatpush1.bf16.msra.mxu1 %v4696_v60  ;;  %v1908_v60 = vcombine.high %v5931_v17, %v5931_v17 }
 0x18d   : > { %3671 = vmatpush1.bf16.msra.mxu0 %v4699_v20  ;;  %3508 = vmatprep.subr.bf16.mxu1 %v4704_v7  ;;  %v4788_v20 = vld [vmem:[%s5607_s16 + $0x804] ss:$8 sps:$4 sm:$0xff]   ;;  %v1849_v7 = vcombine.high %v5858_v11, %v5858_v11  ;;  %v4789_v11 = vld [vmem:[%s5607_s16 + $0x810] ss:$8 sps:$4 sm:$0xff]  }
 0x18e   : > { %3672 = vmatprep.subr.bf16.mxu0 %v4707_v21  ;;  %v1898_v21 = vcombine.high %v5862_v12, %v5862_v12  ;;  %v4794_v12 = vld [vmem:[%s5607_s16 + $0x824] ss:$8 sps:$4 sm:$0xff]  }
 0x190   : > { %3509 = vmatpush1.bf16.msra.mxu1 %v4702_v50  ;;  %v4786_v50 = vld [vmem:[%s5607_s16 + $0x800] ss:$8 sps:$4 sm:$0xff]  }
 0x191   : > { %3673 = vmatpush1.bf16.msra.mxu0 %v4705_v23  ;;  %3510 = vmatprep.subr.bf16.mxu1 %v4710_v24  ;;  %v1922_v23 = vrot.slane %v1908_v60, %v5658_v19  ;;  %v4791_v24 = vld [vmem:[%s5607_s16 + $0x814] ss:$8 sps:$4 sm:$0xff]   ;;  %v3820_v60 = vld [vmem:[%s5605_s27] sm:$0x3] (!%p4287_p1) }
 0x192   : > { %3674 = vmatprep.subr.bf16.mxu0 %v4713_v25  ;;  %v4792_v25 = vld [vmem:[%s5607_s16 + $0x820] ss:$8 sps:$4 sm:$0xff]  }
 0x194   : > { %3511 = vmatpush1.bf16.msra.mxu1 %v4708_v27  ;;  %v4797_v27 = vld [vmem:[%s5607_s16 + $0x834] ss:$8 sps:$4 sm:$0xff]  }
 0x195   : > { %3675 = vmatpush1.bf16.msra.mxu0 %v4711_v28  ;;  %3512 = vmatprep.subr.bf16.mxu1 %v4716_v29  ;;  %v4795_v28 = vld [vmem:[%s5607_s16 + $0x830] ss:$8 sps:$4 sm:$0xff]   ;;  %v4800_v29 = vld [vmem:[%s5607_s16 + $0x844] ss:$8 sps:$4 sm:$0xff]  }
 0x196   : > { %3676 = vmatprep.subr.bf16.mxu0 %v4719_v30  ;;  %v4798_v30 = vld [vmem:[%s5607_s16 + $0x840] ss:$8 sps:$4 sm:$0xff]  }
 0x198   : > { %3513 = vmatpush1.bf16.msra.mxu1 %v4714_v31  ;;  %v4803_v31 = vld [vmem:[%s5607_s16 + $0x854] ss:$8 sps:$4 sm:$0xff]  }
 0x199   : > { %3677 = vmatpush1.bf16.msra.mxu0 %v4717_v32  ;;  %3514 = vmatprep.subr.bf16.mxu1 %v4722_v33  ;;  %v4801_v32 = vld [vmem:[%s5607_s16 + $0x850] ss:$8 sps:$4 sm:$0xff]   ;;  %v4806_v33 = vld [vmem:[%s5607_s16 + $0x864] ss:$8 sps:$4 sm:$0xff]  }
 0x19a   : > { %3678 = vmatprep.subr.bf16.mxu0 %v4725_v34  ;;  %v4804_v34 = vld [vmem:[%s5607_s16 + $0x860] ss:$8 sps:$4 sm:$0xff]  }
 0x19c   : > { %3515 = vmatpush1.bf16.msra.mxu1 %v4720_v35  ;;  %v4809_v35 = vld [vmem:[%s5607_s16 + $0x874] ss:$8 sps:$4 sm:$0xff]  }
 0x19d   : > { %3679 = vmatpush1.bf16.msra.mxu0 %v4723_v36  ;;  %3516 = vmatprep.subr.bf16.mxu1 %v4728_v37  ;;  %v4807_v36 = vld [vmem:[%s5607_s16 + $0x870] ss:$8 sps:$4 sm:$0xff]   ;;  %v4812_v37 = vld [vmem:[%s5607_s16 + $0x884] ss:$8 sps:$4 sm:$0xff]  }
 0x19e   : > { %3680 = vmatprep.subr.bf16.mxu0 %v4731_v38  ;;  %v4810_v38 = vld [vmem:[%s5607_s16 + $0x880] ss:$8 sps:$4 sm:$0xff]  }
 0x1a0   : > { %3517 = vmatpush1.bf16.msra.mxu1 %v4726_v39  ;;  %v4815_v39 = vld [vmem:[%s5607_s16 + $0x894] ss:$8 sps:$4 sm:$0xff]  }
 0x1a1   : > { %3681 = vmatpush1.bf16.msra.mxu0 %v4729_v40  ;;  %3518 = vmatprep.subr.bf16.mxu1 %v4734_v41  ;;  %v4813_v40 = vld [vmem:[%s5607_s16 + $0x890] ss:$8 sps:$4 sm:$0xff]   ;;  %v4818_v41 = vld [vmem:[%s5607_s16 + $0x8a4] ss:$8 sps:$4 sm:$0xff]  }
 0x1a2   : > { %3682 = vmatprep.subr.bf16.mxu0 %v4737_v42  ;;  %v4816_v42 = vld [vmem:[%s5607_s16 + $0x8a0] ss:$8 sps:$4 sm:$0xff]  }
 0x1a4   : > { %3519 = vmatpush1.bf16.msra.mxu1 %v4732_v43  ;;  %v4821_v43 = vld [vmem:[%s5607_s16 + $0x8b4] ss:$8 sps:$4 sm:$0xff]  }
 0x1a5   : > { %3683 = vmatpush1.bf16.msra.mxu0 %v4735_v44  ;;  %3520 = vmatprep.subr.bf16.mxu1 %v4740_v45  ;;  %v4819_v44 = vld [vmem:[%s5607_s16 + $0x8b0] ss:$8 sps:$4 sm:$0xff]   ;;  %v4824_v45 = vld [vmem:[%s5607_s16 + $0x8c4] ss:$8 sps:$4 sm:$0xff]  }
 0x1a6   : > { %3684 = vmatprep.subr.bf16.mxu0 %v4743_v46  ;;  %v4822_v46 = vld [vmem:[%s5607_s16 + $0x8c0] ss:$8 sps:$4 sm:$0xff]  }
 0x1a8   : > { %3521 = vmatpush1.bf16.msra.mxu1 %v4738_v47  ;;  %v4827_v47 = vld [vmem:[%s5607_s16 + $0x8d4] ss:$8 sps:$4 sm:$0xff]  }
 0x1a9   : > { %3685 = vmatpush1.bf16.msra.mxu0 %v4741_v48  ;;  %3522 = vmatprep.subr.bf16.mxu1 %v4746_v49  ;;  %v4825_v48 = vld [vmem:[%s5607_s16 + $0x8d0] ss:$8 sps:$4 sm:$0xff]   ;;  %v4830_v49 = vld [vmem:[%s5607_s16 + $0x8e4] ss:$8 sps:$4 sm:$0xff]  }
 0x1aa   : > { %3686 = vmatprep.subr.bf16.mxu0 %v4749_v52  ;;  %v4828_v52 = vld [vmem:[%s5607_s16 + $0x8e0] ss:$8 sps:$4 sm:$0xff]  }
 0x1ac   : > { %3523 = vmatpush1.bf16.msra.mxu1 %v4744_v53  ;;  %v4833_v53 = vld [vmem:[%s5607_s16 + $0x8f4] ss:$8 sps:$4 sm:$0xff]  }
 0x1ad   : > { %3687 = vmatpush1.bf16.msra.mxu0 %v4747_v54  ;;  %3524 = vmatprep.subr.bf16.mxu1 %v4752_v55  ;;  %v4831_v54 = vld [vmem:[%s5607_s16 + $0x8f0] ss:$8 sps:$4 sm:$0xff]   ;;  %v1915_v55 = vrot.slane %v5931_v17, %v5658_v19 }
 0x1ae   : > { %3688 = vmatprep.subr.bf16.mxu0 %v4755_v56 }
 0x1b0   : > { %3525 = vmatpush1.bf16.msra.mxu1 %v4750_v57 }
 0x1b1   : > { %3689 = vmatpush1.bf16.msra.mxu0 %v4753_v58  ;;  %3526 = vmatprep.subr.bf16.mxu1 %v4758_v22 }
 0x1b2   : > { %3690 = vmatprep.subr.bf16.mxu0 %v4761_v26 }
 0x1b4   : > { %3527 = vmatpush1.bf16.msra.mxu1 %v4756_v61 }
 0x1b5   : > { %3691 = vmatpush1.bf16.msra.mxu0 %v4759_v62  ;;  %3528 = vmatprep.subr.bf16.mxu1 %v4764_v63 }
 0x1b6   : > { %3692 = vmatprep.subr.bf16.mxu0 %v4767_v0 }
 0x1b8   : > { %3529 = vmatpush1.bf16.msra.mxu1 %v4762_v1 }
 0x1b9   : > { %3693 = vmatpush1.bf16.msra.mxu0 %v4765_v2  ;;  %3530 = vmatprep.subr.bf16.mxu1 %v4770_v3 }
 0x1ba   : > { %3694 = vmatprep.subr.bf16.mxu0 %v4773_v4  ;;  %v1508_v4 = vld [vmem:[#allocation2] sm:$0x3] }
 0x1bc   : > { %3531 = vmatpush1.bf16.msra.mxu1 %v4768_v5 }
 0x1bd   : > { %3695 = vmatpush1.bf16.msra.mxu0 %v4771_v6  ;;  %3532 = vmatprep.subr.bf16.mxu1 %v4776_v51 }
 0x1be   : > { %3696 = vmatprep.subr.bf16.mxu0 %v4779_v9  ;;  %v3779_v9 = vld [vmem:[%s1480_s10] sm:$0x3] (!%p4287_p1) }
 0x1c0   : > { %3533 = vmatpush1.bf16.msra.mxu1 %v4774_v10 }
 0x1c1   : > { %3697 = vmatpush1.bf16.msra.mxu0 %v4777_v14  ;;  %3534 = vmatprep.subr.bf16.mxu1 %v4782_v15  ;;  %v3785_v14 = vsub.s32 (!%p4287_p1), 0, %v5650_v13  ;;  %v3789_v15 = vsub.s32 (!%p4287_p1), 1, %v5650_v13 }
 0x1c2   : > { %3698 = vmatprep.subr.bf16.mxu0 %v4785_v16 }
 0x1c4   : > { %3535 = vmatpush1.bf16.msra.mxu1 %v4780_v59 }
 0x1c5   : > { %3699 = vmatpush1.bf16.msra.mxu0 %v4783_v18 }
 0x1c6   : > { %3709 = vmatprep.subr.bf16.mxu0 %v4788_v20 }
 0x1c7   : > { %3537 = vmatmul.mubr.bf16.vlgmr.msra.gmra.mrb[0].mxu1 %v1849_v7 }
 0x1c8   : > { %3701 = vmatmul.mubr.bf16.vlgmr.msra.gmra.mrb[0].mxu0 %v1898_v21 }
 0x1c9   : > { %3710 = vmatpush1.bf16.msra.mxu0 %v4786_v50  ;;  %3741 = vmatprep.mubr.bf16.mxu0 %v1922_v23 }
 0x1ca   : > { %3711 = vmatprep.subr.bf16.mxu0 %v4791_v24 }
 0x1cd   : > { %3712 = vmatpush1.bf16.msra.mxu0 %v4789_v11 }
 0x1ce   : > { %3713 = vmatprep.subr.bf16.mxu0 %v4794_v12 }
 0x1d1   : > { %3714 = vmatpush1.bf16.msra.mxu0 %v4792_v25 }
 0x1d2   : > { %3715 = vmatprep.subr.bf16.mxu0 %v4797_v27 }
 0x1d5   : > { %3716 = vmatpush1.bf16.msra.mxu0 %v4795_v28 }
 0x1d6   : > { %3717 = vmatprep.subr.bf16.mxu0 %v4800_v29 }
 0x1d9   : > { %3718 = vmatpush1.bf16.msra.mxu0 %v4798_v30 }
 0x1da   : > { %3719 = vmatprep.subr.bf16.mxu0 %v4803_v31 }
 0x1dd   : > { %3720 = vmatpush1.bf16.msra.mxu0 %v4801_v32 }
 0x1de   : > { %3721 = vmatprep.subr.bf16.mxu0 %v4806_v33 }
 0x1e1   : > { %3722 = vmatpush1.bf16.msra.mxu0 %v4804_v34 }
 0x1e2   : > { %3723 = vmatprep.subr.bf16.mxu0 %v4809_v35 }
 0x1e5   : > { %3724 = vmatpush1.bf16.msra.mxu0 %v4807_v36 }
 0x1e6   : > { %3725 = vmatprep.subr.bf16.mxu0 %v4812_v37 }
 0x1e9   : > { %3726 = vmatpush1.bf16.msra.mxu0 %v4810_v38 }
 0x1ea   : > { %3727 = vmatprep.subr.bf16.mxu0 %v4815_v39 }
 0x1ed   : > { %3728 = vmatpush1.bf16.msra.mxu0 %v4813_v40 }
 0x1ee   : > { %3729 = vmatprep.subr.bf16.mxu0 %v4818_v41 }
 0x1f1   : > { %3730 = vmatpush1.bf16.msra.mxu0 %v4816_v42 }
 0x1f2   : > { %3731 = vmatprep.subr.bf16.mxu0 %v4821_v43 }
 0x1f5   : > { %3732 = vmatpush1.bf16.msra.mxu0 %v4819_v44 }
 0x1f6   : > { %3733 = vmatprep.subr.bf16.mxu0 %v4824_v45 }
 0x1f9   : > { %3734 = vmatpush1.bf16.msra.mxu0 %v4822_v46 }
 0x1fa   : > { %3735 = vmatprep.subr.bf16.mxu0 %v4827_v47 }
 0x1fd   : > { %3736 = vmatpush1.bf16.msra.mxu0 %v4825_v48 }
 0x1fe   : > { %3737 = vmatprep.subr.bf16.mxu0 %v4830_v49 }
 0x201   : > { %3738 = vmatpush1.bf16.msra.mxu0 %v4828_v52 }
 0x202   : > { %3739 = vmatprep.subr.bf16.mxu0 %v4833_v53 }
 0x205   : > { %3740 = vmatpush1.bf16.msra.mxu0 %v4831_v54 }
 0x208   : > { %3742 = vmatmul.mubr.bf16.vlgmr.msra.gmra.mrb[0].mxu0 %v1915_v55 }
 0x29a   : > { %v3538_v56 = vpop.f32.mrb[0].mxu1 }
 0x29b   : > { %v3540_v57 = vpop.f32.mrb[1].mxu1 }
 0x29c   : > { %v3542_v58 = vpop.f32.mrb[2].mxu1 }
 0x29d   : > { %v3543_v22 = vpop.f32.mrb[3].mxu1 }
 0x2db   : > { %v3743_v26 = vpop.f32.mrb[0].mxu0 }
 0x2dc   : > { %v4291_v61 = vadd.f32 %v3743_v26, %v3538_v56  ;;  %v3745_v62 = vpop.f32.mrb[1].mxu0 }
 0x2dd   : > { %v4292_v63 = vadd.f32 %v3745_v62, %v3540_v57  ;;  %v3747_v0 = vpop.f32.mrb[2].mxu0 }
 0x2de   : > { %v3748_v1 = vpop.f32.mrb[3].mxu0 }
 0x2df   : > { %v3752_v2 = vcombine.low %v4291_v61, %v4292_v63 }
 0x2e1   : > { %v3759_v3 = vrot.slane %v3752_v2, %v5658_v19  ;;  %3777 = sbr.rel (%p4287_p1) target bundleno = 765 (0x2fd), region = 78 }
 0x2e3   : > { %v3766_v5 = vrot.slane %v3759_v3, %v5658_v19 }
 0x2e5   : > { %v3768_v6 = vadd.f32 %v3766_v5, %v1508_v4 }
 0x2e7   : > { %3773 = vst.msk [vmem:[#allocation2] sm:$0x3] %vm3771_vm1, %v3768_v6 }
 0x2ee   : > { %v3778_v51 = vld [vmem:[#allocation2] sm:$0x3] }
 0x2ef   : > { %v3780_v10 = vadd.f32 %v3779_v9, %v3778_v51 }
 0x2f1   : > { %v3781_v8 = vmax.f32 %v3780_v10, 0.0 }
 0x2f3   : > { %v3786_v16 = vrot.slane %v3781_v8, %v3785_v14  ;;  %v3790_v17 = vrot.slane %v3781_v8, %v3789_v15 }
 0x2f5   : > { %v4288_v59 = vpack.c.bf16 %v3790_v17, %v3786_v16 }
 0x2f7   : > { %v3804_v18 = vrot.slane %v4288_v59, %v5658_v19 }
 0x2f9   : > { %v3811_v20 = vrot.slane %v3804_v18, %v5658_v19 }
 0x2fb   : > { %v3821_v7 = vsel %vm3819_vm8, %v3811_v20, %v3820_v60 }
 0x2fc   : > { %3822 = vst [vmem:[%s5605_s27] sm:$0x3] %v3821_v7 }
 0x2fd PF: > { %s13_s20 = sadd.s32 1, %s4904_s20   ;;  %s6022_s12 = smov %s4876_s13 }
 0x2fe   : > { %p10_p2 = scmp.ge.s32.totalorder %s13_s20, 14   ;;  %s6023_s13 = smov %s4993_s28 }
 0x2ff   : > { %s6024_s14 = smov %s4892_s17  ;;  %s6025_s15 = smov %s4896_s18 }
 0x300   : > { %s6026_s16 = smov %s4900_s19  ;;  %s6027_s17 = smov %s6031_s21 }
 0x301   : > { %s6028_s18 = smov %s6035_s22  ;;  %s6029_s19 = smov %s6039_s23 }
 0x302   :  { %12 = sbr.rel (!%p10_p2) target bundleno = 5 (0x5), region = 119 }

// kernel: medicalnet_encoder_forward.28
= control target key start
LH: loop header
LB: loop body
LE: loop exit
PB: predicated region body
PF: predicated region fallthrough
CT: control target
= control target key end

     0   :  { %s985_s12 = smov 0   ;;  %s987_s13 = smov 0   ;;  %s1173_s0 = inlined_call_operand.vmem [shape: bf16[2,256], index: 0, kind: input, shape index: {}]   ;;  %s1174_s1 = inlined_call_operand.vmem [shape: bf16[256,512], index: 1, kind: input, shape index: {}]   ;;  %s1175_s2 = inlined_call_operand.vmem [shape: f32[1,512], index: 2, kind: input, shape index: {}]   ;;  %s1176_s3 = inlined_call_operand.vmem [shape: bf16[2,512], index: 3, kind: output, shape index: {}]  }
   0x1   :  { %s989_s14 = smov 0   ;;  %s991_s15 = smov 0  }
   0x2   :  { %s993_s16 = smov 0  }
   0x3 LB: > { %s22_s17 = sadd.s32 1, %s958_s15  ;;  %p65_p1 = scmp.ne.s32.totalorder %s950_s13, %s946_s12  ;;  %s962_s16 = sphi %s993_s16, %s13_s16   ;;  %s958_s15 = sphi %s991_s15, %s1180_s15   ;;  %s954_s14 = sphi %s989_s14, %s1179_s14   ;;  %s950_s13 = sphi %s987_s13, %s1178_s13   ;;  %s946_s12 = sphi %s985_s12, %s1177_s12  }
   0x4   : > { %p23_p0 = scmp.ge.s32.totalorder %s22_s17, 2  ;;  %p66_p2 = scmp.eq.s32.totalorder %s962_s16, 0 }
   0x5   : > { %s58_s19 = sadd.s32 1, %s950_s13  ;;  %p789_p5 = scmp.ge.s32.totalorder %s962_s16, 2 }
   0x6   : > { %s1182_s17 = smov (%p23_p0, %s22_s17), 0  ;;  %p67_p3 = por %p66_p2, %p65_p1 }
   0x7   : > { %s55_s18 = ssub.s32 %s958_s15, %s1182_s17  ;;  %152 = sbr.rel (%p789_p5) target bundleno = 34 (0x22), region = 20 }
   0x8   : > { %p56_p4 = scmp.eq.s32.totalorder %s55_s18, 0 }
   0xa   : > { %s1020_s20 = scalar_select %p56_p4, %s950_s13, %s58_s19  }
   0xe   : > { %155 = sbr.rel (!%p67_p3) target bundleno = 34 (0x22), region = 24  ;;  %s157_s21 = sand.u32 (%p67_p3), 1, %s950_s13  }
   0xf   : > { %s834_s22 = sshll.u32 (%p67_p3), %s958_s15, 3  ;;  %s790_s23 = sshll.u32 (%p67_p3), %s157_s21, 8 }
  0x10   : > { %s1028_s26 = scalar_lea.vmem (%p67_p3), %s1174_s1, %s834_s22  ;;  %s1033_s27 = scalar_lea.vmem (%p67_p3), [#allocation2], %s790_s23 }
  0x11   : > { %v252_v0 = vld [vmem:[%s1028_s26] sm:$0xff] (%p67_p3)  ;;  %v254_v1 = vld [vmem:[%s1028_s26 + $0x10] sm:$0xff] (%p67_p3) }
  0x12   : > { %v256_v2 = vld [vmem:[%s1028_s26 + $0x20] sm:$0xff] (%p67_p3)  ;;  %253 = vst [vmem:[%s1033_s27] sm:$0xff] (%p67_p3), %v252_v0  ;;  %255 = vst [vmem:[%s1033_s27 + $0x8] sm:$0xff] (%p67_p3), %v254_v1  ;;  %v258_v3 = vld [vmem:[%s1028_s26 + $0x30] sm:$0xff] (%p67_p3) }
  0x13   : > { %257 = vst [vmem:[%s1033_s27 + $0x10] sm:$0xff] (%p67_p3), %v256_v2  ;;  %v260_v4 = vld [vmem:[%s1028_s26 + $0x40] sm:$0xff] (%p67_p3)  ;;  %v262_v5 = vld [vmem:[%s1028_s26 + $0x50] sm:$0xff] (%p67_p3)  ;;  %259 = vst [vmem:[%s1033_s27 + $0x18] sm:$0xff] (%p67_p3), %v258_v3 }
  0x14   : > { %261 = vst [vmem:[%s1033_s27 + $0x20] sm:$0xff] (%p67_p3), %v260_v4  ;;  %263 = vst [vmem:[%s1033_s27 + $0x28] sm:$0xff] (%p67_p3), %v262_v5  ;;  %v264_v6 = vld [vmem:[%s1028_s26 + $0x60] sm:$0xff] (%p67_p3)  ;;  %v266_v7 = vld [vmem:[%s1028_s26 + $0x70] sm:$0xff] (%p67_p3) }
  0x15   : > { %v268_v8 = vld [vmem:[%s1028_s26 + $0x80] sm:$0xff]  ;;  %265 = vst [vmem:[%s1033_s27 + $0x30] sm:$0xff] %v264_v6  ;;  %267 = vst [vmem:[%s1033_s27 + $0x38] sm:$0xff] %v266_v7  ;;  %v270_v9 = vld [vmem:[%s1028_s26 + $0x90] sm:$0xff] }
  0x16   : > { %269 = vst [vmem:[%s1033_s27 + $0x40] sm:$0xff] %v268_v8  ;;  %v272_v10 = vld [vmem:[%s1028_s26 + $0xa0] sm:$0xff]  ;;  %v274_v11 = vld [vmem:[%s1028_s26 + $0xb0] sm:$0xff]  ;;  %271 = vst [vmem:[%s1033_s27 + $0x48] sm:$0xff] %v270_v9 }
  0x17   : > { %273 = vst [vmem:[%s1033_s27 + $0x50] sm:$0xff] %v272_v10  ;;  %275 = vst [vmem:[%s1033_s27 + $0x58] sm:$0xff] %v274_v11  ;;  %v276_v12 = vld [vmem:[%s1028_s26 + $0xc0] sm:$0xff]  ;;  %v278_v13 = vld [vmem:[%s1028_s26 + $0xd0] sm:$0xff] }
  0x18   : > { %v280_v14 = vld [vmem:[%s1028_s26 + $0xe0] sm:$0xff]  ;;  %277 = vst [vmem:[%s1033_s27 + $0x60] sm:$0xff] %v276_v12  ;;  %279 = vst [vmem:[%s1033_s27 + $0x68] sm:$0xff] %v278_v13  ;;  %v282_v15 = vld [vmem:[%s1028_s26 + $0xf0] sm:$0xff] }
  0x19   : > { %281 = vst [vmem:[%s1033_s27 + $0x70] sm:$0xff] %v280_v14  ;;  %v284_v16 = vld [vmem:[%s1028_s26 + $0x100] sm:$0xff]  ;;  %v286_v17 = vld [vmem:[%s1028_s26 + $0x110] sm:$0xff]  ;;  %283 = vst [vmem:[%s1033_s27 + $0x78] sm:$0xff] %v282_v15 }
  0x1a   : > { %285 = vst [vmem:[%s1033_s27 + $0x80] sm:$0xff] %v284_v16  ;;  %287 = vst [vmem:[%s1033_s27 + $0x88] sm:$0xff] %v286_v17  ;;  %v288_v18 = vld [vmem:[%s1028_s26 + $0x120] sm:$0xff]  ;;  %v290_v19 = vld [vmem:[%s1028_s26 + $0x130] sm:$0xff] }
  0x1b   : > { %v292_v20 = vld [vmem:[%s1028_s26 + $0x140] sm:$0xff]  ;;  %289 = vst [vmem:[%s1033_s27 + $0x90] sm:$0xff] %v288_v18  ;;  %291 = vst [vmem:[%s1033_s27 + $0x98] sm:$0xff] %v290_v19  ;;  %v294_v21 = vld [vmem:[%s1028_s26 + $0x150] sm:$0xff] }
  0x1c   : > { %293 = vst [vmem:[%s1033_s27 + $0xa0] sm:$0xff] %v292_v20  ;;  %v296_v22 = vld [vmem:[%s1028_s26 + $0x160] sm:$0xff]  ;;  %v298_v23 = vld [vmem:[%s1028_s26 + $0x170] sm:$0xff]  ;;  %295 = vst [vmem:[%s1033_s27 + $0xa8] sm:$0xff] %v294_v21 }
  0x1d   : > { %297 = vst [vmem:[%s1033_s27 + $0xb0] sm:$0xff] %v296_v22  ;;  %299 = vst [vmem:[%s1033_s27 + $0xb8] sm:$0xff] %v298_v23  ;;  %v300_v24 = vld [vmem:[%s1028_s26 + $0x180] sm:$0xff]  ;;  %v302_v25 = vld [vmem:[%s1028_s26 + $0x190] sm:$0xff] }
  0x1e   : > { %v304_v26 = vld [vmem:[%s1028_s26 + $0x1a0] sm:$0xff]  ;;  %301 = vst [vmem:[%s1033_s27 + $0xc0] sm:$0xff] %v300_v24  ;;  %303 = vst [vmem:[%s1033_s27 + $0xc8] sm:$0xff] %v302_v25  ;;  %v306_v27 = vld [vmem:[%s1028_s26 + $0x1b0] sm:$0xff] }
  0x1f   : > { %305 = vst [vmem:[%s1033_s27 + $0xd0] sm:$0xff] %v304_v26  ;;  %v308_v28 = vld [vmem:[%s1028_s26 + $0x1c0] sm:$0xff]  ;;  %v310_v29 = vld [vmem:[%s1028_s26 + $0x1d0] sm:$0xff]  ;;  %307 = vst [vmem:[%s1033_s27 + $0xd8] sm:$0xff] %v306_v27 }
  0x20   : > { %309 = vst [vmem:[%s1033_s27 + $0xe0] sm:$0xff] %v308_v28  ;;  %311 = vst [vmem:[%s1033_s27 + $0xe8] sm:$0xff] %v310_v29  ;;  %v312_v30 = vld [vmem:[%s1028_s26 + $0x1e0] sm:$0xff]  ;;  %v314_v31 = vld [vmem:[%s1028_s26 + $0x1f0] sm:$0xff] }
  0x21   : > { %313 = vst [vmem:[%s1033_s27 + $0xf0] sm:$0xff] %v312_v30  ;;  %315 = vst [vmem:[%s1033_s27 + $0xf8] sm:$0xff] %v314_v31 }
  0x22 PF: > { %p793_p6 = scmp.ge.s32.totalorder %s962_s16, 1  ;;  %p328_p7 = scmp.lt.s32.totalorder %s962_s16, 3 }
  0x24   : > { %p329_p8 = pnand %p793_p6, %p328_p7 }
  0x25   : > { %s335_s28 = sand.u32 (!%p329_p8), 1, %s946_s12   ;;  %v1102_v32 = vld.sshfl [vmem:[%s1173_s0] sm:$0x11 pattern:$0x75316420] (!%p329_p8)  ;;  %v423_v33 = vlaneseq (!%p329_p8)  ;;  %s795_s6 = sshll.u32 (!%p329_p8), %s954_s14, 1 }
  0x26   : > { %332 = sbr.rel (%p329_p8) target bundleno = 325 (0x145), region = 66  ;;  %s794_s4 = sshll.u32 (!%p329_p8), %s335_s28, 8  ;;  %v964_v35 = vmov (!%p329_p8), 1966171168   ;;  %v441_v39 = vcombine.high (!%p329_p8), %v1102_v32, %v1102_v32 }
  0x27   : > { %v1104_v34 = vshrl.u32 (!%p329_p8), %v423_v33, 7  ;;  %v443_v36 = vunpack.c.l.s4 (!%p329_p8), %v964_v35  ;;  %s1106_s5 = scalar_lea.vmem (!%p329_p8), [#allocation2], %s794_s4  ;;  %p375_p9 = scmp.lt.s32.totalorder (!%p329_p8), %s795_s6, 3 }
  0x28   : > { %v876_v37 = vld [vmem:[%s1106_s5 + $0x4] ss:$8 sps:$4 sm:$0xff] (!%p329_p8)   ;;  %v878_v38 = vld [vmem:[%s1106_s5] ss:$8 sps:$4 sm:$0xff] (!%p329_p8)   ;;  %v879_v41 = vld [vmem:[%s1106_s5 + $0x14] ss:$8 sps:$4 sm:$0xff] (!%p329_p8)  }
  0x29   : > { %v444_v40 = vunpack.c.0.s8 (!%p329_p8), %v443_v36  ;;  %618 = vmatprep.subr.bf16.mxu0 (!%p329_p8), %v876_v37  ;;  %v881_v42 = vld [vmem:[%s1106_s5 + $0x10] ss:$8 sps:$4 sm:$0xff] (!%p329_p8)   ;;  %v882_v44 = vld [vmem:[%s1106_s5 + $0x24] ss:$8 sps:$4 sm:$0xff] (!%p329_p8)   ;;  %v884_v46 = vld [vmem:[%s1106_s5 + $0x20] ss:$8 sps:$4 sm:$0xff] (!%p329_p8)  }
  0x2a   : > { %619 = vmatpush1.bf16.msra.mxu0 (!%p329_p8), %v878_v38  ;;  %v885_v47 = vld [vmem:[%s1106_s5 + $0x34] ss:$8 sps:$4 sm:$0xff] (!%p329_p8)   ;;  %v887_v48 = vld [vmem:[%s1106_s5 + $0x30] ss:$8 sps:$4 sm:$0xff] (!%p329_p8)   ;;  %v888_v49 = vld [vmem:[%s1106_s5 + $0x44] ss:$8 sps:$4 sm:$0xff] (!%p329_p8)  }
  0x2b   : > { %v1115_v43 = vsub.s32 (!%p329_p8), %v444_v40, %v1104_v34  ;;  %620 = vmatprep.subr.bf16.mxu0 (!%p329_p8), %v879_v41  ;;  %v890_v50 = vld [vmem:[%s1106_s5 + $0x40] ss:$8 sps:$4 sm:$0xff] (!%p329_p8)   ;;  %v891_v51 = vld [vmem:[%s1106_s5 + $0x54] ss:$8 sps:$4 sm:$0xff] (!%p329_p8)   ;;  %v893_v52 = vld [vmem:[%s1106_s5 + $0x50] ss:$8 sps:$4 sm:$0xff] (!%p329_p8)  }
  0x2c   : > { %v894_v53 = vld [vmem:[%s1106_s5 + $0x64] ss:$8 sps:$4 sm:$0xff] (!%p329_p8)   ;;  %v896_v54 = vld [vmem:[%s1106_s5 + $0x60] ss:$8 sps:$4 sm:$0xff] (!%p329_p8)   ;;  %v897_v55 = vld [vmem:[%s1106_s5 + $0x74] ss:$8 sps:$4 sm:$0xff] (!%p329_p8)  }
  0x2d   : > { %v455_v45 = vrot.slane %v441_v39, %v1115_v43  ;;  %v899_v56 = vld [vmem:[%s1106_s5 + $0x70] ss:$8 sps:$4 sm:$0xff]   ;;  %v900_v57 = vld [vmem:[%s1106_s5 + $0x84] ss:$8 sps:$4 sm:$0xff]   ;;  %v902_v58 = vld [vmem:[%s1106_s5 + $0x80] ss:$8 sps:$4 sm:$0xff]   ;;  %v448_v9 = vrot.slane %v1102_v32, %v1115_v43 }
  0x2e   : > { %621 = vmatpush1.bf16.msra.mxu0 %v881_v42  ;;  %v903_v59 = vld [vmem:[%s1106_s5 + $0x94] ss:$8 sps:$4 sm:$0xff]   ;;  %v905_v60 = vld [vmem:[%s1106_s5 + $0x90] ss:$8 sps:$4 sm:$0xff]   ;;  %v906_v61 = vld [vmem:[%s1106_s5 + $0xa4] ss:$8 sps:$4 sm:$0xff]  }
  0x2f   : > { %650 = vmatprep.mubr.bf16.mxu0 %v455_v45  ;;  %622 = vmatprep.subr.bf16.mxu0 %v882_v44  ;;  %v908_v62 = vld [vmem:[%s1106_s5 + $0xa0] ss:$8 sps:$4 sm:$0xff]   ;;  %v909_v63 = vld [vmem:[%s1106_s5 + $0xb4] ss:$8 sps:$4 sm:$0xff]   ;;  %v911_v0 = vld [vmem:[%s1106_s5 + $0xb0] ss:$8 sps:$4 sm:$0xff]  }
  0x30   : > { %v912_v1 = vld [vmem:[%s1106_s5 + $0xc4] ss:$8 sps:$4 sm:$0xff]   ;;  %v914_v2 = vld [vmem:[%s1106_s5 + $0xc0] ss:$8 sps:$4 sm:$0xff]   ;;  %v915_v3 = vld [vmem:[%s1106_s5 + $0xd4] ss:$8 sps:$4 sm:$0xff]  }
  0x31   : > { %v917_v4 = vld [vmem:[%s1106_s5 + $0xd0] ss:$8 sps:$4 sm:$0xff]   ;;  %v918_v5 = vld [vmem:[%s1106_s5 + $0xe4] ss:$8 sps:$4 sm:$0xff]   ;;  %v920_v6 = vld [vmem:[%s1106_s5 + $0xe0] ss:$8 sps:$4 sm:$0xff]  }
  0x32   : > { %623 = vmatpush1.bf16.msra.mxu0 %v884_v46  ;;  %v921_v7 = vld [vmem:[%s1106_s5 + $0xf4] ss:$8 sps:$4 sm:$0xff]   ;;  %v923_v8 = vld [vmem:[%s1106_s5 + $0xf0] ss:$8 sps:$4 sm:$0xff]   ;;  %s1184_s6 = smov (!%p375_p9, %s795_s6), 3  ;;  %v425_v10 = vsub.s32 0, %v1104_v34 }
  0x33   : > { %624 = vmatprep.subr.bf16.mxu0 %v885_v47  ;;  %s377_s9 = scalar_lea.vmem %s1175_s2, %s1184_s6  ;;  %v429_v12 = vsub.s32 1, %v1104_v34  ;;  %s386_s12 = scalar_lea.vmem %s1176_s3, %s1184_s6 }
  0x34   : > { %v421_v11 = vld [vmem:[%s377_s9] sm:$0x3] }
  0x35   : > { %v426_v13 = vrot.slane %v421_v11, %v425_v10  ;;  %v430_v14 = vrot.slane %v421_v11, %v429_v12 }
  0x36   : > { %625 = vmatpush1.bf16.msra.mxu0 %v887_v48 }
  0x37   : > { %626 = vmatprep.subr.bf16.mxu0 %v888_v49 }
  0x3a   : > { %627 = vmatpush1.bf16.msra.mxu0 %v890_v50 }
  0x3b   : > { %628 = vmatprep.subr.bf16.mxu0 %v891_v51 }
  0x3e   : > { %629 = vmatpush1.bf16.msra.mxu0 %v893_v52 }
  0x3f   : > { %630 = vmatprep.subr.bf16.mxu0 %v894_v53 }
  0x42   : > { %631 = vmatpush1.bf16.msra.mxu0 %v896_v54 }
  0x43   : > { %632 = vmatprep.subr.bf16.mxu0 %v897_v55 }
  0x46   : > { %633 = vmatpush1.bf16.msra.mxu0 %v899_v56 }
  0x47   : > { %634 = vmatprep.subr.bf16.mxu0 %v900_v57 }
  0x4a   : > { %635 = vmatpush1.bf16.msra.mxu0 %v902_v58 }
  0x4b   : > { %636 = vmatprep.subr.bf16.mxu0 %v903_v59 }
  0x4e   : > { %637 = vmatpush1.bf16.msra.mxu0 %v905_v60 }
  0x4f   : > { %638 = vmatprep.subr.bf16.mxu0 %v906_v61 }
  0x52   : > { %639 = vmatpush1.bf16.msra.mxu0 %v908_v62 }
  0x53   : > { %640 = vmatprep.subr.bf16.mxu0 %v909_v63 }
  0x56   : > { %641 = vmatpush1.bf16.msra.mxu0 %v911_v0 }
  0x57   : > { %642 = vmatprep.subr.bf16.mxu0 %v912_v1 }
  0x5a   : > { %643 = vmatpush1.bf16.msra.mxu0 %v914_v2 }
  0x5b   : > { %644 = vmatprep.subr.bf16.mxu0 %v915_v3 }
  0x5e   : > { %645 = vmatpush1.bf16.msra.mxu0 %v917_v4 }
  0x5f   : > { %646 = vmatprep.subr.bf16.mxu0 %v918_v5 }
  0x62   : > { %647 = vmatpush1.bf16.msra.mxu0 %v920_v6 }
  0x63   : > { %648 = vmatprep.subr.bf16.mxu0 %v921_v7 }
  0x66   : > { %649 = vmatpush1.bf16.msra.mxu0 %v923_v8 }
  0x69   : > { %651 = vmatmul.mubr.bf16.vlgmr.msra.gmra.mrb[0].mxu0 %v448_v9 }
 0x13c   : > { %v652_v15 = vpop.f32.mrb[0].mxu0 }
 0x13d   : > { %v653_v16 = vadd.f32 %v652_v15, %v426_v13  ;;  %v654_v17 = vpop.f32.mrb[1].mxu0 }
 0x13e   : > { %v655_v18 = vadd.f32 %v654_v17, %v430_v14  ;;  %v656_v19 = vpop.f32.mrb[2].mxu0 }
 0x13f   : > { %v657_v20 = vpop.f32.mrb[3].mxu0 }
 0x140   : > { %v830_v21 = vpack.c.bf16 %v655_v18, %v653_v16 }
 0x142   : > { %v670_v22 = vrot.slane %v830_v21, %v1115_v43 }
 0x144   : > { %831 = vst.sshfl [vmem:[%s386_s12] sm:$0x5 pattern:$0x73625140] %v670_v22 }
 0x145 PF: > { %s13_s16 = sadd.s32 1, %s962_s16   ;;  %s1177_s12 = smov %s950_s13 }
 0x146   : > { %p10_p10 = scmp.ge.s32.totalorder %s13_s16, 4   ;;  %s1178_s13 = smov %s1020_s20 }
 0x147   : > { %s1179_s14 = smov %s958_s15  ;;  %s1180_s15 = smov %s1182_s17 }
 0x148   :  { %12 = sbr.rel (!%p10_p10) target bundleno = 3 (0x3), region = 111 }

// kernel: medicalnet_encoder_forward.31
= control target key start
LH: loop header
LB: loop body
LE: loop exit
PB: predicated region body
PF: predicated region fallthrough
CT: control target
= control target key end

     0   :  { %vm292_vm0 = vcmask 1041409   ;;  %vm294_vm1 = vcmask 1042434   ;;  %vm296_vm2 = vcmask 1043459   ;;  %vm298_vm3 = vcmask 1044484   ;;  %s668_s0 = inlined_call_operand.vmem [shape: bf16[8,8,512], index: 0, kind: input, shape index: {}]   ;;  %s669_s1 = inlined_call_operand.vmem [shape: f32[8,512], index: 1, kind: output, shape index: {}]  }
   0x1   :  { %v20_v0 = vld [vmem:[%s668_s0] sm:$0xff]  ;;  %v21_v1 = vld [vmem:[%s668_s0 + $0x8] sm:$0xff]  ;;  %v22_v2 = vld [vmem:[%s668_s0 + $0x10] sm:$0xff]  ;;  %vm300_vm4 = vcmask 1045509   ;;  %vm302_vm5 = vcmask 1046534   ;;  %vm304_vm6 = vcmask 1047559  }
   0x2   :  { %v23_v3 = vld [vmem:[%s668_s0 + $0x18] sm:$0xff]  ;;  %v379_v4 = vld [vmem:[%s668_s0 + $0x20] sm:$0xff]  ;;  %v384_v5 = vld [vmem:[%s668_s0 + $0x28] sm:$0xff]  ;;  %v36_v6 = vunpack.c.l.bf16 %v20_v0  ;;  %v37_v7 = vunpack.c.h.bf16 %v20_v0  ;;  %v38_v8 = vunpack.c.l.bf16 %v21_v1  ;;  %v39_v9 = vunpack.c.h.bf16 %v21_v1 }
   0x3   :  { %v389_v10 = vld [vmem:[%s668_s0 + $0x30] sm:$0xff]  ;;  %v394_v11 = vld [vmem:[%s668_s0 + $0x38] sm:$0xff]  ;;  %v399_v12 = vld [vmem:[%s668_s0 + $0x40] sm:$0xff]  ;;  %v40_v13 = vunpack.c.l.bf16 %v22_v2  ;;  %v41_v14 = vunpack.c.h.bf16 %v22_v2  ;;  %v42_v15 = vunpack.c.l.bf16 %v23_v3  ;;  %v43_v16 = vunpack.c.h.bf16 %v23_v3 }
   0x4   :  { %v404_v17 = vld [vmem:[%s668_s0 + $0x48] sm:$0xff]  ;;  %v409_v18 = vld [vmem:[%s668_s0 + $0x50] sm:$0xff]  ;;  %v414_v19 = vld [vmem:[%s668_s0 + $0x58] sm:$0xff]  ;;  %v44_v20 = vunpack.c.l.bf16 %v379_v4  ;;  %v45_v21 = vunpack.c.h.bf16 %v379_v4  ;;  %v46_v22 = vunpack.c.l.bf16 %v384_v5  ;;  %v47_v23 = vunpack.c.h.bf16 %v384_v5 }
   0x5   :  { %v423_v24 = vld [vmem:[%s668_s0 + $0x60] sm:$0xff]  ;;  %v428_v25 = vld [vmem:[%s668_s0 + $0x68] sm:$0xff]  ;;  %v48_v26 = vunpack.c.l.bf16 %v389_v10  ;;  %v49_v27 = vunpack.c.h.bf16 %v389_v10  ;;  %v50_v28 = vunpack.c.l.bf16 %v394_v11  ;;  %v51_v29 = vunpack.c.h.bf16 %v394_v11  ;;  %v437_v30 = vld [vmem:[%s668_s0 + $0x70] sm:$0xff] }
   0x6   :  { %v442_v31 = vld [vmem:[%s668_s0 + $0x78] sm:$0xff]  ;;  %v52_v32 = vunpack.c.l.bf16 %v399_v12  ;;  %v53_v33 = vunpack.c.h.bf16 %v399_v12  ;;  %v54_v34 = vunpack.c.l.bf16 %v404_v17  ;;  %v55_v35 = vunpack.c.h.bf16 %v404_v17 }
   0x7   :  { %v56_v36 = vunpack.c.l.bf16 %v409_v18  ;;  %v57_v37 = vunpack.c.h.bf16 %v409_v18  ;;  %v58_v38 = vunpack.c.l.bf16 %v414_v19  ;;  %v59_v39 = vunpack.c.h.bf16 %v414_v19 }
   0x8   :  { %v68_v48 = vrot.slane %v36_v6, 4  ;;  %v74_v49 = vrot.slane %v37_v7, 4  ;;  %v80_v50 = vrot.slane %v38_v8, 4  ;;  %v86_v51 = vrot.slane %v39_v9, 4 }
   0x9   :  { %v92_v52 = vrot.slane %v40_v13, 4  ;;  %v98_v53 = vrot.slane %v41_v14, 4  ;;  %v104_v54 = vrot.slane %v42_v15, 4  ;;  %v110_v55 = vrot.slane %v43_v16, 4 }
   0xa   :  { %v69_v56 = vadd.f32 %v68_v48, %v36_v6  ;;  %v75_v57 = vadd.f32 %v74_v49, %v37_v7  ;;  %v81_v58 = vadd.f32 %v80_v50, %v38_v8  ;;  %v87_v59 = vadd.f32 %v86_v51, %v39_v9 }
   0xb   :  { %v93_v60 = vadd.f32 %v92_v52, %v40_v13  ;;  %v99_v61 = vadd.f32 %v98_v53, %v41_v14  ;;  %v105_v62 = vadd.f32 %v104_v54, %v42_v15  ;;  %v111_v63 = vadd.f32 %v110_v55, %v43_v16 }
   0xc   :  { %v70_v0 = vrot.slane %v69_v56, 2  ;;  %v76_v1 = vrot.slane %v75_v57, 2  ;;  %v82_v2 = vrot.slane %v81_v58, 2  ;;  %v88_v3 = vrot.slane %v87_v59, 2 }
   0xd   :  { %v94_v47 = vrot.slane %v93_v60, 2  ;;  %v100_v46 = vrot.slane %v99_v61, 2  ;;  %v106_v45 = vrot.slane %v105_v62, 2  ;;  %v112_v44 = vrot.slane %v111_v63, 2 }
   0xe   :  { %v71_v43 = vadd.f32 %v70_v0, %v69_v56  ;;  %v77_v42 = vadd.f32 %v76_v1, %v75_v57  ;;  %v83_v41 = vadd.f32 %v82_v2, %v81_v58  ;;  %v89_v40 = vadd.f32 %v88_v3, %v87_v59 }
   0xf   :  { %v95_v6 = vadd.f32 %v94_v47, %v93_v60  ;;  %v101_v7 = vadd.f32 %v100_v46, %v99_v61  ;;  %v107_v8 = vadd.f32 %v106_v45, %v105_v62  ;;  %v113_v9 = vadd.f32 %v112_v44, %v111_v63 }
  0x10   :  { %v72_v13 = vrot.slane %v71_v43, 1  ;;  %v78_v14 = vrot.slane %v77_v42, 1  ;;  %v84_v15 = vrot.slane %v83_v41, 1  ;;  %v90_v16 = vrot.slane %v89_v40, 1 }
  0x11   :  { %v96_v48 = vrot.slane %v95_v6, 1  ;;  %v102_v49 = vrot.slane %v101_v7, 1  ;;  %v108_v50 = vrot.slane %v107_v8, 1  ;;  %v114_v51 = vrot.slane %v113_v9, 1 }
  0x12   :  { %v460_v52 = vadd.f32 %v72_v13, %v71_v43  ;;  %v462_v53 = vadd.f32 %v78_v14, %v77_v42  ;;  %v464_v54 = vadd.f32 %v84_v15, %v83_v41  ;;  %v466_v55 = vadd.f32 %v90_v16, %v89_v40 }
  0x13   :  { %v468_v47 = vadd.f32 %v96_v48, %v95_v6  ;;  %v470_v45 = vadd.f32 %v102_v49, %v101_v7  ;;  %v472_v44 = vadd.f32 %v108_v50, %v107_v8  ;;  %v474_v46 = vadd.f32 %v114_v51, %v113_v9 }
  0x14   :  { %v116_v56 = vrot.slane %v44_v20, 4  ;;  %v122_v43 = vrot.slane %v45_v21, 4  ;;  %v128_v41 = vrot.slane %v46_v22, 4  ;;  %v134_v40 = vrot.slane %v47_v23, 4 }
  0x15   :  { %v140_v42 = vrot.slane %v48_v26, 4  ;;  %v146_v57 = vrot.slane %v49_v27, 4  ;;  %v152_v58 = vrot.slane %v50_v28, 4  ;;  %v158_v59 = vrot.slane %v51_v29, 4 }
  0x16   :  { %v117_v60 = vadd.f32 %v116_v56, %v44_v20  ;;  %v123_v61 = vadd.f32 %v122_v43, %v45_v21  ;;  %v129_v62 = vadd.f32 %v128_v41, %v46_v22  ;;  %v135_v63 = vadd.f32 %v134_v40, %v47_v23 }
  0x17   :  { %v141_v0 = vadd.f32 %v140_v42, %v48_v26  ;;  %v147_v1 = vadd.f32 %v146_v57, %v49_v27  ;;  %v153_v2 = vadd.f32 %v152_v58, %v50_v28  ;;  %v159_v20 = vadd.f32 %v158_v59, %v51_v29 }
  0x18   :  { %v118_v4 = vrot.slane %v117_v60, 2  ;;  %v124_v21 = vrot.slane %v123_v61, 2  ;;  %v130_v3 = vrot.slane %v129_v62, 2  ;;  %v136_v6 = vrot.slane %v135_v63, 2 }
  0x19   :  { %v142_v22 = vrot.slane %v141_v0, 2  ;;  %v148_v7 = vrot.slane %v147_v1, 2  ;;  %v154_v5 = vrot.slane %v153_v2, 2  ;;  %v160_v23 = vrot.slane %v159_v20, 2 }
  0x1a   :  { %v119_v8 = vadd.f32 %v118_v4, %v117_v60  ;;  %v125_v9 = vadd.f32 %v124_v21, %v123_v61  ;;  %v131_v26 = vadd.f32 %v130_v3, %v129_v62  ;;  %v137_v13 = vadd.f32 %v136_v6, %v135_v63 }
  0x1b   :  { %v143_v10 = vadd.f32 %v142_v22, %v141_v0  ;;  %v149_v27 = vadd.f32 %v148_v7, %v147_v1  ;;  %v155_v14 = vadd.f32 %v154_v5, %v153_v2  ;;  %v161_v15 = vadd.f32 %v160_v23, %v159_v20 }
  0x1c   :  { %v120_v28 = vrot.slane %v119_v8, 1  ;;  %v126_v16 = vrot.slane %v125_v9, 1  ;;  %v132_v11 = vrot.slane %v131_v26, 1  ;;  %v138_v29 = vrot.slane %v137_v13, 1 }
  0x1d   :  { %v144_v48 = vrot.slane %v143_v10, 1  ;;  %v150_v49 = vrot.slane %v149_v27, 1  ;;  %v156_v50 = vrot.slane %v155_v14, 1  ;;  %v162_v51 = vrot.slane %v161_v15, 1 }
  0x1e   :  { %v508_v56 = vadd.f32 %v120_v28, %v119_v8  ;;  %v510_v43 = vadd.f32 %v126_v16, %v125_v9  ;;  %v512_v41 = vadd.f32 %v132_v11, %v131_v26  ;;  %v514_v40 = vadd.f32 %v138_v29, %v137_v13 }
  0x1f   :  { %v516_v42 = vadd.f32 %v144_v48, %v143_v10  ;;  %v518_v57 = vadd.f32 %v150_v49, %v149_v27  ;;  %v520_v58 = vadd.f32 %v156_v50, %v155_v14  ;;  %v522_v59 = vadd.f32 %v162_v51, %v161_v15 }
  0x20   :  { %v164_v60 = vrot.slane %v52_v32, 4  ;;  %v170_v61 = vrot.slane %v53_v33, 4  ;;  %v176_v62 = vrot.slane %v54_v34, 4  ;;  %v182_v63 = vrot.slane %v55_v35, 4 }
  0x21   :  { %v188_v0 = vrot.slane %v56_v36, 4  ;;  %v194_v1 = vrot.slane %v57_v37, 4  ;;  %v200_v2 = vrot.slane %v58_v38, 4  ;;  %v206_v20 = vrot.slane %v59_v39, 4 }
  0x22   :  { %v165_v4 = vadd.f32 %v164_v60, %v52_v32  ;;  %v171_v21 = vadd.f32 %v170_v61, %v53_v33  ;;  %v177_v3 = vadd.f32 %v176_v62, %v54_v34  ;;  %v183_v6 = vadd.f32 %v182_v63, %v55_v35 }
  0x23   :  { %v189_v22 = vadd.f32 %v188_v0, %v56_v36  ;;  %v195_v7 = vadd.f32 %v194_v1, %v57_v37  ;;  %v201_v5 = vadd.f32 %v200_v2, %v58_v38  ;;  %v207_v32 = vadd.f32 %v206_v20, %v59_v39 }
  0x24   :  { %v166_v12 = vrot.slane %v165_v4, 2  ;;  %v172_v33 = vrot.slane %v171_v21, 2  ;;  %v178_v23 = vrot.slane %v177_v3, 2  ;;  %v184_v8 = vrot.slane %v183_v6, 2 }
  0x25   :  { %v190_v34 = vrot.slane %v189_v22, 2  ;;  %v196_v9 = vrot.slane %v195_v7, 2  ;;  %v202_v17 = vrot.slane %v201_v5, 2  ;;  %v208_v35 = vrot.slane %v207_v32, 2 }
  0x26   :  { %v167_v26 = vadd.f32 %v166_v12, %v165_v4  ;;  %v173_v13 = vadd.f32 %v172_v33, %v171_v21  ;;  %v179_v36 = vadd.f32 %v178_v23, %v177_v3  ;;  %v185_v10 = vadd.f32 %v184_v8, %v183_v6 }
  0x27   :  { %v191_v18 = vadd.f32 %v190_v34, %v189_v22  ;;  %v197_v37 = vadd.f32 %v196_v9, %v195_v7  ;;  %v203_v27 = vadd.f32 %v202_v17, %v201_v5  ;;  %v209_v14 = vadd.f32 %v208_v35, %v207_v32 }
  0x28   :  { %v168_v38 = vrot.slane %v167_v26, 1  ;;  %v174_v15 = vrot.slane %v173_v13, 1  ;;  %v180_v19 = vrot.slane %v179_v36, 1  ;;  %v186_v39 = vrot.slane %v185_v10, 1 }
  0x29   :  { %v192_v28 = vrot.slane %v191_v18, 1  ;;  %v198_v16 = vrot.slane %v197_v37, 1  ;;  %v204_v11 = vrot.slane %v203_v27, 1  ;;  %v210_v29 = vrot.slane %v209_v14, 1 }
  0x2a   :  { %v556_v48 = vadd.f32 %v168_v38, %v167_v26  ;;  %v558_v49 = vadd.f32 %v174_v15, %v173_v13  ;;  %v560_v50 = vadd.f32 %v180_v19, %v179_v36  ;;  %v562_v51 = vadd.f32 %v186_v39, %v185_v10 }
  0x2b   :  { %v564_v60 = vadd.f32 %v192_v28, %v191_v18  ;;  %v566_v61 = vadd.f32 %v198_v16, %v197_v37  ;;  %v568_v62 = vadd.f32 %v204_v11, %v203_v27  ;;  %v570_v63 = vadd.f32 %v210_v29, %v209_v14 }
  0x2c   :  { %v670_v0 = vunpack.c.l.bf16 %v423_v24  ;;  %v671_v2 = vunpack.c.h.bf16 %v423_v24  ;;  %v672_v4 = vunpack.c.l.bf16 %v428_v25  ;;  %v673_v3 = vunpack.c.h.bf16 %v428_v25 }
  0x2d   :  { %v674_v22 = vunpack.c.l.bf16 %v437_v30  ;;  %v675_v5 = vunpack.c.h.bf16 %v437_v30  ;;  %v676_v12 = vunpack.c.l.bf16 %v442_v31  ;;  %v677_v23 = vunpack.c.h.bf16 %v442_v31 }
  0x2e   :  { %v212_v1 = vrot.slane %v670_v0, 4  ;;  %v218_v20 = vrot.slane %v671_v2, 4  ;;  %v224_v21 = vrot.slane %v672_v4, 4  ;;  %v230_v6 = vrot.slane %v673_v3, 4 }
  0x2f   :  { %v236_v7 = vrot.slane %v674_v22, 4  ;;  %v242_v32 = vrot.slane %v675_v5, 4  ;;  %v248_v33 = vrot.slane %v676_v12, 4  ;;  %v254_v8 = vrot.slane %v677_v23, 4 }
  0x30   :  { %v678_v34 = vmov %v670_v0  ;;  %v679_v17 = vmov %v671_v2  ;;  %v680_v26 = vmov %v672_v4  ;;  %v681_v36 = vmov %v673_v3 }
  0x31   :  { %v213_v9 = vadd.f32 %v212_v1, %v678_v34  ;;  %v219_v35 = vadd.f32 %v218_v20, %v679_v17  ;;  %v225_v13 = vadd.f32 %v224_v21, %v680_v26  ;;  %v231_v10 = vadd.f32 %v230_v6, %v681_v36 }
  0x32   :  { %v682_v18 = vmov %v674_v22  ;;  %v683_v27 = vmov %v675_v5  ;;  %v684_v38 = vmov %v676_v12  ;;  %v685_v19 = vmov %v677_v23 }
  0x33   :  { %v237_v37 = vadd.f32 %v236_v7, %v682_v18  ;;  %v243_v14 = vadd.f32 %v242_v32, %v683_v27  ;;  %v249_v15 = vadd.f32 %v248_v33, %v684_v38  ;;  %v255_v24 = vadd.f32 %v254_v8, %v685_v19 }
  0x34   :  { %v214_v39 = vrot.slane %v213_v9, 2  ;;  %v220_v28 = vrot.slane %v219_v35, 2  ;;  %v226_v16 = vrot.slane %v225_v13, 2  ;;  %v232_v11 = vrot.slane %v231_v10, 2 }
  0x35   :  { %v238_v25 = vrot.slane %v237_v37, 2  ;;  %v244_v29 = vrot.slane %v243_v14, 2  ;;  %v250_v0 = vrot.slane %v249_v15, 2  ;;  %v256_v1 = vrot.slane %v255_v24, 2 }
  0x36   :  { %v215_v2 = vadd.f32 %v214_v39, %v213_v9  ;;  %v221_v30 = vadd.f32 %v220_v28, %v219_v35  ;;  %v227_v20 = vadd.f32 %v226_v16, %v225_v13  ;;  %v233_v4 = vadd.f32 %v232_v11, %v231_v10 }
  0x37   :  { %v239_v21 = vadd.f32 %v238_v25, %v237_v37  ;;  %v245_v3 = vadd.f32 %v244_v29, %v243_v14  ;;  %v251_v31 = vadd.f32 %v250_v0, %v249_v15  ;;  %v257_v6 = vadd.f32 %v256_v1, %v255_v24 }
  0x38   :  { %v216_v22 = vrot.slane %v215_v2, 1  ;;  %v222_v7 = vrot.slane %v221_v30, 1  ;;  %v228_v5 = vrot.slane %v227_v20, 1  ;;  %v234_v32 = vrot.slane %v233_v4, 1 }
  0x39   :  { %v240_v12 = vrot.slane %v239_v21, 1  ;;  %v246_v33 = vrot.slane %v245_v3, 1  ;;  %v252_v23 = vrot.slane %v251_v31, 1  ;;  %v258_v8 = vrot.slane %v257_v6, 1 }
  0x3a   :  { %v217_v34 = vadd.f32 %v216_v22, %v215_v2  ;;  %v223_v17 = vadd.f32 %v222_v7, %v221_v30  ;;  %v229_v9 = vadd.f32 %v228_v5, %v227_v20  ;;  %v235_v35 = vadd.f32 %v234_v32, %v233_v4 }
  0x3b   :  { %v241_v26 = vadd.f32 %v240_v12, %v239_v21  ;;  %v247_v13 = vadd.f32 %v246_v33, %v245_v3  ;;  %v253_v36 = vadd.f32 %v252_v23, %v251_v31  ;;  %v259_v10 = vadd.f32 %v258_v8, %v257_v6 }
  0x3c   :  { %v293_v18 = vsel %vm292_vm0, %v468_v47, %v460_v52  ;;  %v306_v37 = vsel %vm292_vm0, %v470_v45, %v462_v53  ;;  %v313_v27 = vsel %vm292_vm0, %v472_v44, %v464_v54  ;;  %v320_v14 = vsel %vm292_vm0, %v474_v46, %v466_v55 }
  0x3d   :  { %v295_v38 = vsel %vm294_vm1, %v508_v56, %v293_v18  ;;  %v307_v15 = vsel %vm294_vm1, %v510_v43, %v306_v37  ;;  %v314_v52 = vsel %vm294_vm1, %v512_v41, %v313_v27  ;;  %v321_v53 = vsel %vm294_vm1, %v514_v40, %v320_v14 }
  0x3e   :  { %v297_v47 = vsel %vm296_vm2, %v516_v42, %v295_v38  ;;  %v308_v54 = vsel %vm296_vm2, %v518_v57, %v307_v15  ;;  %v315_v55 = vsel %vm296_vm2, %v520_v58, %v314_v52  ;;  %v322_v45 = vsel %vm296_vm2, %v522_v59, %v321_v53 }
  0x3f   :  { %v299_v44 = vsel %vm298_vm3, %v556_v48, %v297_v47  ;;  %v309_v46 = vsel %vm298_vm3, %v558_v49, %v308_v54  ;;  %v316_v56 = vsel %vm298_vm3, %v560_v50, %v315_v55  ;;  %v323_v43 = vsel %vm298_vm3, %v562_v51, %v322_v45 }
  0x40   :  { %v301_v41 = vsel %vm300_vm4, %v564_v60, %v299_v44  ;;  %v310_v40 = vsel %vm300_vm4, %v566_v61, %v309_v46  ;;  %v317_v42 = vsel %vm300_vm4, %v568_v62, %v316_v56  ;;  %v324_v57 = vsel %vm300_vm4, %v570_v63, %v323_v43 }
  0x41   :  { %v303_v58 = vsel %vm302_vm5, %v217_v34, %v301_v41  ;;  %v311_v59 = vsel %vm302_vm5, %v223_v17, %v310_v40  ;;  %v318_v48 = vsel %vm302_vm5, %v229_v9, %v317_v42  ;;  %v325_v49 = vsel %vm302_vm5, %v235_v35, %v324_v57 }
  0x42   :  { %v305_v50 = vsel %vm304_vm6, %v241_v26, %v303_v58  ;;  %v312_v51 = vsel %vm304_vm6, %v247_v13, %v311_v59  ;;  %v319_v60 = vsel %vm304_vm6, %v253_v36, %v318_v48  ;;  %v326_v61 = vsel %vm304_vm6, %v259_v10, %v325_v49 }
  0x43   :  { %346 = vst [vmem:[%s669_s1] sm:$0xff] %v305_v50  ;;  %347 = vst [vmem:[%s669_s1 + $0x8] sm:$0xff] %v312_v51 }
  0x44   :  { %348 = vst [vmem:[%s669_s1 + $0x10] sm:$0xff] %v319_v60  ;;  %349 = vst [vmem:[%s669_s1 + $0x18] sm:$0xff] %v326_v61 }

// kernel: medicalnet_encoder_forward.30
= control target key start
LH: loop header
LB: loop body
LE: loop exit
PB: predicated region body
PF: predicated region fallthrough
CT: control target
= control target key end

     0   :  { %s7903_s0 = inlined_call_operand.vmem [shape: bf16[2,3,1,4608], index: 0, kind: input, shape index: {}]   ;;  %s7904_s1 = inlined_call_operand.hbm [shape: bf16[3,4608,512], index: 1, kind: input, shape index: {}]   ;;  %s7905_s2 = inlined_call_operand.vmem [shape: f32[1,512], index: 2, kind: input, shape index: {}]   ;;  %s7906_s3 = inlined_call_operand.vmem [shape: bf16[2,1,1,512], index: 3, kind: input, shape index: {}]   ;;  %s7907_s4 = inlined_call_operand.vmem [shape: bf16[2,1,1,512], index: 4, kind: output, shape index: {}]  }
   0x1   :  { %7909 = sst [smem:[#allocation8_spill]] %s7904_s1 }
   0x2   :  { %9 = vsyncpa [#allocation4], 0 }
   0x3   :  { %11 = vsyncpa [#allocation4 + $0x1], 0  ;;  %s6938_s15 = smov 0   ;;  %s6940_s16 = smov 0  }
   0x4   :  { %s6942_s17 = smov 0   ;;  %s6944_s18 = smov 0  }
   0x5   :  { %s6946_s19 = smov 0   ;;  %s6948_s20 = smov 0  }
   0x6   :  { %s6950_s21 = smov 0   ;;  %s6952_s22 = smov 0  }
   0x7   :  { %s6954_s23 = smov 0   ;;  %s6956_s24 = smov 0  }
   0x8 LB: > { %s5168_s25 = sadd.s32 4294967295, %s6905_s24   ;;  %s35_s26 = sadd.s32 1, %s6893_s21  ;;  %s6905_s24 = sphi %s6956_s24, %s17_s24   ;;  %s6901_s23 = sphi %s6954_s23, %s7925_s23   ;;  %s6897_s22 = sphi %s6952_s22, %s7924_s22   ;;  %s6893_s21 = sphi %s6950_s21, %s7923_s21   ;;  %s6889_s20 = sphi %s6948_s20, %s7922_s20   ;;  %s6885_s19 = sphi %s6946_s19, %s7921_s19   ;;  %s6881_s18 = sphi %s6944_s18, %s7920_s18   ;;  %s6877_s17 = sphi %s6942_s17, %s7919_s17   ;;  %s6873_s16 = sphi %s6940_s16, %s7918_s16   ;;  %s6869_s15 = sphi %s6938_s15, %s7917_s15  }
   0x9   : > { %p36_p0 = scmp.ge.s32.totalorder %s35_s26, 3  ;;  %s38_s27 = sadd.s32 1, %s6897_s22 }
   0xa   : > { %s50_s28 = sadd.s32 1, %s6901_s23  ;;  %s91_s29 = sadd.s32 1, %s6877_s17 }
   0xb   : > { %s7927_s26 = smov (%p36_p0, %s35_s26), 0  ;;  %s7929_s27 = smov (!%p36_p0, %s38_s27), %s6897_s22 }
   0xc   : > { %s86_s30 = ssub.s32 %s6893_s21, %s7927_s26  ;;  %p98_p1 = scmp.ne.s32.totalorder %s6877_s17, %s6873_s16 }
   0xd   : > { %p40_p2 = scmp.ge.s32.totalorder %s7929_s27, 2  ;;  %p99_p3 = scmp.eq.s32.totalorder %s6905_s24, 0 }
   0xe   : > { %p104_p4 = scmp.ne.s32.totalorder %s6873_s16, %s6869_s15  ;;  %p105_p5 = scmp.eq.s32.totalorder %s5168_s25, 0 }
   0xf   : > { %s7931_s27 = smov (%p40_p2, %s7929_s27), 0  ;;  %s7933_s28 = smov (!%p40_p2, %s50_s28), %s6901_s23 }
  0x10   : > { %7910 = sst [smem:[#allocation6_spill]] %s7931_s27  ;;  %s87_s5 = ssub.s32 %s6897_s22, %s7931_s27 }
  0x11   : > { %p100_p6 = por %p99_p3, %p98_p1  ;;  %p52_p7 = scmp.ge.s32.totalorder %s7933_s28, 2 }
  0x12   : > { %s88_s6 = sor.u32 %s87_s5, %s86_s30  ;;  %p7008_p9 = por %p105_p5, %p104_p4 }
  0x13   : > { %p89_p8 = scmp.eq.s32.totalorder %s88_s6, 0  ;;  %s7935_s28 = smov (%p52_p7, %s7933_s28), 0 }
  0x14   : > { %7912 = sst [smem:[#allocation7_spill]] %s7935_s28  ;;  %p5839_p10 = scmp.lt.s32.totalorder %s6905_s24, 12 }
  0x15   : > { %s7015_s8 = scalar_select %p89_p8, %s6877_s17, %s91_s29  }
  0x16   : > { %s235_s9 = sand.u32 1, %s6877_s17   ;;  %s5172_s10 = sshll.u32 %s6897_s22, 1 }
  0x17   : > { %s5828_s11 = smul.u32 4608, %s235_s9  ;;  %p7021_p11 = pnand %p5839_p10, %p100_p6 }
  0x18   : > { %s5829_s12 = smul.u32 2304, %s6893_s21  ;;  %s7914_s1 = sld [smem:[#allocation8_spill]] }
  0x19   : > { %s239_s15 = scalar_lea.vmem [#allocation3], %s5828_s11  ;;  %s7032_s28 = scalar_lea.sflag [#allocation4], %s235_s9 }
  0x1a   : > { %s245_s14 = sadd.s32 %s5829_s12, %s5172_s10  ;;  %s248_s25 = sshll.u32 %s239_s15, 4  ;;  %s7025_s25 = int_to_ptr.vmem [resolvable:$true] %s248_s25 }
  0x1b   : > { %s5173_s30 = sshll.u32 %s245_s14, 6  ;;  %p6795_p13 = pneg %p7021_p11 }
  0x1e   : > { %s7030_s6 = scalar_lea.hbm %s7914_s1, %s5173_s30  ;;  %s6798_s12 = scalar_lea.hbm %s7914_s1, 442368 }
  0x1f   : > { %s6793_s27 = scalar_lea.hbm %s7030_s6, 73728  ;;  %p6799_p2 = scmp.lt.u32.totalorder %s7030_s6, %s7914_s1 }
  0x20   : > { %p6794_p12 = scmp.ne.s32.totalorder %s7030_s6, %s6793_s27  ;;  %p6800_p3 = scmp.lt.u32.totalorder %s6798_s12, %s6793_s27 }
  0x21   : > { %p6802_p5 = scmp.lt.u32.totalorder %s6793_s27, %s7030_s6 }
  0x22   : > { %p6796_p0 = pnand %p6795_p13, %p6794_p12  ;;  %p6801_p4 = por %p6800_p3, %p6799_p2 }
  0x24   : > { %p6797_p1 = pneg %p6796_p0  ;;  %p6803_p6 = por %p6802_p5, %p6801_p4 }
  0x26   : > { %p6804_p7 = pnand %p6803_p6, %p6797_p1 }
  0x28   : > { %6807 = shalt.err (!%p6804_p7)
}
  0x29   : > { %s6808_s9 = scalar_lea.vmem %s7025_s25, 73728  ;;  %s6907_s30 = smov [#allocation3]  }
  0x2a   : > { %p6809_p8 = scmp.ne.s32.totalorder %s7025_s25, %s6808_s9  ;;  %s6813_s5 = sshll.u32 %s6907_s30, 4  ;;  %s6814_s5 = int_to_ptr.vmem [resolvable:$false] %s6813_s5 }
  0x2b   : > { %s6815_s29 = scalar_lea.vmem %s6814_s5, 147456  ;;  %p6816_p0 = scmp.lt.s32.totalorder %s7025_s25, %s6814_s5 }
  0x2c   : > { %p6811_p10 = pnand %p6809_p8, %p6795_p13  ;;  %p6817_p2 = scmp.lt.s32.totalorder %s6815_s29, %s6808_s9 }
  0x2e   : > { %p6812_p12 = pneg %p6811_p10  ;;  %p6818_p3 = por %p6817_p2, %p6816_p0 }
  0x30   : > { %p6819_p4 = pnand %p6818_p3, %p6812_p12 }
  0x32   : > { %6822 = shalt.err (!%p6819_p4)
}
  0x33   : > { %s6908_s27 = smov 256   ;;  %s6909_s10 = smov 128  }
  0x34   : > { %s6910_s11 = smov 8   ;;  %p5174_p13 = scmp.ge.s32.totalorder %s6905_s24, 1 }
  0x35   : > { %5838 = dma.hbm_to_vmem [thread:$0]  (!%p7021_p11), %s7030_s6, 73728, %s7025_s25, %s7032_s28, %s6908_s27, %s6909_s10, %s6910_s11  }
  0x36   : > { %p284_p1 = scmp.lt.s32.totalorder %s6905_s24, 13 }
  0x38   : > { %p285_p5 = pnand %p5174_p13, %p284_p1 }
  0x39   : > { %s290_s12 = sand.u32 (!%p285_p5), 1, %s6873_s16  }
  0x3a   : > { %288 = sbr.rel (%p285_p5) target bundleno = 907 (0x38b), region = 36  ;;  %s291_s15 = scalar_lea.sflag (!%p285_p5), [#allocation4], %s290_s12 }
  0x3b   : > { %s5830_s14 = smul.u32 (!%p285_p5), 4608, %s290_s12 }
  0x3d   : > { %s7063_s9 = scalar_lea.vmem (!%p285_p5), [#allocation3], %s5830_s14 }
  0x41   : > { %6864 = dma.done.wait (%p7008_p9), %s291_s15, 73728  }
  0x42   : > { %6866 = vsyncadd (%p7008_p9), %s291_s15, 4294893568  ;;  %p364_p11 = scmp.lt.s32.totalorder %s6889_s20, 1  ;;  %p366_p6 = scmp.lt.s32.totalorder %s6881_s18, 2 }
  0x43   : > { %s5175_s28 = sshll.u32 %s6885_s19, 1  ;;  %p5180_p9 = scmp.ne.s32.totalorder %s6881_s18, 0 }
  0x44   : > { %s7937_s20 = smov (!%p364_p11, %s6889_s20), 1  ;;  %p379_p7 = scmp.lt.s32.totalorder %s5175_s28, 3  ;;  %v421_v0 = vlaneseq (!%p5180_p9)  ;;  %v6911_v1 = vmov (!%p5180_p9), 0.0  }
  0x45   : > { %s367_s13 = scalar_select %p366_p6, %s6881_s18, 2 }
  0x46   : > { %s5832_s25 = smul.u32 108, %s7937_s20  ;;  %s5177_s30 = sshll.u32 %s7937_s20, 2  ;;  %vm423_vm0 = vcmp.lt.s32.totalorder (!%p5180_p9), %v421_v0, 256 }
  0x47   : > { %s5831_s6 = smul.u32 36, %s367_s13  ;;  %s7939_s28 = smov (!%p379_p7, %s5175_s28), 3  ;;  %425 = vst.msk [vmem:[#allocation2] sm:$0x3] (!%p5180_p9), %vm423_vm0, %v6911_v1 }
  0x48   : > { %s381_s19 = scalar_lea.vmem %s7905_s2, %s7939_s28  ;;  %s7086_s12 = sadd.s32 %s5177_s30, %s7939_s28 }
  0x49   : > { %s374_s7 = sadd.s32 %s5832_s25, %s5831_s6  ;;  %s398_s20 = scalar_lea.vmem %s7906_s3, %s7086_s12 }
  0x4a   : > { %s7079_s27 = scalar_lea.vmem %s7903_s0, %s374_s7  ;;  %s7096_s25 = scalar_lea.vmem %s7907_s4, %s7086_s12 }
  0x4b   : > { %420 = sbr.rel (%p5180_p9) target bundleno = 82 (0x52), region = 44 }
  0x52 PF: > { %v5925_v2 = vld [vmem:[%s7063_s9 + $0x4] ss:$8 sps:$4 sm:$0xff]   ;;  %v5929_v4 = vld [vmem:[%s7063_s9] ss:$8 sps:$4 sm:$0xff]   ;;  %v5931_v6 = vld [vmem:[%s7063_s9 + $0x14] ss:$8 sps:$4 sm:$0xff]   ;;  %v1017_v42 = vlaneseq }
  0x53   : > { %v5927_v3 = vld [vmem:[%s7063_s9 + $0x904] ss:$8 sps:$4 sm:$0xff]   ;;  %4149 = vmatprep.subr.bf16.mxu1 %v5925_v2  ;;  %v5930_v5 = vld [vmem:[%s7063_s9 + $0x900] ss:$8 sps:$4 sm:$0xff]   ;;  %v5933_v7 = vld [vmem:[%s7063_s9 + $0x914] ss:$8 sps:$4 sm:$0xff]  }
  0x54   : > { %4518 = vmatprep.subr.bf16.mxu0 %v5927_v3  ;;  %4150 = vmatpush1.bf16.msra.mxu1 %v5929_v4  ;;  %v5935_v8 = vld [vmem:[%s7063_s9 + $0x10] ss:$8 sps:$4 sm:$0xff]   ;;  %v5937_v10 = vld [vmem:[%s7063_s9 + $0x24] ss:$8 sps:$4 sm:$0xff]   ;;  %v5941_v12 = vld [vmem:[%s7063_s9 + $0x20] ss:$8 sps:$4 sm:$0xff]  }
  0x55   : > { %4519 = vmatpush1.bf16.msra.mxu0 %v5930_v5  ;;  %4151 = vmatprep.subr.bf16.mxu1 %v5931_v6  ;;  %v5936_v9 = vld [vmem:[%s7063_s9 + $0x910] ss:$8 sps:$4 sm:$0xff]   ;;  %v5939_v11 = vld [vmem:[%s7063_s9 + $0x924] ss:$8 sps:$4 sm:$0xff]   ;;  %v5942_v13 = vld [vmem:[%s7063_s9 + $0x920] ss:$8 sps:$4 sm:$0xff]  }
  0x56   : > { %4520 = vmatprep.subr.bf16.mxu0 %v5933_v7  ;;  %v5943_v14 = vld [vmem:[%s7063_s9 + $0x34] ss:$8 sps:$4 sm:$0xff]   ;;  %v5947_v16 = vld [vmem:[%s7063_s9 + $0x30] ss:$8 sps:$4 sm:$0xff]   ;;  %v5949_v18 = vld [vmem:[%s7063_s9 + $0x44] ss:$8 sps:$4 sm:$0xff]  }
  0x57   : > { %v5945_v15 = vld [vmem:[%s7063_s9 + $0x934] ss:$8 sps:$4 sm:$0xff]   ;;  %v5948_v17 = vld [vmem:[%s7063_s9 + $0x930] ss:$8 sps:$4 sm:$0xff]   ;;  %v5951_v19 = vld [vmem:[%s7063_s9 + $0x944] ss:$8 sps:$4 sm:$0xff]  }
  0x58   : > { %4152 = vmatpush1.bf16.msra.mxu1 %v5935_v8  ;;  %v5953_v20 = vld [vmem:[%s7063_s9 + $0x40] ss:$8 sps:$4 sm:$0xff]   ;;  %v5955_v22 = vld [vmem:[%s7063_s9 + $0x54] ss:$8 sps:$4 sm:$0xff]   ;;  %v5959_v24 = vld [vmem:[%s7063_s9 + $0x50] ss:$8 sps:$4 sm:$0xff]  }
  0x59   : > { %4521 = vmatpush1.bf16.msra.mxu0 %v5936_v9  ;;  %4153 = vmatprep.subr.bf16.mxu1 %v5937_v10  ;;  %v5954_v21 = vld [vmem:[%s7063_s9 + $0x940] ss:$8 sps:$4 sm:$0xff]   ;;  %v5957_v23 = vld [vmem:[%s7063_s9 + $0x954] ss:$8 sps:$4 sm:$0xff]   ;;  %v5960_v25 = vld [vmem:[%s7063_s9 + $0x950] ss:$8 sps:$4 sm:$0xff]  }
  0x5a   : > { %4522 = vmatprep.subr.bf16.mxu0 %v5939_v11  ;;  %v5961_v26 = vld [vmem:[%s7063_s9 + $0x64] ss:$8 sps:$4 sm:$0xff]   ;;  %v5965_v28 = vld [vmem:[%s7063_s9 + $0x60] ss:$8 sps:$4 sm:$0xff]   ;;  %v5967_v30 = vld [vmem:[%s7063_s9 + $0x74] ss:$8 sps:$4 sm:$0xff]  }
  0x5b   : > { %v5963_v27 = vld [vmem:[%s7063_s9 + $0x964] ss:$8 sps:$4 sm:$0xff]   ;;  %v5966_v29 = vld [vmem:[%s7063_s9 + $0x960] ss:$8 sps:$4 sm:$0xff]   ;;  %v5969_v31 = vld [vmem:[%s7063_s9 + $0x974] ss:$8 sps:$4 sm:$0xff]  }
  0x5c   : > { %4154 = vmatpush1.bf16.msra.mxu1 %v5941_v12  ;;  %v5971_v32 = vld [vmem:[%s7063_s9 + $0x70] ss:$8 sps:$4 sm:$0xff]   ;;  %v5973_v34 = vld [vmem:[%s7063_s9 + $0x84] ss:$8 sps:$4 sm:$0xff]   ;;  %v5977_v36 = vld [vmem:[%s7063_s9 + $0x80] ss:$8 sps:$4 sm:$0xff]  }
  0x5d   : > { %4523 = vmatpush1.bf16.msra.mxu0 %v5942_v13  ;;  %4155 = vmatprep.subr.bf16.mxu1 %v5943_v14  ;;  %v5972_v33 = vld [vmem:[%s7063_s9 + $0x970] ss:$8 sps:$4 sm:$0xff]   ;;  %v5975_v35 = vld [vmem:[%s7063_s9 + $0x984] ss:$8 sps:$4 sm:$0xff]   ;;  %v5978_v37 = vld [vmem:[%s7063_s9 + $0x980] ss:$8 sps:$4 sm:$0xff]  }
  0x5e   : > { %4524 = vmatprep.subr.bf16.mxu0 %v5945_v15  ;;  %v5979_v38 = vld [vmem:[%s7063_s9 + $0x94] ss:$8 sps:$4 sm:$0xff]   ;;  %v6912_v40 = vmov 1966171168   ;;  %v5983_v43 = vld [vmem:[%s7063_s9 + $0x90] ss:$8 sps:$4 sm:$0xff]  }
  0x5f   : > { %v5981_v39 = vld [vmem:[%s7063_s9 + $0x994] ss:$8 sps:$4 sm:$0xff]   ;;  %v1015_v41 = vunpack.c.l.s4 %v6912_v40  ;;  %v5984_v44 = vld [vmem:[%s7063_s9 + $0x990] ss:$8 sps:$4 sm:$0xff]   ;;  %v5985_v45 = vld [vmem:[%s7063_s9 + $0xa4] ss:$8 sps:$4 sm:$0xff]  }
  0x60   : > { %4156 = vmatpush1.bf16.msra.mxu1 %v5947_v16  ;;  %v5987_v46 = vld [vmem:[%s7063_s9 + $0x9a4] ss:$8 sps:$4 sm:$0xff]   ;;  %v7142_v48 = vshrl.u32 %v1017_v42, 7  ;;  %v5989_v49 = vld [vmem:[%s7063_s9 + $0xa0] ss:$8 sps:$4 sm:$0xff]   ;;  %v429_v58 = vld [vmem:[%s7079_s27 + $0x10] sm:$0xff] }
  0x61   : > { %4525 = vmatpush1.bf16.msra.mxu0 %v5948_v17  ;;  %4157 = vmatprep.subr.bf16.mxu1 %v5949_v18  ;;  %v1016_v47 = vunpack.c.0.s8 %v1015_v41  ;;  %v5990_v50 = vld [vmem:[%s7063_s9 + $0x9a0] ss:$8 sps:$4 sm:$0xff]   ;;  %v5991_v51 = vld [vmem:[%s7063_s9 + $0xb4] ss:$8 sps:$4 sm:$0xff]   ;;  %v5995_v55 = vld [vmem:[%s7063_s9 + $0xb0] ss:$8 sps:$4 sm:$0xff]   ;;  %v1111_v11 = vcombine.high %v429_v58, %v429_v58 }
  0x62   : > { %4526 = vmatprep.subr.bf16.mxu0 %v5951_v19  ;;  %v5993_v52 = vld [vmem:[%s7063_s9 + $0x9b4] ss:$8 sps:$4 sm:$0xff]   ;;  %v7152_v54 = vld [vmem:[%s7079_s27] sm:$0xff]  ;;  %v5996_v57 = vld [vmem:[%s7063_s9 + $0x9b0] ss:$8 sps:$4 sm:$0xff]   ;;  %vm4908_vm1 = vcmp.lt.s32.totalorder %v1017_v42, 256 }
  0x63   : > { %v7149_v53 = vsub.s32 %v1016_v47, %v7142_v48  ;;  %v5997_v59 = vld [vmem:[%s7063_s9 + $0xc4] ss:$8 sps:$4 sm:$0xff]   ;;  %v6001_v1 = vld [vmem:[%s7063_s9 + $0xc0] ss:$8 sps:$4 sm:$0xff]   ;;  %v6003_v3 = vld [vmem:[%s7063_s9 + $0xd4] ss:$8 sps:$4 sm:$0xff]  }
  0x64   : > { %4158 = vmatpush1.bf16.msra.mxu1 %v5953_v20  ;;  %v5999_v60 = vld [vmem:[%s7063_s9 + $0x9c4] ss:$8 sps:$4 sm:$0xff]   ;;  %v6002_v2 = vld [vmem:[%s7063_s9 + $0x9c0] ss:$8 sps:$4 sm:$0xff]   ;;  %v6005_v4 = vld [vmem:[%s7063_s9 + $0x9d4] ss:$8 sps:$4 sm:$0xff]  }
  0x65   : > { %4527 = vmatpush1.bf16.msra.mxu0 %v5954_v21  ;;  %4159 = vmatprep.subr.bf16.mxu1 %v5955_v22  ;;  %v1020_v56 = vrot.slane %v7152_v54, %v7149_v53  ;;  %v1118_v62 = vrot.slane %v429_v58, %v7149_v53  ;;  %v6007_v7 = vld [vmem:[%s7063_s9 + $0xd0] ss:$8 sps:$4 sm:$0xff]   ;;  %v6009_v9 = vld [vmem:[%s7063_s9 + $0xe4] ss:$8 sps:$4 sm:$0xff]   ;;  %v6013_v12 = vld [vmem:[%s7063_s9 + $0xe0] ss:$8 sps:$4 sm:$0xff]   ;;  %v7184_v16 = vrot.slane %v1111_v11, %v7149_v53 }
  0x66   : > { %4528 = vmatprep.subr.bf16.mxu0 %v5957_v23  ;;  %v6008_v8 = vld [vmem:[%s7063_s9 + $0x9d0] ss:$8 sps:$4 sm:$0xff]   ;;  %v6011_v10 = vld [vmem:[%s7063_s9 + $0x9e4] ss:$8 sps:$4 sm:$0xff]   ;;  %v6014_v13 = vld [vmem:[%s7063_s9 + $0x9e0] ss:$8 sps:$4 sm:$0xff]  }
  0x67   : > { %v1028_v61 = vcombine.high %v1020_v56, %v1020_v56  ;;  %v1126_v0 = vcombine.high %v1118_v62, %v1118_v62  ;;  %v6015_v14 = vld [vmem:[%s7063_s9 + $0xf4] ss:$8 sps:$4 sm:$0xff]   ;;  %v7187_v17 = vrot.slane %v1118_v62, %v7149_v53  ;;  %v6019_v18 = vld [vmem:[%s7063_s9 + $0xf0] ss:$8 sps:$4 sm:$0xff]   ;;  %v6024_v20 = vld [vmem:[%s7063_s9 + $0x104] ss:$8 sps:$4 sm:$0xff]   ;;  %v1127_v22 = vcombine.high %v7184_v16, %v7184_v16 }
  0x68   : > { %4160 = vmatpush1.bf16.msra.mxu1 %v5959_v24  ;;  %v6017_v15 = vld [vmem:[%s7063_s9 + $0x9f4] ss:$8 sps:$4 sm:$0xff]   ;;  %v6020_v19 = vld [vmem:[%s7063_s9 + $0x9f0] ss:$8 sps:$4 sm:$0xff]   ;;  %v6028_v21 = vld [vmem:[%s7063_s9 + $0xa04] ss:$8 sps:$4 sm:$0xff]   ;;  %v7196_v23 = vrot.slane %v1020_v56, %v7149_v53 }
  0x69   : > { %4529 = vmatpush1.bf16.msra.mxu0 %v5960_v25  ;;  %4161 = vmatprep.subr.bf16.mxu1 %v5961_v26  ;;  %v7163_v63 = vrot.slane %v1028_v61, %v7149_v53  ;;  %v7170_v5 = vrot.slane %v1126_v0, %v7149_v53  ;;  %v1156_v24 = vcombine.high %v7187_v17, %v7187_v17  ;;  %v6022_v25 = vld [vmem:[%s7063_s9 + $0x100] ss:$8 sps:$4 sm:$0xff]   ;;  %v6044_v40 = vld [vmem:[%s7063_s9 + $0xa30] ss:$8 sps:$4 sm:$0xff]   ;;  %v6049_v41 = vld [vmem:[%s7063_s9 + $0x144] ss:$8 sps:$4 sm:$0xff]  }
  0x6a   : > { %4530 = vmatprep.subr.bf16.mxu0 %v5963_v27  ;;  %v6026_v26 = vld [vmem:[%s7063_s9 + $0xa00] ss:$8 sps:$4 sm:$0xff]   ;;  %v6031_v27 = vld [vmem:[%s7063_s9 + $0x114] ss:$8 sps:$4 sm:$0xff]   ;;  %v6073_v61 = vld [vmem:[%s7063_s9 + $0x184] ss:$8 sps:$4 sm:$0xff]  }
  0x6b   : > { %4181 = vmatprep.mubr.bf16.mxu1 %v7163_v63  ;;  %v1158_v6 = vcombine.high %v7170_v5, %v7170_v5  ;;  %v6058_v47 = vld [vmem:[%s7063_s9 + $0xa54] ss:$8 sps:$4 sm:$0xff]   ;;  %v6062_v56 = vld [vmem:[%s7063_s9 + $0xa60] ss:$8 sps:$4 sm:$0xff]   ;;  %v6076_v62 = vld [vmem:[%s7063_s9 + $0xa84] ss:$8 sps:$4 sm:$0xff]  }
  0x6c   : > { %4162 = vmatpush1.bf16.msra.mxu1 %v5965_v28  ;;  %v6034_v28 = vld [vmem:[%s7063_s9 + $0xa14] ss:$8 sps:$4 sm:$0xff]   ;;  %v6074_v0 = vld [vmem:[%s7063_s9 + $0xa80] ss:$8 sps:$4 sm:$0xff]   ;;  %p5758_p8 = scmp.ne.s32.totalorder %s6881_s18, 2 }
  0x6d   : > { %4531 = vmatpush1.bf16.msra.mxu0 %v5966_v29  ;;  %4163 = vmatprep.subr.bf16.mxu1 %v5967_v30  ;;  %v1060_v29 = vcombine.high %v7163_v63, %v7163_v63  ;;  %v7207_v30 = vrot.slane %v1127_v22, %v7149_v53  ;;  %v6070_v58 = vld [vmem:[%s7063_s9 + $0xa74] ss:$8 sps:$4 sm:$0xff]   ;;  %v6071_v63 = vld [vmem:[%s7063_s9 + $0x180] ss:$8 sps:$4 sm:$0xff]   ;;  %v6101_v22 = vld [vmem:[%s7063_s9 + $0x1d0] ss:$8 sps:$4 sm:$0xff]  }
  0x6e   : > { %4532 = vmatprep.subr.bf16.mxu0 %v5969_v31  ;;  %4550 = vmatprep.mubr.bf16.mxu0 %v1158_v6  ;;  %v6029_v31 = vld [vmem:[%s7063_s9 + $0x110] ss:$8 sps:$4 sm:$0xff]   ;;  %v6085_v6 = vld [vmem:[%s7063_s9 + $0x1a4] ss:$8 sps:$4 sm:$0xff]   ;;  %v6094_v11 = vld [vmem:[%s7063_s9 + $0xab4] ss:$8 sps:$4 sm:$0xff]  }
  0x6f   : > { %vm4962_vm2 = vcmask (!%p5758_p8), 1040384   ;;  %vm4963_vm3 = vsmask.f32 (!%p5758_p8), 256  ;;  %vm4965_vm4 = vcmask (!%p5758_p8), 1041409   ;;  %vm4966_vm5 = vsmask.f32 (!%p5758_p8), 1280 }
  0x70   : > { %4164 = vmatpush1.bf16.msra.mxu1 %v5971_v32  ;;  %v6032_v32 = vld [vmem:[%s7063_s9 + $0xa10] ss:$8 sps:$4 sm:$0xff]   ;;  %vm4964_vm6 = vmand (!%p5758_p8), %vm4962_vm2, %vm4963_vm3 }
  0x71   : > { %4533 = vmatpush1.bf16.msra.mxu0 %v5972_v33  ;;  %4165 = vmatprep.subr.bf16.mxu1 %v5973_v34  ;;  %v6037_v33 = vld [vmem:[%s7063_s9 + $0x124] ss:$8 sps:$4 sm:$0xff]   ;;  %vm4967_vm7 = vmand (!%p5758_p8), %vm4965_vm4, %vm4966_vm5 }
  0x72   : > { %4534 = vmatprep.subr.bf16.mxu0 %v5975_v35  ;;  %v6040_v34 = vld [vmem:[%s7063_s9 + $0xa24] ss:$8 sps:$4 sm:$0xff]   ;;  %v6035_v35 = vld [vmem:[%s7063_s9 + $0x120] ss:$8 sps:$4 sm:$0xff]   ;;  %vm4968_vm8 = vmor (!%p5758_p8), %vm4967_vm7, %vm4964_vm6 }
  0x74   : > { %4166 = vmatpush1.bf16.msra.mxu1 %v5977_v36  ;;  %v6038_v36 = vld [vmem:[%s7063_s9 + $0xa20] ss:$8 sps:$4 sm:$0xff]  }
  0x75   : > { %4535 = vmatpush1.bf16.msra.mxu0 %v5978_v37  ;;  %4167 = vmatprep.subr.bf16.mxu1 %v5979_v38  ;;  %v6043_v37 = vld [vmem:[%s7063_s9 + $0x134] ss:$8 sps:$4 sm:$0xff]  }
  0x76   : > { %4536 = vmatprep.subr.bf16.mxu0 %v5981_v39  ;;  %v6046_v38 = vld [vmem:[%s7063_s9 + $0xa34] ss:$8 sps:$4 sm:$0xff]   ;;  %v6041_v39 = vld [vmem:[%s7063_s9 + $0x130] ss:$8 sps:$4 sm:$0xff]  }
  0x78   : > { %4168 = vmatpush1.bf16.msra.mxu1 %v5983_v43  ;;  %v6052_v43 = vld [vmem:[%s7063_s9 + $0xa44] ss:$8 sps:$4 sm:$0xff]  }
  0x79   : > { %4537 = vmatpush1.bf16.msra.mxu0 %v5984_v44  ;;  %4169 = vmatprep.subr.bf16.mxu1 %v5985_v45  ;;  %v6047_v44 = vld [vmem:[%s7063_s9 + $0x140] ss:$8 sps:$4 sm:$0xff]  }
  0x7a   : > { %4538 = vmatprep.subr.bf16.mxu0 %v5987_v46  ;;  %v6050_v45 = vld [vmem:[%s7063_s9 + $0xa40] ss:$8 sps:$4 sm:$0xff]   ;;  %v6055_v46 = vld [vmem:[%s7063_s9 + $0x154] ss:$8 sps:$4 sm:$0xff]  }
  0x7c   : > { %4170 = vmatpush1.bf16.msra.mxu1 %v5989_v49  ;;  %v6053_v49 = vld [vmem:[%s7063_s9 + $0x150] ss:$8 sps:$4 sm:$0xff]  }
  0x7d   : > { %4539 = vmatpush1.bf16.msra.mxu0 %v5990_v50  ;;  %4171 = vmatprep.subr.bf16.mxu1 %v5991_v51  ;;  %v6056_v50 = vld [vmem:[%s7063_s9 + $0xa50] ss:$8 sps:$4 sm:$0xff]   ;;  %v6061_v51 = vld [vmem:[%s7063_s9 + $0x164] ss:$8 sps:$4 sm:$0xff]  }
  0x7e   : > { %4540 = vmatprep.subr.bf16.mxu0 %v5993_v52  ;;  %v6064_v52 = vld [vmem:[%s7063_s9 + $0xa64] ss:$8 sps:$4 sm:$0xff]  }
  0x80   : > { %4172 = vmatpush1.bf16.msra.mxu1 %v5995_v55  ;;  %v6059_v55 = vld [vmem:[%s7063_s9 + $0x160] ss:$8 sps:$4 sm:$0xff]  }
  0x81   : > { %4541 = vmatpush1.bf16.msra.mxu0 %v5996_v57  ;;  %4173 = vmatprep.subr.bf16.mxu1 %v5997_v59  ;;  %v6067_v57 = vld [vmem:[%s7063_s9 + $0x174] ss:$8 sps:$4 sm:$0xff]   ;;  %v6065_v59 = vld [vmem:[%s7063_s9 + $0x170] ss:$8 sps:$4 sm:$0xff]  }
  0x82   : > { %4542 = vmatprep.subr.bf16.mxu0 %v5999_v60  ;;  %v6068_v60 = vld [vmem:[%s7063_s9 + $0xa70] ss:$8 sps:$4 sm:$0xff]  }
  0x84   : > { %4174 = vmatpush1.bf16.msra.mxu1 %v6001_v1  ;;  %v6079_v1 = vld [vmem:[%s7063_s9 + $0x194] ss:$8 sps:$4 sm:$0xff]  }
  0x85   : > { %4543 = vmatpush1.bf16.msra.mxu0 %v6002_v2  ;;  %4175 = vmatprep.subr.bf16.mxu1 %v6003_v3  ;;  %v6082_v2 = vld [vmem:[%s7063_s9 + $0xa94] ss:$8 sps:$4 sm:$0xff]   ;;  %v6077_v3 = vld [vmem:[%s7063_s9 + $0x190] ss:$8 sps:$4 sm:$0xff]  }
  0x86   : > { %4544 = vmatprep.subr.bf16.mxu0 %v6005_v4  ;;  %v6080_v4 = vld [vmem:[%s7063_s9 + $0xa90] ss:$8 sps:$4 sm:$0xff]  }
  0x88   : > { %4176 = vmatpush1.bf16.msra.mxu1 %v6007_v7  ;;  %v6088_v7 = vld [vmem:[%s7063_s9 + $0xaa4] ss:$8 sps:$4 sm:$0xff]  }
  0x89   : > { %4545 = vmatpush1.bf16.msra.mxu0 %v6008_v8  ;;  %4177 = vmatprep.subr.bf16.mxu1 %v6009_v9  ;;  %v6083_v8 = vld [vmem:[%s7063_s9 + $0x1a0] ss:$8 sps:$4 sm:$0xff]  }
  0x8a   : > { %4546 = vmatprep.subr.bf16.mxu0 %v6011_v10  ;;  %v6086_v9 = vld [vmem:[%s7063_s9 + $0xaa0] ss:$8 sps:$4 sm:$0xff]   ;;  %v6091_v10 = vld [vmem:[%s7063_s9 + $0x1b4] ss:$8 sps:$4 sm:$0xff]  }
  0x8c   : > { %4178 = vmatpush1.bf16.msra.mxu1 %v6013_v12  ;;  %v6089_v12 = vld [vmem:[%s7063_s9 + $0x1b0] ss:$8 sps:$4 sm:$0xff]  }
  0x8d   : > { %4547 = vmatpush1.bf16.msra.mxu0 %v6014_v13  ;;  %4179 = vmatprep.subr.bf16.mxu1 %v6015_v14  ;;  %v6092_v13 = vld [vmem:[%s7063_s9 + $0xab0] ss:$8 sps:$4 sm:$0xff]   ;;  %v6097_v14 = vld [vmem:[%s7063_s9 + $0x1c4] ss:$8 sps:$4 sm:$0xff]  }
  0x8e   : > { %4548 = vmatprep.subr.bf16.mxu0 %v6017_v15  ;;  %v6100_v15 = vld [vmem:[%s7063_s9 + $0xac4] ss:$8 sps:$4 sm:$0xff]  }
  0x90   : > { %4180 = vmatpush1.bf16.msra.mxu1 %v6019_v18  ;;  %v6095_v18 = vld [vmem:[%s7063_s9 + $0x1c0] ss:$8 sps:$4 sm:$0xff]  }
  0x91   : > { %4549 = vmatpush1.bf16.msra.mxu0 %v6020_v19  ;;  %4190 = vmatprep.subr.bf16.mxu1 %v6024_v20  ;;  %v6098_v19 = vld [vmem:[%s7063_s9 + $0xac0] ss:$8 sps:$4 sm:$0xff]   ;;  %v6103_v20 = vld [vmem:[%s7063_s9 + $0x1d4] ss:$8 sps:$4 sm:$0xff]  }
  0x92   : > { %4559 = vmatprep.subr.bf16.mxu0 %v6028_v21  ;;  %v6106_v21 = vld [vmem:[%s7063_s9 + $0xad4] ss:$8 sps:$4 sm:$0xff]  }
  0x93   : > { %4182 = vmatmul.mubr.bf16.vlgmr.msra.gmra.mrb[0].mxu1 %v7196_v23 }
  0x94   : > { %4551 = vmatmul.mubr.bf16.vlgmr.msra.gmra.mrb[0].mxu0 %v1156_v24  ;;  %4191 = vmatpush1.bf16.msra.mxu1 %v6022_v25  ;;  %v6104_v24 = vld [vmem:[%s7063_s9 + $0xad0] ss:$8 sps:$4 sm:$0xff]   ;;  %v6109_v25 = vld [vmem:[%s7063_s9 + $0x1e4] ss:$8 sps:$4 sm:$0xff]  }
  0x95   : > { %4560 = vmatpush1.bf16.msra.mxu0 %v6026_v26  ;;  %4192 = vmatprep.subr.bf16.mxu1 %v6031_v27  ;;  %v6112_v26 = vld [vmem:[%s7063_s9 + $0xae4] ss:$8 sps:$4 sm:$0xff]   ;;  %v1013_v27 = vcombine.high %v7152_v54, %v7152_v54  ;;  %v6116_v54 = vld [vmem:[%s7063_s9 + $0xaf0] ss:$8 sps:$4 sm:$0xff]  }
  0x96   : > { %4561 = vmatprep.subr.bf16.mxu0 %v6034_v28  ;;  %4222 = vmatprep.mubr.bf16.mxu1 %v1060_v29  ;;  %v6107_v28 = vld [vmem:[%s7063_s9 + $0x1e0] ss:$8 sps:$4 sm:$0xff]  }
  0x97   : > { %4591 = vmatprep.mubr.bf16.mxu0 %v7207_v30  ;;  %v6110_v29 = vld [vmem:[%s7063_s9 + $0xae0] ss:$8 sps:$4 sm:$0xff]  }
  0x98   : > { %4193 = vmatpush1.bf16.msra.mxu1 %v6029_v31  ;;  %v6115_v31 = vld [vmem:[%s7063_s9 + $0x1f4] ss:$8 sps:$4 sm:$0xff]  }
  0x99   : > { %4562 = vmatpush1.bf16.msra.mxu0 %v6032_v32  ;;  %4194 = vmatprep.subr.bf16.mxu1 %v6037_v33  ;;  %v6118_v32 = vld [vmem:[%s7063_s9 + $0xaf4] ss:$8 sps:$4 sm:$0xff]   ;;  %v7270_v33 = vrot.slane %v1013_v27, %v7149_v53  ;;  %v6185_v27 = vld [vmem:[%s7063_s9 + $0x2b0] ss:$8 sps:$4 sm:$0xff]  }
  0x9a   : > { %4563 = vmatprep.subr.bf16.mxu0 %v6040_v34  ;;  %v6113_v34 = vld [vmem:[%s7063_s9 + $0x1f0] ss:$8 sps:$4 sm:$0xff]  }
  0x9c   : > { %4195 = vmatpush1.bf16.msra.mxu1 %v6035_v35  ;;  %v6121_v35 = vld [vmem:[%s7063_s9 + $0x204] ss:$8 sps:$4 sm:$0xff]  }
  0x9d   : > { %4564 = vmatpush1.bf16.msra.mxu0 %v6038_v36  ;;  %4196 = vmatprep.subr.bf16.mxu1 %v6043_v37  ;;  %v6124_v36 = vld [vmem:[%s7063_s9 + $0xb04] ss:$8 sps:$4 sm:$0xff]   ;;  %v1029_v37 = vcombine.high %v7270_v33, %v7270_v33 }
  0x9e   : > { %4565 = vmatprep.subr.bf16.mxu0 %v6046_v38  ;;  %v1058_v38 = vcombine.high %v7196_v23, %v7196_v23  ;;  %v1159_v23 = vcombine.high %v7207_v30, %v7207_v30  ;;  %v6131_v30 = vld [vmem:[%s7063_s9 + $0x220] ss:$8 sps:$4 sm:$0xff]  }
  0xa0   : > { %4197 = vmatpush1.bf16.msra.mxu1 %v6041_v39  ;;  %v7282_v39 = vrot.slane %v7184_v16, %v7149_v53  ;;  %v6125_v16 = vld [vmem:[%s7063_s9 + $0x210] ss:$8 sps:$4 sm:$0xff]  }
  0xa1   : > { %4566 = vmatpush1.bf16.msra.mxu0 %v6044_v40  ;;  %4198 = vmatprep.subr.bf16.mxu1 %v6049_v41  ;;  %v6119_v40 = vld [vmem:[%s7063_s9 + $0x200] ss:$8 sps:$4 sm:$0xff]  }
  0xa2   : > { %4567 = vmatprep.subr.bf16.mxu0 %v6052_v43  ;;  %v6122_v41 = vld [vmem:[%s7063_s9 + $0xb00] ss:$8 sps:$4 sm:$0xff]   ;;  %v6127_v43 = vld [vmem:[%s7063_s9 + $0x214] ss:$8 sps:$4 sm:$0xff]  }
  0xa4   : > { %4199 = vmatpush1.bf16.msra.mxu1 %v6047_v44  ;;  %v6130_v44 = vld [vmem:[%s7063_s9 + $0xb14] ss:$8 sps:$4 sm:$0xff]  }
  0xa5   : > { %4568 = vmatpush1.bf16.msra.mxu0 %v6050_v45  ;;  %4200 = vmatprep.subr.bf16.mxu1 %v6055_v46  ;;  %v7289_v45 = vrot.slane %v1029_v37, %v7149_v53  ;;  %v6128_v46 = vld [vmem:[%s7063_s9 + $0xb10] ss:$8 sps:$4 sm:$0xff]  }
  0xa6   : > { %4569 = vmatprep.subr.bf16.mxu0 %v6058_v47  ;;  %v6133_v47 = vld [vmem:[%s7063_s9 + $0x224] ss:$8 sps:$4 sm:$0xff]   ;;  %v6200_v37 = vld [vmem:[%s7063_s9 + $0xbd0] ss:$8 sps:$4 sm:$0xff]  }
  0xa8   : > { %4201 = vmatpush1.bf16.msra.mxu1 %v6053_v49  ;;  %v6136_v49 = vld [vmem:[%s7063_s9 + $0xb24] ss:$8 sps:$4 sm:$0xff]  }
  0xa9   : > { %4570 = vmatpush1.bf16.msra.mxu0 %v6056_v50  ;;  %4202 = vmatprep.subr.bf16.mxu1 %v6061_v51  ;;  %v6134_v50 = vld [vmem:[%s7063_s9 + $0xb20] ss:$8 sps:$4 sm:$0xff]   ;;  %v6139_v51 = vld [vmem:[%s7063_s9 + $0x234] ss:$8 sps:$4 sm:$0xff]  }
  0xaa   : > { %4571 = vmatprep.subr.bf16.mxu0 %v6064_v52  ;;  %v6142_v52 = vld [vmem:[%s7063_s9 + $0xb34] ss:$8 sps:$4 sm:$0xff]  }
  0xac   : > { %4203 = vmatpush1.bf16.msra.mxu1 %v6059_v55  ;;  %v6137_v55 = vld [vmem:[%s7063_s9 + $0x230] ss:$8 sps:$4 sm:$0xff]  }
  0xad   : > { %4572 = vmatpush1.bf16.msra.mxu0 %v6062_v56  ;;  %4204 = vmatprep.subr.bf16.mxu1 %v6067_v57  ;;  %v6140_v56 = vld [vmem:[%s7063_s9 + $0xb30] ss:$8 sps:$4 sm:$0xff]   ;;  %v6145_v57 = vld [vmem:[%s7063_s9 + $0x244] ss:$8 sps:$4 sm:$0xff]  }
  0xae   : > { %4573 = vmatprep.subr.bf16.mxu0 %v6070_v58  ;;  %v6148_v58 = vld [vmem:[%s7063_s9 + $0xb44] ss:$8 sps:$4 sm:$0xff]  }
  0xb0   : > { %4205 = vmatpush1.bf16.msra.mxu1 %v6065_v59  ;;  %v6143_v59 = vld [vmem:[%s7063_s9 + $0x240] ss:$8 sps:$4 sm:$0xff]  }
  0xb1   : > { %4574 = vmatpush1.bf16.msra.mxu0 %v6068_v60  ;;  %4206 = vmatprep.subr.bf16.mxu1 %v6073_v61  ;;  %v6146_v60 = vld [vmem:[%s7063_s9 + $0xb40] ss:$8 sps:$4 sm:$0xff]   ;;  %v6151_v61 = vld [vmem:[%s7063_s9 + $0x254] ss:$8 sps:$4 sm:$0xff]  }
  0xb2   : > { %4575 = vmatprep.subr.bf16.mxu0 %v6076_v62  ;;  %v6154_v62 = vld [vmem:[%s7063_s9 + $0xb54] ss:$8 sps:$4 sm:$0xff]  }
  0xb4   : > { %4207 = vmatpush1.bf16.msra.mxu1 %v6071_v63  ;;  %v6149_v63 = vld [vmem:[%s7063_s9 + $0x250] ss:$8 sps:$4 sm:$0xff]  }
  0xb5   : > { %4576 = vmatpush1.bf16.msra.mxu0 %v6074_v0  ;;  %4208 = vmatprep.subr.bf16.mxu1 %v6079_v1  ;;  %v6152_v0 = vld [vmem:[%s7063_s9 + $0xb50] ss:$8 sps:$4 sm:$0xff]   ;;  %v6157_v1 = vld [vmem:[%s7063_s9 + $0x264] ss:$8 sps:$4 sm:$0xff]  }
  0xb6   : > { %4577 = vmatprep.subr.bf16.mxu0 %v6082_v2  ;;  %v6160_v2 = vld [vmem:[%s7063_s9 + $0xb64] ss:$8 sps:$4 sm:$0xff]  }
  0xb8   : > { %4209 = vmatpush1.bf16.msra.mxu1 %v6077_v3  ;;  %v6155_v3 = vld [vmem:[%s7063_s9 + $0x260] ss:$8 sps:$4 sm:$0xff]  }
  0xb9   : > { %4578 = vmatpush1.bf16.msra.mxu0 %v6080_v4  ;;  %4210 = vmatprep.subr.bf16.mxu1 %v6085_v6  ;;  %v6158_v4 = vld [vmem:[%s7063_s9 + $0xb60] ss:$8 sps:$4 sm:$0xff]   ;;  %v6163_v6 = vld [vmem:[%s7063_s9 + $0x274] ss:$8 sps:$4 sm:$0xff]  }
  0xba   : > { %4579 = vmatprep.subr.bf16.mxu0 %v6088_v7  ;;  %v6166_v7 = vld [vmem:[%s7063_s9 + $0xb74] ss:$8 sps:$4 sm:$0xff]  }
  0xbc   : > { %4211 = vmatpush1.bf16.msra.mxu1 %v6083_v8  ;;  %v6161_v8 = vld [vmem:[%s7063_s9 + $0x270] ss:$8 sps:$4 sm:$0xff]  }
  0xbd   : > { %4580 = vmatpush1.bf16.msra.mxu0 %v6086_v9  ;;  %4212 = vmatprep.subr.bf16.mxu1 %v6091_v10  ;;  %v6164_v9 = vld [vmem:[%s7063_s9 + $0xb70] ss:$8 sps:$4 sm:$0xff]   ;;  %v6169_v10 = vld [vmem:[%s7063_s9 + $0x284] ss:$8 sps:$4 sm:$0xff]  }
  0xbe   : > { %4581 = vmatprep.subr.bf16.mxu0 %v6094_v11  ;;  %v6172_v11 = vld [vmem:[%s7063_s9 + $0xb84] ss:$8 sps:$4 sm:$0xff]  }
  0xc0   : > { %4213 = vmatpush1.bf16.msra.mxu1 %v6089_v12  ;;  %v6167_v12 = vld [vmem:[%s7063_s9 + $0x280] ss:$8 sps:$4 sm:$0xff]  }
  0xc1   : > { %4582 = vmatpush1.bf16.msra.mxu0 %v6092_v13  ;;  %4214 = vmatprep.subr.bf16.mxu1 %v6097_v14  ;;  %v6170_v13 = vld [vmem:[%s7063_s9 + $0xb80] ss:$8 sps:$4 sm:$0xff]   ;;  %v6175_v14 = vld [vmem:[%s7063_s9 + $0x294] ss:$8 sps:$4 sm:$0xff]  }
  0xc2   : > { %4583 = vmatprep.subr.bf16.mxu0 %v6100_v15  ;;  %v6178_v15 = vld [vmem:[%s7063_s9 + $0xb94] ss:$8 sps:$4 sm:$0xff]  }
  0xc4   : > { %4215 = vmatpush1.bf16.msra.mxu1 %v6095_v18  ;;  %v6173_v18 = vld [vmem:[%s7063_s9 + $0x290] ss:$8 sps:$4 sm:$0xff]  }
  0xc5   : > { %4584 = vmatpush1.bf16.msra.mxu0 %v6098_v19  ;;  %4216 = vmatprep.subr.bf16.mxu1 %v6103_v20  ;;  %v6176_v19 = vld [vmem:[%s7063_s9 + $0xb90] ss:$8 sps:$4 sm:$0xff]   ;;  %v6181_v20 = vld [vmem:[%s7063_s9 + $0x2a4] ss:$8 sps:$4 sm:$0xff]  }
  0xc6   : > { %4585 = vmatprep.subr.bf16.mxu0 %v6106_v21  ;;  %v6184_v21 = vld [vmem:[%s7063_s9 + $0xba4] ss:$8 sps:$4 sm:$0xff]  }
  0xc8   : > { %4217 = vmatpush1.bf16.msra.mxu1 %v6101_v22  ;;  %v6179_v22 = vld [vmem:[%s7063_s9 + $0x2a0] ss:$8 sps:$4 sm:$0xff]  }
  0xc9   : > { %4586 = vmatpush1.bf16.msra.mxu0 %v6104_v24  ;;  %4218 = vmatprep.subr.bf16.mxu1 %v6109_v25  ;;  %v6182_v24 = vld [vmem:[%s7063_s9 + $0xba0] ss:$8 sps:$4 sm:$0xff]   ;;  %v6187_v25 = vld [vmem:[%s7063_s9 + $0x2b4] ss:$8 sps:$4 sm:$0xff]  }
  0xca   : > { %4587 = vmatprep.subr.bf16.mxu0 %v6112_v26  ;;  %v6190_v26 = vld [vmem:[%s7063_s9 + $0xbb4] ss:$8 sps:$4 sm:$0xff]  }
  0xcc   : > { %4219 = vmatpush1.bf16.msra.mxu1 %v6107_v28  ;;  %v6188_v28 = vld [vmem:[%s7063_s9 + $0xbb0] ss:$8 sps:$4 sm:$0xff]  }
  0xcd   : > { %4588 = vmatpush1.bf16.msra.mxu0 %v6110_v29  ;;  %4220 = vmatprep.subr.bf16.mxu1 %v6115_v31  ;;  %v6193_v29 = vld [vmem:[%s7063_s9 + $0x2c4] ss:$8 sps:$4 sm:$0xff]  }
  0xce   : > { %4589 = vmatprep.subr.bf16.mxu0 %v6118_v32  ;;  %v6196_v31 = vld [vmem:[%s7063_s9 + $0xbc4] ss:$8 sps:$4 sm:$0xff]   ;;  %v6191_v32 = vld [vmem:[%s7063_s9 + $0x2c0] ss:$8 sps:$4 sm:$0xff]  }
  0xd0   : > { %4221 = vmatpush1.bf16.msra.mxu1 %v6113_v34  ;;  %v6194_v34 = vld [vmem:[%s7063_s9 + $0xbc0] ss:$8 sps:$4 sm:$0xff]  }
  0xd1   : > { %4590 = vmatpush1.bf16.msra.mxu0 %v6116_v54  ;;  %4231 = vmatprep.subr.bf16.mxu1 %v6121_v35  ;;  %v6199_v54 = vld [vmem:[%s7063_s9 + $0x2d4] ss:$8 sps:$4 sm:$0xff]  }
  0xd2   : > { %4600 = vmatprep.subr.bf16.mxu0 %v6124_v36  ;;  %v6202_v35 = vld [vmem:[%s7063_s9 + $0xbd4] ss:$8 sps:$4 sm:$0xff]   ;;  %v6197_v36 = vld [vmem:[%s7063_s9 + $0x2d0] ss:$8 sps:$4 sm:$0xff]  }
  0xd3   : > { %4223 = vmatmul.mubr.bf16.vlgmr.msra.gmra.mrb[0].mxu1 %v1058_v38  ;;  %v6205_v38 = vld [vmem:[%s7063_s9 + $0x2e4] ss:$8 sps:$4 sm:$0xff]  }
  0xd4   : > { %4592 = vmatmul.mubr.bf16.vlgmr.msra.gmra.mrb[0].mxu0 %v7282_v39  ;;  %4232 = vmatpush1.bf16.msra.mxu1 %v6119_v40  ;;  %v6208_v40 = vld [vmem:[%s7063_s9 + $0xbe4] ss:$8 sps:$4 sm:$0xff]  }
  0xd5   : > { %4601 = vmatpush1.bf16.msra.mxu0 %v6122_v41  ;;  %4233 = vmatprep.subr.bf16.mxu1 %v6127_v43  ;;  %v6203_v41 = vld [vmem:[%s7063_s9 + $0x2e0] ss:$8 sps:$4 sm:$0xff]  }
  0xd6   : > { %4602 = vmatprep.subr.bf16.mxu0 %v6130_v44  ;;  %4263 = vmatprep.mubr.bf16.mxu1 %v7289_v45  ;;  %v7349_v43 = vld [vmem:[%s7079_s27 + $0x18] sm:$0xff] }
  0xd7   : > { %4632 = vmatprep.mubr.bf16.mxu0 %v1159_v23  ;;  %v6206_v44 = vld [vmem:[%s7063_s9 + $0xbe0] ss:$8 sps:$4 sm:$0xff]   ;;  %v6211_v23 = vld [vmem:[%s7063_s9 + $0x2f4] ss:$8 sps:$4 sm:$0xff]  }
  0xd8   : > { %4234 = vmatpush1.bf16.msra.mxu1 %v6125_v16  ;;  %v6214_v16 = vld [vmem:[%s7063_s9 + $0xbf4] ss:$8 sps:$4 sm:$0xff]  }
  0xd9   : > { %4603 = vmatpush1.bf16.msra.mxu0 %v6128_v46  ;;  %4235 = vmatprep.subr.bf16.mxu1 %v6133_v47  ;;  %v7356_v46 = vrot.slane %v7349_v43, %v7149_v53  ;;  %v6209_v47 = vld [vmem:[%s7063_s9 + $0x2f0] ss:$8 sps:$4 sm:$0xff]  }
  0xda   : > { %4604 = vmatprep.subr.bf16.mxu0 %v6136_v49  ;;  %v6212_v49 = vld [vmem:[%s7063_s9 + $0xbf0] ss:$8 sps:$4 sm:$0xff]  }
  0xdc   : > { %4236 = vmatpush1.bf16.msra.mxu1 %v6131_v30  ;;  %v6217_v30 = vld [vmem:[%s7063_s9 + $0x304] ss:$8 sps:$4 sm:$0xff]  }
  0xdd   : > { %4605 = vmatpush1.bf16.msra.mxu0 %v6134_v50  ;;  %4237 = vmatprep.subr.bf16.mxu1 %v6139_v51  ;;  %v6220_v50 = vld [vmem:[%s7063_s9 + $0xc04] ss:$8 sps:$4 sm:$0xff]   ;;  %v1175_v51 = vcombine.high %v7356_v46, %v7356_v46 }
  0xde   : > { %4606 = vmatprep.subr.bf16.mxu0 %v6142_v52  ;;  %v6215_v52 = vld [vmem:[%s7063_s9 + $0x300] ss:$8 sps:$4 sm:$0xff]  }
  0xe0   : > { %4238 = vmatpush1.bf16.msra.mxu1 %v6137_v55  ;;  %v7367_v55 = vrot.slane %v7270_v33, %v7149_v53  ;;  %v7377_v33 = vrot.slane %v1175_v51, %v7149_v53  ;;  %v6293_v51 = vld [vmem:[%s7063_s9 + $0x3d0] ss:$8 sps:$4 sm:$0xff]  }
  0xe1   : > { %4607 = vmatpush1.bf16.msra.mxu0 %v6140_v56  ;;  %4239 = vmatprep.subr.bf16.mxu1 %v6145_v57  ;;  %v1157_v56 = vcombine.high %v7282_v39, %v7282_v39  ;;  %v6218_v57 = vld [vmem:[%s7063_s9 + $0xc00] ss:$8 sps:$4 sm:$0xff]   ;;  %v6221_v39 = vld [vmem:[%s7063_s9 + $0x310] ss:$8 sps:$4 sm:$0xff]  }
  0xe2   : > { %4608 = vmatprep.subr.bf16.mxu0 %v6148_v58  ;;  %v6223_v58 = vld [vmem:[%s7063_s9 + $0x314] ss:$8 sps:$4 sm:$0xff]  }
  0xe4   : > { %4240 = vmatpush1.bf16.msra.mxu1 %v6143_v59  ;;  %v6226_v59 = vld [vmem:[%s7063_s9 + $0xc14] ss:$8 sps:$4 sm:$0xff]  }
  0xe5   : > { %4609 = vmatpush1.bf16.msra.mxu0 %v6146_v60  ;;  %4241 = vmatprep.subr.bf16.mxu1 %v6151_v61  ;;  %v1061_v60 = vcombine.high %v7289_v45, %v7289_v45  ;;  %v6224_v61 = vld [vmem:[%s7063_s9 + $0xc10] ss:$8 sps:$4 sm:$0xff]   ;;  %v6232_v45 = vld [vmem:[%s7063_s9 + $0xc24] ss:$8 sps:$4 sm:$0xff]  }
  0xe6   : > { %4610 = vmatprep.subr.bf16.mxu0 %v6154_v62  ;;  %v6229_v62 = vld [vmem:[%s7063_s9 + $0x324] ss:$8 sps:$4 sm:$0xff]  }
  0xe8   : > { %4242 = vmatpush1.bf16.msra.mxu1 %v6149_v63  ;;  %v6227_v63 = vld [vmem:[%s7063_s9 + $0x320] ss:$8 sps:$4 sm:$0xff]  }
  0xe9   : > { %4611 = vmatpush1.bf16.msra.mxu0 %v6152_v0  ;;  %4243 = vmatprep.subr.bf16.mxu1 %v6157_v1  ;;  %v6230_v0 = vld [vmem:[%s7063_s9 + $0xc20] ss:$8 sps:$4 sm:$0xff]   ;;  %v6235_v1 = vld [vmem:[%s7063_s9 + $0x334] ss:$8 sps:$4 sm:$0xff]  }
  0xea   : > { %4612 = vmatprep.subr.bf16.mxu0 %v6160_v2  ;;  %v6238_v2 = vld [vmem:[%s7063_s9 + $0xc34] ss:$8 sps:$4 sm:$0xff]  }
  0xec   : > { %4244 = vmatpush1.bf16.msra.mxu1 %v6155_v3  ;;  %v6233_v3 = vld [vmem:[%s7063_s9 + $0x330] ss:$8 sps:$4 sm:$0xff]  }
  0xed   : > { %4613 = vmatpush1.bf16.msra.mxu0 %v6158_v4  ;;  %4245 = vmatprep.subr.bf16.mxu1 %v6163_v6  ;;  %v6236_v4 = vld [vmem:[%s7063_s9 + $0xc30] ss:$8 sps:$4 sm:$0xff]   ;;  %v6241_v6 = vld [vmem:[%s7063_s9 + $0x344] ss:$8 sps:$4 sm:$0xff]  }
  0xee   : > { %4614 = vmatprep.subr.bf16.mxu0 %v6166_v7  ;;  %v6244_v7 = vld [vmem:[%s7063_s9 + $0xc44] ss:$8 sps:$4 sm:$0xff]  }
  0xf0   : > { %4246 = vmatpush1.bf16.msra.mxu1 %v6161_v8  ;;  %v6239_v8 = vld [vmem:[%s7063_s9 + $0x340] ss:$8 sps:$4 sm:$0xff]  }
  0xf1   : > { %4615 = vmatpush1.bf16.msra.mxu0 %v6164_v9  ;;  %4247 = vmatprep.subr.bf16.mxu1 %v6169_v10  ;;  %v6242_v9 = vld [vmem:[%s7063_s9 + $0xc40] ss:$8 sps:$4 sm:$0xff]   ;;  %v6247_v10 = vld [vmem:[%s7063_s9 + $0x354] ss:$8 sps:$4 sm:$0xff]  }
  0xf2   : > { %4616 = vmatprep.subr.bf16.mxu0 %v6172_v11  ;;  %v6250_v11 = vld [vmem:[%s7063_s9 + $0xc54] ss:$8 sps:$4 sm:$0xff]  }
  0xf4   : > { %4248 = vmatpush1.bf16.msra.mxu1 %v6167_v12  ;;  %v6245_v12 = vld [vmem:[%s7063_s9 + $0x350] ss:$8 sps:$4 sm:$0xff]  }
  0xf5   : > { %4617 = vmatpush1.bf16.msra.mxu0 %v6170_v13  ;;  %4249 = vmatprep.subr.bf16.mxu1 %v6175_v14  ;;  %v6248_v13 = vld [vmem:[%s7063_s9 + $0xc50] ss:$8 sps:$4 sm:$0xff]   ;;  %v6253_v14 = vld [vmem:[%s7063_s9 + $0x364] ss:$8 sps:$4 sm:$0xff]  }
  0xf6   : > { %4618 = vmatprep.subr.bf16.mxu0 %v6178_v15  ;;  %v6256_v15 = vld [vmem:[%s7063_s9 + $0xc64] ss:$8 sps:$4 sm:$0xff]  }
  0xf8   : > { %4250 = vmatpush1.bf16.msra.mxu1 %v6173_v18  ;;  %v6251_v18 = vld [vmem:[%s7063_s9 + $0x360] ss:$8 sps:$4 sm:$0xff]  }
  0xf9   : > { %4619 = vmatpush1.bf16.msra.mxu0 %v6176_v19  ;;  %4251 = vmatprep.subr.bf16.mxu1 %v6181_v20  ;;  %v6254_v19 = vld [vmem:[%s7063_s9 + $0xc60] ss:$8 sps:$4 sm:$0xff]   ;;  %v6259_v20 = vld [vmem:[%s7063_s9 + $0x374] ss:$8 sps:$4 sm:$0xff]  }
  0xfa   : > { %4620 = vmatprep.subr.bf16.mxu0 %v6184_v21  ;;  %v6262_v21 = vld [vmem:[%s7063_s9 + $0xc74] ss:$8 sps:$4 sm:$0xff]  }
  0xfc   : > { %4252 = vmatpush1.bf16.msra.mxu1 %v6179_v22  ;;  %v6257_v22 = vld [vmem:[%s7063_s9 + $0x370] ss:$8 sps:$4 sm:$0xff]  }
  0xfd   : > { %4621 = vmatpush1.bf16.msra.mxu0 %v6182_v24  ;;  %4253 = vmatprep.subr.bf16.mxu1 %v6187_v25  ;;  %v6260_v24 = vld [vmem:[%s7063_s9 + $0xc70] ss:$8 sps:$4 sm:$0xff]   ;;  %v6265_v25 = vld [vmem:[%s7063_s9 + $0x384] ss:$8 sps:$4 sm:$0xff]  }
  0xfe   : > { %4622 = vmatprep.subr.bf16.mxu0 %v6190_v26  ;;  %v6268_v26 = vld [vmem:[%s7063_s9 + $0xc84] ss:$8 sps:$4 sm:$0xff]  }
 0x100   : > { %4254 = vmatpush1.bf16.msra.mxu1 %v6185_v27  ;;  %v6263_v27 = vld [vmem:[%s7063_s9 + $0x380] ss:$8 sps:$4 sm:$0xff]  }
 0x101   : > { %4623 = vmatpush1.bf16.msra.mxu0 %v6188_v28  ;;  %4255 = vmatprep.subr.bf16.mxu1 %v6193_v29  ;;  %v6266_v28 = vld [vmem:[%s7063_s9 + $0xc80] ss:$8 sps:$4 sm:$0xff]   ;;  %v6271_v29 = vld [vmem:[%s7063_s9 + $0x394] ss:$8 sps:$4 sm:$0xff]  }
 0x102   : > { %4624 = vmatprep.subr.bf16.mxu0 %v6196_v31  ;;  %v6274_v31 = vld [vmem:[%s7063_s9 + $0xc94] ss:$8 sps:$4 sm:$0xff]  }
 0x104   : > { %4256 = vmatpush1.bf16.msra.mxu1 %v6191_v32  ;;  %v6269_v32 = vld [vmem:[%s7063_s9 + $0x390] ss:$8 sps:$4 sm:$0xff]  }
 0x105   : > { %4625 = vmatpush1.bf16.msra.mxu0 %v6194_v34  ;;  %4257 = vmatprep.subr.bf16.mxu1 %v6199_v54  ;;  %v6272_v34 = vld [vmem:[%s7063_s9 + $0xc90] ss:$8 sps:$4 sm:$0xff]   ;;  %v6277_v54 = vld [vmem:[%s7063_s9 + $0x3a4] ss:$8 sps:$4 sm:$0xff]  }
 0x106   : > { %4626 = vmatprep.subr.bf16.mxu0 %v6202_v35  ;;  %v6280_v35 = vld [vmem:[%s7063_s9 + $0xca4] ss:$8 sps:$4 sm:$0xff]  }
 0x108   : > { %4258 = vmatpush1.bf16.msra.mxu1 %v6197_v36  ;;  %v6275_v36 = vld [vmem:[%s7063_s9 + $0x3a0] ss:$8 sps:$4 sm:$0xff]  }
 0x109   : > { %4627 = vmatpush1.bf16.msra.mxu0 %v6200_v37  ;;  %4259 = vmatprep.subr.bf16.mxu1 %v6205_v38  ;;  %v6278_v37 = vld [vmem:[%s7063_s9 + $0xca0] ss:$8 sps:$4 sm:$0xff]   ;;  %v6283_v38 = vld [vmem:[%s7063_s9 + $0x3b4] ss:$8 sps:$4 sm:$0xff]  }
 0x10a   : > { %4628 = vmatprep.subr.bf16.mxu0 %v6208_v40  ;;  %v6286_v40 = vld [vmem:[%s7063_s9 + $0xcb4] ss:$8 sps:$4 sm:$0xff]  }
 0x10c   : > { %4260 = vmatpush1.bf16.msra.mxu1 %v6203_v41  ;;  %v6281_v41 = vld [vmem:[%s7063_s9 + $0x3b0] ss:$8 sps:$4 sm:$0xff]  }
 0x10d   : > { %4629 = vmatpush1.bf16.msra.mxu0 %v6206_v44  ;;  %4261 = vmatprep.subr.bf16.mxu1 %v6211_v23  ;;  %v6284_v44 = vld [vmem:[%s7063_s9 + $0xcb0] ss:$8 sps:$4 sm:$0xff]   ;;  %v6289_v23 = vld [vmem:[%s7063_s9 + $0x3c4] ss:$8 sps:$4 sm:$0xff]  }
 0x10e   : > { %4630 = vmatprep.subr.bf16.mxu0 %v6214_v16  ;;  %v6292_v16 = vld [vmem:[%s7063_s9 + $0xcc4] ss:$8 sps:$4 sm:$0xff]  }
 0x110   : > { %4262 = vmatpush1.bf16.msra.mxu1 %v6209_v47  ;;  %v6287_v47 = vld [vmem:[%s7063_s9 + $0x3c0] ss:$8 sps:$4 sm:$0xff]  }
 0x111   : > { %4631 = vmatpush1.bf16.msra.mxu0 %v6212_v49  ;;  %4272 = vmatprep.subr.bf16.mxu1 %v6217_v30  ;;  %v6290_v49 = vld [vmem:[%s7063_s9 + $0xcc0] ss:$8 sps:$4 sm:$0xff]   ;;  %v6295_v30 = vld [vmem:[%s7063_s9 + $0x3d4] ss:$8 sps:$4 sm:$0xff]  }
 0x112   : > { %4641 = vmatprep.subr.bf16.mxu0 %v6220_v50  ;;  %v6298_v50 = vld [vmem:[%s7063_s9 + $0xcd4] ss:$8 sps:$4 sm:$0xff]  }
 0x113   : > { %4264 = vmatmul.mubr.bf16.vlgmr.msra.gmra.mrb[0].mxu1 %v7367_v55 }
 0x114   : > { %4633 = vmatmul.mubr.bf16.vlgmr.msra.gmra.mrb[0].mxu0 %v1157_v56  ;;  %4273 = vmatpush1.bf16.msra.mxu1 %v6215_v52  ;;  %v6296_v52 = vld [vmem:[%s7063_s9 + $0xcd0] ss:$8 sps:$4 sm:$0xff]   ;;  %v6301_v56 = vld [vmem:[%s7063_s9 + $0x3e4] ss:$8 sps:$4 sm:$0xff]  }
 0x115   : > { %4642 = vmatpush1.bf16.msra.mxu0 %v6218_v57  ;;  %4274 = vmatprep.subr.bf16.mxu1 %v6223_v58  ;;  %v6304_v57 = vld [vmem:[%s7063_s9 + $0xce4] ss:$8 sps:$4 sm:$0xff]   ;;  %v6299_v58 = vld [vmem:[%s7063_s9 + $0x3e0] ss:$8 sps:$4 sm:$0xff]  }
 0x116   : > { %4643 = vmatprep.subr.bf16.mxu0 %v6226_v59  ;;  %4304 = vmatprep.mubr.bf16.mxu1 %v1061_v60  ;;  %v6302_v59 = vld [vmem:[%s7063_s9 + $0xce0] ss:$8 sps:$4 sm:$0xff]   ;;  %v7436_v60 = vld [vmem:[%s7079_s27 + $0x8] sm:$0xff] }
 0x117   : > { %4673 = vmatprep.mubr.bf16.mxu0 %v7377_v33 }
 0x118   : > { %4275 = vmatpush1.bf16.msra.mxu1 %v6221_v39  ;;  %v6307_v39 = vld [vmem:[%s7063_s9 + $0x3f4] ss:$8 sps:$4 sm:$0xff]  }
 0x119   : > { %4644 = vmatpush1.bf16.msra.mxu0 %v6224_v61  ;;  %4276 = vmatprep.subr.bf16.mxu1 %v6229_v62  ;;  %v6310_v61 = vld [vmem:[%s7063_s9 + $0xcf4] ss:$8 sps:$4 sm:$0xff]   ;;  %v7442_v62 = vrot.slane %v7436_v60, %v7149_v53 }
 0x11a   : > { %4645 = vmatprep.subr.bf16.mxu0 %v6232_v45  ;;  %v6305_v45 = vld [vmem:[%s7063_s9 + $0x3f0] ss:$8 sps:$4 sm:$0xff]  }
 0x11c   : > { %4277 = vmatpush1.bf16.msra.mxu1 %v6227_v63  ;;  %v6308_v63 = vld [vmem:[%s7063_s9 + $0xcf0] ss:$8 sps:$4 sm:$0xff]  }
 0x11d   : > { %4646 = vmatpush1.bf16.msra.mxu0 %v6230_v0  ;;  %4278 = vmatprep.subr.bf16.mxu1 %v6235_v1  ;;  %v6313_v0 = vld [vmem:[%s7063_s9 + $0x404] ss:$8 sps:$4 sm:$0xff]  }
 0x11e   : > { %4647 = vmatprep.subr.bf16.mxu0 %v6238_v2  ;;  %v6316_v1 = vld [vmem:[%s7063_s9 + $0xd04] ss:$8 sps:$4 sm:$0xff]   ;;  %v1077_v2 = vcombine.high %v7442_v62, %v7442_v62 }
 0x120   : > { %4279 = vmatpush1.bf16.msra.mxu1 %v6233_v3  ;;  %v6311_v3 = vld [vmem:[%s7063_s9 + $0x400] ss:$8 sps:$4 sm:$0xff]  }
 0x121   : > { %4648 = vmatpush1.bf16.msra.mxu0 %v6236_v4  ;;  %4280 = vmatprep.subr.bf16.mxu1 %v6241_v6  ;;  %v6314_v4 = vld [vmem:[%s7063_s9 + $0xd00] ss:$8 sps:$4 sm:$0xff]   ;;  %v1059_v6 = vcombine.high %v7367_v55, %v7367_v55  ;;  %v6320_v55 = vld [vmem:[%s7063_s9 + $0xd10] ss:$8 sps:$4 sm:$0xff]  }
 0x122   : > { %4649 = vmatprep.subr.bf16.mxu0 %v6244_v7  ;;  %v7456_v7 = vrot.slane %v7356_v46, %v7149_v53  ;;  %v6317_v46 = vld [vmem:[%s7063_s9 + $0x410] ss:$8 sps:$4 sm:$0xff]  }
 0x124   : > { %4281 = vmatpush1.bf16.msra.mxu1 %v6239_v8  ;;  %v6319_v8 = vld [vmem:[%s7063_s9 + $0x414] ss:$8 sps:$4 sm:$0xff]  }
 0x125   : > { %4650 = vmatpush1.bf16.msra.mxu0 %v6242_v9  ;;  %4282 = vmatprep.subr.bf16.mxu1 %v6247_v10  ;;  %v6322_v9 = vld [vmem:[%s7063_s9 + $0xd14] ss:$8 sps:$4 sm:$0xff]   ;;  %v7461_v10 = vrot.slane %v1077_v2, %v7149_v53 }
 0x126   : > { %4651 = vmatprep.subr.bf16.mxu0 %v6250_v11  ;;  %v1207_v11 = vcombine.high %v7377_v33, %v7377_v33  ;;  %v6323_v33 = vld [vmem:[%s7063_s9 + $0x420] ss:$8 sps:$4 sm:$0xff]   ;;  %v6394_v2 = vld [vmem:[%s7063_s9 + $0xdd4] ss:$8 sps:$4 sm:$0xff]  }
 0x128   : > { %4283 = vmatpush1.bf16.msra.mxu1 %v6245_v12  ;;  %v6325_v12 = vld [vmem:[%s7063_s9 + $0x424] ss:$8 sps:$4 sm:$0xff]  }
 0x129   : > { %4652 = vmatpush1.bf16.msra.mxu0 %v6248_v13  ;;  %4284 = vmatprep.subr.bf16.mxu1 %v6253_v14  ;;  %v6328_v13 = vld [vmem:[%s7063_s9 + $0xd24] ss:$8 sps:$4 sm:$0xff]   ;;  %v6326_v14 = vld [vmem:[%s7063_s9 + $0xd20] ss:$8 sps:$4 sm:$0xff]  }
 0x12a   : > { %4653 = vmatprep.subr.bf16.mxu0 %v6256_v15  ;;  %v6331_v15 = vld [vmem:[%s7063_s9 + $0x434] ss:$8 sps:$4 sm:$0xff]  }
 0x12c   : > { %4285 = vmatpush1.bf16.msra.mxu1 %v6251_v18  ;;  %v6334_v18 = vld [vmem:[%s7063_s9 + $0xd34] ss:$8 sps:$4 sm:$0xff]  }
 0x12d   : > { %4654 = vmatpush1.bf16.msra.mxu0 %v6254_v19  ;;  %4286 = vmatprep.subr.bf16.mxu1 %v6259_v20  ;;  %v6329_v19 = vld [vmem:[%s7063_s9 + $0x430] ss:$8 sps:$4 sm:$0xff]  }
 0x12e   : > { %4655 = vmatprep.subr.bf16.mxu0 %v6262_v21  ;;  %v6332_v20 = vld [vmem:[%s7063_s9 + $0xd30] ss:$8 sps:$4 sm:$0xff]   ;;  %v6337_v21 = vld [vmem:[%s7063_s9 + $0x444] ss:$8 sps:$4 sm:$0xff]  }
 0x130   : > { %4287 = vmatpush1.bf16.msra.mxu1 %v6257_v22  ;;  %v6340_v22 = vld [vmem:[%s7063_s9 + $0xd44] ss:$8 sps:$4 sm:$0xff]  }
 0x131   : > { %4656 = vmatpush1.bf16.msra.mxu0 %v6260_v24  ;;  %4288 = vmatprep.subr.bf16.mxu1 %v6265_v25  ;;  %v6335_v24 = vld [vmem:[%s7063_s9 + $0x440] ss:$8 sps:$4 sm:$0xff]  }
 0x132   : > { %4657 = vmatprep.subr.bf16.mxu0 %v6268_v26  ;;  %v6338_v25 = vld [vmem:[%s7063_s9 + $0xd40] ss:$8 sps:$4 sm:$0xff]   ;;  %v6343_v26 = vld [vmem:[%s7063_s9 + $0x454] ss:$8 sps:$4 sm:$0xff]  }
 0x134   : > { %4289 = vmatpush1.bf16.msra.mxu1 %v6263_v27  ;;  %v6346_v27 = vld [vmem:[%s7063_s9 + $0xd54] ss:$8 sps:$4 sm:$0xff]  }
 0x135   : > { %4658 = vmatpush1.bf16.msra.mxu0 %v6266_v28  ;;  %4290 = vmatprep.subr.bf16.mxu1 %v6271_v29  ;;  %v6341_v28 = vld [vmem:[%s7063_s9 + $0x450] ss:$8 sps:$4 sm:$0xff]  }
 0x136   : > { %4659 = vmatprep.subr.bf16.mxu0 %v6274_v31  ;;  %v6344_v29 = vld [vmem:[%s7063_s9 + $0xd50] ss:$8 sps:$4 sm:$0xff]   ;;  %v6349_v31 = vld [vmem:[%s7063_s9 + $0x464] ss:$8 sps:$4 sm:$0xff]  }
 0x138   : > { %4291 = vmatpush1.bf16.msra.mxu1 %v6269_v32  ;;  %v6352_v32 = vld [vmem:[%s7063_s9 + $0xd64] ss:$8 sps:$4 sm:$0xff]  }
 0x139   : > { %4660 = vmatpush1.bf16.msra.mxu0 %v6272_v34  ;;  %4292 = vmatprep.subr.bf16.mxu1 %v6277_v54  ;;  %v6347_v34 = vld [vmem:[%s7063_s9 + $0x460] ss:$8 sps:$4 sm:$0xff]  }
 0x13a   : > { %4661 = vmatprep.subr.bf16.mxu0 %v6280_v35  ;;  %v6350_v54 = vld [vmem:[%s7063_s9 + $0xd60] ss:$8 sps:$4 sm:$0xff]   ;;  %v6355_v35 = vld [vmem:[%s7063_s9 + $0x474] ss:$8 sps:$4 sm:$0xff]  }
 0x13c   : > { %4293 = vmatpush1.bf16.msra.mxu1 %v6275_v36  ;;  %v6358_v36 = vld [vmem:[%s7063_s9 + $0xd74] ss:$8 sps:$4 sm:$0xff]  }
 0x13d   : > { %4662 = vmatpush1.bf16.msra.mxu0 %v6278_v37  ;;  %4294 = vmatprep.subr.bf16.mxu1 %v6283_v38  ;;  %v6353_v37 = vld [vmem:[%s7063_s9 + $0x470] ss:$8 sps:$4 sm:$0xff]  }
 0x13e   : > { %4663 = vmatprep.subr.bf16.mxu0 %v6286_v40  ;;  %v6356_v38 = vld [vmem:[%s7063_s9 + $0xd70] ss:$8 sps:$4 sm:$0xff]   ;;  %v6361_v40 = vld [vmem:[%s7063_s9 + $0x484] ss:$8 sps:$4 sm:$0xff]  }
 0x140   : > { %4295 = vmatpush1.bf16.msra.mxu1 %v6281_v41  ;;  %v6364_v41 = vld [vmem:[%s7063_s9 + $0xd84] ss:$8 sps:$4 sm:$0xff]  }
 0x141   : > { %4664 = vmatpush1.bf16.msra.mxu0 %v6284_v44  ;;  %4296 = vmatprep.subr.bf16.mxu1 %v6289_v23  ;;  %v6359_v44 = vld [vmem:[%s7063_s9 + $0x480] ss:$8 sps:$4 sm:$0xff]  }
 0x142   : > { %4665 = vmatprep.subr.bf16.mxu0 %v6292_v16  ;;  %v6362_v23 = vld [vmem:[%s7063_s9 + $0xd80] ss:$8 sps:$4 sm:$0xff]   ;;  %v6367_v16 = vld [vmem:[%s7063_s9 + $0x494] ss:$8 sps:$4 sm:$0xff]  }
 0x144   : > { %4297 = vmatpush1.bf16.msra.mxu1 %v6287_v47  ;;  %v6370_v47 = vld [vmem:[%s7063_s9 + $0xd94] ss:$8 sps:$4 sm:$0xff]  }
 0x145   : > { %4666 = vmatpush1.bf16.msra.mxu0 %v6290_v49  ;;  %4298 = vmatprep.subr.bf16.mxu1 %v6295_v30  ;;  %v6365_v49 = vld [vmem:[%s7063_s9 + $0x490] ss:$8 sps:$4 sm:$0xff]  }
 0x146   : > { %4667 = vmatprep.subr.bf16.mxu0 %v6298_v50  ;;  %v6368_v30 = vld [vmem:[%s7063_s9 + $0xd90] ss:$8 sps:$4 sm:$0xff]   ;;  %v6373_v50 = vld [vmem:[%s7063_s9 + $0x4a4] ss:$8 sps:$4 sm:$0xff]  }
 0x148   : > { %4299 = vmatpush1.bf16.msra.mxu1 %v6293_v51  ;;  %v6376_v51 = vld [vmem:[%s7063_s9 + $0xda4] ss:$8 sps:$4 sm:$0xff]  }
 0x149   : > { %4668 = vmatpush1.bf16.msra.mxu0 %v6296_v52  ;;  %4300 = vmatprep.subr.bf16.mxu1 %v6301_v56  ;;  %v6371_v52 = vld [vmem:[%s7063_s9 + $0x4a0] ss:$8 sps:$4 sm:$0xff]  }
 0x14a   : > { %4669 = vmatprep.subr.bf16.mxu0 %v6304_v57  ;;  %v6374_v56 = vld [vmem:[%s7063_s9 + $0xda0] ss:$8 sps:$4 sm:$0xff]   ;;  %v6379_v57 = vld [vmem:[%s7063_s9 + $0x4b4] ss:$8 sps:$4 sm:$0xff]  }
 0x14c   : > { %4301 = vmatpush1.bf16.msra.mxu1 %v6299_v58  ;;  %v6382_v58 = vld [vmem:[%s7063_s9 + $0xdb4] ss:$8 sps:$4 sm:$0xff]  }
 0x14d   : > { %4670 = vmatpush1.bf16.msra.mxu0 %v6302_v59  ;;  %4302 = vmatprep.subr.bf16.mxu1 %v6307_v39  ;;  %v6377_v59 = vld [vmem:[%s7063_s9 + $0x4b0] ss:$8 sps:$4 sm:$0xff]  }
 0x14e   : > { %4671 = vmatprep.subr.bf16.mxu0 %v6310_v61  ;;  %v6380_v39 = vld [vmem:[%s7063_s9 + $0xdb0] ss:$8 sps:$4 sm:$0xff]   ;;  %v6385_v61 = vld [vmem:[%s7063_s9 + $0x4c4] ss:$8 sps:$4 sm:$0xff]  }
 0x150   : > { %4303 = vmatpush1.bf16.msra.mxu1 %v6305_v45  ;;  %v6388_v45 = vld [vmem:[%s7063_s9 + $0xdc4] ss:$8 sps:$4 sm:$0xff]  }
 0x151   : > { %4672 = vmatpush1.bf16.msra.mxu0 %v6308_v63  ;;  %4313 = vmatprep.subr.bf16.mxu1 %v6313_v0  ;;  %v6383_v63 = vld [vmem:[%s7063_s9 + $0x4c0] ss:$8 sps:$4 sm:$0xff]  }
 0x152   : > { %4682 = vmatprep.subr.bf16.mxu0 %v6316_v1  ;;  %v6386_v0 = vld [vmem:[%s7063_s9 + $0xdc0] ss:$8 sps:$4 sm:$0xff]   ;;  %v6391_v1 = vld [vmem:[%s7063_s9 + $0x4d4] ss:$8 sps:$4 sm:$0xff]  }
 0x153   : > { %4305 = vmatmul.mubr.bf16.vlgmr.msra.gmra.mrb[0].mxu1 %v1059_v6  ;;  %v6397_v6 = vld [vmem:[%s7063_s9 + $0x4e4] ss:$8 sps:$4 sm:$0xff]  }
 0x154   : > { %4674 = vmatmul.mubr.bf16.vlgmr.msra.gmra.mrb[0].mxu0 %v7456_v7  ;;  %4314 = vmatpush1.bf16.msra.mxu1 %v6311_v3  ;;  %v6389_v3 = vld [vmem:[%s7063_s9 + $0x4d0] ss:$8 sps:$4 sm:$0xff]  }
 0x155   : > { %4683 = vmatpush1.bf16.msra.mxu0 %v6314_v4  ;;  %4315 = vmatprep.subr.bf16.mxu1 %v6319_v8  ;;  %v6392_v4 = vld [vmem:[%s7063_s9 + $0xdd0] ss:$8 sps:$4 sm:$0xff]   ;;  %v6400_v8 = vld [vmem:[%s7063_s9 + $0xde4] ss:$8 sps:$4 sm:$0xff]  }
 0x156   : > { %4684 = vmatprep.subr.bf16.mxu0 %v6322_v9  ;;  %4345 = vmatprep.mubr.bf16.mxu1 %v7461_v10  ;;  %v1160_v9 = vcombine.high %v7349_v43, %v7349_v43  ;;  %v6404_v43 = vld [vmem:[%s7063_s9 + $0xdf0] ss:$8 sps:$4 sm:$0xff]  }
 0x157   : > { %4714 = vmatprep.mubr.bf16.mxu0 %v1207_v11  ;;  %v6395_v11 = vld [vmem:[%s7063_s9 + $0x4e0] ss:$8 sps:$4 sm:$0xff]  }
 0x158   : > { %4316 = vmatpush1.bf16.msra.mxu1 %v6317_v46  ;;  %v6398_v46 = vld [vmem:[%s7063_s9 + $0xde0] ss:$8 sps:$4 sm:$0xff]  }
 0x159   : > { %4685 = vmatpush1.bf16.msra.mxu0 %v6320_v55  ;;  %4317 = vmatprep.subr.bf16.mxu1 %v6325_v12  ;;  %v6403_v55 = vld [vmem:[%s7063_s9 + $0x4f4] ss:$8 sps:$4 sm:$0xff]  }
 0x15a   : > { %4686 = vmatprep.subr.bf16.mxu0 %v6328_v13  ;;  %v6406_v12 = vld [vmem:[%s7063_s9 + $0xdf4] ss:$8 sps:$4 sm:$0xff]   ;;  %v7526_v13 = vrot.slane %v1160_v9, %v7149_v53 }
 0x15b   : > { %v6478_v9 = vld [vmem:[%s7063_s9 + $0xeb4] ss:$8 sps:$4 sm:$0xff]  }
 0x15c   : > { %4318 = vmatpush1.bf16.msra.mxu1 %v6323_v33  ;;  %v6401_v33 = vld [vmem:[%s7063_s9 + $0x4f0] ss:$8 sps:$4 sm:$0xff]  }
 0x15d   : > { %4687 = vmatpush1.bf16.msra.mxu0 %v6326_v14  ;;  %4319 = vmatprep.subr.bf16.mxu1 %v6331_v15  ;;  %v6409_v14 = vld [vmem:[%s7063_s9 + $0x504] ss:$8 sps:$4 sm:$0xff]  }
 0x15e   : > { %4688 = vmatprep.subr.bf16.mxu0 %v6334_v18  ;;  %v6412_v15 = vld [vmem:[%s7063_s9 + $0xe04] ss:$8 sps:$4 sm:$0xff]   ;;  %v1176_v18 = vcombine.high %v7526_v13, %v7526_v13 }
 0x160   : > { %4320 = vmatpush1.bf16.msra.mxu1 %v6329_v19  ;;  %v7536_v19 = vrot.slane %v7442_v62, %v7149_v53  ;;  %v7547_v62 = vrot.slane %v1176_v18, %v7149_v53  ;;  %v6485_v18 = vld [vmem:[%s7063_s9 + $0x5d0] ss:$8 sps:$4 sm:$0xff]  }
 0x161   : > { %4689 = vmatpush1.bf16.msra.mxu0 %v6332_v20  ;;  %4321 = vmatprep.subr.bf16.mxu1 %v6337_v21  ;;  %v1205_v20 = vcombine.high %v7456_v7, %v7456_v7  ;;  %v6407_v21 = vld [vmem:[%s7063_s9 + $0x500] ss:$8 sps:$4 sm:$0xff]   ;;  %v6413_v7 = vld [vmem:[%s7063_s9 + $0x510] ss:$8 sps:$4 sm:$0xff]  }
 0x162   : > { %4690 = vmatprep.subr.bf16.mxu0 %v6340_v22  ;;  %v6410_v22 = vld [vmem:[%s7063_s9 + $0xe00] ss:$8 sps:$4 sm:$0xff]  }
 0x164   : > { %4322 = vmatpush1.bf16.msra.mxu1 %v6335_v24  ;;  %v6415_v24 = vld [vmem:[%s7063_s9 + $0x514] ss:$8 sps:$4 sm:$0xff]  }
 0x165   : > { %4691 = vmatpush1.bf16.msra.mxu0 %v6338_v25  ;;  %4323 = vmatprep.subr.bf16.mxu1 %v6343_v26  ;;  %v6418_v25 = vld [vmem:[%s7063_s9 + $0xe14] ss:$8 sps:$4 sm:$0xff]   ;;  %v1109_v26 = vcombine.high %v7461_v10, %v7461_v10  ;;  %v6424_v10 = vld [vmem:[%s7063_s9 + $0xe24] ss:$8 sps:$4 sm:$0xff]  }
 0x166   : > { %4692 = vmatprep.subr.bf16.mxu0 %v6346_v27  ;;  %v6416_v27 = vld [vmem:[%s7063_s9 + $0xe10] ss:$8 sps:$4 sm:$0xff]  }
 0x168   : > { %4324 = vmatpush1.bf16.msra.mxu1 %v6341_v28  ;;  %v6421_v28 = vld [vmem:[%s7063_s9 + $0x524] ss:$8 sps:$4 sm:$0xff]  }
 0x169   : > { %4693 = vmatpush1.bf16.msra.mxu0 %v6344_v29  ;;  %4325 = vmatprep.subr.bf16.mxu1 %v6349_v31  ;;  %v6419_v29 = vld [vmem:[%s7063_s9 + $0x520] ss:$8 sps:$4 sm:$0xff]  }
 0x16a   : > { %4694 = vmatprep.subr.bf16.mxu0 %v6352_v32  ;;  %v6422_v31 = vld [vmem:[%s7063_s9 + $0xe20] ss:$8 sps:$4 sm:$0xff]   ;;  %v6427_v32 = vld [vmem:[%s7063_s9 + $0x534] ss:$8 sps:$4 sm:$0xff]  }
 0x16c   : > { %4326 = vmatpush1.bf16.msra.mxu1 %v6347_v34  ;;  %v6430_v34 = vld [vmem:[%s7063_s9 + $0xe34] ss:$8 sps:$4 sm:$0xff]  }
 0x16d   : > { %4695 = vmatpush1.bf16.msra.mxu0 %v6350_v54  ;;  %4327 = vmatprep.subr.bf16.mxu1 %v6355_v35  ;;  %v6425_v54 = vld [vmem:[%s7063_s9 + $0x530] ss:$8 sps:$4 sm:$0xff]  }
 0x16e   : > { %4696 = vmatprep.subr.bf16.mxu0 %v6358_v36  ;;  %v6428_v35 = vld [vmem:[%s7063_s9 + $0xe30] ss:$8 sps:$4 sm:$0xff]   ;;  %v6433_v36 = vld [vmem:[%s7063_s9 + $0x544] ss:$8 sps:$4 sm:$0xff]  }
 0x170   : > { %4328 = vmatpush1.bf16.msra.mxu1 %v6353_v37  ;;  %v6436_v37 = vld [vmem:[%s7063_s9 + $0xe44] ss:$8 sps:$4 sm:$0xff]  }
 0x171   : > { %4697 = vmatpush1.bf16.msra.mxu0 %v6356_v38  ;;  %4329 = vmatprep.subr.bf16.mxu1 %v6361_v40  ;;  %v6431_v38 = vld [vmem:[%s7063_s9 + $0x540] ss:$8 sps:$4 sm:$0xff]  }
 0x172   : > { %4698 = vmatprep.subr.bf16.mxu0 %v6364_v41  ;;  %v6434_v40 = vld [vmem:[%s7063_s9 + $0xe40] ss:$8 sps:$4 sm:$0xff]   ;;  %v6439_v41 = vld [vmem:[%s7063_s9 + $0x554] ss:$8 sps:$4 sm:$0xff]  }
 0x174   : > { %4330 = vmatpush1.bf16.msra.mxu1 %v6359_v44  ;;  %v6442_v44 = vld [vmem:[%s7063_s9 + $0xe54] ss:$8 sps:$4 sm:$0xff]  }
 0x175   : > { %4699 = vmatpush1.bf16.msra.mxu0 %v6362_v23  ;;  %4331 = vmatprep.subr.bf16.mxu1 %v6367_v16  ;;  %v6437_v23 = vld [vmem:[%s7063_s9 + $0x550] ss:$8 sps:$4 sm:$0xff]  }
 0x176   : > { %4700 = vmatprep.subr.bf16.mxu0 %v6370_v47  ;;  %v6440_v16 = vld [vmem:[%s7063_s9 + $0xe50] ss:$8 sps:$4 sm:$0xff]   ;;  %v6445_v47 = vld [vmem:[%s7063_s9 + $0x564] ss:$8 sps:$4 sm:$0xff]  }
 0x178   : > { %4332 = vmatpush1.bf16.msra.mxu1 %v6365_v49  ;;  %v6448_v49 = vld [vmem:[%s7063_s9 + $0xe64] ss:$8 sps:$4 sm:$0xff]  }
 0x179   : > { %4701 = vmatpush1.bf16.msra.mxu0 %v6368_v30  ;;  %4333 = vmatprep.subr.bf16.mxu1 %v6373_v50  ;;  %v6443_v30 = vld [vmem:[%s7063_s9 + $0x560] ss:$8 sps:$4 sm:$0xff]  }
 0x17a   : > { %4702 = vmatprep.subr.bf16.mxu0 %v6376_v51  ;;  %v6446_v50 = vld [vmem:[%s7063_s9 + $0xe60] ss:$8 sps:$4 sm:$0xff]   ;;  %v6451_v51 = vld [vmem:[%s7063_s9 + $0x574] ss:$8 sps:$4 sm:$0xff]  }
 0x17c   : > { %4334 = vmatpush1.bf16.msra.mxu1 %v6371_v52  ;;  %v6454_v52 = vld [vmem:[%s7063_s9 + $0xe74] ss:$8 sps:$4 sm:$0xff]  }
 0x17d   : > { %4703 = vmatpush1.bf16.msra.mxu0 %v6374_v56  ;;  %4335 = vmatprep.subr.bf16.mxu1 %v6379_v57  ;;  %v6449_v56 = vld [vmem:[%s7063_s9 + $0x570] ss:$8 sps:$4 sm:$0xff]  }
 0x17e   : > { %4704 = vmatprep.subr.bf16.mxu0 %v6382_v58  ;;  %v6452_v57 = vld [vmem:[%s7063_s9 + $0xe70] ss:$8 sps:$4 sm:$0xff]   ;;  %v6457_v58 = vld [vmem:[%s7063_s9 + $0x584] ss:$8 sps:$4 sm:$0xff]  }
 0x180   : > { %4336 = vmatpush1.bf16.msra.mxu1 %v6377_v59  ;;  %v6460_v59 = vld [vmem:[%s7063_s9 + $0xe84] ss:$8 sps:$4 sm:$0xff]  }
 0x181   : > { %4705 = vmatpush1.bf16.msra.mxu0 %v6380_v39  ;;  %4337 = vmatprep.subr.bf16.mxu1 %v6385_v61  ;;  %v6455_v39 = vld [vmem:[%s7063_s9 + $0x580] ss:$8 sps:$4 sm:$0xff]  }
 0x182   : > { %4706 = vmatprep.subr.bf16.mxu0 %v6388_v45  ;;  %v6458_v61 = vld [vmem:[%s7063_s9 + $0xe80] ss:$8 sps:$4 sm:$0xff]   ;;  %v6463_v45 = vld [vmem:[%s7063_s9 + $0x594] ss:$8 sps:$4 sm:$0xff]  }
 0x184   : > { %4338 = vmatpush1.bf16.msra.mxu1 %v6383_v63  ;;  %v6466_v63 = vld [vmem:[%s7063_s9 + $0xe94] ss:$8 sps:$4 sm:$0xff]  }
 0x185   : > { %4707 = vmatpush1.bf16.msra.mxu0 %v6386_v0  ;;  %4339 = vmatprep.subr.bf16.mxu1 %v6391_v1  ;;  %v6461_v0 = vld [vmem:[%s7063_s9 + $0x590] ss:$8 sps:$4 sm:$0xff]  }
 0x186   : > { %4708 = vmatprep.subr.bf16.mxu0 %v6394_v2  ;;  %v6464_v1 = vld [vmem:[%s7063_s9 + $0xe90] ss:$8 sps:$4 sm:$0xff]   ;;  %v6469_v2 = vld [vmem:[%s7063_s9 + $0x5a4] ss:$8 sps:$4 sm:$0xff]  }
 0x188   : > { %4340 = vmatpush1.bf16.msra.mxu1 %v6389_v3  ;;  %v6472_v3 = vld [vmem:[%s7063_s9 + $0xea4] ss:$8 sps:$4 sm:$0xff]  }
 0x189   : > { %4709 = vmatpush1.bf16.msra.mxu0 %v6392_v4  ;;  %4341 = vmatprep.subr.bf16.mxu1 %v6397_v6  ;;  %v6467_v4 = vld [vmem:[%s7063_s9 + $0x5a0] ss:$8 sps:$4 sm:$0xff]  }
 0x18a   : > { %4710 = vmatprep.subr.bf16.mxu0 %v6400_v8  ;;  %v6470_v6 = vld [vmem:[%s7063_s9 + $0xea0] ss:$8 sps:$4 sm:$0xff]   ;;  %v6475_v8 = vld [vmem:[%s7063_s9 + $0x5b4] ss:$8 sps:$4 sm:$0xff]  }
 0x18c   : > { %4342 = vmatpush1.bf16.msra.mxu1 %v6395_v11  ;;  %v6473_v11 = vld [vmem:[%s7063_s9 + $0x5b0] ss:$8 sps:$4 sm:$0xff]  }
 0x18d   : > { %4711 = vmatpush1.bf16.msra.mxu0 %v6398_v46  ;;  %4343 = vmatprep.subr.bf16.mxu1 %v6403_v55  ;;  %v6476_v46 = vld [vmem:[%s7063_s9 + $0xeb0] ss:$8 sps:$4 sm:$0xff]   ;;  %v6481_v55 = vld [vmem:[%s7063_s9 + $0x5c4] ss:$8 sps:$4 sm:$0xff]  }
 0x18e   : > { %4712 = vmatprep.subr.bf16.mxu0 %v6406_v12  ;;  %v6484_v12 = vld [vmem:[%s7063_s9 + $0xec4] ss:$8 sps:$4 sm:$0xff]  }
 0x190   : > { %4344 = vmatpush1.bf16.msra.mxu1 %v6401_v33  ;;  %v6479_v33 = vld [vmem:[%s7063_s9 + $0x5c0] ss:$8 sps:$4 sm:$0xff]  }
 0x191   : > { %4713 = vmatpush1.bf16.msra.mxu0 %v6404_v43  ;;  %4354 = vmatprep.subr.bf16.mxu1 %v6409_v14  ;;  %v6482_v43 = vld [vmem:[%s7063_s9 + $0xec0] ss:$8 sps:$4 sm:$0xff]   ;;  %v6487_v14 = vld [vmem:[%s7063_s9 + $0x5d4] ss:$8 sps:$4 sm:$0xff]  }
 0x192   : > { %4723 = vmatprep.subr.bf16.mxu0 %v6412_v15  ;;  %v6490_v15 = vld [vmem:[%s7063_s9 + $0xed4] ss:$8 sps:$4 sm:$0xff]  }
 0x193   : > { %4346 = vmatmul.mubr.bf16.vlgmr.msra.gmra.mrb[0].mxu1 %v7536_v19 }
 0x194   : > { %4715 = vmatmul.mubr.bf16.vlgmr.msra.gmra.mrb[0].mxu0 %v1205_v20  ;;  %4355 = vmatpush1.bf16.msra.mxu1 %v6407_v21  ;;  %v6488_v20 = vld [vmem:[%s7063_s9 + $0xed0] ss:$8 sps:$4 sm:$0xff]   ;;  %v6493_v21 = vld [vmem:[%s7063_s9 + $0x5e4] ss:$8 sps:$4 sm:$0xff]  }
 0x195   : > { %4724 = vmatpush1.bf16.msra.mxu0 %v6410_v22  ;;  %4356 = vmatprep.subr.bf16.mxu1 %v6415_v24  ;;  %v6496_v22 = vld [vmem:[%s7063_s9 + $0xee4] ss:$8 sps:$4 sm:$0xff]   ;;  %v1062_v24 = vcombine.high %v7436_v60, %v7436_v60  ;;  %v6500_v60 = vld [vmem:[%s7063_s9 + $0xef0] ss:$8 sps:$4 sm:$0xff]  }
 0x196   : > { %4725 = vmatprep.subr.bf16.mxu0 %v6418_v25  ;;  %4386 = vmatprep.mubr.bf16.mxu1 %v1109_v26  ;;  %v6491_v25 = vld [vmem:[%s7063_s9 + $0x5e0] ss:$8 sps:$4 sm:$0xff]  }
 0x197   : > { %4755 = vmatprep.mubr.bf16.mxu0 %v7547_v62  ;;  %v6494_v26 = vld [vmem:[%s7063_s9 + $0xee0] ss:$8 sps:$4 sm:$0xff]  }
 0x198   : > { %4357 = vmatpush1.bf16.msra.mxu1 %v6413_v7  ;;  %v6499_v7 = vld [vmem:[%s7063_s9 + $0x5f4] ss:$8 sps:$4 sm:$0xff]  }
 0x199   : > { %4726 = vmatpush1.bf16.msra.mxu0 %v6416_v27  ;;  %4358 = vmatprep.subr.bf16.mxu1 %v6421_v28  ;;  %v6502_v27 = vld [vmem:[%s7063_s9 + $0xef4] ss:$8 sps:$4 sm:$0xff]   ;;  %v7610_v28 = vrot.slane %v1062_v24, %v7149_v53  ;;  %v6570_v24 = vld [vmem:[%s7063_s9 + $0x6b0] ss:$8 sps:$4 sm:$0xff]  }
 0x19a   : > { %4727 = vmatprep.subr.bf16.mxu0 %v6424_v10  ;;  %v6497_v10 = vld [vmem:[%s7063_s9 + $0x5f0] ss:$8 sps:$4 sm:$0xff]  }
 0x19c   : > { %4359 = vmatpush1.bf16.msra.mxu1 %v6419_v29  ;;  %v6505_v29 = vld [vmem:[%s7063_s9 + $0x604] ss:$8 sps:$4 sm:$0xff]  }
 0x19d   : > { %4728 = vmatpush1.bf16.msra.mxu0 %v6422_v31  ;;  %4360 = vmatprep.subr.bf16.mxu1 %v6427_v32  ;;  %v6509_v31 = vld [vmem:[%s7063_s9 + $0xf04] ss:$8 sps:$4 sm:$0xff]   ;;  %v1078_v32 = vcombine.high %v7610_v28, %v7610_v28 }
 0x19e   : > { %4729 = vmatprep.subr.bf16.mxu0 %v6430_v34  ;;  %v1107_v34 = vcombine.high %v7536_v19, %v7536_v19  ;;  %v1208_v19 = vcombine.high %v7547_v62, %v7547_v62  ;;  %v6516_v62 = vld [vmem:[%s7063_s9 + $0x620] ss:$8 sps:$4 sm:$0xff]  }
 0x1a0   : > { %4361 = vmatpush1.bf16.msra.mxu1 %v6425_v54  ;;  %v7622_v54 = vrot.slane %v7526_v13, %v7149_v53  ;;  %v6510_v13 = vld [vmem:[%s7063_s9 + $0x610] ss:$8 sps:$4 sm:$0xff]  }
 0x1a1   : > { %4730 = vmatpush1.bf16.msra.mxu0 %v6428_v35  ;;  %4362 = vmatprep.subr.bf16.mxu1 %v6433_v36  ;;  %v6503_v35 = vld [vmem:[%s7063_s9 + $0x600] ss:$8 sps:$4 sm:$0xff]  }
 0x1a2   : > { %4731 = vmatprep.subr.bf16.mxu0 %v6436_v37  ;;  %v6507_v36 = vld [vmem:[%s7063_s9 + $0xf00] ss:$8 sps:$4 sm:$0xff]   ;;  %v6512_v37 = vld [vmem:[%s7063_s9 + $0x614] ss:$8 sps:$4 sm:$0xff]  }
 0x1a4   : > { %4363 = vmatpush1.bf16.msra.mxu1 %v6431_v38  ;;  %v6515_v38 = vld [vmem:[%s7063_s9 + $0xf14] ss:$8 sps:$4 sm:$0xff]  }
 0x1a5   : > { %4732 = vmatpush1.bf16.msra.mxu0 %v6434_v40  ;;  %4364 = vmatprep.subr.bf16.mxu1 %v6439_v41  ;;  %v7629_v40 = vrot.slane %v1078_v32, %v7149_v53  ;;  %v6513_v41 = vld [vmem:[%s7063_s9 + $0xf10] ss:$8 sps:$4 sm:$0xff]  }
 0x1a6   : > { %4733 = vmatprep.subr.bf16.mxu0 %v6442_v44  ;;  %v6518_v44 = vld [vmem:[%s7063_s9 + $0x624] ss:$8 sps:$4 sm:$0xff]   ;;  %v6585_v32 = vld [vmem:[%s7063_s9 + $0xfd0] ss:$8 sps:$4 sm:$0xff]  }
 0x1a8   : > { %4365 = vmatpush1.bf16.msra.mxu1 %v6437_v23  ;;  %v6521_v23 = vld [vmem:[%s7063_s9 + $0xf24] ss:$8 sps:$4 sm:$0xff]  }
 0x1a9   : > { %4734 = vmatpush1.bf16.msra.mxu0 %v6440_v16  ;;  %4366 = vmatprep.subr.bf16.mxu1 %v6445_v47  ;;  %v6519_v16 = vld [vmem:[%s7063_s9 + $0xf20] ss:$8 sps:$4 sm:$0xff]   ;;  %v6524_v47 = vld [vmem:[%s7063_s9 + $0x634] ss:$8 sps:$4 sm:$0xff]  }
 0x1aa   : > { %4735 = vmatprep.subr.bf16.mxu0 %v6448_v49  ;;  %v6527_v49 = vld [vmem:[%s7063_s9 + $0xf34] ss:$8 sps:$4 sm:$0xff]  }
 0x1ac   : > { %4367 = vmatpush1.bf16.msra.mxu1 %v6443_v30  ;;  %v6522_v30 = vld [vmem:[%s7063_s9 + $0x630] ss:$8 sps:$4 sm:$0xff]  }
 0x1ad   : > { %4736 = vmatpush1.bf16.msra.mxu0 %v6446_v50  ;;  %4368 = vmatprep.subr.bf16.mxu1 %v6451_v51  ;;  %v6525_v50 = vld [vmem:[%s7063_s9 + $0xf30] ss:$8 sps:$4 sm:$0xff]   ;;  %v6530_v51 = vld [vmem:[%s7063_s9 + $0x644] ss:$8 sps:$4 sm:$0xff]  }
 0x1ae   : > { %4737 = vmatprep.subr.bf16.mxu0 %v6454_v52  ;;  %v6533_v52 = vld [vmem:[%s7063_s9 + $0xf44] ss:$8 sps:$4 sm:$0xff]  }
 0x1b0   : > { %4369 = vmatpush1.bf16.msra.mxu1 %v6449_v56  ;;  %v6528_v56 = vld [vmem:[%s7063_s9 + $0x640] ss:$8 sps:$4 sm:$0xff]  }
 0x1b1   : > { %4738 = vmatpush1.bf16.msra.mxu0 %v6452_v57  ;;  %4370 = vmatprep.subr.bf16.mxu1 %v6457_v58  ;;  %v6531_v57 = vld [vmem:[%s7063_s9 + $0xf40] ss:$8 sps:$4 sm:$0xff]   ;;  %v6536_v58 = vld [vmem:[%s7063_s9 + $0x654] ss:$8 sps:$4 sm:$0xff]  }
 0x1b2   : > { %4739 = vmatprep.subr.bf16.mxu0 %v6460_v59  ;;  %v6539_v59 = vld [vmem:[%s7063_s9 + $0xf54] ss:$8 sps:$4 sm:$0xff]  }
 0x1b4   : > { %4371 = vmatpush1.bf16.msra.mxu1 %v6455_v39  ;;  %v6534_v39 = vld [vmem:[%s7063_s9 + $0x650] ss:$8 sps:$4 sm:$0xff]  }
 0x1b5   : > { %4740 = vmatpush1.bf16.msra.mxu0 %v6458_v61  ;;  %4372 = vmatprep.subr.bf16.mxu1 %v6463_v45  ;;  %v6537_v61 = vld [vmem:[%s7063_s9 + $0xf50] ss:$8 sps:$4 sm:$0xff]   ;;  %v6542_v45 = vld [vmem:[%s7063_s9 + $0x664] ss:$8 sps:$4 sm:$0xff]  }
 0x1b6   : > { %4741 = vmatprep.subr.bf16.mxu0 %v6466_v63  ;;  %v6545_v63 = vld [vmem:[%s7063_s9 + $0xf64] ss:$8 sps:$4 sm:$0xff]  }
 0x1b8   : > { %4373 = vmatpush1.bf16.msra.mxu1 %v6461_v0  ;;  %v6540_v0 = vld [vmem:[%s7063_s9 + $0x660] ss:$8 sps:$4 sm:$0xff]  }
 0x1b9   : > { %4742 = vmatpush1.bf16.msra.mxu0 %v6464_v1  ;;  %4374 = vmatprep.subr.bf16.mxu1 %v6469_v2  ;;  %v6543_v1 = vld [vmem:[%s7063_s9 + $0xf60] ss:$8 sps:$4 sm:$0xff]   ;;  %v6548_v2 = vld [vmem:[%s7063_s9 + $0x674] ss:$8 sps:$4 sm:$0xff]  }
 0x1ba   : > { %4743 = vmatprep.subr.bf16.mxu0 %v6472_v3  ;;  %v6551_v3 = vld [vmem:[%s7063_s9 + $0xf74] ss:$8 sps:$4 sm:$0xff]  }
 0x1bc   : > { %4375 = vmatpush1.bf16.msra.mxu1 %v6467_v4  ;;  %v6546_v4 = vld [vmem:[%s7063_s9 + $0x670] ss:$8 sps:$4 sm:$0xff]  }
 0x1bd   : > { %4744 = vmatpush1.bf16.msra.mxu0 %v6470_v6  ;;  %4376 = vmatprep.subr.bf16.mxu1 %v6475_v8  ;;  %v6549_v6 = vld [vmem:[%s7063_s9 + $0xf70] ss:$8 sps:$4 sm:$0xff]   ;;  %v6554_v8 = vld [vmem:[%s7063_s9 + $0x684] ss:$8 sps:$4 sm:$0xff]  }
 0x1be   : > { %4745 = vmatprep.subr.bf16.mxu0 %v6478_v9  ;;  %v6557_v9 = vld [vmem:[%s7063_s9 + $0xf84] ss:$8 sps:$4 sm:$0xff]  }
 0x1c0   : > { %4377 = vmatpush1.bf16.msra.mxu1 %v6473_v11  ;;  %v6552_v11 = vld [vmem:[%s7063_s9 + $0x680] ss:$8 sps:$4 sm:$0xff]  }
 0x1c1   : > { %4746 = vmatpush1.bf16.msra.mxu0 %v6476_v46  ;;  %4378 = vmatprep.subr.bf16.mxu1 %v6481_v55  ;;  %v6555_v46 = vld [vmem:[%s7063_s9 + $0xf80] ss:$8 sps:$4 sm:$0xff]   ;;  %v6560_v55 = vld [vmem:[%s7063_s9 + $0x694] ss:$8 sps:$4 sm:$0xff]  }
 0x1c2   : > { %4747 = vmatprep.subr.bf16.mxu0 %v6484_v12  ;;  %v6563_v12 = vld [vmem:[%s7063_s9 + $0xf94] ss:$8 sps:$4 sm:$0xff]  }
 0x1c4   : > { %4379 = vmatpush1.bf16.msra.mxu1 %v6479_v33  ;;  %v6558_v33 = vld [vmem:[%s7063_s9 + $0x690] ss:$8 sps:$4 sm:$0xff]  }
 0x1c5   : > { %4748 = vmatpush1.bf16.msra.mxu0 %v6482_v43  ;;  %4380 = vmatprep.subr.bf16.mxu1 %v6487_v14  ;;  %v6561_v43 = vld [vmem:[%s7063_s9 + $0xf90] ss:$8 sps:$4 sm:$0xff]   ;;  %v6566_v14 = vld [vmem:[%s7063_s9 + $0x6a4] ss:$8 sps:$4 sm:$0xff]  }
 0x1c6   : > { %4749 = vmatprep.subr.bf16.mxu0 %v6490_v15  ;;  %v6569_v15 = vld [vmem:[%s7063_s9 + $0xfa4] ss:$8 sps:$4 sm:$0xff]  }
 0x1c8   : > { %4381 = vmatpush1.bf16.msra.mxu1 %v6485_v18  ;;  %v6564_v18 = vld [vmem:[%s7063_s9 + $0x6a0] ss:$8 sps:$4 sm:$0xff]  }
 0x1c9   : > { %4750 = vmatpush1.bf16.msra.mxu0 %v6488_v20  ;;  %4382 = vmatprep.subr.bf16.mxu1 %v6493_v21  ;;  %v6567_v20 = vld [vmem:[%s7063_s9 + $0xfa0] ss:$8 sps:$4 sm:$0xff]   ;;  %v6572_v21 = vld [vmem:[%s7063_s9 + $0x6b4] ss:$8 sps:$4 sm:$0xff]  }
 0x1ca   : > { %4751 = vmatprep.subr.bf16.mxu0 %v6496_v22  ;;  %v6575_v22 = vld [vmem:[%s7063_s9 + $0xfb4] ss:$8 sps:$4 sm:$0xff]  }
 0x1cc   : > { %4383 = vmatpush1.bf16.msra.mxu1 %v6491_v25  ;;  %v6573_v25 = vld [vmem:[%s7063_s9 + $0xfb0] ss:$8 sps:$4 sm:$0xff]  }
 0x1cd   : > { %4752 = vmatpush1.bf16.msra.mxu0 %v6494_v26  ;;  %4384 = vmatprep.subr.bf16.mxu1 %v6499_v7  ;;  %v6578_v26 = vld [vmem:[%s7063_s9 + $0x6c4] ss:$8 sps:$4 sm:$0xff]  }
 0x1ce   : > { %4753 = vmatprep.subr.bf16.mxu0 %v6502_v27  ;;  %v6581_v7 = vld [vmem:[%s7063_s9 + $0xfc4] ss:$8 sps:$4 sm:$0xff]   ;;  %v6576_v27 = vld [vmem:[%s7063_s9 + $0x6c0] ss:$8 sps:$4 sm:$0xff]  }
 0x1d0   : > { %4385 = vmatpush1.bf16.msra.mxu1 %v6497_v10  ;;  %v6579_v10 = vld [vmem:[%s7063_s9 + $0xfc0] ss:$8 sps:$4 sm:$0xff]  }
 0x1d1   : > { %4754 = vmatpush1.bf16.msra.mxu0 %v6500_v60  ;;  %4395 = vmatprep.subr.bf16.mxu1 %v6505_v29  ;;  %v6584_v60 = vld [vmem:[%s7063_s9 + $0x6d4] ss:$8 sps:$4 sm:$0xff]  }
 0x1d2   : > { %4764 = vmatprep.subr.bf16.mxu0 %v6509_v31  ;;  %v6587_v29 = vld [vmem:[%s7063_s9 + $0xfd4] ss:$8 sps:$4 sm:$0xff]   ;;  %v6582_v31 = vld [vmem:[%s7063_s9 + $0x6d0] ss:$8 sps:$4 sm:$0xff]  }
 0x1d3   : > { %4387 = vmatmul.mubr.bf16.vlgmr.msra.gmra.mrb[0].mxu1 %v1107_v34  ;;  %v6590_v34 = vld [vmem:[%s7063_s9 + $0x6e4] ss:$8 sps:$4 sm:$0xff]  }
 0x1d4   : > { %4756 = vmatmul.mubr.bf16.vlgmr.msra.gmra.mrb[0].mxu0 %v7622_v54  ;;  %4396 = vmatpush1.bf16.msra.mxu1 %v6503_v35  ;;  %v6593_v35 = vld [vmem:[%s7063_s9 + $0xfe4] ss:$8 sps:$4 sm:$0xff]  }
 0x1d5   : > { %4765 = vmatpush1.bf16.msra.mxu0 %v6507_v36  ;;  %4397 = vmatprep.subr.bf16.mxu1 %v6512_v37  ;;  %v6588_v36 = vld [vmem:[%s7063_s9 + $0x6e0] ss:$8 sps:$4 sm:$0xff]  }
 0x1d6   : > { %4766 = vmatprep.subr.bf16.mxu0 %v6515_v38  ;;  %4427 = vmatprep.mubr.bf16.mxu1 %v7629_v40  ;;  %v6591_v37 = vld [vmem:[%s7063_s9 + $0xfe0] ss:$8 sps:$4 sm:$0xff]   ;;  %v6596_v38 = vld [vmem:[%s7063_s9 + $0x6f4] ss:$8 sps:$4 sm:$0xff]  }
 0x1d7   : > { %4796 = vmatprep.mubr.bf16.mxu0 %v1208_v19  ;;  %v6599_v19 = vld [vmem:[%s7063_s9 + $0xff4] ss:$8 sps:$4 sm:$0xff]  }
 0x1d8   : > { %4398 = vmatpush1.bf16.msra.mxu1 %v6510_v13  ;;  %v7692_v13 = vld.sshfl [vmem:[%s7079_s27 + $0x20] sm:$0x33 pattern:$0x75316420] }
 0x1d9   : > { %4767 = vmatpush1.bf16.msra.mxu0 %v6513_v41  ;;  %4399 = vmatprep.subr.bf16.mxu1 %v6518_v44  ;;  %v6594_v41 = vld [vmem:[%s7063_s9 + $0x6f0] ss:$8 sps:$4 sm:$0xff]  }
 0x1da   : > { %4768 = vmatprep.subr.bf16.mxu0 %v6521_v23  ;;  %v6597_v44 = vld [vmem:[%s7063_s9 + $0xff0] ss:$8 sps:$4 sm:$0xff]   ;;  %v6603_v23 = vld [vmem:[%s7063_s9 + $0x704] ss:$8 sps:$4 sm:$0xff]  }
 0x1dc   : > { %4400 = vmatpush1.bf16.msra.mxu1 %v6516_v62  ;;  %v6606_v62 = vld [vmem:[%s7063_s9 + $0x1004] ss:$8 sps:$4 sm:$0xff]  }
 0x1dd   : > { %4769 = vmatpush1.bf16.msra.mxu0 %v6519_v16  ;;  %4401 = vmatprep.subr.bf16.mxu1 %v6524_v47  ;;  %v1216_v16 = vcombine.high %v7692_v13, %v7692_v13  ;;  %v7702_v47 = vrot.slane %v7610_v28, %v7149_v53 }
 0x1de   : > { %4770 = vmatprep.subr.bf16.mxu0 %v6527_v49  ;;  %v1206_v49 = vcombine.high %v7622_v54, %v7622_v54  ;;  %v6607_v54 = vld [vmem:[%s7063_s9 + $0x710] ss:$8 sps:$4 sm:$0xff]  }
 0x1df   : > { %v7713_v28 = vrot.slane %v1216_v16, %v7149_v53  ;;  %v6682_v16 = vld [vmem:[%s7063_s9 + $0x10d0] ss:$8 sps:$4 sm:$0xff]  }
 0x1e0   : > { %4402 = vmatpush1.bf16.msra.mxu1 %v6522_v30  ;;  %v6601_v30 = vld [vmem:[%s7063_s9 + $0x700] ss:$8 sps:$4 sm:$0xff]  }
 0x1e1   : > { %4771 = vmatpush1.bf16.msra.mxu0 %v6525_v50  ;;  %4403 = vmatprep.subr.bf16.mxu1 %v6530_v51  ;;  %v6604_v50 = vld [vmem:[%s7063_s9 + $0x1000] ss:$8 sps:$4 sm:$0xff]   ;;  %v6609_v51 = vld [vmem:[%s7063_s9 + $0x714] ss:$8 sps:$4 sm:$0xff]  }
 0x1e2   : > { %4772 = vmatprep.subr.bf16.mxu0 %v6533_v52  ;;  %v6612_v52 = vld [vmem:[%s7063_s9 + $0x1014] ss:$8 sps:$4 sm:$0xff]  }
 0x1e4   : > { %4404 = vmatpush1.bf16.msra.mxu1 %v6528_v56  ;;  %v1110_v56 = vcombine.high %v7629_v40, %v7629_v40  ;;  %v6618_v40 = vld [vmem:[%s7063_s9 + $0x1024] ss:$8 sps:$4 sm:$0xff]  }
 0x1e5   : > { %4773 = vmatpush1.bf16.msra.mxu0 %v6531_v57  ;;  %4405 = vmatprep.subr.bf16.mxu1 %v6536_v58  ;;  %v6610_v57 = vld [vmem:[%s7063_s9 + $0x1010] ss:$8 sps:$4 sm:$0xff]   ;;  %v6615_v58 = vld [vmem:[%s7063_s9 + $0x724] ss:$8 sps:$4 sm:$0xff]  }
 0x1e6   : > { %4774 = vmatprep.subr.bf16.mxu0 %v6539_v59  ;;  %v6613_v59 = vld [vmem:[%s7063_s9 + $0x720] ss:$8 sps:$4 sm:$0xff]  }
 0x1e8   : > { %4406 = vmatpush1.bf16.msra.mxu1 %v6534_v39  ;;  %v6616_v39 = vld [vmem:[%s7063_s9 + $0x1020] ss:$8 sps:$4 sm:$0xff]  }
 0x1e9   : > { %4775 = vmatpush1.bf16.msra.mxu0 %v6537_v61  ;;  %4407 = vmatprep.subr.bf16.mxu1 %v6542_v45  ;;  %v6621_v61 = vld [vmem:[%s7063_s9 + $0x734] ss:$8 sps:$4 sm:$0xff]  }
 0x1ea   : > { %4776 = vmatprep.subr.bf16.mxu0 %v6545_v63  ;;  %v6624_v45 = vld [vmem:[%s7063_s9 + $0x1034] ss:$8 sps:$4 sm:$0xff]   ;;  %v6619_v63 = vld [vmem:[%s7063_s9 + $0x730] ss:$8 sps:$4 sm:$0xff]  }
 0x1ec   : > { %4408 = vmatpush1.bf16.msra.mxu1 %v6540_v0  ;;  %v6622_v0 = vld [vmem:[%s7063_s9 + $0x1030] ss:$8 sps:$4 sm:$0xff]  }
 0x1ed   : > { %4777 = vmatpush1.bf16.msra.mxu0 %v6543_v1  ;;  %4409 = vmatprep.subr.bf16.mxu1 %v6548_v2  ;;  %v6627_v1 = vld [vmem:[%s7063_s9 + $0x744] ss:$8 sps:$4 sm:$0xff]  }
 0x1ee   : > { %4778 = vmatprep.subr.bf16.mxu0 %v6551_v3  ;;  %v6630_v2 = vld [vmem:[%s7063_s9 + $0x1044] ss:$8 sps:$4 sm:$0xff]   ;;  %v6625_v3 = vld [vmem:[%s7063_s9 + $0x740] ss:$8 sps:$4 sm:$0xff]  }
 0x1f0   : > { %4410 = vmatpush1.bf16.msra.mxu1 %v6546_v4  ;;  %v6628_v4 = vld [vmem:[%s7063_s9 + $0x1040] ss:$8 sps:$4 sm:$0xff]  }
 0x1f1   : > { %4779 = vmatpush1.bf16.msra.mxu0 %v6549_v6  ;;  %4411 = vmatprep.subr.bf16.mxu1 %v6554_v8  ;;  %v6633_v6 = vld [vmem:[%s7063_s9 + $0x754] ss:$8 sps:$4 sm:$0xff]  }
 0x1f2   : > { %4780 = vmatprep.subr.bf16.mxu0 %v6557_v9  ;;  %v6636_v8 = vld [vmem:[%s7063_s9 + $0x1054] ss:$8 sps:$4 sm:$0xff]   ;;  %v6631_v9 = vld [vmem:[%s7063_s9 + $0x750] ss:$8 sps:$4 sm:$0xff]  }
 0x1f4   : > { %4412 = vmatpush1.bf16.msra.mxu1 %v6552_v11  ;;  %v6634_v11 = vld [vmem:[%s7063_s9 + $0x1050] ss:$8 sps:$4 sm:$0xff]  }
 0x1f5   : > { %4781 = vmatpush1.bf16.msra.mxu0 %v6555_v46  ;;  %4413 = vmatprep.subr.bf16.mxu1 %v6560_v55  ;;  %v6639_v46 = vld [vmem:[%s7063_s9 + $0x764] ss:$8 sps:$4 sm:$0xff]  }
 0x1f6   : > { %4782 = vmatprep.subr.bf16.mxu0 %v6563_v12  ;;  %v6642_v55 = vld [vmem:[%s7063_s9 + $0x1064] ss:$8 sps:$4 sm:$0xff]   ;;  %v6637_v12 = vld [vmem:[%s7063_s9 + $0x760] ss:$8 sps:$4 sm:$0xff]  }
 0x1f8   : > { %4414 = vmatpush1.bf16.msra.mxu1 %v6558_v33  ;;  %v6640_v33 = vld [vmem:[%s7063_s9 + $0x1060] ss:$8 sps:$4 sm:$0xff]  }
 0x1f9   : > { %4783 = vmatpush1.bf16.msra.mxu0 %v6561_v43  ;;  %4415 = vmatprep.subr.bf16.mxu1 %v6566_v14  ;;  %v6645_v43 = vld [vmem:[%s7063_s9 + $0x774] ss:$8 sps:$4 sm:$0xff]  }
 0x1fa   : > { %4784 = vmatprep.subr.bf16.mxu0 %v6569_v15  ;;  %v6648_v14 = vld [vmem:[%s7063_s9 + $0x1074] ss:$8 sps:$4 sm:$0xff]   ;;  %v6643_v15 = vld [vmem:[%s7063_s9 + $0x770] ss:$8 sps:$4 sm:$0xff]  }
 0x1fc   : > { %4416 = vmatpush1.bf16.msra.mxu1 %v6564_v18  ;;  %v6646_v18 = vld [vmem:[%s7063_s9 + $0x1070] ss:$8 sps:$4 sm:$0xff]  }
 0x1fd   : > { %4785 = vmatpush1.bf16.msra.mxu0 %v6567_v20  ;;  %4417 = vmatprep.subr.bf16.mxu1 %v6572_v21  ;;  %v6651_v20 = vld [vmem:[%s7063_s9 + $0x784] ss:$8 sps:$4 sm:$0xff]  }
 0x1fe   : > { %4786 = vmatprep.subr.bf16.mxu0 %v6575_v22  ;;  %v6654_v21 = vld [vmem:[%s7063_s9 + $0x1084] ss:$8 sps:$4 sm:$0xff]   ;;  %v6649_v22 = vld [vmem:[%s7063_s9 + $0x780] ss:$8 sps:$4 sm:$0xff]  }
 0x200   : > { %4418 = vmatpush1.bf16.msra.mxu1 %v6570_v24  ;;  %v6652_v24 = vld [vmem:[%s7063_s9 + $0x1080] ss:$8 sps:$4 sm:$0xff]  }
 0x201   : > { %4787 = vmatpush1.bf16.msra.mxu0 %v6573_v25  ;;  %4419 = vmatprep.subr.bf16.mxu1 %v6578_v26  ;;  %v6657_v25 = vld [vmem:[%s7063_s9 + $0x794] ss:$8 sps:$4 sm:$0xff]  }
 0x202   : > { %4788 = vmatprep.subr.bf16.mxu0 %v6581_v7  ;;  %v6660_v26 = vld [vmem:[%s7063_s9 + $0x1094] ss:$8 sps:$4 sm:$0xff]   ;;  %v6655_v7 = vld [vmem:[%s7063_s9 + $0x790] ss:$8 sps:$4 sm:$0xff]  }
 0x204   : > { %4420 = vmatpush1.bf16.msra.mxu1 %v6576_v27  ;;  %v6658_v27 = vld [vmem:[%s7063_s9 + $0x1090] ss:$8 sps:$4 sm:$0xff]  }
 0x205   : > { %4789 = vmatpush1.bf16.msra.mxu0 %v6579_v10  ;;  %4421 = vmatprep.subr.bf16.mxu1 %v6584_v60  ;;  %v6663_v10 = vld [vmem:[%s7063_s9 + $0x7a4] ss:$8 sps:$4 sm:$0xff]  }
 0x206   : > { %4790 = vmatprep.subr.bf16.mxu0 %v6587_v29  ;;  %v6666_v60 = vld [vmem:[%s7063_s9 + $0x10a4] ss:$8 sps:$4 sm:$0xff]   ;;  %v6661_v29 = vld [vmem:[%s7063_s9 + $0x7a0] ss:$8 sps:$4 sm:$0xff]  }
 0x208   : > { %4422 = vmatpush1.bf16.msra.mxu1 %v6582_v31  ;;  %v6664_v31 = vld [vmem:[%s7063_s9 + $0x10a0] ss:$8 sps:$4 sm:$0xff]  }
 0x209   : > { %4791 = vmatpush1.bf16.msra.mxu0 %v6585_v32  ;;  %4423 = vmatprep.subr.bf16.mxu1 %v6590_v34  ;;  %v6669_v32 = vld [vmem:[%s7063_s9 + $0x7b4] ss:$8 sps:$4 sm:$0xff]  }
 0x20a   : > { %4792 = vmatprep.subr.bf16.mxu0 %v6593_v35  ;;  %v6672_v34 = vld [vmem:[%s7063_s9 + $0x10b4] ss:$8 sps:$4 sm:$0xff]   ;;  %v6667_v35 = vld [vmem:[%s7063_s9 + $0x7b0] ss:$8 sps:$4 sm:$0xff]  }
 0x20c   : > { %4424 = vmatpush1.bf16.msra.mxu1 %v6588_v36  ;;  %v6670_v36 = vld [vmem:[%s7063_s9 + $0x10b0] ss:$8 sps:$4 sm:$0xff]  }
 0x20d   : > { %4793 = vmatpush1.bf16.msra.mxu0 %v6591_v37  ;;  %4425 = vmatprep.subr.bf16.mxu1 %v6596_v38  ;;  %v6675_v37 = vld [vmem:[%s7063_s9 + $0x7c4] ss:$8 sps:$4 sm:$0xff]  }
 0x20e   : > { %4794 = vmatprep.subr.bf16.mxu0 %v6599_v19  ;;  %v6678_v38 = vld [vmem:[%s7063_s9 + $0x10c4] ss:$8 sps:$4 sm:$0xff]   ;;  %v6673_v19 = vld [vmem:[%s7063_s9 + $0x7c0] ss:$8 sps:$4 sm:$0xff]  }
 0x210   : > { %4426 = vmatpush1.bf16.msra.mxu1 %v6594_v41  ;;  %v6676_v41 = vld [vmem:[%s7063_s9 + $0x10c0] ss:$8 sps:$4 sm:$0xff]  }
 0x211   : > { %4795 = vmatpush1.bf16.msra.mxu0 %v6597_v44  ;;  %4436 = vmatprep.subr.bf16.mxu1 %v6603_v23  ;;  %v6681_v44 = vld [vmem:[%s7063_s9 + $0x7d4] ss:$8 sps:$4 sm:$0xff]  }
 0x212   : > { %4805 = vmatprep.subr.bf16.mxu0 %v6606_v62  ;;  %v6684_v23 = vld [vmem:[%s7063_s9 + $0x10d4] ss:$8 sps:$4 sm:$0xff]   ;;  %v6679_v62 = vld [vmem:[%s7063_s9 + $0x7d0] ss:$8 sps:$4 sm:$0xff]  }
 0x213   : > { %4428 = vmatmul.mubr.bf16.vlgmr.msra.gmra.mrb[0].mxu1 %v7702_v47 }
 0x214   : > { %4797 = vmatmul.mubr.bf16.vlgmr.msra.gmra.mrb[0].mxu0 %v1206_v49  ;;  %4437 = vmatpush1.bf16.msra.mxu1 %v6601_v30  ;;  %v6687_v49 = vld [vmem:[%s7063_s9 + $0x7e4] ss:$8 sps:$4 sm:$0xff]  }
 0x215   : > { %4806 = vmatpush1.bf16.msra.mxu0 %v6604_v50  ;;  %4438 = vmatprep.subr.bf16.mxu1 %v6609_v51  ;;  %v6690_v30 = vld [vmem:[%s7063_s9 + $0x10e4] ss:$8 sps:$4 sm:$0xff]   ;;  %v6685_v50 = vld [vmem:[%s7063_s9 + $0x7e0] ss:$8 sps:$4 sm:$0xff]  }
 0x216   : > { %4807 = vmatprep.subr.bf16.mxu0 %v6612_v52  ;;  %4468 = vmatprep.mubr.bf16.mxu1 %v1110_v56  ;;  %v6688_v51 = vld [vmem:[%s7063_s9 + $0x10e0] ss:$8 sps:$4 sm:$0xff]   ;;  %v6693_v52 = vld [vmem:[%s7063_s9 + $0x7f4] ss:$8 sps:$4 sm:$0xff]  }
 0x217   : > { %4837 = vmatprep.mubr.bf16.mxu0 %v7713_v28  ;;  %v6696_v56 = vld [vmem:[%s7063_s9 + $0x10f4] ss:$8 sps:$4 sm:$0xff]  }
 0x218   : > { %4439 = vmatpush1.bf16.msra.mxu1 %v6607_v54  ;;  %v6691_v54 = vld [vmem:[%s7063_s9 + $0x7f0] ss:$8 sps:$4 sm:$0xff]  }
 0x219   : > { %4808 = vmatpush1.bf16.msra.mxu0 %v6610_v57  ;;  %4440 = vmatprep.subr.bf16.mxu1 %v6615_v58  ;;  %v6694_v57 = vld [vmem:[%s7063_s9 + $0x10f0] ss:$8 sps:$4 sm:$0xff]   ;;  %v6699_v58 = vld [vmem:[%s7063_s9 + $0x804] ss:$8 sps:$4 sm:$0xff]  }
 0x21a   : > { %4809 = vmatprep.subr.bf16.mxu0 %v6618_v40  ;;  %v6702_v40 = vld [vmem:[%s7063_s9 + $0x1104] ss:$8 sps:$4 sm:$0xff]  }
 0x21c   : > { %4441 = vmatpush1.bf16.msra.mxu1 %v6613_v59  ;;  %v1108_v59 = vcombine.high %v7702_v47, %v7702_v47  ;;  %v6706_v47 = vld [vmem:[%s7063_s9 + $0x1110] ss:$8 sps:$4 sm:$0xff]  }
 0x21d   : > { %4810 = vmatpush1.bf16.msra.mxu0 %v6616_v39  ;;  %4442 = vmatprep.subr.bf16.mxu1 %v6621_v61  ;;  %v7781_v39 = vrot.slane %v7692_v13, %v7149_v53  ;;  %v6697_v61 = vld [vmem:[%s7063_s9 + $0x800] ss:$8 sps:$4 sm:$0xff]   ;;  %v6703_v13 = vld [vmem:[%s7063_s9 + $0x810] ss:$8 sps:$4 sm:$0xff]  }
 0x21e   : > { %4811 = vmatprep.subr.bf16.mxu0 %v6624_v45  ;;  %v6700_v45 = vld [vmem:[%s7063_s9 + $0x1100] ss:$8 sps:$4 sm:$0xff]  }
 0x220   : > { %4443 = vmatpush1.bf16.msra.mxu1 %v6619_v63  ;;  %v6705_v63 = vld [vmem:[%s7063_s9 + $0x814] ss:$8 sps:$4 sm:$0xff]  }
 0x221   : > { %4812 = vmatpush1.bf16.msra.mxu0 %v6622_v0  ;;  %4444 = vmatprep.subr.bf16.mxu1 %v6627_v1  ;;  %v6708_v0 = vld [vmem:[%s7063_s9 + $0x1114] ss:$8 sps:$4 sm:$0xff]   ;;  %v1232_v1 = vcombine.high %v7713_v28, %v7713_v28  ;;  %v6709_v28 = vld [vmem:[%s7063_s9 + $0x820] ss:$8 sps:$4 sm:$0xff]  }
 0x222   : > { %4813 = vmatprep.subr.bf16.mxu0 %v6630_v2  ;;  %v6711_v2 = vld [vmem:[%s7063_s9 + $0x824] ss:$8 sps:$4 sm:$0xff]  }
 0x224   : > { %4445 = vmatpush1.bf16.msra.mxu1 %v6625_v3  ;;  %v6714_v3 = vld [vmem:[%s7063_s9 + $0x1124] ss:$8 sps:$4 sm:$0xff]  }
 0x225   : > { %4814 = vmatpush1.bf16.msra.mxu0 %v6628_v4  ;;  %4446 = vmatprep.subr.bf16.mxu1 %v6633_v6  ;;  %v6712_v4 = vld [vmem:[%s7063_s9 + $0x1120] ss:$8 sps:$4 sm:$0xff]   ;;  %v6717_v6 = vld [vmem:[%s7063_s9 + $0x834] ss:$8 sps:$4 sm:$0xff]  }
 0x226   : > { %4815 = vmatprep.subr.bf16.mxu0 %v6636_v8  ;;  %v6720_v8 = vld [vmem:[%s7063_s9 + $0x1134] ss:$8 sps:$4 sm:$0xff]  }
 0x228   : > { %4447 = vmatpush1.bf16.msra.mxu1 %v6631_v9  ;;  %v6715_v9 = vld [vmem:[%s7063_s9 + $0x830] ss:$8 sps:$4 sm:$0xff]  }
 0x229   : > { %4816 = vmatpush1.bf16.msra.mxu0 %v6634_v11  ;;  %4448 = vmatprep.subr.bf16.mxu1 %v6639_v46  ;;  %v6723_v11 = vld [vmem:[%s7063_s9 + $0x844] ss:$8 sps:$4 sm:$0xff]  }
 0x22a   : > { %4817 = vmatprep.subr.bf16.mxu0 %v6642_v55  ;;  %v6726_v46 = vld [vmem:[%s7063_s9 + $0x1144] ss:$8 sps:$4 sm:$0xff]   ;;  %v6721_v55 = vld [vmem:[%s7063_s9 + $0x840] ss:$8 sps:$4 sm:$0xff]  }
 0x22c   : > { %4449 = vmatpush1.bf16.msra.mxu1 %v6637_v12  ;;  %v6724_v12 = vld [vmem:[%s7063_s9 + $0x1140] ss:$8 sps:$4 sm:$0xff]  }
 0x22d   : > { %4818 = vmatpush1.bf16.msra.mxu0 %v6640_v33  ;;  %4450 = vmatprep.subr.bf16.mxu1 %v6645_v43  ;;  %v6729_v33 = vld [vmem:[%s7063_s9 + $0x854] ss:$8 sps:$4 sm:$0xff]  }
 0x22e   : > { %4819 = vmatprep.subr.bf16.mxu0 %v6648_v14  ;;  %v6732_v43 = vld [vmem:[%s7063_s9 + $0x1154] ss:$8 sps:$4 sm:$0xff]   ;;  %v6727_v14 = vld [vmem:[%s7063_s9 + $0x850] ss:$8 sps:$4 sm:$0xff]  }
 0x230   : > { %4451 = vmatpush1.bf16.msra.mxu1 %v6643_v15  ;;  %v6730_v15 = vld [vmem:[%s7063_s9 + $0x1150] ss:$8 sps:$4 sm:$0xff]  }
 0x231   : > { %4820 = vmatpush1.bf16.msra.mxu0 %v6646_v18  ;;  %4452 = vmatprep.subr.bf16.mxu1 %v6651_v20  ;;  %v6735_v18 = vld [vmem:[%s7063_s9 + $0x864] ss:$8 sps:$4 sm:$0xff]  }
 0x232   : > { %4821 = vmatprep.subr.bf16.mxu0 %v6654_v21  ;;  %v6738_v20 = vld [vmem:[%s7063_s9 + $0x1164] ss:$8 sps:$4 sm:$0xff]   ;;  %v6733_v21 = vld [vmem:[%s7063_s9 + $0x860] ss:$8 sps:$4 sm:$0xff]  }
 0x234   : > { %4453 = vmatpush1.bf16.msra.mxu1 %v6649_v22  ;;  %v6736_v22 = vld [vmem:[%s7063_s9 + $0x1160] ss:$8 sps:$4 sm:$0xff]  }
 0x235   : > { %4822 = vmatpush1.bf16.msra.mxu0 %v6652_v24  ;;  %4454 = vmatprep.subr.bf16.mxu1 %v6657_v25  ;;  %v6741_v24 = vld [vmem:[%s7063_s9 + $0x874] ss:$8 sps:$4 sm:$0xff]  }
 0x236   : > { %4823 = vmatprep.subr.bf16.mxu0 %v6660_v26  ;;  %v6744_v25 = vld [vmem:[%s7063_s9 + $0x1174] ss:$8 sps:$4 sm:$0xff]   ;;  %v6739_v26 = vld [vmem:[%s7063_s9 + $0x870] ss:$8 sps:$4 sm:$0xff]  }
 0x238   : > { %4455 = vmatpush1.bf16.msra.mxu1 %v6655_v7  ;;  %v6742_v7 = vld [vmem:[%s7063_s9 + $0x1170] ss:$8 sps:$4 sm:$0xff]  }
 0x239   : > { %4824 = vmatpush1.bf16.msra.mxu0 %v6658_v27  ;;  %4456 = vmatprep.subr.bf16.mxu1 %v6663_v10  ;;  %v6747_v27 = vld [vmem:[%s7063_s9 + $0x884] ss:$8 sps:$4 sm:$0xff]  }
 0x23a   : > { %4825 = vmatprep.subr.bf16.mxu0 %v6666_v60  ;;  %v6750_v10 = vld [vmem:[%s7063_s9 + $0x1184] ss:$8 sps:$4 sm:$0xff]   ;;  %v6745_v60 = vld [vmem:[%s7063_s9 + $0x880] ss:$8 sps:$4 sm:$0xff]  }
 0x23c   : > { %4457 = vmatpush1.bf16.msra.mxu1 %v6661_v29  ;;  %v6748_v29 = vld [vmem:[%s7063_s9 + $0x1180] ss:$8 sps:$4 sm:$0xff]  }
 0x23d   : > { %4826 = vmatpush1.bf16.msra.mxu0 %v6664_v31  ;;  %4458 = vmatprep.subr.bf16.mxu1 %v6669_v32  ;;  %v6753_v31 = vld [vmem:[%s7063_s9 + $0x894] ss:$8 sps:$4 sm:$0xff]  }
 0x23e   : > { %4827 = vmatprep.subr.bf16.mxu0 %v6672_v34  ;;  %v6756_v32 = vld [vmem:[%s7063_s9 + $0x1194] ss:$8 sps:$4 sm:$0xff]   ;;  %v6751_v34 = vld [vmem:[%s7063_s9 + $0x890] ss:$8 sps:$4 sm:$0xff]  }
 0x240   : > { %4459 = vmatpush1.bf16.msra.mxu1 %v6667_v35  ;;  %v6754_v35 = vld [vmem:[%s7063_s9 + $0x1190] ss:$8 sps:$4 sm:$0xff]  }
 0x241   : > { %4828 = vmatpush1.bf16.msra.mxu0 %v6670_v36  ;;  %4460 = vmatprep.subr.bf16.mxu1 %v6675_v37  ;;  %v6759_v36 = vld [vmem:[%s7063_s9 + $0x8a4] ss:$8 sps:$4 sm:$0xff]  }
 0x242   : > { %4829 = vmatprep.subr.bf16.mxu0 %v6678_v38  ;;  %v6762_v37 = vld [vmem:[%s7063_s9 + $0x11a4] ss:$8 sps:$4 sm:$0xff]   ;;  %v6757_v38 = vld [vmem:[%s7063_s9 + $0x8a0] ss:$8 sps:$4 sm:$0xff]  }
 0x244   : > { %4461 = vmatpush1.bf16.msra.mxu1 %v6673_v19  ;;  %v6760_v19 = vld [vmem:[%s7063_s9 + $0x11a0] ss:$8 sps:$4 sm:$0xff]  }
 0x245   : > { %4830 = vmatpush1.bf16.msra.mxu0 %v6676_v41  ;;  %4462 = vmatprep.subr.bf16.mxu1 %v6681_v44  ;;  %v6765_v41 = vld [vmem:[%s7063_s9 + $0x8b4] ss:$8 sps:$4 sm:$0xff]  }
 0x246   : > { %4831 = vmatprep.subr.bf16.mxu0 %v6684_v23  ;;  %v6768_v44 = vld [vmem:[%s7063_s9 + $0x11b4] ss:$8 sps:$4 sm:$0xff]   ;;  %v6763_v23 = vld [vmem:[%s7063_s9 + $0x8b0] ss:$8 sps:$4 sm:$0xff]  }
 0x248   : > { %4463 = vmatpush1.bf16.msra.mxu1 %v6679_v62  ;;  %v6766_v62 = vld [vmem:[%s7063_s9 + $0x11b0] ss:$8 sps:$4 sm:$0xff]  }
 0x249   : > { %4832 = vmatpush1.bf16.msra.mxu0 %v6682_v16  ;;  %4464 = vmatprep.subr.bf16.mxu1 %v6687_v49  ;;  %v6771_v16 = vld [vmem:[%s7063_s9 + $0x8c4] ss:$8 sps:$4 sm:$0xff]  }
 0x24a   : > { %4833 = vmatprep.subr.bf16.mxu0 %v6690_v30  ;;  %v6774_v49 = vld [vmem:[%s7063_s9 + $0x11c4] ss:$8 sps:$4 sm:$0xff]   ;;  %v6769_v30 = vld [vmem:[%s7063_s9 + $0x8c0] ss:$8 sps:$4 sm:$0xff]  }
 0x24c   : > { %4465 = vmatpush1.bf16.msra.mxu1 %v6685_v50  ;;  %v6772_v50 = vld [vmem:[%s7063_s9 + $0x11c0] ss:$8 sps:$4 sm:$0xff]  }
 0x24d   : > { %4834 = vmatpush1.bf16.msra.mxu0 %v6688_v51  ;;  %4466 = vmatprep.subr.bf16.mxu1 %v6693_v52  ;;  %v6777_v51 = vld [vmem:[%s7063_s9 + $0x8d4] ss:$8 sps:$4 sm:$0xff]  }
 0x24e   : > { %4835 = vmatprep.subr.bf16.mxu0 %v6696_v56  ;;  %v6780_v52 = vld [vmem:[%s7063_s9 + $0x11d4] ss:$8 sps:$4 sm:$0xff]   ;;  %v6775_v56 = vld [vmem:[%s7063_s9 + $0x8d0] ss:$8 sps:$4 sm:$0xff]  }
 0x250   : > { %4467 = vmatpush1.bf16.msra.mxu1 %v6691_v54  ;;  %v6778_v54 = vld [vmem:[%s7063_s9 + $0x11d0] ss:$8 sps:$4 sm:$0xff]  }
 0x251   : > { %4836 = vmatpush1.bf16.msra.mxu0 %v6694_v57  ;;  %4477 = vmatprep.subr.bf16.mxu1 %v6699_v58  ;;  %v6783_v57 = vld [vmem:[%s7063_s9 + $0x8e4] ss:$8 sps:$4 sm:$0xff]  }
 0x252   : > { %4846 = vmatprep.subr.bf16.mxu0 %v6702_v40  ;;  %v6786_v58 = vld [vmem:[%s7063_s9 + $0x11e4] ss:$8 sps:$4 sm:$0xff]   ;;  %v6781_v40 = vld [vmem:[%s7063_s9 + $0x8e0] ss:$8 sps:$4 sm:$0xff]  }
 0x253   : > { %4469 = vmatmul.mubr.bf16.vlgmr.msra.gmra.mrb[0].mxu1 %v1108_v59  ;;  %v6784_v59 = vld [vmem:[%s7063_s9 + $0x11e0] ss:$8 sps:$4 sm:$0xff]  }
 0x254   : > { %4838 = vmatmul.mubr.bf16.vlgmr.msra.gmra.mrb[0].mxu0 %v7781_v39  ;;  %4478 = vmatpush1.bf16.msra.mxu1 %v6697_v61  ;;  %v6789_v61 = vld [vmem:[%s7063_s9 + $0x8f4] ss:$8 sps:$4 sm:$0xff]  }
 0x255   : > { %4847 = vmatpush1.bf16.msra.mxu0 %v6700_v45  ;;  %4479 = vmatprep.subr.bf16.mxu1 %v6705_v63  ;;  %v6792_v45 = vld [vmem:[%s7063_s9 + $0x11f4] ss:$8 sps:$4 sm:$0xff]   ;;  %v6787_v63 = vld [vmem:[%s7063_s9 + $0x8f0] ss:$8 sps:$4 sm:$0xff]  }
 0x256   : > { %4848 = vmatprep.subr.bf16.mxu0 %v6708_v0  ;;  %4509 = vmatprep.mubr.bf16.mxu1 %v7170_v5  ;;  %v6718_v5 = vld [vmem:[%s7063_s9 + $0x1130] ss:$8 sps:$4 sm:$0xff]  }
 0x257   : > { %4878 = vmatprep.mubr.bf16.mxu0 %v1232_v1  ;;  %v6790_v0 = vld [vmem:[%s7063_s9 + $0x11f0] ss:$8 sps:$4 sm:$0xff]   ;;  %v1231_v1 = vcombine.high %v7781_v39, %v7781_v39 }
 0x258   : > { %4480 = vmatpush1.bf16.msra.mxu1 %v6703_v13 }
 0x259   : > { %4849 = vmatpush1.bf16.msra.mxu0 %v6706_v47  ;;  %4481 = vmatprep.subr.bf16.mxu1 %v6711_v2 }
 0x25a   : > { %4850 = vmatprep.subr.bf16.mxu0 %v6714_v3 }
 0x25c   : > { %4482 = vmatpush1.bf16.msra.mxu1 %v6709_v28 }
 0x25d   : > { %4851 = vmatpush1.bf16.msra.mxu0 %v6712_v4  ;;  %4483 = vmatprep.subr.bf16.mxu1 %v6717_v6 }
 0x25e   : > { %4852 = vmatprep.subr.bf16.mxu0 %v6720_v8 }
 0x260   : > { %4484 = vmatpush1.bf16.msra.mxu1 %v6715_v9 }
 0x261   : > { %4853 = vmatpush1.bf16.msra.mxu0 %v6718_v5  ;;  %4485 = vmatprep.subr.bf16.mxu1 %v6723_v11 }
 0x262   : > { %4854 = vmatprep.subr.bf16.mxu0 %v6726_v46 }
 0x264   : > { %4486 = vmatpush1.bf16.msra.mxu1 %v6721_v55  ;;  %v426_v55 = vld [vmem:[#allocation2] sm:$0x3] }
 0x265   : > { %4855 = vmatpush1.bf16.msra.mxu0 %v6724_v12  ;;  %4487 = vmatprep.subr.bf16.mxu1 %v6729_v33  ;;  %v4916_v33 = vld [vmem:[%s381_s19] sm:$0x3] (!%p5758_p8) }
 0x266   : > { %4856 = vmatprep.subr.bf16.mxu0 %v6732_v43  ;;  %v4918_v43 = vld [vmem:[%s398_s20] sm:$0x3] (!%p5758_p8) }
 0x267   : > { %v4919_v42 = vunpack.c.l.bf16 (!%p5758_p8), %v4918_v43 }
 0x268   : > { %4488 = vmatpush1.bf16.msra.mxu1 %v6727_v14 }
 0x269   : > { %4857 = vmatpush1.bf16.msra.mxu0 %v6730_v15  ;;  %4489 = vmatprep.subr.bf16.mxu1 %v6735_v18  ;;  %v4927_v15 = vrot.slane (!%p5758_p8), %v4919_v42, %v7149_v53 }
 0x26a   : > { %4858 = vmatprep.subr.bf16.mxu0 %v6738_v20  ;;  %v4934_v20 = vsub.s32 (!%p5758_p8), 0, %v7142_v48 }
 0x26c   : > { %4490 = vmatpush1.bf16.msra.mxu1 %v6733_v21  ;;  %v4938_v21 = vsub.s32 (!%p5758_p8), 1, %v7142_v48 }
 0x26d   : > { %4859 = vmatpush1.bf16.msra.mxu0 %v6736_v22  ;;  %4491 = vmatprep.subr.bf16.mxu1 %v6741_v24 }
 0x26e   : > { %4860 = vmatprep.subr.bf16.mxu0 %v6744_v25 }
 0x270   : > { %4492 = vmatpush1.bf16.msra.mxu1 %v6739_v26 }
 0x271   : > { %4861 = vmatpush1.bf16.msra.mxu0 %v6742_v7  ;;  %4493 = vmatprep.subr.bf16.mxu1 %v6747_v27  ;;  %v4969_v27 = vld [vmem:[%s7096_s25] sm:$0x3] (!%p5758_p8) }
 0x272   : > { %4862 = vmatprep.subr.bf16.mxu0 %v6750_v10 }
 0x274   : > { %4494 = vmatpush1.bf16.msra.mxu1 %v6745_v60 }
 0x275   : > { %4863 = vmatpush1.bf16.msra.mxu0 %v6748_v29  ;;  %4495 = vmatprep.subr.bf16.mxu1 %v6753_v31 }
 0x276   : > { %4864 = vmatprep.subr.bf16.mxu0 %v6756_v32 }
 0x278   : > { %4496 = vmatpush1.bf16.msra.mxu1 %v6751_v34 }
 0x279   : > { %4865 = vmatpush1.bf16.msra.mxu0 %v6754_v35  ;;  %4497 = vmatprep.subr.bf16.mxu1 %v6759_v36 }
 0x27a   : > { %4866 = vmatprep.subr.bf16.mxu0 %v6762_v37 }
 0x27c   : > { %4498 = vmatpush1.bf16.msra.mxu1 %v6757_v38 }
 0x27d   : > { %4867 = vmatpush1.bf16.msra.mxu0 %v6760_v19  ;;  %4499 = vmatprep.subr.bf16.mxu1 %v6765_v41 }
 0x27e   : > { %4868 = vmatprep.subr.bf16.mxu0 %v6768_v44 }
 0x280   : > { %4500 = vmatpush1.bf16.msra.mxu1 %v6763_v23 }
 0x281   : > { %4869 = vmatpush1.bf16.msra.mxu0 %v6766_v62  ;;  %4501 = vmatprep.subr.bf16.mxu1 %v6771_v16 }
 0x282   : > { %4870 = vmatprep.subr.bf16.mxu0 %v6774_v49 }
 0x284   : > { %4502 = vmatpush1.bf16.msra.mxu1 %v6769_v30 }
 0x285   : > { %4871 = vmatpush1.bf16.msra.mxu0 %v6772_v50  ;;  %4503 = vmatprep.subr.bf16.mxu1 %v6777_v51 }
 0x286   : > { %4872 = vmatprep.subr.bf16.mxu0 %v6780_v52 }
 0x288   : > { %4504 = vmatpush1.bf16.msra.mxu1 %v6775_v56 }
 0x289   : > { %4873 = vmatpush1.bf16.msra.mxu0 %v6778_v54  ;;  %4505 = vmatprep.subr.bf16.mxu1 %v6783_v57 }
 0x28a   : > { %4874 = vmatprep.subr.bf16.mxu0 %v6786_v58 }
 0x28c   : > { %4506 = vmatpush1.bf16.msra.mxu1 %v6781_v40 }
 0x28d   : > { %4875 = vmatpush1.bf16.msra.mxu0 %v6784_v59  ;;  %4507 = vmatprep.subr.bf16.mxu1 %v6789_v61 }
 0x28e   : > { %4876 = vmatprep.subr.bf16.mxu0 %v6792_v45 }
 0x290   : > { %4508 = vmatpush1.bf16.msra.mxu1 %v6787_v63 }
 0x291   : > { %4877 = vmatpush1.bf16.msra.mxu0 %v6790_v0 }
 0x293   : > { %4510 = vmatmul.mubr.bf16.vlgmr.msra.gmra.mrb[0].mxu1 %v7187_v17 }
 0x294   : > { %4879 = vmatmul.mubr.bf16.vlgmr.msra.gmra.mrb[0].mxu0 %v1231_v1 }
 0x366   : > { %v4511_v13 = vpop.f32.mrb[0].mxu1 }
 0x367   : > { %v4880_v47 = vpop.f32.mrb[0].mxu0  ;;  %v4513_v3 = vpop.f32.mrb[1].mxu1 }
 0x368   : > { %v5762_v2 = vadd.f32 %v4880_v47, %v4511_v13  ;;  %v4882_v28 = vpop.f32.mrb[1].mxu0  ;;  %v4515_v6 = vpop.f32.mrb[2].mxu1 }
 0x369   : > { %v5763_v4 = vadd.f32 %v4882_v28, %v4513_v3  ;;  %v4884_v8 = vpop.f32.mrb[2].mxu0  ;;  %v4516_v9 = vpop.f32.mrb[3].mxu1 }
 0x36a   : > { %v4885_v5 = vpop.f32.mrb[3].mxu0 }
 0x36b   : > { %v4889_v11 = vcombine.low %v5762_v2, %v5763_v4 }
 0x36d   : > { %v4896_v46 = vrot.slane %v4889_v11, %v7149_v53  ;;  %4914 = sbr.rel (%p5758_p8) target bundleno = 907 (0x38b), region = 48 }
 0x36f   : > { %v4903_v39 = vrot.slane %v4896_v46, %v7149_v53 }
 0x371   : > { %v4905_v17 = vadd.f32 %v4903_v39, %v426_v55 }
 0x373   : > { %4910 = vst.msk [vmem:[#allocation2] sm:$0x3] %vm4908_vm1, %v4905_v17 }
 0x37a   : > { %v4915_v12 = vld [vmem:[#allocation2] sm:$0x3] }
 0x37b   : > { %v4917_v14 = vadd.f32 %v4916_v33, %v4915_v12 }
 0x37d   : > { %v4929_v18 = vadd.f32 %v4927_v15, %v4917_v14 }
 0x37f   : > { %v4930_v22 = vmax.f32 %v4929_v18, 0.0 }
 0x381   : > { %v4935_v24 = vrot.slane %v4930_v22, %v4934_v20  ;;  %v4939_v25 = vrot.slane %v4930_v22, %v4938_v21 }
 0x383   : > { %v5759_v26 = vpack.c.bf16 %v4939_v25, %v4935_v24 }
 0x385   : > { %v4953_v7 = vrot.slane %v5759_v26, %v7149_v53 }
 0x387   : > { %v4960_v10 = vrot.slane %v4953_v7, %v7149_v53 }
 0x389   : > { %v4970_v60 = vsel %vm4968_vm8, %v4960_v10, %v4969_v27 }
 0x38a   : > { %4971 = vst [vmem:[%s7096_s25] sm:$0x3] %v4970_v60 }
 0x38b PF: > { %s17_s24 = sadd.s32 1, %s6905_s24   ;;  %s7915_s28 = sld [smem:[#allocation6_spill]] }
 0x38c   : > { %p14_p10 = scmp.ge.s32.totalorder %s17_s24, 14   ;;  %s7916_s7 = sld [smem:[#allocation7_spill]] }
 0x38d   : > { %s7917_s15 = smov %s6873_s16  ;;  %s7918_s16 = smov %s6877_s17 }
 0x38e   : > { %s7919_s17 = smov %s7015_s8  ;;  %s7920_s18 = smov %s6893_s21 }
 0x38f   : > { %s7921_s19 = smov %s6897_s22  ;;  %s7922_s20 = smov %s6901_s23 }
 0x390   : > { %s7923_s21 = smov %s7927_s26  ;;  %16 = sbr.rel (!%p14_p10) target bundleno = 8 (0x8), region = 93 }
 0x391   : > { %s7924_s22 = smov %s7915_s28 }
 0x392   : > { %s7925_s23 = smov %s7916_s7 }
 0x397   :  { %5016 = vsyncpa [#allocation4], 1 }
 0x398   :  { %5018 = vsyncpa [#allocation4 + $0x1], 1 }

</bundles_post_ra>
